<compile_context>
chip_gen: v7x
topology: tpu7x:2x2x1
jax: 0.10.0
libtpu: 0.0.40
codegen_flags: <defaults>
</compile_context>

<pallas_src>
import functools

import jax
import jax.numpy as jnp
from jax.experimental import pallas as pl
from jax.experimental.pallas import tpu as pltpu

D_IN, D_H1, D_H2, D_H3, D_OUT = 2048, 1024, 512, 256, 64
D_OUT_PAD = 128  # lane-dense padded output width (final cols are zero)


def _cdiv(a, b):
    return -(-a // b)


def _round_up(n, m):
    return _cdiv(n, m) * m


def _choose_tiling(B, tm_max):
    """Pick (batch_tile, num_steps) minimizing padding while keeping the tile
    <= tm_max, a multiple of 8, and (for large batches) an even step count so
    the grid splits cleanly across v7x's 2 TensorCores."""
    steps = max(1, _cdiv(B, tm_max))
    if B >= 256:
        steps = max(steps, 2)          # give both TCs work on v7x
    if steps > 1 and steps % 2:
        steps += 1                     # even step count -> balanced TC split
    tile = max(8, _round_up(_cdiv(B, steps), 8))
    return tile, steps


def mlp_kernel(alpha_ref,                       # SMEM: (3,) PReLU scalars (f32)
               x_ref,                           # VMEM block: (tm, 2048) bf16/f32
               w1_ref, b1_ref,                  # bf16 (2048,1024) / f32 (1,1024)
               w2_ref, b2_ref,
               w3_ref, b3_ref,
               w4_ref, b4_ref,                  # bf16 (256,128)  / f32 (1,128)
               o_ref):                          # VMEM block: (tm, 128) f32
    a0, a1, a2 = alpha_ref[0], alpha_ref[1], alpha_ref[2]

    h = x_ref[...]
    if h.dtype != jnp.bfloat16:                 # trace-time; no-op for bf16 input
        h = h.astype(jnp.bfloat16)

    # bf16 x bf16 MXU matmuls, f32 accumulation, f32 bias + PReLU epilogue.
    h = jnp.dot(h, w1_ref[...], preferred_element_type=jnp.float32) + b1_ref[...]
    h = jnp.where(h > 0, h, a0 * h).astype(jnp.bfloat16)

    h = jnp.dot(h, w2_ref[...], preferred_element_type=jnp.float32) + b2_ref[...]
    h = jnp.where(h > 0, h, a1 * h).astype(jnp.bfloat16)

    h = jnp.dot(h, w3_ref[...], preferred_element_type=jnp.float32) + b3_ref[...]
    h = jnp.where(h > 0, h, a2 * h).astype(jnp.bfloat16)

    h = jnp.dot(h, w4_ref[...], preferred_element_type=jnp.float32) + b4_ref[...]
    o_ref[...] = h  # already f32, lane-dense 128 wide


@functools.partial(jax.jit, static_argnames=("tm",))
def embedding_net_forward(x, prepared_params, *, tm=512):
    """x: [B, 2048] (bf16 preferred, f32 accepted) -> [B, 64] f32."""
    (w1, b1, w2, b2, w3, b3, w4, b4, alphas) = prepared_params
    B, d_in = x.shape
    assert d_in == D_IN, d_in

    tile, steps = _choose_tiling(B, tm)
    b_pad = tile * steps
    if b_pad != B:
        x = jnp.pad(x, ((0, b_pad - B), (0, 0)))

    def vmem_full():
        # Whole array resident in VMEM, single copy (no pipeline double-buffer).
        return pl.BlockSpec(memory_space=pltpu.MemorySpace.VMEM)

    grid_spec = pltpu.PrefetchScalarGridSpec(
        num_scalar_prefetch=0,
        grid=(steps,),
        in_specs=[
            pl.BlockSpec(memory_space=pltpu.MemorySpace.SMEM),     # alphas
            pl.BlockSpec((tile, D_IN), lambda i: (i, 0)),          # x (pipelined)
            vmem_full(), vmem_full(),                              # w1, b1
            vmem_full(), vmem_full(),                              # w2, b2
            vmem_full(), vmem_full(),                              # w3, b3
            vmem_full(), vmem_full(),                              # w4, b4
        ],
        out_specs=pl.BlockSpec((tile, D_OUT_PAD), lambda i: (i, 0)),
    )

    out = pl.pallas_call(
        mlp_kernel,
        out_shape=jax.ShapeDtypeStruct((b_pad, D_OUT_PAD), jnp.float32),
        grid_spec=grid_spec,
        compiler_params=pltpu.CompilerParams(
            dimension_semantics=("parallel",),   # shards grid steps across TCs
            vmem_limit_bytes=32 * 1024 * 1024,   # > v5e 16 MiB default, < v7x 64 MiB
        ),
    )(alphas, x, w1, b1, w2, b2, w3, b3, w4, b4)

    return out[:B, :D_OUT]


def init_params(key):
    """Deterministic synthetic parameters matching nn.Linear / nn.PReLU (f32)."""
    ks = jax.random.split(key, 8)

    def linear(kw, kb, fan_in, fan_out):
        bound = 1.0 / jnp.sqrt(fan_in)
        w = jax.random.uniform(kw, (fan_in, fan_out), jnp.float32, -bound, bound)
        b = jax.random.uniform(kb, (1, fan_out), jnp.float32, -bound, bound)
        return w, b

    w1, b1 = linear(ks[0], ks[1], D_IN, D_H1)
    w2, b2 = linear(ks[2], ks[3], D_H1, D_H2)
    w3, b3 = linear(ks[4], ks[5], D_H2, D_H3)
    w4, b4 = linear(ks[6], ks[7], D_H3, D_OUT)
    alphas = jnp.full((3,), 0.25, dtype=jnp.float32)   # nn.PReLU default (3 PReLUs)
    return (w1, b1, w2, b2, w3, b3, w4, b4, alphas)


def prepare_params(params):
    """One-time (outside jit): cast weights to bf16, pad last layer to 128 lanes."""
    (w1, b1, w2, b2, w3, b3, w4, b4, alphas) = params
    w4p = jnp.pad(w4, ((0, 0), (0, D_OUT_PAD - D_OUT)))
    b4p = jnp.pad(b4, ((0, 0), (0, D_OUT_PAD - D_OUT)))
    bf = lambda w: w.astype(jnp.bfloat16)
    return (bf(w1), b1, bf(w2), b2, bf(w3), b3, bf(w4p), b4p, alphas)


def reference_forward(x, prepared_params):
    """Pure-JAX reference with the same bf16-matmul / f32-accumulate recipe."""
    (w1, b1, w2, b2, w3, b3, w4, b4, a) = prepared_params

    def dense(h, w, b):
        return jnp.dot(h.astype(jnp.bfloat16), w,
                       preferred_element_type=jnp.float32) + b

    h = dense(x, w1, b1)
    h = jnp.where(h > 0, h, a[0] * h)
    h = dense(h, w2, b2)
    h = jnp.where(h > 0, h, a[1] * h)
    h = dense(h, w3, b3)
    h = jnp.where(h > 0, h, a[2] * h)
    h = dense(h, w4, b4)
    return h[:, :D_OUT]


if __name__ == "__main__":
    key = jax.random.PRNGKey(0)
    k_param, k_x, k_x2 = jax.random.split(key, 3)

    params = init_params(k_param)
    prepared = prepare_params(params)

    # Small batch, bf16 input produced upstream (preferred fast path).
    B = 16
    x = jax.random.normal(k_x, (B, D_IN), dtype=jnp.float32).astype(jnp.bfloat16)
    out = jax.block_until_ready(embedding_net_forward(x, prepared))
    ref = reference_forward(x, prepared)
    assert out.shape == (B, D_OUT), out.shape
    assert jnp.allclose(out, ref, atol=1e-2, rtol=1e-2), "mismatch (bf16 input)"

    # Ragged batch in f32: exercises in-kernel cast, multi-step grid (2 even
    # steps of tile=152 -> only 4 padded rows instead of 212), padding slice.
    B2 = 300
    x2 = jax.random.normal(k_x2, (B2, D_IN), dtype=jnp.float32)
    out2 = jax.block_until_ready(embedding_net_forward(x2, prepared))
    ref2 = reference_forward(x2, prepared)
    assert out2.shape == (B2, D_OUT), out2.shape
    assert jnp.allclose(out2, ref2, atol=1e-2, rtol=1e-2), "mismatch (f32 ragged batch)"

    # TODO(synk): for tiny-batch serving, pin the ~5.3 MiB bf16 weights in VMEM
    # across calls (cross-pallas_call semaphore-future pattern) to avoid
    # re-DMAing weights every invocation.
    print("KERNEL_OK")
</pallas_src>

<mosaic_0001>
module attributes {stable_mosaic.version = 11 : i64} {
  func.func @mlp_kernel(%arg0: i32, %arg1: memref<3xf32, #tpu.memory_space<smem>>, %arg2: memref<16x2048xbf16, #tpu.memory_space<vmem>>, %arg3: memref<2048x1024xbf16, #tpu.memory_space<vmem>>, %arg4: memref<1x1024xf32, #tpu.memory_space<vmem>>, %arg5: memref<1024x512xbf16, #tpu.memory_space<vmem>>, %arg6: memref<1x512xf32, #tpu.memory_space<vmem>>, %arg7: memref<512x256xbf16, #tpu.memory_space<vmem>>, %arg8: memref<1x256xf32, #tpu.memory_space<vmem>>, %arg9: memref<256x128xbf16, #tpu.memory_space<vmem>>, %arg10: memref<1x128xf32, #tpu.memory_space<vmem>>, %arg11: memref<16x128xf32, #tpu.memory_space<vmem>>) attributes {dimension_semantics = [#tpu.dimension_semantics<parallel>], iteration_bounds = array<i64: 1>, scalar_prefetch = 0 : i64, scratch_operands = 0 : i64, tpu.core_type = #tpu.core_type<tc>, window_params = [{transform_indices = @transform_0, window_bounds = array<i64: 3>}, {transform_indices = @transform_1, window_bounds = array<i64: 16, 2048>}, {pipeline_mode = #tpu.pipeline_mode<synchronous>, transform_indices = @transform_2, window_bounds = array<i64: 2048, 1024>}, {pipeline_mode = #tpu.pipeline_mode<synchronous>, transform_indices = @transform_3, window_bounds = array<i64: 1, 1024>}, {pipeline_mode = #tpu.pipeline_mode<synchronous>, transform_indices = @transform_4, window_bounds = array<i64: 1024, 512>}, {pipeline_mode = #tpu.pipeline_mode<synchronous>, transform_indices = @transform_5, window_bounds = array<i64: 1, 512>}, {pipeline_mode = #tpu.pipeline_mode<synchronous>, transform_indices = @transform_6, window_bounds = array<i64: 512, 256>}, {pipeline_mode = #tpu.pipeline_mode<synchronous>, transform_indices = @transform_7, window_bounds = array<i64: 1, 256>}, {pipeline_mode = #tpu.pipeline_mode<synchronous>, transform_indices = @transform_8, window_bounds = array<i64: 256, 128>}, {pipeline_mode = #tpu.pipeline_mode<synchronous>, transform_indices = @transform_9, window_bounds = array<i64: 1, 128>}, {transform_indices = @transform_10, window_bounds = array<i64: 16, 128>}]} {
    %c0 = arith.constant 0 : index
    %0 = memref.load %arg1[%c0] : memref<3xf32, #tpu.memory_space<smem>>
    %c1 = arith.constant 1 : index
    %1 = memref.load %arg1[%c1] : memref<3xf32, #tpu.memory_space<smem>>
    %c2 = arith.constant 2 : index
    %2 = memref.load %arg1[%c2] : memref<3xf32, #tpu.memory_space<smem>>
    %c0_0 = arith.constant 0 : index
    %c0_1 = arith.constant 0 : index
    %3 = vector.load %arg2[%c0_0, %c0_1] : memref<16x2048xbf16, #tpu.memory_space<vmem>>, vector<16x2048xbf16>
    %c0_2 = arith.constant 0 : index
    %c0_3 = arith.constant 0 : index
    %4 = vector.load %arg3[%c0_2, %c0_3] : memref<2048x1024xbf16, #tpu.memory_space<vmem>>, vector<2048x1024xbf16>
    %cst = arith.constant dense<0.000000e+00> : vector<16x1024xf32>
    %5 = tpu.matmul %3, %4, %cst {dimension_numbers = #tpu.dot_dimension_numbers<[1], [0], [0], [1], [0, 0, 1, 1], [], []>} : vector<16x2048xbf16>, vector<2048x1024xbf16>, vector<16x1024xf32> -> vector<16x1024xf32>
    %c0_4 = arith.constant 0 : index
    %c0_5 = arith.constant 0 : index
    %6 = vector.load %arg4[%c0_4, %c0_5] : memref<1x1024xf32, #tpu.memory_space<vmem>>, vector<1x1024xf32>
    %7 = vector.broadcast %6 : vector<1x1024xf32> to vector<16x1024xf32>
    %8 = arith.addf %5, %7 : vector<16x1024xf32>
    %cst_6 = arith.constant 0.000000e+00 : f32
    %9 = vector.broadcast %cst_6 : f32 to vector<16x1024xf32>
    %10 = arith.cmpf ogt, %8, %9 : vector<16x1024xf32>
    %11 = vector.broadcast %0 : f32 to vector<16x1024xf32>
    %12 = arith.mulf %11, %8 : vector<16x1024xf32>
    %13 = arith.select %10, %8, %12 : vector<16x1024xi1>, vector<16x1024xf32>
    %14 = arith.truncf %13 : vector<16x1024xf32> to vector<16x1024xbf16>
    %c0_7 = arith.constant 0 : index
    %c0_8 = arith.constant 0 : index
    %15 = vector.load %arg5[%c0_7, %c0_8] : memref<1024x512xbf16, #tpu.memory_space<vmem>>, vector<1024x512xbf16>
    %cst_9 = arith.constant dense<0.000000e+00> : vector<16x512xf32>
    %16 = tpu.matmul %14, %15, %cst_9 {dimension_numbers = #tpu.dot_dimension_numbers<[1], [0], [0], [1], [0, 0, 1, 1], [], []>} : vector<16x1024xbf16>, vector<1024x512xbf16>, vector<16x512xf32> -> vector<16x512xf32>
    %c0_10 = arith.constant 0 : index
    %c0_11 = arith.constant 0 : index
    %17 = vector.load %arg6[%c0_10, %c0_11] : memref<1x512xf32, #tpu.memory_space<vmem>>, vector<1x512xf32>
    %18 = vector.broadcast %17 : vector<1x512xf32> to vector<16x512xf32>
    %19 = arith.addf %16, %18 : vector<16x512xf32>
    %cst_12 = arith.constant 0.000000e+00 : f32
    %20 = vector.broadcast %cst_12 : f32 to vector<16x512xf32>
    %21 = arith.cmpf ogt, %19, %20 : vector<16x512xf32>
    %22 = vector.broadcast %1 : f32 to vector<16x512xf32>
    %23 = arith.mulf %22, %19 : vector<16x512xf32>
    %24 = arith.select %21, %19, %23 : vector<16x512xi1>, vector<16x512xf32>
    %25 = arith.truncf %24 : vector<16x512xf32> to vector<16x512xbf16>
    %c0_13 = arith.constant 0 : index
    %c0_14 = arith.constant 0 : index
    %26 = vector.load %arg7[%c0_13, %c0_14] : memref<512x256xbf16, #tpu.memory_space<vmem>>, vector<512x256xbf16>
    %cst_15 = arith.constant dense<0.000000e+00> : vector<16x256xf32>
    %27 = tpu.matmul %25, %26, %cst_15 {dimension_numbers = #tpu.dot_dimension_numbers<[1], [0], [0], [1], [0, 0, 1, 1], [], []>} : vector<16x512xbf16>, vector<512x256xbf16>, vector<16x256xf32> -> vector<16x256xf32>
    %c0_16 = arith.constant 0 : index
    %c0_17 = arith.constant 0 : index
    %28 = vector.load %arg8[%c0_16, %c0_17] : memref<1x256xf32, #tpu.memory_space<vmem>>, vector<1x256xf32>
    %29 = vector.broadcast %28 : vector<1x256xf32> to vector<16x256xf32>
    %30 = arith.addf %27, %29 : vector<16x256xf32>
    %cst_18 = arith.constant 0.000000e+00 : f32
    %31 = vector.broadcast %cst_18 : f32 to vector<16x256xf32>
    %32 = arith.cmpf ogt, %30, %31 : vector<16x256xf32>
    %33 = vector.broadcast %2 : f32 to vector<16x256xf32>
    %34 = arith.mulf %33, %30 : vector<16x256xf32>
    %35 = arith.select %32, %30, %34 : vector<16x256xi1>, vector<16x256xf32>
    %36 = arith.truncf %35 : vector<16x256xf32> to vector<16x256xbf16>
    %c0_19 = arith.constant 0 : index
    %c0_20 = arith.constant 0 : index
    %37 = vector.load %arg9[%c0_19, %c0_20] : memref<256x128xbf16, #tpu.memory_space<vmem>>, vector<256x128xbf16>
    %cst_21 = arith.constant dense<0.000000e+00> : vector<16x128xf32>
    %38 = tpu.matmul %36, %37, %cst_21 {dimension_numbers = #tpu.dot_dimension_numbers<[1], [0], [0], [1], [0, 0, 1, 1], [], []>} : vector<16x256xbf16>, vector<256x128xbf16>, vector<16x128xf32> -> vector<16x128xf32>
    %c0_22 = arith.constant 0 : index
    %c0_23 = arith.constant 0 : index
    %39 = vector.load %arg10[%c0_22, %c0_23] : memref<1x128xf32, #tpu.memory_space<vmem>>, vector<1x128xf32>
    %40 = vector.broadcast %39 : vector<1x128xf32> to vector<16x128xf32>
    %41 = arith.addf %38, %40 : vector<16x128xf32>
    %c0_24 = arith.constant 0 : index
    %c0_25 = arith.constant 0 : index
    %42 = vector.load %arg11[%c0_24, %c0_25] : memref<16x128xf32, #tpu.memory_space<vmem>>, vector<16x128xf32>
    tpu.vector_store %arg11[%c0_24, %c0_25], %41 {strides = array<i32>} : memref<16x128xf32, #tpu.memory_space<vmem>>, vector<16x128xf32>,
    return
  }
  func.func @transform_0(%arg0: i32) -> i32 {
    %c0_i32 = arith.constant 0 : i32
    %c0_i32_0 = arith.constant 0 : i32
    return %c0_i32 : i32
  }
  func.func @transform_1(%arg0: i32) -> (i32, i32) {
    %c0_i32 = arith.constant 0 : i32
    %c0_i32_0 = arith.constant 0 : i32
    return %arg0, %c0_i32 : i32, i32
  }
  func.func @transform_2(%arg0: i32) -> (i32, i32) {
    %c0_i32 = arith.constant 0 : i32
    %c0_i32_0 = arith.constant 0 : i32
    %c0_i32_1 = arith.constant 0 : i32
    return %c0_i32, %c0_i32_0 : i32, i32
  }
  func.func @transform_3(%arg0: i32) -> (i32, i32) {
    %c0_i32 = arith.constant 0 : i32
    %c0_i32_0 = arith.constant 0 : i32
    %c0_i32_1 = arith.constant 0 : i32
    return %c0_i32, %c0_i32_0 : i32, i32
  }
  func.func @transform_4(%arg0: i32) -> (i32, i32) {
    %c0_i32 = arith.constant 0 : i32
    %c0_i32_0 = arith.constant 0 : i32
    %c0_i32_1 = arith.constant 0 : i32
    return %c0_i32, %c0_i32_0 : i32, i32
  }
  func.func @transform_5(%arg0: i32) -> (i32, i32) {
    %c0_i32 = arith.constant 0 : i32
    %c0_i32_0 = arith.constant 0 : i32
    %c0_i32_1 = arith.constant 0 : i32
    return %c0_i32, %c0_i32_0 : i32, i32
  }
  func.func @transform_6(%arg0: i32) -> (i32, i32) {
    %c0_i32 = arith.constant 0 : i32
    %c0_i32_0 = arith.constant 0 : i32
    %c0_i32_1 = arith.constant 0 : i32
    return %c0_i32, %c0_i32_0 : i32, i32
  }
  func.func @transform_7(%arg0: i32) -> (i32, i32) {
    %c0_i32 = arith.constant 0 : i32
    %c0_i32_0 = arith.constant 0 : i32
    %c0_i32_1 = arith.constant 0 : i32
    return %c0_i32, %c0_i32_0 : i32, i32
  }
  func.func @transform_8(%arg0: i32) -> (i32, i32) {
    %c0_i32 = arith.constant 0 : i32
    %c0_i32_0 = arith.constant 0 : i32
    %c0_i32_1 = arith.constant 0 : i32
    return %c0_i32, %c0_i32_0 : i32, i32
  }
  func.func @transform_9(%arg0: i32) -> (i32, i32) {
    %c0_i32 = arith.constant 0 : i32
    %c0_i32_0 = arith.constant 0 : i32
    %c0_i32_1 = arith.constant 0 : i32
    return %c0_i32, %c0_i32_0 : i32, i32
  }
  func.func @transform_10(%arg0: i32) -> (i32, i32) {
    %c0_i32 = arith.constant 0 : i32
    %c0_i32_0 = arith.constant 0 : i32
    return %arg0, %c0_i32 : i32, i32
  }
}

</mosaic_0001>

<bundles_post_ra>
// kernel: embedding_net_forward.1
= control target key start
LH: loop header
LB: loop body
LE: loop exit
PB: predicated region body
PF: predicated region fallthrough
CT: control target
= control target key end

     0   :  { %15 = vsyncpa [#allocation5], 0  ;;  %s13328_s0 = inlined_call_operand.hbm [shape: f32[3], index: 0, kind: input, shape index: {}]   ;;  %s13329_s1 = inlined_call_operand.hbm [shape: bf16[16,2048], index: 1, kind: input, shape index: {}]   ;;  %s13330_s2 = inlined_call_operand.hbm [shape: bf16[2048,1024], index: 2, kind: input, shape index: {}]   ;;  %s13331_s3 = inlined_call_operand.hbm [shape: f32[1,1024], index: 3, kind: input, shape index: {}]   ;;  %s13332_s4 = inlined_call_operand.hbm [shape: bf16[1024,512], index: 4, kind: input, shape index: {}]   ;;  %s13333_s5 = inlined_call_operand.hbm [shape: f32[1,512], index: 5, kind: input, shape index: {}]   ;;  %s13334_s6 = inlined_call_operand.hbm [shape: bf16[512,256], index: 6, kind: input, shape index: {}]   ;;  %s13335_s7 = inlined_call_operand.hbm [shape: f32[1,256], index: 7, kind: input, shape index: {}]   ;;  %s13336_s8 = inlined_call_operand.hbm [shape: bf16[256,128], index: 8, kind: input, shape index: {}]   ;;  %s13337_s9 = inlined_call_operand.hbm [shape: f32[1,128], index: 9, kind: input, shape index: {}]   ;;  %s13338_s10 = inlined_call_operand.hbm [shape: f32[16,128], index: 10, kind: output, shape index: {}]  }
   0x1   :  { %16 = vsyncpa [#allocation3], 0 }
   0x2   :  { %17 = vsyncpa [#allocation8], 0 }
   0x3   :  { %18 = vsyncpa [#allocation11], 0 }
   0x4   :  { %19 = vsyncpa [#allocation14], 0 }
   0x5   :  { %20 = vsyncpa [#allocation17], 0 }
   0x6   :  { %21 = vsyncpa [#allocation4], 0  ;;  %s12838_s13 = smov [#allocation7]   ;;  %s12594_s17 = scalar_lea.hbm %s13330_s2, 131072 }
   0x7   :  { %s47_s14 = sshll.u32 %s12838_s13, 4  ;;  %p12595_p0 = scmp.ne.s32.totalorder %s13330_s2, %s12594_s17  ;;  %s48_s14 = int_to_ptr.vmem [resolvable:$true] %s47_s14 }
   0x8   :  { %p12598_p1 = scmp.lt.u32.totalorder %s12594_s17, %s13330_s2 }
   0xa   :  { %p12600_p2 = pnand %p12598_p1, %p12595_p0 }
   0xc   :  { %12603 = shalt.err (!%p12600_p2)
}
   0xd   :  { %s12604_s22 = scalar_lea.vmem %s48_s14, 131072  ;;  %p12609_p4 = scmp.lt.s32.totalorder %s48_s14, %s48_s14 }
   0xe   :  { %p12605_p3 = scmp.ne.s32.totalorder %s48_s14, %s12604_s22  ;;  %p12610_p5 = scmp.lt.s32.totalorder %s12604_s22, %s12604_s22 }
  0x10   :  { %p12611_p6 = por %p12610_p5, %p12609_p4 }
  0x12   :  { %p12612_p7 = pnand %p12611_p6, %p12605_p3 }
  0x14   :  { %12615 = shalt.err (!%p12612_p7)
}
  0x15   :  { %s12839_s23 = smov 512   ;;  %s12840_s24 = smov 32  }
  0x16   :  { %53 = dma.hbm_to_vmem [thread:$0]  %s13330_s2, 131072, %s48_s14, [#allocation8], %s12839_s23, %s12839_s23, %s12840_s24  }
  0x17   :  { %s12841_s27 = smov [#allocation10]   ;;  %s12616_s11 = scalar_lea.hbm %s13332_s4, 32768 }
  0x18   :  { %s69_s28 = sshll.u32 %s12841_s27, 4  ;;  %p12617_p8 = scmp.ne.s32.totalorder %s13332_s4, %s12616_s11  ;;  %s70_s28 = int_to_ptr.vmem [resolvable:$true] %s69_s28 }
  0x19   :  { %p12620_p9 = scmp.lt.u32.totalorder %s12616_s11, %s13332_s4 }
  0x1b   :  { %p12622_p10 = pnand %p12620_p9, %p12617_p8 }
  0x1d   :  { %12625 = shalt.err (!%p12622_p10)
}
  0x1e   :  { %s12626_s17 = scalar_lea.vmem %s70_s28, 32768  ;;  %p12631_p12 = scmp.lt.s32.totalorder %s70_s28, %s70_s28 }
  0x1f   :  { %p12627_p11 = scmp.ne.s32.totalorder %s70_s28, %s12626_s17  ;;  %p12632_p13 = scmp.lt.s32.totalorder %s12626_s17, %s12626_s17 }
  0x21   :  { %p12633_p0 = por %p12632_p13, %p12631_p12 }
  0x23   :  { %p12634_p1 = pnand %p12633_p0, %p12627_p11 }
  0x25   :  { %12637 = shalt.err (!%p12634_p1)
}
  0x26   :  { %s12842_s2 = smov 256   ;;  %s12843_s14 = smov 16  }
  0x27   :  { %75 = dma.hbm_to_vmem [thread:$0]  %s13332_s4, 32768, %s70_s28, [#allocation11], %s12842_s2, %s12842_s2, %s12843_s14  }
  0x28   :  { %s12844_s20 = smov [#allocation13]   ;;  %s12638_s24 = scalar_lea.hbm %s13334_s6, 8192 }
  0x29   :  { %s91_s21 = sshll.u32 %s12844_s20, 4  ;;  %p12639_p2 = scmp.ne.s32.totalorder %s13334_s6, %s12638_s24  ;;  %s92_s21 = int_to_ptr.vmem [resolvable:$true] %s91_s21 }
  0x2a   :  { %p12642_p3 = scmp.lt.u32.totalorder %s12638_s24, %s13334_s6 }
  0x2c   :  { %p12644_p4 = pnand %p12642_p3, %p12639_p2 }
  0x2e   :  { %12647 = shalt.err (!%p12644_p4)
}
  0x2f   :  { %s12648_s30 = scalar_lea.vmem %s92_s21, 8192  ;;  %p12653_p6 = scmp.lt.s32.totalorder %s92_s21, %s92_s21 }
  0x30   :  { %p12649_p5 = scmp.ne.s32.totalorder %s92_s21, %s12648_s30  ;;  %p12654_p7 = scmp.lt.s32.totalorder %s12648_s30, %s12648_s30 }
  0x32   :  { %p12655_p8 = por %p12654_p7, %p12653_p6 }
  0x34   :  { %p12656_p9 = pnand %p12655_p8, %p12649_p5 }
  0x36   :  { %12659 = shalt.err (!%p12656_p9)
}
  0x37   :  { %s12845_s4 = smov 128   ;;  %s12846_s28 = smov 8  }
  0x38   :  { %97 = dma.hbm_to_vmem [thread:$0]  %s13334_s6, 8192, %s92_s21, [#allocation14], %s12845_s4, %s12845_s4, %s12846_s28  }
  0x39   :  { %s12847_s13 = smov [#allocation16]   ;;  %s12660_s2 = scalar_lea.hbm %s13336_s8, 2048 }
  0x3a   :  { %s113_s15 = sshll.u32 %s12847_s13, 4  ;;  %p12661_p10 = scmp.ne.s32.totalorder %s13336_s8, %s12660_s2  ;;  %s114_s15 = int_to_ptr.vmem [resolvable:$true] %s113_s15 }
  0x3b   :  { %p12664_p11 = scmp.lt.u32.totalorder %s12660_s2, %s13336_s8 }
  0x3d   :  { %p12666_p12 = pnand %p12664_p11, %p12661_p10 }
  0x3f   :  { %12669 = shalt.err (!%p12666_p12)
}
  0x40   :  { %s12670_s22 = scalar_lea.vmem %s114_s15, 2048  ;;  %p12675_p0 = scmp.lt.s32.totalorder %s114_s15, %s114_s15 }
  0x41   :  { %p12671_p13 = scmp.ne.s32.totalorder %s114_s15, %s12670_s22  ;;  %p12676_p1 = scmp.lt.s32.totalorder %s12670_s22, %s12670_s22 }
  0x43   :  { %p12677_p2 = por %p12676_p1, %p12675_p0 }
  0x45   :  { %p12678_p3 = pnand %p12677_p2, %p12671_p13 }
  0x47   :  { %12681 = shalt.err (!%p12678_p3)
}
  0x48   :  { %s12848_s6 = smov 64   ;;  %s12849_s21 = smov 4  }
  0x49   :  { %119 = dma.hbm_to_vmem [thread:$0]  %s13336_s8, 2048, %s114_s15, [#allocation17], %s12848_s6, %s12848_s6, %s12849_s21  }
  0x4a   :  { %s12682_s27 = scalar_lea.hbm %s13328_s0, 16 }
  0x4b   :  { %p12683_p4 = scmp.ne.s32.totalorder %s13328_s0, %s12682_s27  ;;  %p12686_p5 = scmp.lt.u32.totalorder %s12682_s27, %s13328_s0 }
  0x4d   :  { %p12688_p6 = pnand %p12686_p5, %p12683_p4 }
  0x4f   :  { %12691 = shalt.err (!%p12688_p6)
}
  0x50   :  { %s12850_s13 = smov [#allocation2]   ;;  %s12851_s8 = smov [#allocation6]  }
  0x51   :  { %29 = dma.hbm_to_smem %s13328_s0, 16, %s12850_s13, [#allocation5]  }
  0x52   :  { %s35_s15 = sshll.u32 %s12851_s8, 4  ;;  %s12692_s18 = scalar_lea.hbm %s13329_s1, 2048  ;;  %s36_s15 = int_to_ptr.vmem [resolvable:$true] %s35_s15 }
  0x53   :  { %p12693_p7 = scmp.ne.s32.totalorder %s13329_s1, %s12692_s18  ;;  %p12696_p8 = scmp.lt.u32.totalorder %s12692_s18, %s13329_s1 }
  0x55   :  { %p12698_p9 = pnand %p12696_p8, %p12693_p7 }
  0x57   :  { %12701 = shalt.err (!%p12698_p9)
}
  0x58   :  { %s12702_s23 = scalar_lea.vmem %s36_s15, 2048  ;;  %p12707_p11 = scmp.lt.s32.totalorder %s36_s15, %s36_s15 }
  0x59   :  { %p12703_p10 = scmp.ne.s32.totalorder %s36_s15, %s12702_s23  ;;  %p12708_p12 = scmp.lt.s32.totalorder %s12702_s23, %s12702_s23 }
  0x5b   :  { %p12709_p13 = por %p12708_p12, %p12707_p11 }
  0x5d   :  { %p12710_p0 = pnand %p12709_p13, %p12703_p10 }
  0x5f   :  { %12713 = shalt.err (!%p12710_p0)
}
  0x60   :  { %s12852_s0 = smov 1024   ;;  %s12853_s26 = smov [#allocation9]  }
  0x61   :  { %41 = dma.hbm_to_vmem [thread:$0]  %s13329_s1, 2048, %s36_s15, [#allocation3], %s12852_s0, %s12852_s0, %s12848_s6  }
  0x62   :  { %s60_s27 = sshll.u32 %s12853_s26, 4  ;;  %s12854_s29 = smov [#allocation12]   ;;  %s61_s27 = int_to_ptr.vmem [resolvable:$true] %s60_s27 }
  0x63   :  { %s82_s30 = sshll.u32 %s12854_s29, 4  ;;  %s12714_s13 = scalar_lea.hbm %s13331_s3, 128  ;;  %s83_s30 = int_to_ptr.vmem [resolvable:$true] %s82_s30 }
  0x64   :  { %p12715_p1 = scmp.ne.s32.totalorder %s13331_s3, %s12714_s13  ;;  %p12718_p2 = scmp.lt.u32.totalorder %s12714_s13, %s13331_s3 }
  0x66   :  { %p12720_p3 = pnand %p12718_p2, %p12715_p1 }
  0x68   :  { %12723 = shalt.err (!%p12720_p3)
}
  0x69   :  { %s12724_s1 = scalar_lea.vmem %s61_s27, 128  ;;  %p12729_p5 = scmp.lt.s32.totalorder %s61_s27, %s61_s27 }
  0x6a   :  { %p12725_p4 = scmp.ne.s32.totalorder %s61_s27, %s12724_s1  ;;  %p12730_p6 = scmp.lt.s32.totalorder %s12724_s1, %s12724_s1 }
  0x6c   :  { %p12731_p7 = por %p12730_p6, %p12729_p5 }
  0x6e   :  { %p12732_p8 = pnand %p12731_p7, %p12725_p4 }
  0x70   :  { %12735 = shalt.err (!%p12732_p8)
}
  0x71   :  { %63 = dma.hbm_to_vmem [thread:$0]  %s13331_s3, 128, %s61_s27, [#allocation8]  }
  0x72   :  { %s12736_s19 = scalar_lea.hbm %s13333_s5, 64 }
  0x73   :  { %p12737_p9 = scmp.ne.s32.totalorder %s13333_s5, %s12736_s19  ;;  %p12740_p10 = scmp.lt.u32.totalorder %s12736_s19, %s13333_s5 }
  0x75   :  { %p12742_p11 = pnand %p12740_p10, %p12737_p9 }
  0x77   :  { %12745 = shalt.err (!%p12742_p11)
}
  0x78   :  { %s12746_s0 = scalar_lea.vmem %s83_s30, 64  ;;  %p12751_p13 = scmp.lt.s32.totalorder %s83_s30, %s83_s30 }
  0x79   :  { %p12747_p12 = scmp.ne.s32.totalorder %s83_s30, %s12746_s0  ;;  %p12752_p0 = scmp.lt.s32.totalorder %s12746_s0, %s12746_s0 }
  0x7b   :  { %p12753_p1 = por %p12752_p0, %p12751_p13 }
  0x7d   :  { %p12754_p2 = pnand %p12753_p1, %p12747_p12 }
  0x7f   :  { %12757 = shalt.err (!%p12754_p2)
}
  0x80   :  { %85 = dma.hbm_to_vmem [thread:$0]  %s13333_s5, 64, %s83_s30, [#allocation11]  }
  0x81   :  { %s12855_s25 = smov [#allocation15]   ;;  %s12856_s27 = smov [#allocation18]  }
  0x82   :  { %s104_s26 = sshll.u32 %s12855_s25, 4  ;;  %s126_s29 = sshll.u32 %s12856_s27, 4  ;;  %s105_s26 = int_to_ptr.vmem [resolvable:$true] %s104_s26  ;;  %s127_s29 = int_to_ptr.vmem [resolvable:$true] %s126_s29 }
  0x83   :  { %s12758_s13 = scalar_lea.hbm %s13335_s7, 32 }
  0x84   :  { %p12759_p3 = scmp.ne.s32.totalorder %s13335_s7, %s12758_s13  ;;  %p12762_p4 = scmp.lt.u32.totalorder %s12758_s13, %s13335_s7 }
  0x86   :  { %p12764_p5 = pnand %p12762_p4, %p12759_p3 }
  0x88   :  { %12767 = shalt.err (!%p12764_p5)
}
  0x89   :  { %s12768_s5 = scalar_lea.vmem %s105_s26, 32  ;;  %p12773_p7 = scmp.lt.s32.totalorder %s105_s26, %s105_s26 }
  0x8a   :  { %p12769_p6 = scmp.ne.s32.totalorder %s105_s26, %s12768_s5  ;;  %p12774_p8 = scmp.lt.s32.totalorder %s12768_s5, %s12768_s5 }
  0x8c   :  { %p12775_p9 = por %p12774_p8, %p12773_p7 }
  0x8e   :  { %p12776_p10 = pnand %p12775_p9, %p12769_p6 }
  0x90   :  { %12779 = shalt.err (!%p12776_p10)
}
  0x91   :  { %107 = dma.hbm_to_vmem [thread:$0]  %s13335_s7, 32, %s105_s26, [#allocation14]  }
  0x92   :  { %s12780_s14 = scalar_lea.hbm %s13337_s9, 16 }
  0x93   :  { %p12781_p11 = scmp.ne.s32.totalorder %s13337_s9, %s12780_s14  ;;  %p12784_p12 = scmp.lt.u32.totalorder %s12780_s14, %s13337_s9 }
  0x95   :  { %p12786_p13 = pnand %p12784_p12, %p12781_p11 }
  0x97   :  { %12789 = shalt.err (!%p12786_p13)
}
  0x98   :  { %s12790_s21 = scalar_lea.vmem %s127_s29, 16  ;;  %s12794_s23 = scalar_lea.vmem %s127_s29, 32 }
  0x99   :  { %p12791_p0 = scmp.ne.s32.totalorder %s127_s29, %s12790_s21  ;;  %p12795_p1 = scmp.lt.s32.totalorder %s127_s29, %s127_s29 }
  0x9a   :  { %p12796_p2 = scmp.lt.s32.totalorder %s12794_s23, %s12790_s21 }
  0x9c   :  { %p12797_p3 = por %p12796_p2, %p12795_p1 }
  0x9e   :  { %p12798_p4 = pnand %p12797_p3, %p12791_p0 }
  0xa0   :  { %12801 = shalt.err (!%p12798_p4)
}
  0xa1   :  { %129 = dma.hbm_to_vmem [thread:$0]  %s13337_s9, 16, %s127_s29, [#allocation17]  }
  0xa2   :  { %12824 = dma.done.wait [#allocation5], 16  }
  0xa3   :  { %12825 = vsyncadd [#allocation5], 4294967280 }
  0xa4   :  { %12826 = dma.done.wait [#allocation3], 2048  }
  0xa5   :  { %12827 = vsyncadd [#allocation3], 4294965248 }
  0xa6   :  { %12828 = dma.done.wait [#allocation8], 131200  }
  0xa7   :  { %12829 = vsyncadd [#allocation8], 4294836096 }
  0xa8   :  { %12830 = dma.done.wait [#allocation11], 32832  }
  0xa9   :  { %12831 = vsyncadd [#allocation11], 4294934464 }
  0xaa   :  { %12832 = dma.done.wait [#allocation14], 8224  }
  0xab   :  { %12833 = vsyncadd [#allocation14], 4294959072 }
  0xac   :  { %12834 = dma.done.wait [#allocation17], 2064  }
  0xad   :  { %12835 = vsyncadd [#allocation17], 4294965232 }
  0xae   :  { %160 = sfence }
  0xaf   :  { %v181_v0 = vld [vmem:[#allocation7] sm:$0xff]  ;;  %v13047_v59 = vld [vmem:[#allocation6 + $0x8] sm:$0xff]  ;;  %s162_s9 = sld [smem:[#allocation2]]  ;;  %s10508_s3 = sld [smem:[#allocation2 + $0x1]] }
  0xb0   :  { %v185_v1 = vld [vmem:[#allocation7 + $0x20] sm:$0xff]  ;;  %v13049_v60 = vld [vmem:[#allocation6 + $0x48] sm:$0xff]  ;;  %s10509_s24 = sld [smem:[#allocation2 + $0x2]]  ;;  %s12857_s25 = smov [#allocation19]  }
  0xb1   :  { %v309_v2 = vld [vmem:[#allocation7 + $0x400] sm:$0xff]  ;;  %v10527_v3 = vcombine.high %v181_v0, %v185_v1  ;;  %v10526_v5 = vcombine.low %v181_v0, %v185_v1  ;;  %v13053_v63 = vcombine.high %v13047_v59, %v13049_v60  ;;  %s10491_s26 = sshll.u32 %s12857_s25, 4  ;;  %s10492_s26 = int_to_ptr.vmem [resolvable:$true] %s10491_s26 }
  0xb2   :  { %v313_v4 = vld [vmem:[#allocation7 + $0x420] sm:$0xff]  ;;  %s12802_s27 = scalar_lea.vmem %s10492_s26, 256  ;;  %p12807_p6 = scmp.lt.s32.totalorder %s10492_s26, %s10492_s26 }
  0xb3   :  { %v189_v6 = vld [vmem:[#allocation7 + $0x40] sm:$0xff]  ;;  %v10655_v8 = vcombine.high %v309_v2, %v313_v4  ;;  %v10654_v9 = vcombine.low %v309_v2, %v313_v4  ;;  %6447 = vmatprep.subr.bf16.mxu1 %v10527_v3  ;;  %6522 = vmatprep.mubr.bf16.mxu0 %v13053_v63  ;;  %p12803_p5 = scmp.ne.s32.totalorder %s10492_s26, %s12802_s27  ;;  %p12808_p7 = scmp.lt.s32.totalorder %s12802_s27, %s12802_s27 }
  0xb4   :  { %v193_v7 = vld [vmem:[#allocation7 + $0x60] sm:$0xff]  ;;  %6448 = vmatpush1.bf16.msra.mxu1 %v10526_v5 }
  0xb5   :  { %v10535_v10 = vcombine.high %v189_v6, %v193_v7  ;;  %v317_v11 = vld [vmem:[#allocation7 + $0x440] sm:$0xff]  ;;  %6490 = vmatprep.subr.bf16.mxu0 %v10655_v8  ;;  %v10534_v18 = vcombine.low %v189_v6, %v193_v7  ;;  %p12809_p8 = por %p12808_p7, %p12807_p6 }
  0xb6   :  { %v321_v12 = vld [vmem:[#allocation7 + $0x460] sm:$0xff]  ;;  %6491 = vmatpush1.bf16.msra.mxu0 %v10654_v9 }
  0xb7   :  { %v197_v13 = vld [vmem:[#allocation7 + $0x80] sm:$0xff]  ;;  %v10663_v14 = vcombine.high %v317_v11, %v321_v12  ;;  %6449 = vmatprep.subr.bf16.mxu1 %v10535_v10  ;;  %v10662_v19 = vcombine.low %v317_v11, %v321_v12  ;;  %p12810_p9 = pnand %p12809_p8, %p12803_p5 }
  0xb8   :  { %v201_v15 = vld [vmem:[#allocation7 + $0xa0] sm:$0xff]  ;;  %6450 = vmatpush1.bf16.msra.mxu1 %v10534_v18 }
  0xb9   :  { %v325_v16 = vld [vmem:[#allocation7 + $0x480] sm:$0xff]  ;;  %v10543_v20 = vcombine.high %v197_v13, %v201_v15  ;;  %6492 = vmatprep.subr.bf16.mxu0 %v10663_v14  ;;  %v10542_v26 = vcombine.low %v197_v13, %v201_v15 }
  0xba   :  { %v329_v17 = vld [vmem:[#allocation7 + $0x4a0] sm:$0xff]  ;;  %6493 = vmatpush1.bf16.msra.mxu0 %v10662_v19 }
  0xbb   :  { %v10671_v21 = vcombine.high %v325_v16, %v329_v17  ;;  %v205_v22 = vld [vmem:[#allocation7 + $0xc0] sm:$0xff]  ;;  %6451 = vmatprep.subr.bf16.mxu1 %v10543_v20  ;;  %v10670_v27 = vcombine.low %v325_v16, %v329_v17 }
  0xbc   :  { %v209_v23 = vld [vmem:[#allocation7 + $0xe0] sm:$0xff]  ;;  %6452 = vmatpush1.bf16.msra.mxu1 %v10542_v26 }
  0xbd   :  { %v333_v24 = vld [vmem:[#allocation7 + $0x4c0] sm:$0xff]  ;;  %v10551_v28 = vcombine.high %v205_v22, %v209_v23  ;;  %6494 = vmatprep.subr.bf16.mxu0 %v10671_v21  ;;  %v10550_v34 = vcombine.low %v205_v22, %v209_v23 }
  0xbe   :  { %v337_v25 = vld [vmem:[#allocation7 + $0x4e0] sm:$0xff]  ;;  %6495 = vmatpush1.bf16.msra.mxu0 %v10670_v27 }
  0xbf   :  { %v10679_v29 = vcombine.high %v333_v24, %v337_v25  ;;  %v213_v30 = vld [vmem:[#allocation7 + $0x100] sm:$0xff]  ;;  %6453 = vmatprep.subr.bf16.mxu1 %v10551_v28  ;;  %v10678_v35 = vcombine.low %v333_v24, %v337_v25 }
  0xc0   :  { %v217_v31 = vld [vmem:[#allocation7 + $0x120] sm:$0xff]  ;;  %6454 = vmatpush1.bf16.msra.mxu1 %v10550_v34 }
  0xc1   :  { %v341_v32 = vld [vmem:[#allocation7 + $0x500] sm:$0xff]  ;;  %v10559_v36 = vcombine.high %v213_v30, %v217_v31  ;;  %6496 = vmatprep.subr.bf16.mxu0 %v10679_v29  ;;  %v10558_v42 = vcombine.low %v213_v30, %v217_v31 }
  0xc2   :  { %v345_v33 = vld [vmem:[#allocation7 + $0x520] sm:$0xff]  ;;  %6497 = vmatpush1.bf16.msra.mxu0 %v10678_v35 }
  0xc3   :  { %v10687_v37 = vcombine.high %v341_v32, %v345_v33  ;;  %v221_v38 = vld [vmem:[#allocation7 + $0x140] sm:$0xff]  ;;  %6455 = vmatprep.subr.bf16.mxu1 %v10559_v36  ;;  %v10686_v43 = vcombine.low %v341_v32, %v345_v33 }
  0xc4   :  { %v225_v39 = vld [vmem:[#allocation7 + $0x160] sm:$0xff]  ;;  %6456 = vmatpush1.bf16.msra.mxu1 %v10558_v42 }
  0xc5   :  { %v349_v40 = vld [vmem:[#allocation7 + $0x540] sm:$0xff]  ;;  %v10567_v44 = vcombine.high %v221_v38, %v225_v39  ;;  %6498 = vmatprep.subr.bf16.mxu0 %v10687_v37  ;;  %v10566_v50 = vcombine.low %v221_v38, %v225_v39 }
  0xc6   :  { %v353_v41 = vld [vmem:[#allocation7 + $0x560] sm:$0xff]  ;;  %6499 = vmatpush1.bf16.msra.mxu0 %v10686_v43 }
  0xc7   :  { %v10695_v45 = vcombine.high %v349_v40, %v353_v41  ;;  %v229_v46 = vld [vmem:[#allocation7 + $0x180] sm:$0xff]  ;;  %6457 = vmatprep.subr.bf16.mxu1 %v10567_v44  ;;  %v10694_v51 = vcombine.low %v349_v40, %v353_v41 }
  0xc8   :  { %v233_v47 = vld [vmem:[#allocation7 + $0x1a0] sm:$0xff]  ;;  %6458 = vmatpush1.bf16.msra.mxu1 %v10566_v50 }
  0xc9   :  { %v357_v48 = vld [vmem:[#allocation7 + $0x580] sm:$0xff]  ;;  %v10575_v52 = vcombine.high %v229_v46, %v233_v47  ;;  %6500 = vmatprep.subr.bf16.mxu0 %v10695_v45  ;;  %v10574_v0 = vcombine.low %v229_v46, %v233_v47 }
  0xca   :  { %v361_v49 = vld [vmem:[#allocation7 + $0x5a0] sm:$0xff]  ;;  %6501 = vmatpush1.bf16.msra.mxu0 %v10694_v51 }
  0xcb   :  { %v237_v53 = vld [vmem:[#allocation7 + $0x1c0] sm:$0xff]  ;;  %v10703_v56 = vcombine.high %v357_v48, %v361_v49  ;;  %6459 = vmatprep.subr.bf16.mxu1 %v10575_v52  ;;  %v10702_v1 = vcombine.low %v357_v48, %v361_v49 }
  0xcc   :  { %v13039_v54 = vld [vmem:[#allocation6] sm:$0xff]  ;;  %6460 = vmatpush1.bf16.msra.mxu1 %v10574_v0 }
  0xcd   :  { %v13041_v55 = vld [vmem:[#allocation6 + $0x40] sm:$0xff]  ;;  %6502 = vmatprep.subr.bf16.mxu0 %v10703_v56 }
  0xce   :  { %v241_v57 = vld [vmem:[#allocation7 + $0x1e0] sm:$0xff]  ;;  %v13045_v58 = vcombine.high %v13039_v54, %v13041_v55  ;;  %6503 = vmatpush1.bf16.msra.mxu0 %v10702_v1 }
  0xcf   :  { %v365_v61 = vld [vmem:[#allocation7 + $0x5c0] sm:$0xff]  ;;  %v10583_v2 = vcombine.high %v237_v53, %v241_v57  ;;  %v10582_v8 = vcombine.low %v237_v53, %v241_v57 }
  0xd0   :  { %v369_v62 = vld [vmem:[#allocation7 + $0x5e0] sm:$0xff]  ;;  %6479 = vmatprep.mubr.bf16.mxu1 %v13045_v58 }
  0xd1   :  { %v10711_v3 = vcombine.high %v365_v61, %v369_v62  ;;  %v245_v4 = vld [vmem:[#allocation7 + $0x200] sm:$0xff]  ;;  %6461 = vmatprep.subr.bf16.mxu1 %v10583_v2  ;;  %v10710_v9 = vcombine.low %v365_v61, %v369_v62 }
  0xd2   :  { %v249_v5 = vld [vmem:[#allocation7 + $0x220] sm:$0xff]  ;;  %6462 = vmatpush1.bf16.msra.mxu1 %v10582_v8 }
  0xd3   :  { %v373_v6 = vld [vmem:[#allocation7 + $0x600] sm:$0xff]  ;;  %v10591_v10 = vcombine.high %v245_v4, %v249_v5  ;;  %6504 = vmatprep.subr.bf16.mxu0 %v10711_v3  ;;  %v10590_v16 = vcombine.low %v245_v4, %v249_v5 }
  0xd4   :  { %v377_v7 = vld [vmem:[#allocation7 + $0x620] sm:$0xff]  ;;  %6505 = vmatpush1.bf16.msra.mxu0 %v10710_v9 }
  0xd5   :  { %v10719_v11 = vcombine.high %v373_v6, %v377_v7  ;;  %v253_v12 = vld [vmem:[#allocation7 + $0x240] sm:$0xff]  ;;  %6463 = vmatprep.subr.bf16.mxu1 %v10591_v10  ;;  %v10718_v17 = vcombine.low %v373_v6, %v377_v7  ;;  %v182_v10 = vld [vmem:[#allocation7 + $0x8] sm:$0xff] }
  0xd6   :  { %v257_v13 = vld [vmem:[#allocation7 + $0x260] sm:$0xff]  ;;  %6464 = vmatpush1.bf16.msra.mxu1 %v10590_v16 }
  0xd7   :  { %v381_v14 = vld [vmem:[#allocation7 + $0x640] sm:$0xff]  ;;  %v10599_v18 = vcombine.high %v253_v12, %v257_v13  ;;  %6506 = vmatprep.subr.bf16.mxu0 %v10719_v11  ;;  %v10598_v24 = vcombine.low %v253_v12, %v257_v13  ;;  %v186_v11 = vld [vmem:[#allocation7 + $0x28] sm:$0xff] }
  0xd8   :  { %v385_v15 = vld [vmem:[#allocation7 + $0x660] sm:$0xff]  ;;  %6507 = vmatpush1.bf16.msra.mxu0 %v10718_v17  ;;  %v10529_v16 = vcombine.high %v182_v10, %v186_v11 }
  0xd9   :  { %v10727_v19 = vcombine.high %v381_v14, %v385_v15  ;;  %v261_v20 = vld [vmem:[#allocation7 + $0x280] sm:$0xff]  ;;  %6465 = vmatprep.subr.bf16.mxu1 %v10599_v18  ;;  %v10726_v25 = vcombine.low %v381_v14, %v385_v15 }
  0xda   :  { %v265_v21 = vld [vmem:[#allocation7 + $0x2a0] sm:$0xff]  ;;  %6466 = vmatpush1.bf16.msra.mxu1 %v10598_v24  ;;  %v13063_v24 = vld [vmem:[#allocation6 + $0x50] sm:$0xff] }
  0xdb   :  { %v389_v22 = vld [vmem:[#allocation7 + $0x680] sm:$0xff]  ;;  %v10607_v26 = vcombine.high %v261_v20, %v265_v21  ;;  %6508 = vmatprep.subr.bf16.mxu0 %v10727_v19  ;;  %v10606_v32 = vcombine.low %v261_v20, %v265_v21  ;;  %v190_v19 = vld [vmem:[#allocation7 + $0x48] sm:$0xff]  ;;  %v13059_v21 = vcombine.low %v13039_v54, %v13041_v55 }
  0xdc   :  { %v393_v23 = vld [vmem:[#allocation7 + $0x6a0] sm:$0xff]  ;;  %6509 = vmatpush1.bf16.msra.mxu0 %v10726_v25  ;;  %v194_v20 = vld [vmem:[#allocation7 + $0x68] sm:$0xff]  ;;  %v10528_v25 = vcombine.low %v182_v10, %v186_v11 }
  0xdd   :  { %v10735_v27 = vcombine.high %v389_v22, %v393_v23  ;;  %v269_v28 = vld [vmem:[#allocation7 + $0x2c0] sm:$0xff]  ;;  %6467 = vmatprep.subr.bf16.mxu1 %v10607_v26  ;;  %v10734_v33 = vcombine.low %v389_v22, %v393_v23  ;;  %v13061_v23 = vld [vmem:[#allocation6 + $0x10] sm:$0xff]  ;;  %v13067_v26 = vcombine.low %v13047_v59, %v13049_v60  ;;  %v202_v54 = vld [vmem:[#allocation7 + $0xa8] sm:$0xff]  ;;  %v10536_v59 = vcombine.low %v190_v19, %v194_v20 }
  0xde   :  { %v273_v29 = vld [vmem:[#allocation7 + $0x2e0] sm:$0xff]  ;;  %6468 = vmatpush1.bf16.msra.mxu1 %v10606_v32  ;;  %v13071_v55 = vcombine.high %v13061_v23, %v13063_v24  ;;  %v238_v10 = vld [vmem:[#allocation7 + $0x1c8] sm:$0xff] }
  0xdf   :  { %v397_v30 = vld [vmem:[#allocation7 + $0x6c0] sm:$0xff]  ;;  %v10615_v34 = vcombine.high %v269_v28, %v273_v29  ;;  %6510 = vmatprep.subr.bf16.mxu0 %v10735_v27  ;;  %v10614_v40 = vcombine.low %v269_v28, %v273_v29  ;;  %v10537_v28 = vcombine.high %v190_v19, %v194_v20  ;;  %v250_v20 = vld [vmem:[#allocation7 + $0x228] sm:$0xff] }
  0xe0   :  { %v401_v31 = vld [vmem:[#allocation7 + $0x6e0] sm:$0xff]  ;;  %6511 = vmatpush1.bf16.msra.mxu0 %v10734_v33 }
  0xe1   :  { %v10743_v35 = vcombine.high %v397_v30, %v401_v31  ;;  %v277_v36 = vld [vmem:[#allocation7 + $0x300] sm:$0xff]  ;;  %6469 = vmatprep.subr.bf16.mxu1 %v10615_v34  ;;  %v10742_v41 = vcombine.low %v397_v30, %v401_v31  ;;  %v198_v30 = vld [vmem:[#allocation7 + $0x88] sm:$0xff] }
  0xe2   :  { %v281_v37 = vld [vmem:[#allocation7 + $0x320] sm:$0xff]  ;;  %6470 = vmatpush1.bf16.msra.mxu1 %v10614_v40  ;;  %v10545_v33 = vcombine.high %v198_v30, %v202_v54 }
  0xe3   :  { %v405_v38 = vld [vmem:[#allocation7 + $0x700] sm:$0xff]  ;;  %v10623_v42 = vcombine.high %v277_v36, %v281_v37  ;;  %6512 = vmatprep.subr.bf16.mxu0 %v10743_v35  ;;  %v10622_v48 = vcombine.low %v277_v36, %v281_v37  ;;  %v206_v36 = vld [vmem:[#allocation7 + $0xc8] sm:$0xff] }
  0xe4   :  { %v409_v39 = vld [vmem:[#allocation7 + $0x720] sm:$0xff]  ;;  %6513 = vmatpush1.bf16.msra.mxu0 %v10742_v41 }
  0xe5   :  { %v10751_v43 = vcombine.high %v405_v38, %v409_v39  ;;  %v285_v44 = vld [vmem:[#allocation7 + $0x340] sm:$0xff]  ;;  %6471 = vmatprep.subr.bf16.mxu1 %v10623_v42  ;;  %v10750_v49 = vcombine.low %v405_v38, %v409_v39  ;;  %v210_v38 = vld [vmem:[#allocation7 + $0xe8] sm:$0xff]  ;;  %v10544_v39 = vcombine.low %v198_v30, %v202_v54 }
  0xe6   :  { %v289_v45 = vld [vmem:[#allocation7 + $0x360] sm:$0xff]  ;;  %6472 = vmatpush1.bf16.msra.mxu1 %v10622_v48  ;;  %v10553_v41 = vcombine.high %v206_v36, %v210_v38  ;;  %v254_v30 = vld [vmem:[#allocation7 + $0x248] sm:$0xff] }
  0xe7   :  { %v413_v46 = vld [vmem:[#allocation7 + $0x740] sm:$0xff]  ;;  %v10631_v50 = vcombine.high %v285_v44, %v289_v45  ;;  %6514 = vmatprep.subr.bf16.mxu0 %v10751_v43  ;;  %v10630_v61 = vcombine.low %v285_v44, %v289_v45  ;;  %v214_v44 = vld [vmem:[#allocation7 + $0x108] sm:$0xff] }
  0xe8   :  { %v417_v47 = vld [vmem:[#allocation7 + $0x760] sm:$0xff]  ;;  %6515 = vmatpush1.bf16.msra.mxu0 %v10750_v49 }
  0xe9   :  { %v10759_v51 = vcombine.high %v413_v46, %v417_v47  ;;  %v293_v52 = vld [vmem:[#allocation7 + $0x380] sm:$0xff]  ;;  %6473 = vmatprep.subr.bf16.mxu1 %v10631_v50  ;;  %v10758_v62 = vcombine.low %v413_v46, %v417_v47  ;;  %v218_v46 = vld [vmem:[#allocation7 + $0x128] sm:$0xff]  ;;  %v10552_v47 = vcombine.low %v206_v36, %v210_v38 }
  0xea   :  { %v297_v53 = vld [vmem:[#allocation7 + $0x3a0] sm:$0xff]  ;;  %6474 = vmatpush1.bf16.msra.mxu1 %v10630_v61  ;;  %v10561_v49 = vcombine.high %v214_v44, %v218_v46 }
  0xeb   :  { %v421_v56 = vld [vmem:[#allocation7 + $0x780] sm:$0xff]  ;;  %v10639_v0 = vcombine.high %v293_v52, %v297_v53  ;;  %6516 = vmatprep.subr.bf16.mxu0 %v10759_v51  ;;  %v10638_v6 = vcombine.low %v293_v52, %v297_v53  ;;  %v222_v52 = vld [vmem:[#allocation7 + $0x148] sm:$0xff] }
  0xec   :  { %v425_v57 = vld [vmem:[#allocation7 + $0x7a0] sm:$0xff]  ;;  %6517 = vmatpush1.bf16.msra.mxu0 %v10758_v62 }
  0xed   :  { %v10767_v1 = vcombine.high %v421_v56, %v425_v57  ;;  %v301_v2 = vld [vmem:[#allocation7 + $0x3c0] sm:$0xff]  ;;  %6475 = vmatprep.subr.bf16.mxu1 %v10639_v0  ;;  %v10766_v7 = vcombine.low %v421_v56, %v425_v57  ;;  %v226_v56 = vld [vmem:[#allocation7 + $0x168] sm:$0xff]  ;;  %v10560_v57 = vcombine.low %v214_v44, %v218_v46 }
  0xee   :  { %v305_v3 = vld [vmem:[#allocation7 + $0x3e0] sm:$0xff]  ;;  %6476 = vmatpush1.bf16.msra.mxu1 %v10638_v6  ;;  %v10569_v62 = vcombine.high %v222_v52, %v226_v56 }
  0xef   :  { %v429_v4 = vld [vmem:[#allocation7 + $0x7c0] sm:$0xff]  ;;  %v10647_v8 = vcombine.high %v301_v2, %v305_v3  ;;  %6518 = vmatprep.subr.bf16.mxu0 %v10767_v1  ;;  %v10646_v14 = vcombine.low %v301_v2, %v305_v3  ;;  %v230_v2 = vld [vmem:[#allocation7 + $0x188] sm:$0xff] }
  0xf0   :  { %v433_v5 = vld [vmem:[#allocation7 + $0x7e0] sm:$0xff]  ;;  %6519 = vmatpush1.bf16.msra.mxu0 %v10766_v7 }
  0xf1   :  { %v10775_v9 = vcombine.high %v429_v4, %v433_v5  ;;  %v437_v12 = vld [vmem:[#allocation7 + $0x800] sm:$0xff]  ;;  %6477 = vmatprep.subr.bf16.mxu1 %v10647_v8  ;;  %v10774_v15 = vcombine.low %v429_v4, %v433_v5  ;;  %v234_v4 = vld [vmem:[#allocation7 + $0x1a8] sm:$0xff]  ;;  %v10568_v5 = vcombine.low %v222_v52, %v226_v56 }
  0xf2   :  { %v441_v13 = vld [vmem:[#allocation7 + $0x820] sm:$0xff]  ;;  %6478 = vmatpush1.bf16.msra.mxu1 %v10646_v14  ;;  %v10577_v7 = vcombine.high %v230_v2, %v234_v4 }
  0xf3   :  { %6520 = vmatprep.subr.bf16.mxu0 %v10775_v9  ;;  %v10783_v17 = vcombine.high %v437_v12, %v441_v13  ;;  %v445_v18 = vld [vmem:[#allocation7 + $0x840] sm:$0xff]  ;;  %v10782_v27 = vcombine.low %v437_v12, %v441_v13  ;;  %6791 = vmatprep.subr.bf16.mxu1 %v10529_v16  ;;  %v242_v12 = vld [vmem:[#allocation7 + $0x1e8] sm:$0xff]  ;;  %v10576_v13 = vcombine.low %v230_v2, %v234_v4 }
  0xf4   :  { %v449_v22 = vld [vmem:[#allocation7 + $0x860] sm:$0xff]  ;;  %6521 = vmatpush1.bf16.msra.mxu0 %v10774_v15  ;;  %v10585_v15 = vcombine.high %v238_v10, %v242_v12 }
  0xf5   :  { %6533 = vmatprep.subr.bf16.mxu0 %v10783_v17  ;;  %v10791_v29 = vcombine.high %v445_v18, %v449_v22  ;;  %6480 = vmatmul.mubr.bf16.vlgmr.msra.gmra.mrb[0].mxu1 %v13059_v21  ;;  %v453_v31 = vld [vmem:[#allocation7 + $0x880] sm:$0xff]  ;;  %v10790_v60 = vcombine.low %v445_v18, %v449_v22  ;;  %v246_v18 = vld [vmem:[#allocation7 + $0x208] sm:$0xff]  ;;  %v10584_v22 = vcombine.low %v238_v10, %v242_v12 }
  0xf6   :  { %v457_v32 = vld [vmem:[#allocation7 + $0x8a0] sm:$0xff]  ;;  %6792 = vmatpush1.bf16.msra.mxu1 %v10528_v25  ;;  %6823 = vmatprep.mubr.bf16.mxu1 %v13045_v58 }
  0xf7   :  { %6523 = vmatmul.mubr.bf16.vlgmr.msra.gmra.mrb[0].mxu0 %v13067_v26  ;;  %6793 = vmatprep.subr.bf16.mxu1 %v10537_v28  ;;  %v461_v34 = vld [vmem:[#allocation7 + $0x8c0] sm:$0xff]  ;;  %v10799_v37 = vcombine.high %v453_v31, %v457_v32  ;;  %v10798_v40 = vcombine.low %v453_v31, %v457_v32  ;;  %v258_v31 = vld [vmem:[#allocation7 + $0x268] sm:$0xff]  ;;  %v10592_v32 = vcombine.low %v246_v18, %v250_v20 }
  0xf8   :  { %6534 = vmatpush1.bf16.msra.mxu0 %v10782_v27  ;;  %v465_v35 = vld [vmem:[#allocation7 + $0x8e0] sm:$0xff]  ;;  %6565 = vmatprep.mubr.bf16.mxu0 %v13071_v55  ;;  %v10593_v27 = vcombine.high %v246_v18, %v250_v20  ;;  %v10600_v38 = vcombine.low %v254_v30, %v258_v31 }
  0xf9   :  { %6535 = vmatprep.subr.bf16.mxu0 %v10791_v29  ;;  %v469_v42 = vld [vmem:[#allocation7 + $0x900] sm:$0xff]  ;;  %v10807_v45 = vcombine.high %v461_v34, %v465_v35  ;;  %v10806_v48 = vcombine.low %v461_v34, %v465_v35  ;;  %v262_v35 = vld [vmem:[#allocation7 + $0x288] sm:$0xff] }
  0xfa   :  { %6794 = vmatpush1.bf16.msra.mxu1 %v10536_v59  ;;  %v473_v43 = vld [vmem:[#allocation7 + $0x920] sm:$0xff] }
  0xfb   :  { %6795 = vmatprep.subr.bf16.mxu1 %v10545_v33  ;;  %v477_v50 = vld [vmem:[#allocation7 + $0x940] sm:$0xff]  ;;  %v10815_v53 = vcombine.high %v469_v42, %v473_v43  ;;  %v10814_v61 = vcombine.low %v469_v42, %v473_v43  ;;  %v270_v43 = vld [vmem:[#allocation7 + $0x2c8] sm:$0xff] }
  0xfc   :  { %6536 = vmatpush1.bf16.msra.mxu0 %v10790_v60  ;;  %v481_v51 = vld [vmem:[#allocation7 + $0x960] sm:$0xff]  ;;  %v10601_v60 = vcombine.high %v254_v30, %v258_v31 }
  0xfd   :  { %6537 = vmatprep.subr.bf16.mxu0 %v10799_v37  ;;  %v485_v0 = vld [vmem:[#allocation7 + $0x980] sm:$0xff]  ;;  %v10823_v3 = vcombine.high %v477_v50, %v481_v51  ;;  %v10822_v6 = vcombine.low %v477_v50, %v481_v51  ;;  %v266_v37 = vld [vmem:[#allocation7 + $0x2a8] sm:$0xff] }
  0xfe   :  { %6796 = vmatpush1.bf16.msra.mxu1 %v10544_v39  ;;  %v489_v1 = vld [vmem:[#allocation7 + $0x9a0] sm:$0xff]  ;;  %v10608_v46 = vcombine.low %v262_v35, %v266_v37  ;;  %v278_v51 = vld [vmem:[#allocation7 + $0x308] sm:$0xff] }
  0xff   :  { %6797 = vmatprep.subr.bf16.mxu1 %v10553_v41  ;;  %v493_v8 = vld [vmem:[#allocation7 + $0x9c0] sm:$0xff]  ;;  %v10831_v11 = vcombine.high %v485_v0, %v489_v1  ;;  %v10830_v14 = vcombine.low %v485_v0, %v489_v1  ;;  %v286_v1 = vld [vmem:[#allocation7 + $0x348] sm:$0xff] }
 0x100   :  { %6538 = vmatpush1.bf16.msra.mxu0 %v10798_v40  ;;  %v497_v9 = vld [vmem:[#allocation7 + $0x9e0] sm:$0xff]  ;;  %v10609_v40 = vcombine.high %v262_v35, %v266_v37  ;;  %v322_v35 = vld [vmem:[#allocation7 + $0x468] sm:$0xff] }
 0x101   :  { %6539 = vmatprep.subr.bf16.mxu0 %v10807_v45  ;;  %v501_v16 = vld [vmem:[#allocation7 + $0xa00] sm:$0xff]  ;;  %v10839_v19 = vcombine.high %v493_v8, %v497_v9  ;;  %v10838_v25 = vcombine.low %v493_v8, %v497_v9  ;;  %v274_v45 = vld [vmem:[#allocation7 + $0x2e8] sm:$0xff] }
 0x102   :  { %6798 = vmatpush1.bf16.msra.mxu1 %v10552_v47  ;;  %v505_v17 = vld [vmem:[#allocation7 + $0xa20] sm:$0xff]  ;;  %v10616_v56 = vcombine.low %v270_v43, %v274_v45  ;;  %v294_v9 = vld [vmem:[#allocation7 + $0x388] sm:$0xff] }
 0x103   :  { %6799 = vmatprep.subr.bf16.mxu1 %v10561_v49  ;;  %v509_v28 = vld [vmem:[#allocation7 + $0xa40] sm:$0xff]  ;;  %v10847_v54 = vcombine.high %v501_v16, %v505_v17  ;;  %v10846_v59 = vcombine.low %v501_v16, %v505_v17  ;;  %v302_v17 = vld [vmem:[#allocation7 + $0x3c8] sm:$0xff] }
 0x104   :  { %6540 = vmatpush1.bf16.msra.mxu0 %v10806_v48  ;;  %v513_v29 = vld [vmem:[#allocation7 + $0xa60] sm:$0xff]  ;;  %v10617_v48 = vcombine.high %v270_v43, %v274_v45 }
 0x105   :  { %6541 = vmatprep.subr.bf16.mxu0 %v10815_v53  ;;  %v517_v33 = vld [vmem:[#allocation7 + $0xa80] sm:$0xff]  ;;  %v10855_v36 = vcombine.high %v509_v28, %v513_v29  ;;  %v10854_v39 = vcombine.low %v509_v28, %v513_v29  ;;  %v282_v53 = vld [vmem:[#allocation7 + $0x328] sm:$0xff] }
 0x106   :  { %6800 = vmatpush1.bf16.msra.mxu1 %v10560_v57  ;;  %v521_v34 = vld [vmem:[#allocation7 + $0xaa0] sm:$0xff]  ;;  %v10624_v4 = vcombine.low %v278_v51, %v282_v53  ;;  %v310_v29 = vld [vmem:[#allocation7 + $0x408] sm:$0xff] }
 0x107   :  { %6801 = vmatprep.subr.bf16.mxu1 %v10569_v62  ;;  %v525_v41 = vld [vmem:[#allocation7 + $0xac0] sm:$0xff]  ;;  %v10863_v44 = vcombine.high %v517_v33, %v521_v34  ;;  %v10862_v47 = vcombine.low %v517_v33, %v521_v34  ;;  %v318_v34 = vld [vmem:[#allocation7 + $0x448] sm:$0xff] }
 0x108   :  { %6542 = vmatpush1.bf16.msra.mxu0 %v10814_v61  ;;  %v529_v42 = vld [vmem:[#allocation7 + $0xae0] sm:$0xff]  ;;  %v10625_v61 = vcombine.high %v278_v51, %v282_v53 }
 0x109   :  { %6543 = vmatprep.subr.bf16.mxu0 %v10823_v3  ;;  %v533_v49 = vld [vmem:[#allocation7 + $0xb00] sm:$0xff]  ;;  %v10871_v52 = vcombine.high %v525_v41, %v529_v42  ;;  %v10870_v57 = vcombine.low %v525_v41, %v529_v42  ;;  %v290_v3 = vld [vmem:[#allocation7 + $0x368] sm:$0xff]  ;;  %v10665_v42 = vcombine.high %v318_v34, %v322_v35 }
 0x10a   :  { %6802 = vmatpush1.bf16.msra.mxu1 %v10568_v5  ;;  %v537_v50 = vld [vmem:[#allocation7 + $0xb20] sm:$0xff]  ;;  %v10632_v12 = vcombine.low %v286_v1, %v290_v3 }
 0x10b   :  { %6803 = vmatprep.subr.bf16.mxu1 %v10577_v7  ;;  %v541_v62 = vld [vmem:[#allocation7 + $0xb40] sm:$0xff]  ;;  %v10879_v2 = vcombine.high %v533_v49, %v537_v50  ;;  %v10878_v5 = vcombine.low %v533_v49, %v537_v50 }
 0x10c   :  { %6544 = vmatpush1.bf16.msra.mxu0 %v10822_v6  ;;  %v545_v0 = vld [vmem:[#allocation7 + $0xb60] sm:$0xff]  ;;  %v10633_v6 = vcombine.high %v286_v1, %v290_v3 }
 0x10d   :  { %6545 = vmatprep.subr.bf16.mxu0 %v10831_v11  ;;  %v549_v7 = vld [vmem:[#allocation7 + $0xb80] sm:$0xff]  ;;  %v10887_v10 = vcombine.high %v541_v62, %v545_v0  ;;  %v298_v11 = vld [vmem:[#allocation7 + $0x3a8] sm:$0xff] }
 0x10e   :  { %6804 = vmatpush1.bf16.msra.mxu1 %v10576_v13  ;;  %v553_v8 = vld [vmem:[#allocation7 + $0xba0] sm:$0xff]  ;;  %v10886_v13 = vcombine.low %v541_v62, %v545_v0  ;;  %v10640_v20 = vcombine.low %v294_v9, %v298_v11 }
 0x10f   :  { %6805 = vmatprep.subr.bf16.mxu1 %v10585_v15  ;;  %v557_v15 = vld [vmem:[#allocation7 + $0xbc0] sm:$0xff]  ;;  %v10895_v18 = vcombine.high %v549_v7, %v553_v8 }
 0x110   :  { %6546 = vmatpush1.bf16.msra.mxu0 %v10830_v14  ;;  %v10641_v14 = vcombine.high %v294_v9, %v298_v11  ;;  %v561_v16 = vld [vmem:[#allocation7 + $0xbe0] sm:$0xff] }
 0x111   :  { %6547 = vmatprep.subr.bf16.mxu0 %v10839_v19  ;;  %v306_v19 = vld [vmem:[#allocation7 + $0x3e8] sm:$0xff]  ;;  %v569_v28 = vld [vmem:[#allocation7 + $0xc20] sm:$0xff]  ;;  %v10903_v30 = vcombine.high %v557_v15, %v561_v16 }
 0x112   :  { %6806 = vmatpush1.bf16.msra.mxu1 %v10584_v22  ;;  %v10894_v22 = vcombine.low %v549_v7, %v553_v8  ;;  %v10648_v31 = vcombine.low %v302_v17, %v306_v19  ;;  %v577_v33 = vld [vmem:[#allocation7 + $0xc60] sm:$0xff] }
 0x113   :  { %6807 = vmatprep.subr.bf16.mxu1 %v10593_v27  ;;  %v565_v27 = vld [vmem:[#allocation7 + $0xc00] sm:$0xff] }
 0x114   :  { %6548 = vmatpush1.bf16.msra.mxu0 %v10838_v25  ;;  %v10649_v25 = vcombine.high %v302_v17, %v306_v19  ;;  %v10911_v37 = vcombine.high %v565_v27, %v569_v28  ;;  %v10910_v41 = vcombine.low %v565_v27, %v569_v28  ;;  %v581_v43 = vld [vmem:[#allocation7 + $0xc80] sm:$0xff] }
 0x115   :  { %6549 = vmatprep.subr.bf16.mxu0 %v10847_v54  ;;  %v314_v54 = vld [vmem:[#allocation7 + $0x428] sm:$0xff]  ;;  %v585_v45 = vld [vmem:[#allocation7 + $0xca0] sm:$0xff] }
 0x116   :  { %6808 = vmatpush1.bf16.msra.mxu1 %v10592_v32  ;;  %v10902_v32 = vcombine.low %v557_v15, %v561_v16  ;;  %v589_v50 = vld [vmem:[#allocation7 + $0xcc0] sm:$0xff]  ;;  %v10927_v53 = vcombine.high %v581_v43, %v585_v45 }
 0x117   :  { %6809 = vmatprep.subr.bf16.mxu1 %v10601_v60  ;;  %v573_v60 = vld [vmem:[#allocation7 + $0xc40] sm:$0xff] }
 0x118   :  { %6550 = vmatpush1.bf16.msra.mxu0 %v10846_v59  ;;  %v10657_v59 = vcombine.high %v310_v29, %v314_v54  ;;  %v593_v51 = vld [vmem:[#allocation7 + $0xce0] sm:$0xff] }
 0x119   :  { %6551 = vmatprep.subr.bf16.mxu0 %v10855_v36  ;;  %v13077_v36 = vld [vmem:[#allocation6 + $0x18] sm:$0xff]  ;;  %v597_v0 = vld [vmem:[#allocation7 + $0xd00] sm:$0xff]  ;;  %v10935_v3 = vcombine.high %v589_v50, %v593_v51 }
 0x11a   :  { %6810 = vmatpush1.bf16.msra.mxu1 %v10600_v38  ;;  %v13079_v38 = vld [vmem:[#allocation6 + $0x58] sm:$0xff]  ;;  %v601_v1 = vld [vmem:[#allocation7 + $0xd20] sm:$0xff] }
 0x11b   :  { %6811 = vmatprep.subr.bf16.mxu1 %v10609_v40  ;;  %v13083_v40 = vcombine.low %v13061_v23, %v13063_v24  ;;  %v10664_v23 = vcombine.low %v318_v34, %v322_v35  ;;  %v10918_v24 = vcombine.low %v573_v60, %v577_v33  ;;  %v605_v8 = vld [vmem:[#allocation7 + $0xd40] sm:$0xff]  ;;  %v10943_v11 = vcombine.high %v597_v0, %v601_v1  ;;  %v374_v35 = vld [vmem:[#allocation7 + $0x608] sm:$0xff] }
 0x11c   :  { %6552 = vmatpush1.bf16.msra.mxu0 %v10854_v39  ;;  %v10656_v39 = vcombine.low %v310_v29, %v314_v54  ;;  %v609_v9 = vld [vmem:[#allocation7 + $0xd60] sm:$0xff]  ;;  %v366_v54 = vld [vmem:[#allocation7 + $0x5c8] sm:$0xff] }
 0x11d   :  { %6553 = vmatprep.subr.bf16.mxu0 %v10863_v44  ;;  %v10919_v44 = vcombine.high %v573_v60, %v577_v33  ;;  %v613_v16 = vld [vmem:[#allocation7 + $0xd80] sm:$0xff]  ;;  %v10951_v19 = vcombine.high %v605_v8, %v609_v9 }
 0x11e   :  { %6812 = vmatpush1.bf16.msra.mxu1 %v10608_v46  ;;  %v326_v46 = vld [vmem:[#allocation7 + $0x488] sm:$0xff]  ;;  %v617_v17 = vld [vmem:[#allocation7 + $0xda0] sm:$0xff] }
 0x11f   :  { %6813 = vmatprep.subr.bf16.mxu1 %v10617_v48  ;;  %v13087_v48 = vcombine.high %v13077_v36, %v13079_v38  ;;  %v621_v28 = vld [vmem:[#allocation7 + $0xdc0] sm:$0xff] }
 0x120   :  { %6554 = vmatpush1.bf16.msra.mxu0 %v10862_v47  ;;  %v330_v47 = vld [vmem:[#allocation7 + $0x4a8] sm:$0xff]  ;;  %v625_v29 = vld [vmem:[#allocation7 + $0xde0] sm:$0xff] }
 0x121   :  { %6555 = vmatprep.subr.bf16.mxu0 %v10871_v52  ;;  %v10673_v49 = vcombine.high %v326_v46, %v330_v47  ;;  %v334_v52 = vld [vmem:[#allocation7 + $0x4c8] sm:$0xff]  ;;  %v629_v33 = vld [vmem:[#allocation7 + $0xe00] sm:$0xff] }
 0x122   :  { %6814 = vmatpush1.bf16.msra.mxu1 %v10616_v56  ;;  %v338_v56 = vld [vmem:[#allocation7 + $0x4e8] sm:$0xff]  ;;  %v633_v34 = vld [vmem:[#allocation7 + $0xe20] sm:$0xff] }
 0x123   :  { %6815 = vmatprep.subr.bf16.mxu1 %v10625_v61  ;;  %v10926_v61 = vcombine.low %v581_v43, %v585_v45  ;;  %v10681_v62 = vcombine.high %v334_v52, %v338_v56  ;;  %v641_v45 = vld [vmem:[#allocation7 + $0xe60] sm:$0xff] }
 0x124   :  { %6556 = vmatpush1.bf16.msra.mxu0 %v10870_v57  ;;  %v10672_v57 = vcombine.low %v326_v46, %v330_v47  ;;  %v382_v46 = vld [vmem:[#allocation7 + $0x648] sm:$0xff]  ;;  %v10975_v47 = vcombine.high %v629_v33, %v633_v34 }
 0x125   :  { %6557 = vmatprep.subr.bf16.mxu0 %v10879_v2  ;;  %v342_v2 = vld [vmem:[#allocation7 + $0x508] sm:$0xff] }
 0x126   :  { %6816 = vmatpush1.bf16.msra.mxu1 %v10624_v4  ;;  %v346_v4 = vld [vmem:[#allocation7 + $0x528] sm:$0xff] }
 0x127   :  { %6817 = vmatprep.subr.bf16.mxu1 %v10633_v6  ;;  %v10934_v6 = vcombine.low %v589_v50, %v593_v51  ;;  %v10689_v7 = vcombine.high %v342_v2, %v346_v4  ;;  %v645_v51 = vld [vmem:[#allocation7 + $0xe80] sm:$0xff] }
 0x128   :  { %6558 = vmatpush1.bf16.msra.mxu0 %v10878_v5  ;;  %v10680_v5 = vcombine.low %v334_v52, %v338_v56  ;;  %v649_v52 = vld [vmem:[#allocation7 + $0xea0] sm:$0xff] }
 0x129   :  { %6559 = vmatprep.subr.bf16.mxu0 %v10887_v10  ;;  %v350_v10 = vld [vmem:[#allocation7 + $0x548] sm:$0xff] }
 0x12a   :  { %6818 = vmatpush1.bf16.msra.mxu1 %v10632_v12  ;;  %v354_v12 = vld [vmem:[#allocation7 + $0x568] sm:$0xff] }
 0x12b   :  { %6819 = vmatprep.subr.bf16.mxu1 %v10641_v14  ;;  %v10942_v14 = vcombine.low %v597_v0, %v601_v1  ;;  %v10697_v15 = vcombine.high %v350_v10, %v354_v12  ;;  %v653_v1 = vld [vmem:[#allocation7 + $0xec0] sm:$0xff] }
 0x12c   :  { %6560 = vmatpush1.bf16.msra.mxu0 %v10886_v13  ;;  %v10688_v13 = vcombine.low %v342_v2, %v346_v4  ;;  %v657_v2 = vld [vmem:[#allocation7 + $0xee0] sm:$0xff]  ;;  %v10991_v4 = vcombine.high %v645_v51, %v649_v52 }
 0x12d   :  { %6561 = vmatprep.subr.bf16.mxu0 %v10895_v18  ;;  %v358_v18 = vld [vmem:[#allocation7 + $0x588] sm:$0xff] }
 0x12e   :  { %6820 = vmatpush1.bf16.msra.mxu1 %v10640_v20  ;;  %v362_v20 = vld [vmem:[#allocation7 + $0x5a8] sm:$0xff] }
 0x12f   :  { %6821 = vmatprep.subr.bf16.mxu1 %v10649_v25  ;;  %v10950_v25 = vcombine.low %v605_v8, %v609_v9  ;;  %v10705_v27 = vcombine.high %v358_v18, %v362_v20  ;;  %v661_v9 = vld [vmem:[#allocation7 + $0xf00] sm:$0xff] }
 0x130   :  { %6562 = vmatpush1.bf16.msra.mxu0 %v10894_v22  ;;  %v10696_v22 = vcombine.low %v350_v10, %v354_v12  ;;  %v665_v10 = vld [vmem:[#allocation7 + $0xf20] sm:$0xff]  ;;  %v10999_v12 = vcombine.high %v653_v1, %v657_v2 }
 0x131   :  { %6563 = vmatprep.subr.bf16.mxu0 %v10903_v30  ;;  %v10959_v30 = vcombine.high %v613_v16, %v617_v17 }
 0x132   :  { %6822 = vmatpush1.bf16.msra.mxu1 %v10648_v31  ;;  %v370_v31 = vld [vmem:[#allocation7 + $0x5e8] sm:$0xff] }
 0x133   :  { %6834 = vmatprep.subr.bf16.mxu1 %v10657_v59  ;;  %v10958_v59 = vcombine.low %v613_v16, %v617_v17  ;;  %v10713_v60 = vcombine.high %v366_v54, %v370_v31  ;;  %v669_v17 = vld [vmem:[#allocation7 + $0xf40] sm:$0xff] }
 0x134   :  { %6564 = vmatpush1.bf16.msra.mxu0 %v10902_v32  ;;  %v10704_v32 = vcombine.low %v358_v18, %v362_v20  ;;  %v673_v18 = vld [vmem:[#allocation7 + $0xf60] sm:$0xff]  ;;  %v11007_v20 = vcombine.high %v661_v9, %v665_v10 }
 0x135   :  { %6576 = vmatprep.subr.bf16.mxu0 %v10911_v37  ;;  %6824 = vmatmul.mubr.bf16.vlgmr.msra.gmra.mrb[4].mxu1 %v13059_v21  ;;  %v10967_v37 = vcombine.high %v621_v28, %v625_v29 }
 0x136   :  { %6835 = vmatpush1.bf16.msra.mxu1 %v10656_v39  ;;  %6866 = vmatprep.mubr.bf16.mxu1 %v13053_v63  ;;  %v378_v39 = vld [vmem:[#allocation7 + $0x628] sm:$0xff] }
 0x137   :  { %6566 = vmatmul.mubr.bf16.vlgmr.msra.gmra.mrb[0].mxu0 %v13083_v40  ;;  %6836 = vmatprep.subr.bf16.mxu1 %v10665_v42  ;;  %v10966_v42 = vcombine.low %v621_v28, %v625_v29  ;;  %v10721_v43 = vcombine.high %v374_v35, %v378_v39  ;;  %v677_v29 = vld [vmem:[#allocation7 + $0xf80] sm:$0xff] }
 0x138   :  { %6577 = vmatpush1.bf16.msra.mxu0 %v10910_v41  ;;  %6608 = vmatprep.mubr.bf16.mxu0 %v13087_v48  ;;  %v10712_v41 = vcombine.low %v366_v54, %v370_v31  ;;  %v422_v54 = vld [vmem:[#allocation7 + $0x788] sm:$0xff]  ;;  %v11015_v31 = vcombine.high %v669_v17, %v673_v18 }
 0x139   :  { %6578 = vmatprep.subr.bf16.mxu0 %v10919_v44  ;;  %v637_v44 = vld [vmem:[#allocation7 + $0xe40] sm:$0xff] }
 0x13a   :  { %6837 = vmatpush1.bf16.msra.mxu1 %v10664_v23  ;;  %v386_v23 = vld [vmem:[#allocation7 + $0x668] sm:$0xff]  ;;  %v10983_v56 = vcombine.high %v637_v44, %v641_v45 }
 0x13b   :  { %6838 = vmatprep.subr.bf16.mxu1 %v10673_v49  ;;  %v10974_v49 = vcombine.low %v629_v33, %v633_v34  ;;  %v10729_v50 = vcombine.high %v382_v46, %v386_v23  ;;  %v685_v34 = vld [vmem:[#allocation7 + $0xfc0] sm:$0xff] }
 0x13c   :  { %6579 = vmatpush1.bf16.msra.mxu0 %v10918_v24  ;;  %v10720_v24 = vcombine.low %v374_v35, %v378_v39  ;;  %v689_v35 = vld [vmem:[#allocation7 + $0xfe0] sm:$0xff] }
 0x13d   :  { %6580 = vmatprep.subr.bf16.mxu0 %v10927_v53  ;;  %v390_v53 = vld [vmem:[#allocation7 + $0x688] sm:$0xff] }
 0x13e   :  { %6839 = vmatpush1.bf16.msra.mxu1 %v10672_v57  ;;  %v394_v57 = vld [vmem:[#allocation7 + $0x6a8] sm:$0xff] }
 0x13f   :  { %6840 = vmatprep.subr.bf16.mxu1 %v10681_v62  ;;  %v10982_v62 = vcombine.low %v637_v44, %v641_v45  ;;  %v10737_v0 = vcombine.high %v390_v53, %v394_v57  ;;  %v693_v45 = vld [vmem:[#allocation7 + $0x1000] sm:$0xff] }
 0x140   :  { %6581 = vmatpush1.bf16.msra.mxu0 %v10926_v61  ;;  %v10728_v61 = vcombine.low %v382_v46, %v386_v23  ;;  %v697_v46 = vld [vmem:[#allocation7 + $0x1020] sm:$0xff]  ;;  %v11031_v23 = vcombine.high %v685_v34, %v689_v35 }
 0x141   :  { %6582 = vmatprep.subr.bf16.mxu0 %v10935_v3  ;;  %v398_v3 = vld [vmem:[#allocation7 + $0x6c8] sm:$0xff] }
 0x142   :  { %6841 = vmatpush1.bf16.msra.mxu1 %v10680_v5  ;;  %v402_v5 = vld [vmem:[#allocation7 + $0x6e8] sm:$0xff] }
 0x143   :  { %6842 = vmatprep.subr.bf16.mxu1 %v10689_v7  ;;  %v10990_v7 = vcombine.low %v645_v51, %v649_v52  ;;  %v10745_v8 = vcombine.high %v398_v3, %v402_v5  ;;  %v701_v52 = vld [vmem:[#allocation7 + $0x1040] sm:$0xff] }
 0x144   :  { %6583 = vmatpush1.bf16.msra.mxu0 %v10934_v6  ;;  %v10736_v6 = vcombine.low %v390_v53, %v394_v57  ;;  %v705_v53 = vld [vmem:[#allocation7 + $0x1060] sm:$0xff]  ;;  %v450_v57 = vld [vmem:[#allocation7 + $0x868] sm:$0xff] }
 0x145   :  { %6584 = vmatprep.subr.bf16.mxu0 %v10943_v11  ;;  %v406_v11 = vld [vmem:[#allocation7 + $0x708] sm:$0xff] }
 0x146   :  { %6843 = vmatpush1.bf16.msra.mxu1 %v10688_v13  ;;  %v410_v13 = vld [vmem:[#allocation7 + $0x728] sm:$0xff] }
 0x147   :  { %6844 = vmatprep.subr.bf16.mxu1 %v10697_v15  ;;  %v10998_v15 = vcombine.low %v653_v1, %v657_v2  ;;  %v10753_v16 = vcombine.high %v406_v11, %v410_v13  ;;  %v13099_v2 = vcombine.low %v13077_v36, %v13079_v38  ;;  %v11046_v38 = vcombine.low %v701_v52, %v705_v53 }
 0x148   :  { %6585 = vmatpush1.bf16.msra.mxu0 %v10942_v14  ;;  %v10744_v14 = vcombine.low %v398_v3, %v402_v5  ;;  %v11038_v3 = vcombine.low %v693_v45, %v697_v46  ;;  %v709_v5 = vld [vmem:[#allocation7 + $0x1080] sm:$0xff] }
 0x149   :  { %6586 = vmatprep.subr.bf16.mxu0 %v10951_v19  ;;  %v414_v19 = vld [vmem:[#allocation7 + $0x748] sm:$0xff] }
 0x14a   :  { %6845 = vmatpush1.bf16.msra.mxu1 %v10696_v22  ;;  %v418_v22 = vld [vmem:[#allocation7 + $0x768] sm:$0xff] }
 0x14b   :  { %6846 = vmatprep.subr.bf16.mxu1 %v10705_v27  ;;  %v11006_v27 = vcombine.low %v661_v9, %v665_v10  ;;  %v10761_v28 = vcombine.high %v414_v19, %v418_v22  ;;  %v458_v9 = vld [vmem:[#allocation7 + $0x8a8] sm:$0xff] }
 0x14c   :  { %6587 = vmatpush1.bf16.msra.mxu0 %v10950_v25  ;;  %v10752_v25 = vcombine.low %v406_v11, %v410_v13  ;;  %v721_v13 = vld [vmem:[#allocation7 + $0x10e0] sm:$0xff] }
 0x14d   :  { %6588 = vmatprep.subr.bf16.mxu0 %v10959_v30  ;;  %v681_v30 = vld [vmem:[#allocation7 + $0xfa0] sm:$0xff] }
 0x14e   :  { %6847 = vmatpush1.bf16.msra.mxu1 %v10704_v32  ;;  %v426_v32 = vld [vmem:[#allocation7 + $0x7a8] sm:$0xff]  ;;  %v11023_v39 = vcombine.high %v677_v29, %v681_v30 }
 0x14f   :  { %6848 = vmatprep.subr.bf16.mxu1 %v10713_v60  ;;  %v11014_v60 = vcombine.low %v669_v17, %v673_v18  ;;  %v10769_v33 = vcombine.high %v422_v54, %v426_v32 }
 0x150   :  { %6589 = vmatpush1.bf16.msra.mxu0 %v10958_v59  ;;  %v10760_v59 = vcombine.low %v414_v19, %v418_v22  ;;  %v729_v22 = vld [vmem:[#allocation7 + $0x1120] sm:$0xff] }
 0x151   :  { %6590 = vmatprep.subr.bf16.mxu0 %v10967_v37  ;;  %v430_v37 = vld [vmem:[#allocation7 + $0x7c8] sm:$0xff] }
 0x152   :  { %6849 = vmatpush1.bf16.msra.mxu1 %v10712_v41  ;;  %v434_v41 = vld [vmem:[#allocation7 + $0x7e8] sm:$0xff] }
 0x153   :  { %6850 = vmatprep.subr.bf16.mxu1 %v10721_v43  ;;  %v11022_v43 = vcombine.low %v677_v29, %v681_v30  ;;  %v10777_v44 = vcombine.high %v430_v37, %v434_v41 }
 0x154   :  { %6591 = vmatpush1.bf16.msra.mxu0 %v10966_v42  ;;  %v10768_v42 = vcombine.low %v422_v54, %v426_v32  ;;  %v737_v32 = vld [vmem:[#allocation7 + $0x1160] sm:$0xff] }
 0x155   :  { %6592 = vmatprep.subr.bf16.mxu0 %v10975_v47  ;;  %v438_v47 = vld [vmem:[#allocation7 + $0x808] sm:$0xff] }
 0x156   :  { %6851 = vmatpush1.bf16.msra.mxu1 %v10720_v24  ;;  %v442_v24 = vld [vmem:[#allocation7 + $0x828] sm:$0xff] }
 0x157   :  { %6852 = vmatprep.subr.bf16.mxu1 %v10729_v50  ;;  %v11030_v50 = vcombine.low %v685_v34, %v689_v35  ;;  %v10785_v51 = vcombine.high %v438_v47, %v442_v24  ;;  %v10784_v1 = vcombine.low %v438_v47, %v442_v24  ;;  %v753_v24 = vld [vmem:[#allocation7 + $0x11e0] sm:$0xff] }
 0x158   :  { %6593 = vmatpush1.bf16.msra.mxu0 %v10974_v49  ;;  %v10776_v49 = vcombine.low %v430_v37, %v434_v41  ;;  %v745_v41 = vld [vmem:[#allocation7 + $0x11a0] sm:$0xff] }
 0x159   :  { %6594 = vmatprep.subr.bf16.mxu0 %v10983_v56  ;;  %v446_v56 = vld [vmem:[#allocation7 + $0x848] sm:$0xff] }
 0x15a   :  { %6853 = vmatpush1.bf16.msra.mxu1 %v10728_v61  ;;  %v13093_v61 = vld [vmem:[#allocation6 + $0x20] sm:$0xff]  ;;  %v10792_v36 = vcombine.low %v446_v56, %v450_v57 }
 0x15b   :  { %6854 = vmatprep.subr.bf16.mxu1 %v10737_v0  ;;  %v13095_v0 = vld [vmem:[#allocation6 + $0x60] sm:$0xff] }
 0x15c   :  { %6595 = vmatpush1.bf16.msra.mxu0 %v10982_v62  ;;  %v11039_v62 = vcombine.high %v693_v45, %v697_v46  ;;  %v13103_v10 = vcombine.high %v13093_v61, %v13095_v0 }
 0x15d   :  { %6596 = vmatprep.subr.bf16.mxu0 %v10991_v4  ;;  %v10793_v4 = vcombine.high %v446_v56, %v450_v57  ;;  %v757_v57 = vld [vmem:[#allocation7 + $0x1200] sm:$0xff] }
 0x15e   :  { %6855 = vmatpush1.bf16.msra.mxu1 %v10736_v6  ;;  %v11047_v6 = vcombine.high %v701_v52, %v705_v53 }
 0x15f   :  { %6856 = vmatprep.subr.bf16.mxu1 %v10745_v8  ;;  %v454_v8 = vld [vmem:[#allocation7 + $0x888] sm:$0xff] }
 0x160   :  { %6597 = vmatpush1.bf16.msra.mxu0 %v10990_v7  ;;  %v713_v7 = vld [vmem:[#allocation7 + $0x10a0] sm:$0xff]  ;;  %v10801_v11 = vcombine.high %v454_v8, %v458_v9  ;;  %v10800_v17 = vcombine.low %v454_v8, %v458_v9 }
 0x161   :  { %6598 = vmatprep.subr.bf16.mxu0 %v10999_v12  ;;  %v717_v12 = vld [vmem:[#allocation7 + $0x10c0] sm:$0xff]  ;;  %v11054_v18 = vcombine.low %v709_v5, %v713_v7 }
 0x162   :  { %6857 = vmatpush1.bf16.msra.mxu1 %v10744_v14  ;;  %v462_v14 = vld [vmem:[#allocation7 + $0x8c8] sm:$0xff]  ;;  %v11062_v30 = vcombine.low %v717_v12, %v721_v13  ;;  %v765_v8 = vld [vmem:[#allocation7 + $0x1240] sm:$0xff] }
 0x163   :  { %6858 = vmatprep.subr.bf16.mxu1 %v10753_v16  ;;  %v466_v16 = vld [vmem:[#allocation7 + $0x8e8] sm:$0xff]  ;;  %v769_v9 = vld [vmem:[#allocation7 + $0x1260] sm:$0xff] }
 0x164   :  { %6599 = vmatpush1.bf16.msra.mxu0 %v10998_v15  ;;  %v11055_v15 = vcombine.high %v709_v5, %v713_v7  ;;  %v10809_v19 = vcombine.high %v462_v14, %v466_v16  ;;  %v10808_v29 = vcombine.low %v462_v14, %v466_v16  ;;  %v777_v16 = vld [vmem:[#allocation7 + $0x12a0] sm:$0xff] }
 0x165   :  { %6600 = vmatprep.subr.bf16.mxu0 %v11007_v20  ;;  %v725_v20 = vld [vmem:[#allocation7 + $0x1100] sm:$0xff] }
 0x166   :  { %6859 = vmatpush1.bf16.msra.mxu1 %v10752_v25  ;;  %v470_v25 = vld [vmem:[#allocation7 + $0x908] sm:$0xff]  ;;  %v11070_v35 = vcombine.low %v725_v20, %v729_v22 }
 0x167   :  { %6860 = vmatprep.subr.bf16.mxu1 %v10761_v28  ;;  %v474_v28 = vld [vmem:[#allocation7 + $0x928] sm:$0xff] }
 0x168   :  { %6601 = vmatpush1.bf16.msra.mxu0 %v11006_v27  ;;  %v11063_v27 = vcombine.high %v717_v12, %v721_v13  ;;  %v10817_v54 = vcombine.high %v470_v25, %v474_v28  ;;  %v10816_v34 = vcombine.low %v470_v25, %v474_v28  ;;  %v785_v28 = vld [vmem:[#allocation7 + $0x12e0] sm:$0xff] }
 0x169   :  { %6602 = vmatprep.subr.bf16.mxu0 %v11015_v31  ;;  %v733_v31 = vld [vmem:[#allocation7 + $0x1140] sm:$0xff] }
 0x16a   :  { %6861 = vmatpush1.bf16.msra.mxu1 %v10760_v59  ;;  %v478_v59 = vld [vmem:[#allocation7 + $0x948] sm:$0xff]  ;;  %v11078_v46 = vcombine.low %v733_v31, %v737_v32 }
 0x16b   :  { %6862 = vmatprep.subr.bf16.mxu1 %v10769_v33  ;;  %v482_v33 = vld [vmem:[#allocation7 + $0x968] sm:$0xff] }
 0x16c   :  { %6603 = vmatpush1.bf16.msra.mxu0 %v11014_v60  ;;  %v11071_v60 = vcombine.high %v725_v20, %v729_v22  ;;  %v10825_v37 = vcombine.high %v478_v59, %v482_v33  ;;  %v10824_v45 = vcombine.low %v478_v59, %v482_v33  ;;  %v11110_v22 = vcombine.low %v765_v8, %v769_v9  ;;  %v793_v33 = vld [vmem:[#allocation7 + $0x1320] sm:$0xff] }
 0x16d   :  { %6604 = vmatprep.subr.bf16.mxu0 %v11023_v39  ;;  %v741_v39 = vld [vmem:[#allocation7 + $0x1180] sm:$0xff] }
 0x16e   :  { %6863 = vmatpush1.bf16.msra.mxu1 %v10768_v42  ;;  %v486_v42 = vld [vmem:[#allocation7 + $0x988] sm:$0xff]  ;;  %v11086_v53 = vcombine.low %v741_v39, %v745_v41 }
 0x16f   :  { %6864 = vmatprep.subr.bf16.mxu1 %v10777_v44  ;;  %v490_v44 = vld [vmem:[#allocation7 + $0x9a8] sm:$0xff] }
 0x170   :  { %6605 = vmatpush1.bf16.msra.mxu0 %v11022_v43  ;;  %v11079_v43 = vcombine.high %v733_v31, %v737_v32  ;;  %v10833_v47 = vcombine.high %v486_v42, %v490_v44  ;;  %v10832_v52 = vcombine.low %v486_v42, %v490_v44  ;;  %v801_v44 = vld [vmem:[#allocation7 + $0x1360] sm:$0xff] }
 0x171   :  { %6606 = vmatprep.subr.bf16.mxu0 %v11031_v23  ;;  %v749_v23 = vld [vmem:[#allocation7 + $0x11c0] sm:$0xff] }
 0x172   :  { %6865 = vmatpush1.bf16.msra.mxu1 %v10776_v49  ;;  %v494_v49 = vld [vmem:[#allocation7 + $0x9c8] sm:$0xff] }
 0x173   :  { %6877 = vmatprep.subr.bf16.mxu1 %v10785_v51  ;;  %v498_v51 = vld [vmem:[#allocation7 + $0x9e8] sm:$0xff] }
 0x174   :  { %6607 = vmatpush1.bf16.msra.mxu0 %v11030_v50  ;;  %v11087_v50 = vcombine.high %v741_v39, %v745_v41  ;;  %v10841_v56 = vcombine.high %v494_v49, %v498_v51  ;;  %v10840_v5 = vcombine.low %v494_v49, %v498_v51  ;;  %v809_v51 = vld [vmem:[#allocation7 + $0x13a0] sm:$0xff] }
 0x175   :  { %6619 = vmatprep.subr.bf16.mxu0 %v11039_v62  ;;  %6867 = vmatmul.mubr.bf16.vlgmr.msra.gmra.mrb[4].mxu1 %v13067_v26  ;;  %v761_v62 = vld [vmem:[#allocation7 + $0x1220] sm:$0xff] }
 0x176   :  { %6878 = vmatpush1.bf16.msra.mxu1 %v10784_v1  ;;  %6909 = vmatprep.mubr.bf16.mxu1 %v13071_v55  ;;  %v502_v1 = vld [vmem:[#allocation7 + $0xa08] sm:$0xff]  ;;  %v11102_v13 = vcombine.low %v757_v57, %v761_v62 }
 0x177   :  { %6609 = vmatmul.mubr.bf16.vlgmr.msra.gmra.mrb[0].mxu0 %v13099_v2  ;;  %6879 = vmatprep.subr.bf16.mxu1 %v10793_v4  ;;  %v506_v4 = vld [vmem:[#allocation7 + $0xa28] sm:$0xff] }
 0x178   :  { %6620 = vmatpush1.bf16.msra.mxu0 %v11038_v3  ;;  %6651 = vmatprep.mubr.bf16.mxu0 %v13103_v10  ;;  %v11095_v3 = vcombine.high %v749_v23, %v753_v24  ;;  %v10849_v7 = vcombine.high %v502_v1, %v506_v4  ;;  %v10848_v12 = vcombine.low %v502_v1, %v506_v4 }
 0x179   :  { %6621 = vmatprep.subr.bf16.mxu0 %v11047_v6  ;;  %v11094_v6 = vcombine.low %v749_v23, %v753_v24 }
 0x17a   :  { %6880 = vmatpush1.bf16.msra.mxu1 %v10792_v36  ;;  %v510_v36 = vld [vmem:[#allocation7 + $0xa48] sm:$0xff] }
 0x17b   :  { %6881 = vmatprep.subr.bf16.mxu1 %v10801_v11  ;;  %v514_v11 = vld [vmem:[#allocation7 + $0xa68] sm:$0xff] }
 0x17c   :  { %6622 = vmatpush1.bf16.msra.mxu0 %v11046_v38  ;;  %v11103_v38 = vcombine.high %v757_v57, %v761_v62  ;;  %v10857_v14 = vcombine.high %v510_v36, %v514_v11  ;;  %v10856_v20 = vcombine.low %v510_v36, %v514_v11  ;;  %v566_v11 = vld [vmem:[#allocation7 + $0xc08] sm:$0xff] }
 0x17d   :  { %6623 = vmatprep.subr.bf16.mxu0 %v11055_v15  ;;  %v773_v15 = vld [vmem:[#allocation7 + $0x1280] sm:$0xff] }
 0x17e   :  { %6882 = vmatpush1.bf16.msra.mxu1 %v10800_v17  ;;  %v518_v17 = vld [vmem:[#allocation7 + $0xa88] sm:$0xff]  ;;  %v11118_v32 = vcombine.low %v773_v15, %v777_v16 }
 0x17f   :  { %6883 = vmatprep.subr.bf16.mxu1 %v10809_v19  ;;  %v522_v19 = vld [vmem:[#allocation7 + $0xaa8] sm:$0xff] }
 0x180   :  { %6624 = vmatpush1.bf16.msra.mxu0 %v11054_v18  ;;  %v11111_v18 = vcombine.high %v765_v8, %v769_v9  ;;  %v10865_v25 = vcombine.high %v518_v17, %v522_v19  ;;  %v10864_v31 = vcombine.low %v518_v17, %v522_v19  ;;  %v829_v19 = vld [vmem:[#allocation7 + $0x1440] sm:$0xff] }
 0x181   :  { %6625 = vmatprep.subr.bf16.mxu0 %v11063_v27  ;;  %v781_v27 = vld [vmem:[#allocation7 + $0x12c0] sm:$0xff] }
 0x182   :  { %6884 = vmatpush1.bf16.msra.mxu1 %v10808_v29  ;;  %v526_v29 = vld [vmem:[#allocation7 + $0xac8] sm:$0xff]  ;;  %v11126_v41 = vcombine.low %v781_v27, %v785_v28 }
 0x183   :  { %6885 = vmatprep.subr.bf16.mxu1 %v10817_v54  ;;  %v530_v54 = vld [vmem:[#allocation7 + $0xae8] sm:$0xff] }
 0x184   :  { %6626 = vmatpush1.bf16.msra.mxu0 %v11062_v30  ;;  %v11119_v30 = vcombine.high %v773_v15, %v777_v16  ;;  %v10873_v59 = vcombine.high %v526_v29, %v530_v54  ;;  %v10872_v39 = vcombine.low %v526_v29, %v530_v54 }
 0x185   :  { %6627 = vmatprep.subr.bf16.mxu0 %v11071_v60  ;;  %v789_v60 = vld [vmem:[#allocation7 + $0x1300] sm:$0xff] }
 0x186   :  { %6886 = vmatpush1.bf16.msra.mxu1 %v10816_v34  ;;  %v534_v34 = vld [vmem:[#allocation7 + $0xb08] sm:$0xff]  ;;  %v11134_v24 = vcombine.low %v789_v60, %v793_v33 }
 0x187   :  { %6887 = vmatprep.subr.bf16.mxu1 %v10825_v37  ;;  %v538_v37 = vld [vmem:[#allocation7 + $0xb28] sm:$0xff] }
 0x188   :  { %6628 = vmatpush1.bf16.msra.mxu0 %v11070_v35  ;;  %v11127_v35 = vcombine.high %v781_v27, %v785_v28  ;;  %v10881_v42 = vcombine.high %v534_v34, %v538_v37  ;;  %v10880_v23 = vcombine.low %v534_v34, %v538_v37  ;;  %v13109_v27 = vld [vmem:[#allocation6 + $0x28] sm:$0xff]  ;;  %v837_v34 = vld [vmem:[#allocation7 + $0x1480] sm:$0xff] }
 0x189   :  { %6629 = vmatprep.subr.bf16.mxu0 %v11079_v43  ;;  %v797_v43 = vld [vmem:[#allocation7 + $0x1340] sm:$0xff]  ;;  %v13111_v28 = vld [vmem:[#allocation6 + $0x68] sm:$0xff] }
 0x18a   :  { %6888 = vmatpush1.bf16.msra.mxu1 %v10824_v45  ;;  %v542_v45 = vld [vmem:[#allocation7 + $0xb48] sm:$0xff]  ;;  %v11142_v62 = vcombine.low %v797_v43, %v801_v44 }
 0x18b   :  { %6889 = vmatprep.subr.bf16.mxu1 %v10833_v47  ;;  %v546_v47 = vld [vmem:[#allocation7 + $0xb68] sm:$0xff] }
 0x18c   :  { %6630 = vmatpush1.bf16.msra.mxu0 %v11078_v46  ;;  %v11135_v46 = vcombine.high %v789_v60, %v793_v33  ;;  %v10889_v49 = vcombine.high %v542_v45, %v546_v47  ;;  %v10888_v57 = vcombine.low %v542_v45, %v546_v47  ;;  %v586_v60 = vld [vmem:[#allocation7 + $0xca8] sm:$0xff]  ;;  %v13119_v33 = vcombine.high %v13109_v27, %v13111_v28 }
 0x18d   :  { %6631 = vmatprep.subr.bf16.mxu0 %v11087_v50  ;;  %v805_v50 = vld [vmem:[#allocation7 + $0x1380] sm:$0xff] }
 0x18e   :  { %6890 = vmatpush1.bf16.msra.mxu1 %v10832_v52  ;;  %v550_v52 = vld [vmem:[#allocation7 + $0xb88] sm:$0xff]  ;;  %v11151_v4 = vcombine.high %v805_v50, %v809_v51  ;;  %v11150_v9 = vcombine.low %v805_v50, %v809_v51  ;;  %v853_v50 = vld [vmem:[#allocation7 + $0x1500] sm:$0xff] }
 0x18f   :  { %6891 = vmatprep.subr.bf16.mxu1 %v10841_v56  ;;  %v554_v56 = vld [vmem:[#allocation7 + $0xba8] sm:$0xff]  ;;  %v857_v51 = vld [vmem:[#allocation7 + $0x1520] sm:$0xff] }
 0x190   :  { %6632 = vmatpush1.bf16.msra.mxu0 %v11086_v53  ;;  %v11143_v53 = vcombine.high %v797_v43, %v801_v44  ;;  %v10897_v1 = vcombine.high %v550_v52, %v554_v56  ;;  %v10896_v8 = vcombine.low %v550_v52, %v554_v56  ;;  %v845_v43 = vld [vmem:[#allocation7 + $0x14c0] sm:$0xff] }
 0x191   :  { %6633 = vmatprep.subr.bf16.mxu0 %v11095_v3  ;;  %v558_v3 = vld [vmem:[#allocation7 + $0xbc8] sm:$0xff]  ;;  %v849_v44 = vld [vmem:[#allocation7 + $0x14e0] sm:$0xff] }
 0x192   :  { %6892 = vmatpush1.bf16.msra.mxu1 %v10840_v5  ;;  %v562_v5 = vld [vmem:[#allocation7 + $0xbe8] sm:$0xff] }
 0x193   :  { %6893 = vmatprep.subr.bf16.mxu1 %v10849_v7  ;;  %v817_v7 = vld [vmem:[#allocation7 + $0x13e0] sm:$0xff]  ;;  %v10905_v36 = vcombine.high %v558_v3, %v562_v5  ;;  %v10904_v15 = vcombine.low %v558_v3, %v562_v5 }
 0x194   :  { %6634 = vmatpush1.bf16.msra.mxu0 %v11094_v6  ;;  %v813_v6 = vld [vmem:[#allocation7 + $0x13c0] sm:$0xff] }
 0x195   :  { %6635 = vmatprep.subr.bf16.mxu0 %v11103_v38  ;;  %v11159_v38 = vcombine.high %v813_v6, %v817_v7  ;;  %v11158_v16 = vcombine.low %v813_v6, %v817_v7  ;;  %v861_v3 = vld [vmem:[#allocation7 + $0x1540] sm:$0xff]  ;;  %v11198_v6 = vcombine.low %v853_v50, %v857_v51 }
 0x196   :  { %6894 = vmatpush1.bf16.msra.mxu1 %v10848_v12  ;;  %v570_v12 = vld [vmem:[#allocation7 + $0xc28] sm:$0xff] }
 0x197   :  { %6895 = vmatprep.subr.bf16.mxu1 %v10857_v14  ;;  %v825_v14 = vld [vmem:[#allocation7 + $0x1420] sm:$0xff]  ;;  %v10913_v17 = vcombine.high %v566_v11, %v570_v12  ;;  %v10912_v29 = vcombine.low %v566_v11, %v570_v12 }
 0x198   :  { %6636 = vmatpush1.bf16.msra.mxu0 %v11102_v13  ;;  %v821_v13 = vld [vmem:[#allocation7 + $0x1400] sm:$0xff] }
 0x199   :  { %6637 = vmatprep.subr.bf16.mxu0 %v11111_v18  ;;  %v11167_v18 = vcombine.high %v821_v13, %v825_v14  ;;  %v11166_v54 = vcombine.low %v821_v13, %v825_v14  ;;  %v873_v11 = vld [vmem:[#allocation7 + $0x15a0] sm:$0xff] }
 0x19a   :  { %6896 = vmatpush1.bf16.msra.mxu1 %v10856_v20  ;;  %v574_v20 = vld [vmem:[#allocation7 + $0xc48] sm:$0xff] }
 0x19b   :  { %6897 = vmatprep.subr.bf16.mxu1 %v10865_v25  ;;  %v833_v25 = vld [vmem:[#allocation7 + $0x1460] sm:$0xff] }
 0x19c   :  { %6638 = vmatpush1.bf16.msra.mxu0 %v11110_v22  ;;  %v578_v22 = vld [vmem:[#allocation7 + $0xc68] sm:$0xff] }
 0x19d   :  { %6639 = vmatprep.subr.bf16.mxu0 %v11119_v30  ;;  %v13115_v30 = vcombine.low %v13093_v61, %v13095_v0  ;;  %v10920_v61 = vcombine.low %v574_v20, %v578_v22  ;;  %v11174_v0 = vcombine.low %v829_v19, %v833_v25 }
 0x19e   :  { %6898 = vmatpush1.bf16.msra.mxu1 %v10864_v31  ;;  %v10921_v31 = vcombine.high %v574_v20, %v578_v22  ;;  %v877_v20 = vld [vmem:[#allocation7 + $0x15c0] sm:$0xff] }
 0x19f   :  { %6899 = vmatprep.subr.bf16.mxu1 %v10873_v59  ;;  %v582_v59 = vld [vmem:[#allocation7 + $0xc88] sm:$0xff]  ;;  %v881_v22 = vld [vmem:[#allocation7 + $0x15e0] sm:$0xff] }
 0x1a0   :  { %6640 = vmatpush1.bf16.msra.mxu0 %v11118_v32  ;;  %v11175_v32 = vcombine.high %v829_v19, %v833_v25  ;;  %v10929_v37 = vcombine.high %v582_v59, %v586_v60  ;;  %v10928_v45 = vcombine.low %v582_v59, %v586_v60  ;;  %v11223_v59 = vcombine.high %v877_v20, %v881_v22  ;;  %v630_v60 = vld [vmem:[#allocation7 + $0xe08] sm:$0xff] }
 0x1a1   :  { %6641 = vmatprep.subr.bf16.mxu0 %v11127_v35  ;;  %v841_v35 = vld [vmem:[#allocation7 + $0x14a0] sm:$0xff] }
 0x1a2   :  { %6900 = vmatpush1.bf16.msra.mxu1 %v10872_v39  ;;  %v11183_v39 = vcombine.high %v837_v34, %v841_v35 }
 0x1a3   :  { %6901 = vmatprep.subr.bf16.mxu1 %v10881_v42  ;;  %v594_v42 = vld [vmem:[#allocation7 + $0xce8] sm:$0xff] }
 0x1a4   :  { %6642 = vmatpush1.bf16.msra.mxu0 %v11126_v41  ;;  %v590_v41 = vld [vmem:[#allocation7 + $0xcc8] sm:$0xff] }
 0x1a5   :  { %6643 = vmatprep.subr.bf16.mxu0 %v11135_v46  ;;  %v11182_v46 = vcombine.low %v837_v34, %v841_v35  ;;  %v10937_v47 = vcombine.high %v590_v41, %v594_v42  ;;  %v10936_v52 = vcombine.low %v590_v41, %v594_v42  ;;  %v634_v34 = vld [vmem:[#allocation7 + $0xe28] sm:$0xff]  ;;  %v885_v35 = vld [vmem:[#allocation7 + $0x1600] sm:$0xff] }
 0x1a6   :  { %6902 = vmatpush1.bf16.msra.mxu1 %v10880_v23  ;;  %v11191_v23 = vcombine.high %v845_v43, %v849_v44  ;;  %v638_v42 = vld [vmem:[#allocation7 + $0xe48] sm:$0xff] }
 0x1a7   :  { %6903 = vmatprep.subr.bf16.mxu1 %v10889_v49  ;;  %v602_v49 = vld [vmem:[#allocation7 + $0xd28] sm:$0xff] }
 0x1a8   :  { %6644 = vmatpush1.bf16.msra.mxu0 %v11134_v24  ;;  %v598_v24 = vld [vmem:[#allocation7 + $0xd08] sm:$0xff] }
 0x1a9   :  { %6645 = vmatprep.subr.bf16.mxu0 %v11143_v53  ;;  %v11190_v53 = vcombine.low %v845_v43, %v849_v44  ;;  %v10945_v56 = vcombine.high %v598_v24, %v602_v49  ;;  %v10944_v5 = vcombine.low %v598_v24, %v602_v49  ;;  %v642_v43 = vld [vmem:[#allocation7 + $0xe68] sm:$0xff]  ;;  %v893_v44 = vld [vmem:[#allocation7 + $0x1640] sm:$0xff] }
 0x1aa   :  { %6904 = vmatpush1.bf16.msra.mxu1 %v10888_v57  ;;  %v11199_v57 = vcombine.high %v853_v50, %v857_v51  ;;  %v646_v49 = vld [vmem:[#allocation7 + $0xe88] sm:$0xff]  ;;  %v901_v51 = vld [vmem:[#allocation7 + $0x1680] sm:$0xff] }
 0x1ab   :  { %6905 = vmatprep.subr.bf16.mxu1 %v10897_v1  ;;  %v610_v1 = vld [vmem:[#allocation7 + $0xd68] sm:$0xff] }
 0x1ac   :  { %6646 = vmatpush1.bf16.msra.mxu0 %v11142_v62  ;;  %v606_v62 = vld [vmem:[#allocation7 + $0xd48] sm:$0xff] }
 0x1ad   :  { %6647 = vmatprep.subr.bf16.mxu0 %v11151_v4  ;;  %v865_v4 = vld [vmem:[#allocation7 + $0x1560] sm:$0xff]  ;;  %v10953_v7 = vcombine.high %v606_v62, %v610_v1  ;;  %v10952_v12 = vcombine.low %v606_v62, %v610_v1  ;;  %v650_v50 = vld [vmem:[#allocation7 + $0xea8] sm:$0xff] }
 0x1ae   :  { %6906 = vmatpush1.bf16.msra.mxu1 %v10896_v8  ;;  %v11207_v8 = vcombine.high %v861_v3, %v865_v4  ;;  %v11206_v13 = vcombine.low %v861_v3, %v865_v4  ;;  %v654_v1 = vld [vmem:[#allocation7 + $0xec8] sm:$0xff]  ;;  %v909_v4 = vld [vmem:[#allocation7 + $0x16c0] sm:$0xff] }
 0x1af   :  { %6907 = vmatprep.subr.bf16.mxu1 %v10905_v36  ;;  %v618_v36 = vld [vmem:[#allocation7 + $0xda8] sm:$0xff] }
 0x1b0   :  { %6648 = vmatpush1.bf16.msra.mxu0 %v11150_v9  ;;  %v614_v9 = vld [vmem:[#allocation7 + $0xd88] sm:$0xff] }
 0x1b1   :  { %6649 = vmatprep.subr.bf16.mxu0 %v11159_v38  ;;  %v869_v38 = vld [vmem:[#allocation7 + $0x1580] sm:$0xff]  ;;  %v10961_v14 = vcombine.high %v614_v9, %v618_v36  ;;  %v658_v3 = vld [vmem:[#allocation7 + $0xee8] sm:$0xff] }
 0x1b2   :  { %6908 = vmatpush1.bf16.msra.mxu1 %v10904_v15 }
 0x1b3   :  { %6920 = vmatprep.subr.bf16.mxu1 %v10913_v17  ;;  %v622_v17 = vld [vmem:[#allocation7 + $0xdc8] sm:$0xff] }
 0x1b4   :  { %6650 = vmatpush1.bf16.msra.mxu0 %v11158_v16  ;;  %v11215_v16 = vcombine.high %v869_v38, %v873_v11 }
 0x1b5   :  { %6662 = vmatprep.subr.bf16.mxu0 %v11167_v18  ;;  %6910 = vmatmul.mubr.bf16.vlgmr.msra.gmra.mrb[4].mxu1 %v13083_v40  ;;  %v626_v18 = vld [vmem:[#allocation7 + $0xde8] sm:$0xff] }
 0x1b6   :  { %6921 = vmatpush1.bf16.msra.mxu1 %v10912_v29  ;;  %6952 = vmatprep.mubr.bf16.mxu1 %v13087_v48  ;;  %v10960_v29 = vcombine.low %v614_v9, %v618_v36  ;;  %v662_v36 = vld [vmem:[#allocation7 + $0xf08] sm:$0xff] }
 0x1b7   :  { %6652 = vmatmul.mubr.bf16.vlgmr.msra.gmra.mrb[0].mxu0 %v13115_v30  ;;  %6922 = vmatprep.subr.bf16.mxu1 %v10921_v31  ;;  %v11214_v31 = vcombine.low %v869_v38, %v873_v11  ;;  %v666_v38 = vld [vmem:[#allocation7 + $0xf28] sm:$0xff]  ;;  %v917_v11 = vld [vmem:[#allocation7 + $0x1700] sm:$0xff] }
 0x1b8   :  { %6663 = vmatpush1.bf16.msra.mxu0 %v11166_v54  ;;  %6694 = vmatprep.mubr.bf16.mxu0 %v13119_v33 }
 0x1b9   :  { %6664 = vmatprep.subr.bf16.mxu0 %v11175_v32  ;;  %v10969_v32 = vcombine.high %v622_v17, %v626_v18 }
 0x1ba   :  { %6923 = vmatpush1.bf16.msra.mxu1 %v10920_v61  ;;  %v889_v61 = vld [vmem:[#allocation7 + $0x1620] sm:$0xff] }
 0x1bb   :  { %6924 = vmatprep.subr.bf16.mxu1 %v10929_v37  ;;  %v11222_v37 = vcombine.low %v877_v20, %v881_v22  ;;  %v11231_v41 = vcombine.high %v885_v35, %v889_v61  ;;  %v674_v20 = vld [vmem:[#allocation7 + $0xf68] sm:$0xff]  ;;  %v925_v22 = vld [vmem:[#allocation7 + $0x1740] sm:$0xff] }
 0x1bc   :  { %6665 = vmatpush1.bf16.msra.mxu0 %v11174_v0  ;;  %v10968_v0 = vcombine.low %v622_v17, %v626_v18  ;;  %v670_v18 = vld [vmem:[#allocation7 + $0xf48] sm:$0xff] }
 0x1bd   :  { %6666 = vmatprep.subr.bf16.mxu0 %v11183_v39  ;;  %v10977_v39 = vcombine.high %v630_v60, %v634_v34 }
 0x1be   :  { %6925 = vmatpush1.bf16.msra.mxu1 %v10928_v45  ;;  %v897_v45 = vld [vmem:[#allocation7 + $0x1660] sm:$0xff] }
 0x1bf   :  { %6926 = vmatprep.subr.bf16.mxu1 %v10937_v47  ;;  %v11230_v47 = vcombine.low %v885_v35, %v889_v61  ;;  %v11239_v24 = vcombine.high %v893_v44, %v897_v45  ;;  %v682_v35 = vld [vmem:[#allocation7 + $0xfa8] sm:$0xff]  ;;  %v933_v61 = vld [vmem:[#allocation7 + $0x1780] sm:$0xff] }
 0x1c0   :  { %6667 = vmatpush1.bf16.msra.mxu0 %v11182_v46  ;;  %v10976_v46 = vcombine.low %v630_v60, %v634_v34  ;;  %v678_v34 = vld [vmem:[#allocation7 + $0xf88] sm:$0xff] }
 0x1c1   :  { %6668 = vmatprep.subr.bf16.mxu0 %v11191_v23  ;;  %v10985_v23 = vcombine.high %v638_v42, %v642_v43 }
 0x1c2   :  { %6927 = vmatpush1.bf16.msra.mxu1 %v10936_v52  ;;  %v905_v52 = vld [vmem:[#allocation7 + $0x16a0] sm:$0xff] }
 0x1c3   :  { %6928 = vmatprep.subr.bf16.mxu1 %v10945_v56  ;;  %v11238_v56 = vcombine.low %v893_v44, %v897_v45  ;;  %v11247_v62 = vcombine.high %v901_v51, %v905_v52  ;;  %v690_v44 = vld [vmem:[#allocation7 + $0xfe8] sm:$0xff]  ;;  %v941_v45 = vld [vmem:[#allocation7 + $0x17c0] sm:$0xff] }
 0x1c4   :  { %6669 = vmatpush1.bf16.msra.mxu0 %v11190_v53  ;;  %v10984_v53 = vcombine.low %v638_v42, %v642_v43  ;;  %v686_v43 = vld [vmem:[#allocation7 + $0xfc8] sm:$0xff] }
 0x1c5   :  { %6670 = vmatprep.subr.bf16.mxu0 %v11199_v57  ;;  %v10993_v57 = vcombine.high %v646_v49, %v650_v50 }
 0x1c6   :  { %6929 = vmatpush1.bf16.msra.mxu1 %v10944_v5  ;;  %v913_v5 = vld [vmem:[#allocation7 + $0x16e0] sm:$0xff] }
 0x1c7   :  { %6930 = vmatprep.subr.bf16.mxu1 %v10953_v7  ;;  %v11246_v7 = vcombine.low %v901_v51, %v905_v52  ;;  %v11255_v9 = vcombine.high %v909_v4, %v913_v5  ;;  %v698_v51 = vld [vmem:[#allocation7 + $0x1028] sm:$0xff]  ;;  %v949_v52 = vld [vmem:[#allocation7 + $0x1800] sm:$0xff] }
 0x1c8   :  { %6671 = vmatpush1.bf16.msra.mxu0 %v11198_v6  ;;  %v13125_v15 = vpop.f32.mrb[0].mxu1  ;;  %v10992_v6 = vcombine.low %v646_v49, %v650_v50  ;;  %v694_v50 = vld [vmem:[#allocation7 + $0x1008] sm:$0xff] }
 0x1c9   :  { %6672 = vmatprep.subr.bf16.mxu0 %v11207_v8  ;;  %v13127_v19 = vpop.f32.mrb[1].mxu1  ;;  %v11001_v8 = vcombine.high %v654_v1, %v658_v3 }
 0x1ca   :  { %v13129_v25 = vpop.f32.mrb[2].mxu1  ;;  %6931 = vmatpush1.bf16.msra.mxu1 %v10952_v12  ;;  %v921_v12 = vld [vmem:[#allocation7 + $0x1720] sm:$0xff] }
 0x1cb   :  { %v13131_v54 = vpop.f32.mrb[3].mxu1  ;;  %6932 = vmatprep.subr.bf16.mxu1 %v10961_v14  ;;  %v11254_v14 = vcombine.low %v909_v4, %v913_v5  ;;  %v11263_v17 = vcombine.high %v917_v11, %v921_v12  ;;  %v702_v4 = vld [vmem:[#allocation7 + $0x1048] sm:$0xff] }
 0x1cc   :  { %6673 = vmatpush1.bf16.msra.mxu0 %v11206_v13  ;;  %v11000_v13 = vcombine.low %v654_v1, %v658_v3  ;;  %v957_v3 = vld [vmem:[#allocation7 + $0x1840] sm:$0xff]  ;;  %v706_v5 = vld [vmem:[#allocation7 + $0x1068] sm:$0xff] }
 0x1cd   :  { %6674 = vmatprep.subr.bf16.mxu0 %v11215_v16  ;;  %v11009_v16 = vcombine.high %v662_v36, %v666_v38 }
 0x1ce   :  { %6933 = vmatpush1.bf16.msra.mxu1 %v10960_v29  ;;  %v929_v29 = vld [vmem:[#allocation7 + $0x1760] sm:$0xff] }
 0x1cf   :  { %6934 = vmatprep.subr.bf16.mxu1 %v10969_v32  ;;  %v11262_v32 = vcombine.low %v917_v11, %v921_v12  ;;  %v11271_v60 = vcombine.high %v925_v22, %v929_v29  ;;  %v11049_v11 = vcombine.high %v702_v4, %v706_v5 }
 0x1d0   :  { %6675 = vmatpush1.bf16.msra.mxu0 %v11214_v31  ;;  %v11008_v31 = vcombine.low %v662_v36, %v666_v38  ;;  %v13139_v36 = vcombine.low %v13109_v27, %v13111_v28  ;;  %v11048_v27 = vcombine.low %v702_v4, %v706_v5 }
 0x1d1   :  { %6676 = vmatprep.subr.bf16.mxu0 %v11223_v59  ;;  %v11017_v59 = vcombine.high %v670_v18, %v674_v20 }
 0x1d2   :  { %6935 = vmatpush1.bf16.msra.mxu1 %v10968_v0  ;;  %v937_v0 = vld [vmem:[#allocation7 + $0x17a0] sm:$0xff] }
 0x1d3   :  { %6936 = vmatprep.subr.bf16.mxu1 %v10977_v39  ;;  %v11270_v39 = vcombine.low %v925_v22, %v929_v29  ;;  %v11279_v42 = vcombine.high %v933_v61, %v937_v0  ;;  %v718_v29 = vld [vmem:[#allocation7 + $0x10c8] sm:$0xff] }
 0x1d4   :  { %6677 = vmatpush1.bf16.msra.mxu0 %v11222_v37  ;;  %v11016_v37 = vcombine.low %v670_v18, %v674_v20  ;;  %v969_v18 = vld [vmem:[#allocation7 + $0x18a0] sm:$0xff] }
 0x1d5   :  { %6678 = vmatprep.subr.bf16.mxu0 %v11231_v41  ;;  %v11025_v41 = vcombine.high %v678_v34, %v682_v35 }
 0x1d6   :  { %6937 = vmatpush1.bf16.msra.mxu1 %v10976_v46  ;;  %v945_v46 = vld [vmem:[#allocation7 + $0x17e0] sm:$0xff] }
 0x1d7   :  { %6938 = vmatprep.subr.bf16.mxu1 %v10985_v23  ;;  %v11278_v23 = vcombine.low %v933_v61, %v937_v0  ;;  %v11287_v49 = vcombine.high %v941_v45, %v945_v46  ;;  %v726_v0 = vld [vmem:[#allocation7 + $0x1108] sm:$0xff] }
 0x1d8   :  { %6679 = vmatpush1.bf16.msra.mxu0 %v11230_v47  ;;  %v11024_v47 = vcombine.low %v678_v34, %v682_v35 }
 0x1d9   :  { %6680 = vmatprep.subr.bf16.mxu0 %v11239_v24  ;;  %v11033_v24 = vcombine.high %v686_v43, %v690_v44 }
 0x1da   :  { %6939 = vmatpush1.bf16.msra.mxu1 %v10984_v53  ;;  %v953_v53 = vld [vmem:[#allocation7 + $0x1820] sm:$0xff] }
 0x1db   :  { %6940 = vmatprep.subr.bf16.mxu1 %v10993_v57  ;;  %v11286_v57 = vcombine.low %v941_v45, %v945_v46  ;;  %v11295_v1 = vcombine.high %v949_v52, %v953_v53  ;;  %v11294_v38 = vcombine.low %v949_v52, %v953_v53  ;;  %v734_v46 = vld [vmem:[#allocation7 + $0x1148] sm:$0xff] }
 0x1dc   :  { %6681 = vmatpush1.bf16.msra.mxu0 %v11238_v56  ;;  %v11032_v56 = vcombine.low %v686_v43, %v690_v44  ;;  %v742_v53 = vld [vmem:[#allocation7 + $0x1188] sm:$0xff] }
 0x1dd   :  { %6682 = vmatprep.subr.bf16.mxu0 %v11247_v62  ;;  %v11041_v62 = vcombine.high %v694_v50, %v698_v51 }
 0x1de   :  { %6941 = vmatpush1.bf16.msra.mxu1 %v10992_v6  ;;  %v961_v6 = vld [vmem:[#allocation7 + $0x1860] sm:$0xff] }
 0x1df   :  { %6942 = vmatprep.subr.bf16.mxu1 %v11001_v8  ;;  %v13135_v8 = vld [vmem:[#allocation6 + $0x70] sm:$0xff]  ;;  %v11303_v12 = vcombine.high %v957_v3, %v961_v6  ;;  %v11302_v28 = vcombine.low %v957_v3, %v961_v6  ;;  %v750_v6 = vld [vmem:[#allocation7 + $0x11c8] sm:$0xff] }
 0x1e0   :  { %6683 = vmatpush1.bf16.msra.mxu0 %v11246_v7  ;;  %v13133_v7 = vld [vmem:[#allocation6 + $0x30] sm:$0xff] }
 0x1e1   :  { %6684 = vmatprep.subr.bf16.mxu0 %v11255_v9  ;;  %v11040_v9 = vcombine.low %v694_v50, %v698_v51 }
 0x1e2   :  { %6943 = vmatpush1.bf16.msra.mxu1 %v11000_v13  ;;  %v710_v13 = vld [vmem:[#allocation7 + $0x1088] sm:$0xff] }
 0x1e3   :  { %6944 = vmatprep.subr.bf16.mxu1 %v11009_v16  ;;  %v13143_v16 = vcombine.high %v13133_v7, %v13135_v8 }
 0x1e4   :  { %6685 = vmatpush1.bf16.msra.mxu0 %v11254_v14  ;;  %v714_v14 = vld [vmem:[#allocation7 + $0x10a8] sm:$0xff] }
 0x1e5   :  { %6686 = vmatprep.subr.bf16.mxu0 %v11263_v17  ;;  %v965_v17 = vld [vmem:[#allocation7 + $0x1880] sm:$0xff]  ;;  %v11057_v20 = vcombine.high %v710_v13, %v714_v14 }
 0x1e6   :  { %6945 = vmatpush1.bf16.msra.mxu1 %v11008_v31  ;;  %v11311_v22 = vcombine.high %v965_v17, %v969_v18  ;;  %v722_v31 = vld [vmem:[#allocation7 + $0x10e8] sm:$0xff]  ;;  %v11310_v34 = vcombine.low %v965_v17, %v969_v18 }
 0x1e7   :  { %6946 = vmatprep.subr.bf16.mxu1 %v11017_v59  ;;  %v977_v59 = vld [vmem:[#allocation7 + $0x18e0] sm:$0xff]  ;;  %v11065_v35 = vcombine.high %v718_v29, %v722_v31  ;;  %v758_v18 = vld [vmem:[#allocation7 + $0x1208] sm:$0xff] }
 0x1e8   :  { %6687 = vmatpush1.bf16.msra.mxu0 %v11262_v32  ;;  %v973_v32 = vld [vmem:[#allocation7 + $0x18c0] sm:$0xff] }
 0x1e9   :  { %6688 = vmatprep.subr.bf16.mxu0 %v11271_v60  ;;  %v11056_v60 = vcombine.low %v710_v13, %v714_v14  ;;  %v11319_v61 = vcombine.high %v973_v32, %v977_v59  ;;  %v11318_v43 = vcombine.low %v973_v32, %v977_v59  ;;  %v766_v59 = vld [vmem:[#allocation7 + $0x1248] sm:$0xff] }
 0x1ea   :  { %6947 = vmatpush1.bf16.msra.mxu1 %v11016_v37  ;;  %v730_v37 = vld [vmem:[#allocation7 + $0x1128] sm:$0xff] }
 0x1eb   :  { %6948 = vmatprep.subr.bf16.mxu1 %v11025_v41  ;;  %v985_v41 = vld [vmem:[#allocation7 + $0x1920] sm:$0xff]  ;;  %v11073_v44 = vcombine.high %v726_v0, %v730_v37 }
 0x1ec   :  { %6689 = vmatpush1.bf16.msra.mxu0 %v11270_v39  ;;  %v981_v39 = vld [vmem:[#allocation7 + $0x1900] sm:$0xff] }
 0x1ed   :  { %6690 = vmatprep.subr.bf16.mxu0 %v11279_v42  ;;  %v11064_v42 = vcombine.low %v718_v29, %v722_v31  ;;  %v11327_v45 = vcombine.high %v981_v39, %v985_v41  ;;  %v11326_v50 = vcombine.low %v981_v39, %v985_v41  ;;  %v774_v41 = vld [vmem:[#allocation7 + $0x1288] sm:$0xff] }
 0x1ee   :  { %6949 = vmatpush1.bf16.msra.mxu1 %v11024_v47  ;;  %v738_v47 = vld [vmem:[#allocation7 + $0x1168] sm:$0xff] }
 0x1ef   :  { %6950 = vmatprep.subr.bf16.mxu1 %v11033_v24  ;;  %v993_v24 = vld [vmem:[#allocation7 + $0x1960] sm:$0xff]  ;;  %v11081_v51 = vcombine.high %v734_v46, %v738_v47 }
 0x1f0   :  { %6691 = vmatpush1.bf16.msra.mxu0 %v11278_v23  ;;  %v989_v23 = vld [vmem:[#allocation7 + $0x1940] sm:$0xff] }
 0x1f1   :  { %6692 = vmatprep.subr.bf16.mxu0 %v11287_v49  ;;  %v11072_v49 = vcombine.low %v726_v0, %v730_v37  ;;  %v11335_v52 = vcombine.high %v989_v23, %v993_v24  ;;  %v11334_v3 = vcombine.low %v989_v23, %v993_v24  ;;  %v782_v24 = vld [vmem:[#allocation7 + $0x12c8] sm:$0xff] }
 0x1f2   :  { %6951 = vmatpush1.bf16.msra.mxu1 %v11032_v56  ;;  %v746_v56 = vld [vmem:[#allocation7 + $0x11a8] sm:$0xff] }
 0x1f3   :  { %6963 = vmatprep.subr.bf16.mxu1 %v11041_v62  ;;  %v1001_v62 = vld [vmem:[#allocation7 + $0x19a0] sm:$0xff]  ;;  %v11089_v4 = vcombine.high %v742_v53, %v746_v56 }
 0x1f4   :  { %6693 = vmatpush1.bf16.msra.mxu0 %v11286_v57  ;;  %v997_v57 = vld [vmem:[#allocation7 + $0x1980] sm:$0xff] }
 0x1f5   :  { %6705 = vmatprep.subr.bf16.mxu0 %v11295_v1  ;;  %6953 = vmatmul.mubr.bf16.vlgmr.msra.gmra.mrb[4].mxu1 %v13099_v2  ;;  %v11080_v1 = vcombine.low %v734_v46, %v738_v47  ;;  %v11343_v5 = vcombine.high %v997_v57, %v1001_v62  ;;  %v11342_v13 = vcombine.low %v997_v57, %v1001_v62  ;;  %v790_v62 = vld [vmem:[#allocation7 + $0x1308] sm:$0xff] }
 0x1f6   :  { %6964 = vmatpush1.bf16.msra.mxu1 %v11040_v9  ;;  %6995 = vmatprep.mubr.bf16.mxu1 %v13103_v10  ;;  %v754_v9 = vld [vmem:[#allocation7 + $0x11e8] sm:$0xff] }
 0x1f7   :  { %6695 = vmatmul.mubr.bf16.vlgmr.msra.gmra.mrb[0].mxu0 %v13139_v36  ;;  %6965 = vmatprep.subr.bf16.mxu1 %v11049_v11  ;;  %v1009_v11 = vld [vmem:[#allocation7 + $0x19e0] sm:$0xff]  ;;  %v11097_v14 = vcombine.high %v750_v6, %v754_v9 }
 0x1f8   :  { %6706 = vmatpush1.bf16.msra.mxu0 %v11294_v38  ;;  %6737 = vmatprep.mubr.bf16.mxu0 %v13143_v16  ;;  %v1005_v38 = vld [vmem:[#allocation7 + $0x19c0] sm:$0xff] }
 0x1f9   :  { %6707 = vmatprep.subr.bf16.mxu0 %v11303_v12  ;;  %v11088_v12 = vcombine.low %v742_v53, %v746_v56  ;;  %v11351_v17 = vcombine.high %v1005_v38, %v1009_v11  ;;  %v11350_v29 = vcombine.low %v1005_v38, %v1009_v11  ;;  %v798_v11 = vld [vmem:[#allocation7 + $0x1348] sm:$0xff] }
 0x1fa   :  { %6966 = vmatpush1.bf16.msra.mxu1 %v11048_v27  ;;  %v762_v27 = vld [vmem:[#allocation7 + $0x1228] sm:$0xff] }
 0x1fb   :  { %6967 = vmatprep.subr.bf16.mxu1 %v11057_v20  ;;  %v1017_v20 = vld [vmem:[#allocation7 + $0x1a20] sm:$0xff]  ;;  %v11105_v31 = vcombine.high %v758_v18, %v762_v27 }
 0x1fc   :  { %6708 = vmatpush1.bf16.msra.mxu0 %v11302_v28  ;;  %v1013_v28 = vld [vmem:[#allocation7 + $0x1a00] sm:$0xff] }
 0x1fd   :  { %6709 = vmatprep.subr.bf16.mxu0 %v11311_v22  ;;  %v11096_v22 = vcombine.low %v750_v6, %v754_v9  ;;  %v11359_v32 = vcombine.high %v1013_v28, %v1017_v20  ;;  %v11358_v0 = vcombine.low %v1013_v28, %v1017_v20  ;;  %v806_v20 = vld [vmem:[#allocation7 + $0x1388] sm:$0xff] }
 0x1fe   :  { %6968 = vmatpush1.bf16.msra.mxu1 %v11056_v60  ;;  %v770_v60 = vld [vmem:[#allocation7 + $0x1268] sm:$0xff] }
 0x1ff   :  { %6969 = vmatprep.subr.bf16.mxu1 %v11065_v35  ;;  %v1025_v35 = vld [vmem:[#allocation7 + $0x1a60] sm:$0xff]  ;;  %v11113_v37 = vcombine.high %v766_v59, %v770_v60 }
 0x200   :  { %6710 = vmatpush1.bf16.msra.mxu0 %v11310_v34  ;;  %v1021_v34 = vld [vmem:[#allocation7 + $0x1a40] sm:$0xff] }
 0x201   :  { %6711 = vmatprep.subr.bf16.mxu0 %v11319_v61  ;;  %v11104_v61 = vcombine.low %v758_v18, %v762_v27  ;;  %v11367_v39 = vcombine.high %v1021_v34, %v1025_v35  ;;  %v11366_v46 = vcombine.low %v1021_v34, %v1025_v35  ;;  %v814_v35 = vld [vmem:[#allocation7 + $0x13c8] sm:$0xff] }
 0x202   :  { %6970 = vmatpush1.bf16.msra.mxu1 %v11064_v42  ;;  %v778_v42 = vld [vmem:[#allocation7 + $0x12a8] sm:$0xff] }
 0x203   :  { %6971 = vmatprep.subr.bf16.mxu1 %v11073_v44  ;;  %v1033_v44 = vld [vmem:[#allocation7 + $0x1aa0] sm:$0xff]  ;;  %v11121_v47 = vcombine.high %v774_v41, %v778_v42 }
 0x204   :  { %6712 = vmatpush1.bf16.msra.mxu0 %v11318_v43  ;;  %v1029_v43 = vld [vmem:[#allocation7 + $0x1a80] sm:$0xff] }
 0x205   :  { %6713 = vmatprep.subr.bf16.mxu0 %v11327_v45  ;;  %v11112_v45 = vcombine.low %v766_v59, %v770_v60  ;;  %v11375_v23 = vcombine.high %v1029_v43, %v1033_v44  ;;  %v11374_v53 = vcombine.low %v1029_v43, %v1033_v44  ;;  %v822_v44 = vld [vmem:[#allocation7 + $0x1408] sm:$0xff] }
 0x206   :  { %6972 = vmatpush1.bf16.msra.mxu1 %v11072_v49  ;;  %v786_v49 = vld [vmem:[#allocation7 + $0x12e8] sm:$0xff] }
 0x207   :  { %6973 = vmatprep.subr.bf16.mxu1 %v11081_v51  ;;  %v1041_v51 = vld [vmem:[#allocation7 + $0x1ae0] sm:$0xff]  ;;  %v11129_v56 = vcombine.high %v782_v24, %v786_v49 }
 0x208   :  { %6714 = vmatpush1.bf16.msra.mxu0 %v11326_v50  ;;  %v1037_v50 = vld [vmem:[#allocation7 + $0x1ac0] sm:$0xff] }
 0x209   :  { %6715 = vmatprep.subr.bf16.mxu0 %v11335_v52  ;;  %v11120_v52 = vcombine.low %v774_v41, %v778_v42  ;;  %v11383_v57 = vcombine.high %v1037_v50, %v1041_v51  ;;  %v11382_v6 = vcombine.low %v1037_v50, %v1041_v51  ;;  %v1085_v51 = vld [vmem:[#allocation7 + $0x1c40] sm:$0xff] }
 0x20a   :  { %6974 = vmatpush1.bf16.msra.mxu1 %v11080_v1  ;;  %v794_v1 = vld [vmem:[#allocation7 + $0x1328] sm:$0xff] }
 0x20b   :  { %6975 = vmatprep.subr.bf16.mxu1 %v11089_v4  ;;  %v1049_v4 = vld [vmem:[#allocation7 + $0x1b20] sm:$0xff]  ;;  %v11137_v9 = vcombine.high %v790_v62, %v794_v1 }
 0x20c   :  { %6716 = vmatpush1.bf16.msra.mxu0 %v11334_v3  ;;  %v1045_v3 = vld [vmem:[#allocation7 + $0x1b00] sm:$0xff] }
 0x20d   :  { %6717 = vmatprep.subr.bf16.mxu0 %v11343_v5  ;;  %v11128_v5 = vcombine.low %v782_v24, %v786_v49  ;;  %v11391_v38 = vcombine.high %v1045_v3, %v1049_v4  ;;  %v11390_v18 = vcombine.low %v1045_v3, %v1049_v4  ;;  %v13155_v3 = vcombine.low %v13133_v7, %v13135_v8 }
 0x20e   :  { %6976 = vmatpush1.bf16.msra.mxu1 %v11088_v12  ;;  %v802_v12 = vld [vmem:[#allocation7 + $0x1368] sm:$0xff] }
 0x20f   :  { %6977 = vmatprep.subr.bf16.mxu1 %v11097_v14  ;;  %v1057_v14 = vld [vmem:[#allocation7 + $0x1b60] sm:$0xff]  ;;  %v11145_v27 = vcombine.high %v798_v11, %v802_v12 }
 0x210   :  { %6718 = vmatpush1.bf16.msra.mxu0 %v11342_v13  ;;  %v1053_v13 = vld [vmem:[#allocation7 + $0x1b40] sm:$0xff] }
 0x211   :  { %6719 = vmatprep.subr.bf16.mxu0 %v11351_v17  ;;  %v11136_v17 = vcombine.low %v790_v62, %v794_v1  ;;  %v11399_v28 = vcombine.high %v1053_v13, %v1057_v14  ;;  %v11398_v59 = vcombine.low %v1053_v13, %v1057_v14  ;;  %v13151_v62 = vld [vmem:[#allocation6 + $0x78] sm:$0xff]  ;;  %v1097_v13 = vld [vmem:[#allocation7 + $0x1ca0] sm:$0xff] }
 0x212   :  { %6978 = vmatpush1.bf16.msra.mxu1 %v11096_v22  ;;  %v810_v22 = vld [vmem:[#allocation7 + $0x13a8] sm:$0xff] }
 0x213   :  { %6979 = vmatprep.subr.bf16.mxu1 %v11105_v31  ;;  %v1065_v31 = vld [vmem:[#allocation7 + $0x1ba0] sm:$0xff]  ;;  %v11153_v60 = vcombine.high %v806_v20, %v810_v22 }
 0x214   :  { %6720 = vmatpush1.bf16.msra.mxu0 %v11350_v29  ;;  %v1061_v29 = vld [vmem:[#allocation7 + $0x1b80] sm:$0xff] }
 0x215   :  { %6721 = vmatprep.subr.bf16.mxu0 %v11359_v32  ;;  %v11144_v32 = vcombine.low %v798_v11, %v802_v12  ;;  %v11407_v34 = vcombine.high %v1061_v29, %v1065_v31  ;;  %v11406_v41 = vcombine.low %v1061_v29, %v1065_v31  ;;  %v1093_v12 = vld [vmem:[#allocation7 + $0x1c80] sm:$0xff] }
 0x216   :  { %6980 = vmatpush1.bf16.msra.mxu1 %v11104_v61  ;;  %v818_v61 = vld [vmem:[#allocation7 + $0x13e8] sm:$0xff]  ;;  %v11438_v29 = vcombine.low %v1093_v12, %v1097_v13 }
 0x217   :  { %6981 = vmatprep.subr.bf16.mxu1 %v11113_v37  ;;  %v1073_v37 = vld [vmem:[#allocation7 + $0x1be0] sm:$0xff]  ;;  %v11161_v42 = vcombine.high %v814_v35, %v818_v61 }
 0x218   :  { %6722 = vmatpush1.bf16.msra.mxu0 %v11358_v0  ;;  %v1069_v0 = vld [vmem:[#allocation7 + $0x1bc0] sm:$0xff] }
 0x219   :  { %6723 = vmatprep.subr.bf16.mxu0 %v11367_v39  ;;  %v11152_v39 = vcombine.low %v806_v20, %v810_v22  ;;  %v11415_v43 = vcombine.high %v1069_v0, %v1073_v37  ;;  %v11414_v24 = vcombine.low %v1069_v0, %v1073_v37  ;;  %v1105_v20 = vld [vmem:[#allocation7 + $0x1ce0] sm:$0xff] }
 0x21a   :  { %6982 = vmatpush1.bf16.msra.mxu1 %v11112_v45  ;;  %v826_v45 = vld [vmem:[#allocation7 + $0x1428] sm:$0xff] }
 0x21b   :  { %6983 = vmatprep.subr.bf16.mxu1 %v11121_v47  ;;  %v1081_v47 = vld [vmem:[#allocation7 + $0x1c20] sm:$0xff]  ;;  %v11169_v49 = vcombine.high %v822_v44, %v826_v45  ;;  %v11168_v1 = vcombine.low %v822_v44, %v826_v45 }
 0x21c   :  { %6724 = vmatpush1.bf16.msra.mxu0 %v11366_v46  ;;  %v1077_v46 = vld [vmem:[#allocation7 + $0x1c00] sm:$0xff] }
 0x21d   :  { %6725 = vmatprep.subr.bf16.mxu0 %v11375_v23  ;;  %v11160_v23 = vcombine.low %v814_v35, %v818_v61  ;;  %v11423_v50 = vcombine.high %v1077_v46, %v1081_v47  ;;  %v11422_v4 = vcombine.low %v1077_v46, %v1081_v47  ;;  %v1113_v35 = vld [vmem:[#allocation7 + $0x1d20] sm:$0xff] }
 0x21e   :  { %6984 = vmatpush1.bf16.msra.mxu1 %v11120_v52  ;;  %v830_v52 = vld [vmem:[#allocation7 + $0x1448] sm:$0xff]  ;;  %v1121_v44 = vld [vmem:[#allocation7 + $0x1d60] sm:$0xff] }
 0x21f   :  { %6985 = vmatprep.subr.bf16.mxu1 %v11129_v56  ;;  %v1089_v56 = vld [vmem:[#allocation7 + $0x1c60] sm:$0xff] }
 0x220   :  { %6726 = vmatpush1.bf16.msra.mxu0 %v11374_v53  ;;  %v834_v53 = vld [vmem:[#allocation7 + $0x1468] sm:$0xff]  ;;  %v11430_v8 = vcombine.low %v1085_v51, %v1089_v56 }
 0x221   :  { %6727 = vmatprep.subr.bf16.mxu0 %v11383_v57  ;;  %v13149_v57 = vld [vmem:[#allocation6 + $0x38] sm:$0xff]  ;;  %v11176_v7 = vcombine.low %v830_v52, %v834_v53 }
 0x222   :  { %6986 = vmatpush1.bf16.msra.mxu1 %v11128_v5  ;;  %v11177_v5 = vcombine.high %v830_v52, %v834_v53  ;;  %v13159_v11 = vcombine.high %v13149_v57, %v13151_v62 }
 0x223   :  { %6987 = vmatprep.subr.bf16.mxu1 %v11137_v9  ;;  %v838_v9 = vld [vmem:[#allocation7 + $0x1488] sm:$0xff] }
 0x224   :  { %6728 = vmatpush1.bf16.msra.mxu0 %v11382_v6  ;;  %v11431_v6 = vcombine.high %v1085_v51, %v1089_v56  ;;  %v1129_v51 = vld [vmem:[#allocation7 + $0x1da0] sm:$0xff] }
 0x225   :  { %6729 = vmatprep.subr.bf16.mxu0 %v11391_v38  ;;  %v842_v38 = vld [vmem:[#allocation7 + $0x14a8] sm:$0xff] }
 0x226   :  { %6988 = vmatpush1.bf16.msra.mxu1 %v11136_v17  ;;  %v11185_v14 = vcombine.high %v838_v9, %v842_v38  ;;  %v11439_v17 = vcombine.high %v1093_v12, %v1097_v13  ;;  %v11184_v22 = vcombine.low %v838_v9, %v842_v38  ;;  %v1137_v9 = vld [vmem:[#allocation7 + $0x1de0] sm:$0xff] }
 0x227   :  { %6989 = vmatprep.subr.bf16.mxu1 %v11145_v27  ;;  %v850_v27 = vld [vmem:[#allocation7 + $0x14e8] sm:$0xff] }
 0x228   :  { %6730 = vmatpush1.bf16.msra.mxu0 %v11390_v18  ;;  %v846_v18 = vld [vmem:[#allocation7 + $0x14c8] sm:$0xff] }
 0x229   :  { %6731 = vmatprep.subr.bf16.mxu0 %v11399_v28  ;;  %v1101_v28 = vld [vmem:[#allocation7 + $0x1cc0] sm:$0xff]  ;;  %v11193_v31 = vcombine.high %v846_v18, %v850_v27  ;;  %v11192_v61 = vcombine.low %v846_v18, %v850_v27 }
 0x22a   :  { %6990 = vmatpush1.bf16.msra.mxu1 %v11144_v32  ;;  %v11447_v32 = vcombine.high %v1101_v28, %v1105_v20  ;;  %v11446_v0 = vcombine.low %v1101_v28, %v1105_v20  ;;  %v1145_v18 = vld [vmem:[#allocation7 + $0x1e20] sm:$0xff] }
 0x22b   :  { %6991 = vmatprep.subr.bf16.mxu1 %v11153_v60  ;;  %v858_v60 = vld [vmem:[#allocation7 + $0x1528] sm:$0xff] }
 0x22c   :  { %6732 = vmatpush1.bf16.msra.mxu0 %v11398_v59  ;;  %v854_v59 = vld [vmem:[#allocation7 + $0x1508] sm:$0xff] }
 0x22d   :  { %6733 = vmatprep.subr.bf16.mxu0 %v11407_v34  ;;  %v1109_v34 = vld [vmem:[#allocation7 + $0x1d00] sm:$0xff]  ;;  %v11201_v37 = vcombine.high %v854_v59, %v858_v60  ;;  %v11200_v45 = vcombine.low %v854_v59, %v858_v60 }
 0x22e   :  { %6992 = vmatpush1.bf16.msra.mxu1 %v11152_v39  ;;  %v11455_v39 = vcombine.high %v1109_v34, %v1113_v35  ;;  %v11454_v46 = vcombine.low %v1109_v34, %v1113_v35  ;;  %v1153_v59 = vld [vmem:[#allocation7 + $0x1e60] sm:$0xff] }
 0x22f   :  { %6993 = vmatprep.subr.bf16.mxu1 %v11161_v42  ;;  %v866_v42 = vld [vmem:[#allocation7 + $0x1568] sm:$0xff] }
 0x230   :  { %6734 = vmatpush1.bf16.msra.mxu0 %v11406_v41  ;;  %v862_v41 = vld [vmem:[#allocation7 + $0x1548] sm:$0xff] }
 0x231   :  { %6735 = vmatprep.subr.bf16.mxu0 %v11415_v43  ;;  %v1117_v43 = vld [vmem:[#allocation7 + $0x1d40] sm:$0xff]  ;;  %v11209_v47 = vcombine.high %v862_v41, %v866_v42  ;;  %v11208_v52 = vcombine.low %v862_v41, %v866_v42 }
 0x232   :  { %6994 = vmatpush1.bf16.msra.mxu1 %v11160_v23  ;;  %v11463_v23 = vcombine.high %v1117_v43, %v1121_v44  ;;  %v11462_v53 = vcombine.low %v1117_v43, %v1121_v44  ;;  %v1161_v41 = vld [vmem:[#allocation7 + $0x1ea0] sm:$0xff] }
 0x233   :  { %7006 = vmatprep.subr.bf16.mxu1 %v11169_v49  ;;  %v874_v49 = vld [vmem:[#allocation7 + $0x15a8] sm:$0xff] }
 0x234   :  { %6736 = vmatpush1.bf16.msra.mxu0 %v11414_v24  ;;  %v870_v24 = vld [vmem:[#allocation7 + $0x1588] sm:$0xff] }
 0x235   :  { %6748 = vmatprep.subr.bf16.mxu0 %v11423_v50  ;;  %6996 = vmatmul.mubr.bf16.vlgmr.msra.gmra.mrb[4].mxu1 %v13115_v30  ;;  %v1125_v50 = vld [vmem:[#allocation7 + $0x1d80] sm:$0xff]  ;;  %v11217_v56 = vcombine.high %v870_v24, %v874_v49  ;;  %v11216_v38 = vcombine.low %v870_v24, %v874_v49 }
 0x236   :  { %7007 = vmatpush1.bf16.msra.mxu1 %v11168_v1  ;;  %7038 = vmatprep.mubr.bf16.mxu1 %v13119_v33  ;;  %v11471_v1 = vcombine.high %v1125_v50, %v1129_v51  ;;  %v11470_v12 = vcombine.low %v1125_v50, %v1129_v51  ;;  %v1169_v24 = vld [vmem:[#allocation7 + $0x1ee0] sm:$0xff] }
 0x237   :  { %6738 = vmatmul.mubr.bf16.vlgmr.msra.gmra.mrb[0].mxu0 %v13155_v3  ;;  %7008 = vmatprep.subr.bf16.mxu1 %v11177_v5  ;;  %v882_v5 = vld [vmem:[#allocation7 + $0x15e8] sm:$0xff] }
 0x238   :  { %6749 = vmatpush1.bf16.msra.mxu0 %v11422_v4  ;;  %6780 = vmatprep.mubr.bf16.mxu0 %v13159_v11  ;;  %v878_v4 = vld [vmem:[#allocation7 + $0x15c8] sm:$0xff] }
 0x239   :  { %6750 = vmatprep.subr.bf16.mxu0 %v11431_v6  ;;  %v1133_v6 = vld [vmem:[#allocation7 + $0x1dc0] sm:$0xff]  ;;  %v11225_v13 = vcombine.high %v878_v4, %v882_v5  ;;  %v11224_v27 = vcombine.low %v878_v4, %v882_v5 }
 0x23a   :  { %7009 = vmatpush1.bf16.msra.mxu1 %v11176_v7  ;;  %v11479_v7 = vcombine.high %v1133_v6, %v1137_v9  ;;  %v11478_v28 = vcombine.low %v1133_v6, %v1137_v9  ;;  %v1177_v4 = vld [vmem:[#allocation7 + $0x1f20] sm:$0xff] }
 0x23b   :  { %7010 = vmatprep.subr.bf16.mxu1 %v11185_v14  ;;  %v890_v14 = vld [vmem:[#allocation7 + $0x1628] sm:$0xff] }
 0x23c   :  { %6751 = vmatpush1.bf16.msra.mxu0 %v11430_v8  ;;  %v886_v8 = vld [vmem:[#allocation7 + $0x1608] sm:$0xff] }
 0x23d   :  { %6752 = vmatprep.subr.bf16.mxu0 %v11439_v17  ;;  %v1141_v17 = vld [vmem:[#allocation7 + $0x1e00] sm:$0xff]  ;;  %v11233_v20 = vcombine.high %v886_v8, %v890_v14  ;;  %v11232_v60 = vcombine.low %v886_v8, %v890_v14 }
 0x23e   :  { %7011 = vmatpush1.bf16.msra.mxu1 %v11184_v22  ;;  %v11487_v22 = vcombine.high %v1141_v17, %v1145_v18  ;;  %v11486_v34 = vcombine.low %v1141_v17, %v1145_v18  ;;  %v1185_v8 = vld [vmem:[#allocation7 + $0x1f60] sm:$0xff] }
 0x23f   :  { %7012 = vmatprep.subr.bf16.mxu1 %v11193_v31  ;;  %v898_v31 = vld [vmem:[#allocation7 + $0x1668] sm:$0xff] }
 0x240   :  { %6753 = vmatpush1.bf16.msra.mxu0 %v11438_v29  ;;  %v894_v29 = vld [vmem:[#allocation7 + $0x1648] sm:$0xff] }
 0x241   :  { %6754 = vmatprep.subr.bf16.mxu0 %v11447_v32  ;;  %v1149_v32 = vld [vmem:[#allocation7 + $0x1e40] sm:$0xff]  ;;  %v11241_v35 = vcombine.high %v894_v29, %v898_v31  ;;  %v11240_v42 = vcombine.low %v894_v29, %v898_v31 }
 0x242   :  { %7013 = vmatpush1.bf16.msra.mxu1 %v11192_v61  ;;  %v11495_v61 = vcombine.high %v1149_v32, %v1153_v59  ;;  %v11494_v43 = vcombine.low %v1149_v32, %v1153_v59  ;;  %v1193_v29 = vld [vmem:[#allocation7 + $0x1fa0] sm:$0xff] }
 0x243   :  { %7014 = vmatprep.subr.bf16.mxu1 %v11201_v37  ;;  %v906_v37 = vld [vmem:[#allocation7 + $0x16a8] sm:$0xff] }
 0x244   :  { %6755 = vmatpush1.bf16.msra.mxu0 %v11446_v0  ;;  %v902_v0 = vld [vmem:[#allocation7 + $0x1688] sm:$0xff] }
 0x245   :  { %6756 = vmatprep.subr.bf16.mxu0 %v11455_v39  ;;  %v1157_v39 = vld [vmem:[#allocation7 + $0x1e80] sm:$0xff]  ;;  %v11249_v44 = vcombine.high %v902_v0, %v906_v37  ;;  %v11248_v49 = vcombine.low %v902_v0, %v906_v37 }
 0x246   :  { %7015 = vmatpush1.bf16.msra.mxu1 %v11200_v45  ;;  %v11503_v45 = vcombine.high %v1157_v39, %v1161_v41  ;;  %v11502_v50 = vcombine.low %v1157_v39, %v1161_v41  ;;  %v1201_v0 = vld [vmem:[#allocation7 + $0x1fe0] sm:$0xff] }
 0x247   :  { %7016 = vmatprep.subr.bf16.mxu1 %v11209_v47  ;;  %v914_v47 = vld [vmem:[#allocation7 + $0x16e8] sm:$0xff] }
 0x248   :  { %6757 = vmatpush1.bf16.msra.mxu0 %v11454_v46  ;;  %v910_v46 = vld [vmem:[#allocation7 + $0x16c8] sm:$0xff] }
 0x249   :  { %6758 = vmatprep.subr.bf16.mxu0 %v11463_v23  ;;  %v1165_v23 = vld [vmem:[#allocation7 + $0x1ec0] sm:$0xff]  ;;  %v11257_v51 = vcombine.high %v910_v46, %v914_v47  ;;  %v11256_v5 = vcombine.low %v910_v46, %v914_v47  ;;  %v187_v46 = vld [vmem:[#allocation7 + $0x30] sm:$0xff] }
 0x24a   :  { %7017 = vmatpush1.bf16.msra.mxu1 %v11208_v52  ;;  %v11511_v52 = vcombine.high %v1165_v23, %v1169_v24  ;;  %v11510_v6 = vcombine.low %v1165_v23, %v1169_v24 }
 0x24b   :  { %7018 = vmatprep.subr.bf16.mxu1 %v11217_v56  ;;  %v922_v56 = vld [vmem:[#allocation7 + $0x1728] sm:$0xff] }
 0x24c   :  { %6759 = vmatpush1.bf16.msra.mxu0 %v11462_v53  ;;  %v918_v53 = vld [vmem:[#allocation7 + $0x1708] sm:$0xff] }
 0x24d   :  { %6760 = vmatprep.subr.bf16.mxu0 %v11471_v1  ;;  %v1173_v1 = vld [vmem:[#allocation7 + $0x1f00] sm:$0xff]  ;;  %v11265_v9 = vcombine.high %v918_v53, %v922_v56  ;;  %v11264_v14 = vcombine.low %v918_v53, %v922_v56  ;;  %v195_v53 = vld [vmem:[#allocation7 + $0x70] sm:$0xff]  ;;  %v13167_v56 = vcombine.low %v13149_v57, %v13151_v62 }
 0x24e   :  { %7019 = vmatpush1.bf16.msra.mxu1 %v11216_v38  ;;  %v11519_v38 = vcombine.high %v1173_v1, %v1177_v4  ;;  %v11518_v17 = vcombine.low %v1173_v1, %v1177_v4 }
 0x24f   :  { %7020 = vmatprep.subr.bf16.mxu1 %v11225_v13  ;;  %v930_v13 = vld [vmem:[#allocation7 + $0x1768] sm:$0xff] }
 0x250   :  { %6761 = vmatpush1.bf16.msra.mxu0 %v11470_v12  ;;  %v926_v12 = vld [vmem:[#allocation7 + $0x1748] sm:$0xff] }
 0x251   :  { %6762 = vmatprep.subr.bf16.mxu0 %v11479_v7  ;;  %v1181_v7 = vld [vmem:[#allocation7 + $0x1f40] sm:$0xff]  ;;  %v11273_v18 = vcombine.high %v926_v12, %v930_v13  ;;  %v11272_v31 = vcombine.low %v926_v12, %v930_v13  ;;  %v199_v12 = vld [vmem:[#allocation7 + $0x90] sm:$0xff] }
 0x252   :  { %7021 = vmatpush1.bf16.msra.mxu1 %v11224_v27  ;;  %v11527_v27 = vcombine.high %v1181_v7, %v1185_v8  ;;  %v11526_v32 = vcombine.low %v1181_v7, %v1185_v8  ;;  %v203_v13 = vld [vmem:[#allocation7 + $0xb0] sm:$0xff] }
 0x253   :  { %7022 = vmatprep.subr.bf16.mxu1 %v11233_v20  ;;  %v938_v20 = vld [vmem:[#allocation7 + $0x17a8] sm:$0xff]  ;;  %v10547_v8 = vcombine.high %v199_v12, %v203_v13 }
 0x254   :  { %6763 = vmatpush1.bf16.msra.mxu0 %v11478_v28  ;;  %v934_v28 = vld [vmem:[#allocation7 + $0x1788] sm:$0xff] }
 0x255   :  { %6764 = vmatprep.subr.bf16.mxu0 %v11487_v22  ;;  %v1189_v22 = vld [vmem:[#allocation7 + $0x1f80] sm:$0xff]  ;;  %v11281_v59 = vcombine.high %v934_v28, %v938_v20  ;;  %v11280_v37 = vcombine.low %v934_v28, %v938_v20  ;;  %v10546_v20 = vcombine.low %v199_v12, %v203_v13 }
 0x256   :  { %7023 = vmatpush1.bf16.msra.mxu1 %v11232_v60  ;;  %v11535_v60 = vcombine.high %v1189_v22, %v1193_v29  ;;  %v11534_v39 = vcombine.low %v1189_v22, %v1193_v29 }
 0x257   :  { %7024 = vmatprep.subr.bf16.mxu1 %v11241_v35  ;;  %v946_v35 = vld [vmem:[#allocation7 + $0x17e8] sm:$0xff] }
 0x258   :  { %6765 = vmatpush1.bf16.msra.mxu0 %v11486_v34  ;;  %v942_v34 = vld [vmem:[#allocation7 + $0x17c8] sm:$0xff] }
 0x259   :  { %6766 = vmatprep.subr.bf16.mxu0 %v11495_v61  ;;  %v1197_v61 = vld [vmem:[#allocation7 + $0x1fc0] sm:$0xff]  ;;  %v11289_v41 = vcombine.high %v942_v34, %v946_v35  ;;  %v11288_v47 = vcombine.low %v942_v34, %v946_v35 }
 0x25a   :  { %7025 = vmatpush1.bf16.msra.mxu1 %v11240_v42  ;;  %v11543_v42 = vcombine.high %v1197_v61, %v1201_v0  ;;  %v11542_v23 = vcombine.low %v1197_v61, %v1201_v0 }
 0x25b   :  { %7026 = vmatprep.subr.bf16.mxu1 %v11249_v44  ;;  %v954_v44 = vld [vmem:[#allocation7 + $0x1828] sm:$0xff] }
 0x25c   :  { %6767 = vmatpush1.bf16.msra.mxu0 %v11494_v43  ;;  %v950_v43 = vld [vmem:[#allocation7 + $0x1808] sm:$0xff] }
 0x25d   :  { %6768 = vmatprep.subr.bf16.mxu0 %v11503_v45  ;;  %v183_v45 = vld [vmem:[#allocation7 + $0x10] sm:$0xff]  ;;  %v11297_v24 = vcombine.high %v950_v43, %v954_v44  ;;  %v11296_v1 = vcombine.low %v950_v43, %v954_v44 }
 0x25e   :  { %7027 = vmatpush1.bf16.msra.mxu1 %v11248_v49  ;;  %v10531_v49 = vcombine.high %v183_v45, %v187_v46  ;;  %v10530_v4 = vcombine.low %v183_v45, %v187_v46 }
 0x25f   :  { %7028 = vmatprep.subr.bf16.mxu1 %v11257_v51  ;;  %v962_v51 = vld [vmem:[#allocation7 + $0x1868] sm:$0xff] }
 0x260   :  { %6769 = vmatpush1.bf16.msra.mxu0 %v11502_v50  ;;  %v958_v50 = vld [vmem:[#allocation7 + $0x1848] sm:$0xff] }
 0x261   :  { %6770 = vmatprep.subr.bf16.mxu0 %v11511_v52  ;;  %v191_v52 = vld [vmem:[#allocation7 + $0x50] sm:$0xff]  ;;  %v11304_v7 = vcombine.low %v958_v50, %v962_v51 }
 0x262   :  { %7029 = vmatpush1.bf16.msra.mxu1 %v11256_v5  ;;  %v11305_v5 = vcombine.high %v958_v50, %v962_v51  ;;  %v10538_v57 = vcombine.low %v191_v52, %v195_v53 }
 0x263   :  { %7030 = vmatprep.subr.bf16.mxu1 %v11265_v9  ;;  %v966_v9 = vld [vmem:[#allocation7 + $0x1888] sm:$0xff] }
 0x264   :  { %6771 = vmatpush1.bf16.msra.mxu0 %v11510_v6  ;;  %v10539_v6 = vcombine.high %v191_v52, %v195_v53 }
 0x265   :  { %6772 = vmatprep.subr.bf16.mxu0 %v11519_v38  ;;  %v970_v38 = vld [vmem:[#allocation7 + $0x18a8] sm:$0xff] }
 0x266   :  { %7031 = vmatpush1.bf16.msra.mxu1 %v11264_v14  ;;  %v11313_v62 = vcombine.high %v966_v9, %v970_v38  ;;  %v974_v14 = vld [vmem:[#allocation7 + $0x18c8] sm:$0xff]  ;;  %v11312_v28 = vcombine.low %v966_v9, %v970_v38 }
 0x267   :  { %7032 = vmatprep.subr.bf16.mxu1 %v11273_v18  ;;  %v207_v18 = vld [vmem:[#allocation7 + $0xd0] sm:$0xff] }
 0x268   :  { %6773 = vmatpush1.bf16.msra.mxu0 %v11518_v17  ;;  %v978_v17 = vld [vmem:[#allocation7 + $0x18e8] sm:$0xff] }
 0x269   :  { %6774 = vmatprep.subr.bf16.mxu0 %v11527_v27  ;;  %v211_v27 = vld [vmem:[#allocation7 + $0xf0] sm:$0xff]  ;;  %v11321_v22 = vcombine.high %v974_v14, %v978_v17  ;;  %v11320_v34 = vcombine.low %v974_v14, %v978_v17 }
 0x26a   :  { %7033 = vmatpush1.bf16.msra.mxu1 %v11272_v31  ;;  %v10555_v29 = vcombine.high %v207_v18, %v211_v27  ;;  %v982_v31 = vld [vmem:[#allocation7 + $0x1908] sm:$0xff]  ;;  %v10554_v35 = vcombine.low %v207_v18, %v211_v27 }
 0x26b   :  { %7034 = vmatprep.subr.bf16.mxu1 %v11281_v59  ;;  %v215_v59 = vld [vmem:[#allocation7 + $0x110] sm:$0xff] }
 0x26c   :  { %6775 = vmatpush1.bf16.msra.mxu0 %v11526_v32  ;;  %v986_v32 = vld [vmem:[#allocation7 + $0x1928] sm:$0xff] }
 0x26d   :  { %6776 = vmatprep.subr.bf16.mxu0 %v11535_v60  ;;  %v219_v60 = vld [vmem:[#allocation7 + $0x130] sm:$0xff]  ;;  %v11329_v61 = vcombine.high %v982_v31, %v986_v32  ;;  %v11328_v43 = vcombine.low %v982_v31, %v986_v32 }
 0x26e   :  { %7035 = vmatpush1.bf16.msra.mxu1 %v11280_v37  ;;  %v10563_v0 = vcombine.high %v215_v59, %v219_v60  ;;  %v990_v37 = vld [vmem:[#allocation7 + $0x1948] sm:$0xff]  ;;  %v10562_v44 = vcombine.low %v215_v59, %v219_v60 }
 0x26f   :  { %7036 = vmatprep.subr.bf16.mxu1 %v11289_v41  ;;  %v223_v41 = vld [vmem:[#allocation7 + $0x150] sm:$0xff] }
 0x270   :  { %6777 = vmatpush1.bf16.msra.mxu0 %v11534_v39  ;;  %v994_v39 = vld [vmem:[#allocation7 + $0x1968] sm:$0xff] }
 0x271   :  { %6778 = vmatprep.subr.bf16.mxu0 %v11543_v42  ;;  %v227_v42 = vld [vmem:[#allocation7 + $0x170] sm:$0xff]  ;;  %v11337_v45 = vcombine.high %v990_v37, %v994_v39  ;;  %v11336_v50 = vcombine.low %v990_v37, %v994_v39 }
 0x272   :  { %7037 = vmatpush1.bf16.msra.mxu1 %v11288_v47  ;;  %v10571_v46 = vcombine.high %v223_v41, %v227_v42  ;;  %v998_v47 = vld [vmem:[#allocation7 + $0x1988] sm:$0xff]  ;;  %v10570_v51 = vcombine.low %v223_v41, %v227_v42 }
 0x273   :  { %7049 = vmatprep.subr.bf16.mxu1 %v11297_v24  ;;  %v231_v24 = vld [vmem:[#allocation7 + $0x190] sm:$0xff] }
 0x274   :  { %6779 = vmatpush1.bf16.msra.mxu0 %v11542_v23  ;;  %v1002_v23 = vld [vmem:[#allocation7 + $0x19a8] sm:$0xff] }
 0x275   :  { %7135 = vmatprep.subr.bf16.mxu0 %v10531_v49  ;;  %7039 = vmatmul.mubr.bf16.vlgmr.msra.gmra.mrb[4].mxu1 %v13139_v36  ;;  %v235_v49 = vld [vmem:[#allocation7 + $0x1b0] sm:$0xff]  ;;  %v11345_v52 = vcombine.high %v998_v47, %v1002_v23  ;;  %v11344_v9 = vcombine.low %v998_v47, %v1002_v23 }
 0x276   :  { %7050 = vmatpush1.bf16.msra.mxu1 %v11296_v1  ;;  %7081 = vmatprep.mubr.bf16.mxu1 %v13143_v16  ;;  %v10579_v53 = vcombine.high %v231_v24, %v235_v49  ;;  %v1006_v1 = vld [vmem:[#allocation7 + $0x19c8] sm:$0xff]  ;;  %v10578_v38 = vcombine.low %v231_v24, %v235_v49 }
 0x277   :  { %6781 = vmatmul.mubr.bf16.vlgmr.msra.gmra.mrb[0].mxu0 %v13167_v56  ;;  %7051 = vmatprep.subr.bf16.mxu1 %v11305_v5  ;;  %v239_v5 = vld [vmem:[#allocation7 + $0x1d0] sm:$0xff] }
 0x278   :  { %7136 = vmatpush1.bf16.msra.mxu0 %v10530_v4  ;;  %7167 = vmatprep.mubr.bf16.mxu0 %v13045_v58  ;;  %v1010_v4 = vld [vmem:[#allocation7 + $0x19e8] sm:$0xff] }
 0x279   :  { %7137 = vmatprep.subr.bf16.mxu0 %v10539_v6  ;;  %v243_v6 = vld [vmem:[#allocation7 + $0x1f0] sm:$0xff]  ;;  %v11353_v12 = vcombine.high %v1006_v1, %v1010_v4  ;;  %v11352_v14 = vcombine.low %v1006_v1, %v1010_v4 }
 0x27a   :  { %7052 = vmatpush1.bf16.msra.mxu1 %v11304_v7  ;;  %v10587_v13 = vcombine.high %v239_v5, %v243_v6  ;;  %v1014_v7 = vld [vmem:[#allocation7 + $0x1a08] sm:$0xff]  ;;  %v10586_v17 = vcombine.low %v239_v5, %v243_v6 }
 0x27b   :  { %7053 = vmatprep.subr.bf16.mxu1 %v11313_v62  ;;  %v247_v62 = vld [vmem:[#allocation7 + $0x210] sm:$0xff] }
 0x27c   :  { %7138 = vmatpush1.bf16.msra.mxu0 %v10538_v57  ;;  %v1018_v57 = vld [vmem:[#allocation7 + $0x1a28] sm:$0xff] }
 0x27d   :  { %7139 = vmatprep.subr.bf16.mxu0 %v10547_v8  ;;  %v251_v8 = vld [vmem:[#allocation7 + $0x230] sm:$0xff]  ;;  %v11361_v18 = vcombine.high %v1014_v7, %v1018_v57  ;;  %v11360_v31 = vcombine.low %v1014_v7, %v1018_v57 }
 0x27e   :  { %7054 = vmatpush1.bf16.msra.mxu1 %v11312_v28  ;;  %v10595_v27 = vcombine.high %v247_v62, %v251_v8  ;;  %v1022_v28 = vld [vmem:[#allocation7 + $0x1a48] sm:$0xff]  ;;  %v10594_v32 = vcombine.low %v247_v62, %v251_v8 }
 0x27f   :  { %7055 = vmatprep.subr.bf16.mxu1 %v11321_v22  ;;  %v255_v22 = vld [vmem:[#allocation7 + $0x250] sm:$0xff] }
 0x280   :  { %7140 = vmatpush1.bf16.msra.mxu0 %v10546_v20  ;;  %v1026_v20 = vld [vmem:[#allocation7 + $0x1a68] sm:$0xff] }
 0x281   :  { %7141 = vmatprep.subr.bf16.mxu0 %v10555_v29  ;;  %v259_v29 = vld [vmem:[#allocation7 + $0x270] sm:$0xff]  ;;  %v11369_v59 = vcombine.high %v1022_v28, %v1026_v20  ;;  %v11368_v37 = vcombine.low %v1022_v28, %v1026_v20 }
 0x282   :  { %7056 = vmatpush1.bf16.msra.mxu1 %v11320_v34  ;;  %v10603_v60 = vcombine.high %v255_v22, %v259_v29  ;;  %v1030_v34 = vld [vmem:[#allocation7 + $0x1a88] sm:$0xff]  ;;  %v10602_v39 = vcombine.low %v255_v22, %v259_v29 }
 0x283   :  { %7057 = vmatprep.subr.bf16.mxu1 %v11329_v61  ;;  %v263_v61 = vld [vmem:[#allocation7 + $0x290] sm:$0xff] }
 0x284   :  { %7142 = vmatpush1.bf16.msra.mxu0 %v10554_v35  ;;  %v1034_v35 = vld [vmem:[#allocation7 + $0x1aa8] sm:$0xff] }
 0x285   :  { %7143 = vmatprep.subr.bf16.mxu0 %v10563_v0  ;;  %v267_v0 = vld [vmem:[#allocation7 + $0x2b0] sm:$0xff]  ;;  %v11377_v41 = vcombine.high %v1030_v34, %v1034_v35  ;;  %v11376_v47 = vcombine.low %v1030_v34, %v1034_v35 }
 0x286   :  { %7058 = vmatpush1.bf16.msra.mxu1 %v11328_v43  ;;  %v10611_v42 = vcombine.high %v263_v61, %v267_v0  ;;  %v1038_v43 = vld [vmem:[#allocation7 + $0x1ac8] sm:$0xff]  ;;  %v10610_v23 = vcombine.low %v263_v61, %v267_v0 }
 0x287   :  { %7059 = vmatprep.subr.bf16.mxu1 %v11337_v45  ;;  %v271_v45 = vld [vmem:[#allocation7 + $0x2d0] sm:$0xff] }
 0x288   :  { %7144 = vmatpush1.bf16.msra.mxu0 %v10562_v44  ;;  %v1042_v44 = vld [vmem:[#allocation7 + $0x1ae8] sm:$0xff] }
 0x289   :  { %7145 = vmatprep.subr.bf16.mxu0 %v10571_v46  ;;  %v275_v46 = vld [vmem:[#allocation7 + $0x2f0] sm:$0xff]  ;;  %v11385_v24 = vcombine.high %v1038_v43, %v1042_v44  ;;  %v11384_v1 = vcombine.low %v1038_v43, %v1042_v44 }
 0x28a   :  { %7060 = vmatpush1.bf16.msra.mxu1 %v11336_v50  ;;  %v10619_v49 = vcombine.high %v271_v45, %v275_v46  ;;  %v1046_v50 = vld [vmem:[#allocation7 + $0x1b08] sm:$0xff]  ;;  %v10618_v4 = vcombine.low %v271_v45, %v275_v46 }
 0x28b   :  { %7061 = vmatprep.subr.bf16.mxu1 %v11345_v52  ;;  %v279_v52 = vld [vmem:[#allocation7 + $0x310] sm:$0xff] }
 0x28c   :  { %7146 = vmatpush1.bf16.msra.mxu0 %v10570_v51  ;;  %v1050_v51 = vld [vmem:[#allocation7 + $0x1b28] sm:$0xff] }
 0x28d   :  { %7147 = vmatprep.subr.bf16.mxu0 %v10579_v53  ;;  %v283_v53 = vld [vmem:[#allocation7 + $0x330] sm:$0xff]  ;;  %v11393_v5 = vcombine.high %v1046_v50, %v1050_v51  ;;  %v11392_v7 = vcombine.low %v1046_v50, %v1050_v51 }
 0x28e   :  { %7062 = vmatpush1.bf16.msra.mxu1 %v11344_v9  ;;  %v10627_v6 = vcombine.high %v279_v52, %v283_v53  ;;  %v1054_v9 = vld [vmem:[#allocation7 + $0x1b48] sm:$0xff]  ;;  %v10626_v57 = vcombine.low %v279_v52, %v283_v53 }
 0x28f   :  { %7063 = vmatprep.subr.bf16.mxu1 %v11353_v12  ;;  %v287_v12 = vld [vmem:[#allocation7 + $0x350] sm:$0xff] }
 0x290   :  { %7148 = vmatpush1.bf16.msra.mxu0 %v10578_v38  ;;  %v1058_v38 = vld [vmem:[#allocation7 + $0x1b68] sm:$0xff] }
 0x291   :  { %7149 = vmatprep.subr.bf16.mxu0 %v10587_v13  ;;  %v291_v13 = vld [vmem:[#allocation7 + $0x370] sm:$0xff]  ;;  %v11401_v62 = vcombine.high %v1054_v9, %v1058_v38  ;;  %v11400_v28 = vcombine.low %v1054_v9, %v1058_v38 }
 0x292   :  { %7064 = vmatpush1.bf16.msra.mxu1 %v11352_v14  ;;  %v10635_v8 = vcombine.high %v287_v12, %v291_v13  ;;  %v1062_v14 = vld [vmem:[#allocation7 + $0x1b88] sm:$0xff]  ;;  %v10634_v20 = vcombine.low %v287_v12, %v291_v13 }
 0x293   :  { %7065 = vmatprep.subr.bf16.mxu1 %v11361_v18  ;;  %v295_v18 = vld [vmem:[#allocation7 + $0x390] sm:$0xff] }
 0x294   :  { %7150 = vmatpush1.bf16.msra.mxu0 %v10586_v17  ;;  %v1066_v17 = vld [vmem:[#allocation7 + $0x1ba8] sm:$0xff] }
 0x295   :  { %7151 = vmatprep.subr.bf16.mxu0 %v10595_v27  ;;  %v299_v27 = vld [vmem:[#allocation7 + $0x3b0] sm:$0xff]  ;;  %v11409_v22 = vcombine.high %v1062_v14, %v1066_v17  ;;  %v11408_v34 = vcombine.low %v1062_v14, %v1066_v17 }
 0x296   :  { %7066 = vmatpush1.bf16.msra.mxu1 %v11360_v31  ;;  %v10643_v29 = vcombine.high %v295_v18, %v299_v27  ;;  %v1070_v31 = vld [vmem:[#allocation7 + $0x1bc8] sm:$0xff]  ;;  %v10642_v35 = vcombine.low %v295_v18, %v299_v27 }
 0x297   :  { %7067 = vmatprep.subr.bf16.mxu1 %v11369_v59  ;;  %v303_v59 = vld [vmem:[#allocation7 + $0x3d0] sm:$0xff] }
 0x298   :  { %7152 = vmatpush1.bf16.msra.mxu0 %v10594_v32  ;;  %v1074_v32 = vld [vmem:[#allocation7 + $0x1be8] sm:$0xff] }
 0x299   :  { %7153 = vmatprep.subr.bf16.mxu0 %v10603_v60  ;;  %v307_v60 = vld [vmem:[#allocation7 + $0x3f0] sm:$0xff]  ;;  %v11417_v61 = vcombine.high %v1070_v31, %v1074_v32  ;;  %v11416_v43 = vcombine.low %v1070_v31, %v1074_v32 }
 0x29a   :  { %7068 = vmatpush1.bf16.msra.mxu1 %v11368_v37  ;;  %v10651_v0 = vcombine.high %v303_v59, %v307_v60  ;;  %v1078_v37 = vld [vmem:[#allocation7 + $0x1c08] sm:$0xff]  ;;  %v10650_v44 = vcombine.low %v303_v59, %v307_v60 }
 0x29b   :  { %7069 = vmatprep.subr.bf16.mxu1 %v11377_v41  ;;  %v311_v41 = vld [vmem:[#allocation7 + $0x410] sm:$0xff] }
 0x29c   :  { %7154 = vmatpush1.bf16.msra.mxu0 %v10602_v39  ;;  %v1082_v39 = vld [vmem:[#allocation7 + $0x1c28] sm:$0xff] }
 0x29d   :  { %7155 = vmatprep.subr.bf16.mxu0 %v10611_v42  ;;  %v315_v42 = vld [vmem:[#allocation7 + $0x430] sm:$0xff]  ;;  %v11425_v45 = vcombine.high %v1078_v37, %v1082_v39  ;;  %v11424_v50 = vcombine.low %v1078_v37, %v1082_v39 }
 0x29e   :  { %7070 = vmatpush1.bf16.msra.mxu1 %v11376_v47  ;;  %v10659_v46 = vcombine.high %v311_v41, %v315_v42  ;;  %v1086_v47 = vld [vmem:[#allocation7 + $0x1c48] sm:$0xff]  ;;  %v10658_v51 = vcombine.low %v311_v41, %v315_v42 }
 0x29f   :  { %7071 = vmatprep.subr.bf16.mxu1 %v11385_v24  ;;  %v319_v24 = vld [vmem:[#allocation7 + $0x450] sm:$0xff] }
 0x2a0   :  { %7156 = vmatpush1.bf16.msra.mxu0 %v10610_v23  ;;  %v1090_v23 = vld [vmem:[#allocation7 + $0x1c68] sm:$0xff] }
 0x2a1   :  { %7157 = vmatprep.subr.bf16.mxu0 %v10619_v49  ;;  %v323_v49 = vld [vmem:[#allocation7 + $0x470] sm:$0xff]  ;;  %v11433_v52 = vcombine.high %v1086_v47, %v1090_v23  ;;  %v11432_v9 = vcombine.low %v1086_v47, %v1090_v23 }
 0x2a2   :  { %7072 = vmatpush1.bf16.msra.mxu1 %v11384_v1  ;;  %v10667_v53 = vcombine.high %v319_v24, %v323_v49  ;;  %v1094_v1 = vld [vmem:[#allocation7 + $0x1c88] sm:$0xff]  ;;  %v10666_v38 = vcombine.low %v319_v24, %v323_v49 }
 0x2a3   :  { %7073 = vmatprep.subr.bf16.mxu1 %v11393_v5  ;;  %v327_v5 = vld [vmem:[#allocation7 + $0x490] sm:$0xff] }
 0x2a4   :  { %7158 = vmatpush1.bf16.msra.mxu0 %v10618_v4  ;;  %v1098_v4 = vld [vmem:[#allocation7 + $0x1ca8] sm:$0xff] }
 0x2a5   :  { %7159 = vmatprep.subr.bf16.mxu0 %v10627_v6  ;;  %v331_v6 = vld [vmem:[#allocation7 + $0x4b0] sm:$0xff]  ;;  %v11441_v12 = vcombine.high %v1094_v1, %v1098_v4  ;;  %v11440_v14 = vcombine.low %v1094_v1, %v1098_v4 }
 0x2a6   :  { %7074 = vmatpush1.bf16.msra.mxu1 %v11392_v7  ;;  %v10675_v13 = vcombine.high %v327_v5, %v331_v6  ;;  %v1102_v7 = vld [vmem:[#allocation7 + $0x1cc8] sm:$0xff]  ;;  %v10674_v17 = vcombine.low %v327_v5, %v331_v6 }
 0x2a7   :  { %7075 = vmatprep.subr.bf16.mxu1 %v11401_v62  ;;  %v335_v62 = vld [vmem:[#allocation7 + $0x4d0] sm:$0xff] }
 0x2a8   :  { %7160 = vmatpush1.bf16.msra.mxu0 %v10626_v57  ;;  %v1106_v57 = vld [vmem:[#allocation7 + $0x1ce8] sm:$0xff] }
 0x2a9   :  { %7161 = vmatprep.subr.bf16.mxu0 %v10635_v8  ;;  %v339_v8 = vld [vmem:[#allocation7 + $0x4f0] sm:$0xff]  ;;  %v11449_v18 = vcombine.high %v1102_v7, %v1106_v57  ;;  %v11448_v31 = vcombine.low %v1102_v7, %v1106_v57 }
 0x2aa   :  { %7076 = vmatpush1.bf16.msra.mxu1 %v11400_v28  ;;  %v10683_v27 = vcombine.high %v335_v62, %v339_v8  ;;  %v1110_v28 = vld [vmem:[#allocation7 + $0x1d08] sm:$0xff]  ;;  %v10682_v32 = vcombine.low %v335_v62, %v339_v8 }
 0x2ab   :  { %7077 = vmatprep.subr.bf16.mxu1 %v11409_v22  ;;  %v343_v22 = vld [vmem:[#allocation7 + $0x510] sm:$0xff] }
 0x2ac   :  { %7162 = vmatpush1.bf16.msra.mxu0 %v10634_v20  ;;  %v1114_v20 = vld [vmem:[#allocation7 + $0x1d28] sm:$0xff] }
 0x2ad   :  { %7163 = vmatprep.subr.bf16.mxu0 %v10643_v29  ;;  %v347_v29 = vld [vmem:[#allocation7 + $0x530] sm:$0xff]  ;;  %v11457_v59 = vcombine.high %v1110_v28, %v1114_v20  ;;  %v11456_v37 = vcombine.low %v1110_v28, %v1114_v20 }
 0x2ae   :  { %7078 = vmatpush1.bf16.msra.mxu1 %v11408_v34  ;;  %v10691_v60 = vcombine.high %v343_v22, %v347_v29  ;;  %v1118_v34 = vld [vmem:[#allocation7 + $0x1d48] sm:$0xff]  ;;  %v10690_v39 = vcombine.low %v343_v22, %v347_v29 }
 0x2af   :  { %7079 = vmatprep.subr.bf16.mxu1 %v11417_v61  ;;  %v351_v61 = vld [vmem:[#allocation7 + $0x550] sm:$0xff] }
 0x2b0   :  { %7164 = vmatpush1.bf16.msra.mxu0 %v10642_v35  ;;  %v1122_v35 = vld [vmem:[#allocation7 + $0x1d68] sm:$0xff] }
 0x2b1   :  { %7165 = vmatprep.subr.bf16.mxu0 %v10651_v0  ;;  %v355_v0 = vld [vmem:[#allocation7 + $0x570] sm:$0xff]  ;;  %v11465_v41 = vcombine.high %v1118_v34, %v1122_v35  ;;  %v11464_v47 = vcombine.low %v1118_v34, %v1122_v35 }
 0x2b2   :  { %7080 = vmatpush1.bf16.msra.mxu1 %v11416_v43  ;;  %v10699_v42 = vcombine.high %v351_v61, %v355_v0  ;;  %v1126_v43 = vld [vmem:[#allocation7 + $0x1d88] sm:$0xff]  ;;  %v10698_v23 = vcombine.low %v351_v61, %v355_v0 }
 0x2b3   :  { %7092 = vmatprep.subr.bf16.mxu1 %v11425_v45  ;;  %v359_v45 = vld [vmem:[#allocation7 + $0x590] sm:$0xff] }
 0x2b4   :  { %7166 = vmatpush1.bf16.msra.mxu0 %v10650_v44  ;;  %v1130_v44 = vld [vmem:[#allocation7 + $0x1da8] sm:$0xff] }
 0x2b5   :  { %7178 = vmatprep.subr.bf16.mxu0 %v10659_v46  ;;  %7082 = vmatmul.mubr.bf16.vlgmr.msra.gmra.mrb[4].mxu1 %v13155_v3  ;;  %v363_v46 = vld [vmem:[#allocation7 + $0x5b0] sm:$0xff]  ;;  %v11473_v24 = vcombine.high %v1126_v43, %v1130_v44  ;;  %v11472_v1 = vcombine.low %v1126_v43, %v1130_v44 }
 0x2b6   :  { %7093 = vmatpush1.bf16.msra.mxu1 %v11424_v50  ;;  %7124 = vmatprep.mubr.bf16.mxu1 %v13159_v11  ;;  %v10707_v49 = vcombine.high %v359_v45, %v363_v46  ;;  %v1134_v50 = vld [vmem:[#allocation7 + $0x1dc8] sm:$0xff]  ;;  %v10706_v4 = vcombine.low %v359_v45, %v363_v46 }
 0x2b7   :  { %7168 = vmatmul.mubr.bf16.vlgmr.msra.gmra.mrb[4].mxu0 %v13059_v21  ;;  %7094 = vmatprep.subr.bf16.mxu1 %v11433_v52  ;;  %v367_v52 = vld [vmem:[#allocation7 + $0x5d0] sm:$0xff] }
 0x2b8   :  { %7179 = vmatpush1.bf16.msra.mxu0 %v10658_v51  ;;  %7210 = vmatprep.mubr.bf16.mxu0 %v13053_v63  ;;  %v1138_v51 = vld [vmem:[#allocation7 + $0x1de8] sm:$0xff] }
 0x2b9   :  { %7180 = vmatprep.subr.bf16.mxu0 %v10667_v53  ;;  %v371_v53 = vld [vmem:[#allocation7 + $0x5f0] sm:$0xff]  ;;  %v11481_v5 = vcombine.high %v1134_v50, %v1138_v51  ;;  %v11480_v7 = vcombine.low %v1134_v50, %v1138_v51 }
 0x2ba   :  { %7095 = vmatpush1.bf16.msra.mxu1 %v11432_v9  ;;  %v10715_v6 = vcombine.high %v367_v52, %v371_v53  ;;  %v1142_v9 = vld [vmem:[#allocation7 + $0x1e08] sm:$0xff]  ;;  %v10714_v57 = vcombine.low %v367_v52, %v371_v53 }
 0x2bb   :  { %7096 = vmatprep.subr.bf16.mxu1 %v11441_v12  ;;  %v375_v12 = vld [vmem:[#allocation7 + $0x610] sm:$0xff] }
 0x2bc   :  { %7181 = vmatpush1.bf16.msra.mxu0 %v10666_v38  ;;  %v1146_v38 = vld [vmem:[#allocation7 + $0x1e28] sm:$0xff] }
 0x2bd   :  { %7182 = vmatprep.subr.bf16.mxu0 %v10675_v13  ;;  %v379_v13 = vld [vmem:[#allocation7 + $0x630] sm:$0xff]  ;;  %v11489_v62 = vcombine.high %v1142_v9, %v1146_v38  ;;  %v11488_v28 = vcombine.low %v1142_v9, %v1146_v38 }
 0x2be   :  { %7097 = vmatpush1.bf16.msra.mxu1 %v11440_v14  ;;  %v10723_v8 = vcombine.high %v375_v12, %v379_v13  ;;  %v1150_v14 = vld [vmem:[#allocation7 + $0x1e48] sm:$0xff]  ;;  %v10722_v20 = vcombine.low %v375_v12, %v379_v13 }
 0x2bf   :  { %7098 = vmatprep.subr.bf16.mxu1 %v11449_v18  ;;  %v383_v18 = vld [vmem:[#allocation7 + $0x650] sm:$0xff] }
 0x2c0   :  { %7183 = vmatpush1.bf16.msra.mxu0 %v10674_v17  ;;  %v1154_v17 = vld [vmem:[#allocation7 + $0x1e68] sm:$0xff] }
 0x2c1   :  { %7184 = vmatprep.subr.bf16.mxu0 %v10683_v27  ;;  %v387_v27 = vld [vmem:[#allocation7 + $0x670] sm:$0xff]  ;;  %v11497_v22 = vcombine.high %v1150_v14, %v1154_v17  ;;  %v11496_v34 = vcombine.low %v1150_v14, %v1154_v17 }
 0x2c2   :  { %7099 = vmatpush1.bf16.msra.mxu1 %v11448_v31  ;;  %v10731_v29 = vcombine.high %v383_v18, %v387_v27  ;;  %v1158_v31 = vld [vmem:[#allocation7 + $0x1e88] sm:$0xff]  ;;  %v10730_v35 = vcombine.low %v383_v18, %v387_v27 }
 0x2c3   :  { %7100 = vmatprep.subr.bf16.mxu1 %v11457_v59  ;;  %v391_v59 = vld [vmem:[#allocation7 + $0x690] sm:$0xff] }
 0x2c4   :  { %7185 = vmatpush1.bf16.msra.mxu0 %v10682_v32  ;;  %v1162_v32 = vld [vmem:[#allocation7 + $0x1ea8] sm:$0xff] }
 0x2c5   :  { %7186 = vmatprep.subr.bf16.mxu0 %v10691_v60  ;;  %v395_v60 = vld [vmem:[#allocation7 + $0x6b0] sm:$0xff]  ;;  %v11505_v61 = vcombine.high %v1158_v31, %v1162_v32  ;;  %v11504_v43 = vcombine.low %v1158_v31, %v1162_v32 }
 0x2c6   :  { %7101 = vmatpush1.bf16.msra.mxu1 %v11456_v37  ;;  %v10739_v0 = vcombine.high %v391_v59, %v395_v60  ;;  %v1166_v37 = vld [vmem:[#allocation7 + $0x1ec8] sm:$0xff]  ;;  %v10738_v44 = vcombine.low %v391_v59, %v395_v60 }
 0x2c7   :  { %7102 = vmatprep.subr.bf16.mxu1 %v11465_v41  ;;  %v399_v41 = vld [vmem:[#allocation7 + $0x6d0] sm:$0xff] }
 0x2c8   :  { %7187 = vmatpush1.bf16.msra.mxu0 %v10690_v39  ;;  %v1170_v39 = vld [vmem:[#allocation7 + $0x1ee8] sm:$0xff] }
 0x2c9   :  { %7188 = vmatprep.subr.bf16.mxu0 %v10699_v42  ;;  %v403_v42 = vld [vmem:[#allocation7 + $0x6f0] sm:$0xff]  ;;  %v11513_v45 = vcombine.high %v1166_v37, %v1170_v39  ;;  %v11512_v50 = vcombine.low %v1166_v37, %v1170_v39 }
 0x2ca   :  { %7103 = vmatpush1.bf16.msra.mxu1 %v11464_v47  ;;  %v10747_v46 = vcombine.high %v399_v41, %v403_v42  ;;  %v1174_v47 = vld [vmem:[#allocation7 + $0x1f08] sm:$0xff]  ;;  %v10746_v51 = vcombine.low %v399_v41, %v403_v42 }
 0x2cb   :  { %7104 = vmatprep.subr.bf16.mxu1 %v11473_v24  ;;  %v407_v24 = vld [vmem:[#allocation7 + $0x710] sm:$0xff] }
 0x2cc   :  { %7189 = vmatpush1.bf16.msra.mxu0 %v10698_v23  ;;  %v1178_v23 = vld [vmem:[#allocation7 + $0x1f28] sm:$0xff] }
 0x2cd   :  { %7190 = vmatprep.subr.bf16.mxu0 %v10707_v49  ;;  %v411_v49 = vld [vmem:[#allocation7 + $0x730] sm:$0xff]  ;;  %v11521_v52 = vcombine.high %v1174_v47, %v1178_v23  ;;  %v11520_v9 = vcombine.low %v1174_v47, %v1178_v23 }
 0x2ce   :  { %7105 = vmatpush1.bf16.msra.mxu1 %v11472_v1  ;;  %v10755_v53 = vcombine.high %v407_v24, %v411_v49  ;;  %v1182_v1 = vld [vmem:[#allocation7 + $0x1f48] sm:$0xff]  ;;  %v10754_v38 = vcombine.low %v407_v24, %v411_v49 }
 0x2cf   :  { %7106 = vmatprep.subr.bf16.mxu1 %v11481_v5  ;;  %v415_v5 = vld [vmem:[#allocation7 + $0x750] sm:$0xff] }
 0x2d0   :  { %7191 = vmatpush1.bf16.msra.mxu0 %v10706_v4  ;;  %v1186_v4 = vld [vmem:[#allocation7 + $0x1f68] sm:$0xff] }
 0x2d1   :  { %7192 = vmatprep.subr.bf16.mxu0 %v10715_v6  ;;  %v419_v6 = vld [vmem:[#allocation7 + $0x770] sm:$0xff]  ;;  %v11529_v12 = vcombine.high %v1182_v1, %v1186_v4  ;;  %v11528_v14 = vcombine.low %v1182_v1, %v1186_v4 }
 0x2d2   :  { %7107 = vmatpush1.bf16.msra.mxu1 %v11480_v7  ;;  %v10763_v13 = vcombine.high %v415_v5, %v419_v6  ;;  %v1190_v7 = vld [vmem:[#allocation7 + $0x1f88] sm:$0xff]  ;;  %v10762_v17 = vcombine.low %v415_v5, %v419_v6 }
 0x2d3   :  { %7108 = vmatprep.subr.bf16.mxu1 %v11489_v62  ;;  %v423_v62 = vld [vmem:[#allocation7 + $0x790] sm:$0xff] }
 0x2d4   :  { %7193 = vmatpush1.bf16.msra.mxu0 %v10714_v57  ;;  %v1194_v57 = vld [vmem:[#allocation7 + $0x1fa8] sm:$0xff] }
 0x2d5   :  { %7194 = vmatprep.subr.bf16.mxu0 %v10723_v8  ;;  %v427_v8 = vld [vmem:[#allocation7 + $0x7b0] sm:$0xff]  ;;  %v11537_v18 = vcombine.high %v1190_v7, %v1194_v57  ;;  %v11536_v31 = vcombine.low %v1190_v7, %v1194_v57 }
 0x2d6   :  { %7109 = vmatpush1.bf16.msra.mxu1 %v11488_v28  ;;  %v10771_v27 = vcombine.high %v423_v62, %v427_v8  ;;  %v1198_v28 = vld [vmem:[#allocation7 + $0x1fc8] sm:$0xff]  ;;  %v10770_v32 = vcombine.low %v423_v62, %v427_v8 }
 0x2d7   :  { %7110 = vmatprep.subr.bf16.mxu1 %v11497_v22  ;;  %v431_v22 = vld [vmem:[#allocation7 + $0x7d0] sm:$0xff] }
 0x2d8   :  { %7195 = vmatpush1.bf16.msra.mxu0 %v10722_v20  ;;  %v1202_v20 = vld [vmem:[#allocation7 + $0x1fe8] sm:$0xff] }
 0x2d9   :  { %7196 = vmatprep.subr.bf16.mxu0 %v10731_v29  ;;  %v435_v29 = vld [vmem:[#allocation7 + $0x7f0] sm:$0xff]  ;;  %v11545_v59 = vcombine.high %v1198_v28, %v1202_v20  ;;  %v11544_v37 = vcombine.low %v1198_v28, %v1202_v20 }
 0x2da   :  { %7111 = vmatpush1.bf16.msra.mxu1 %v11496_v34  ;;  %v10779_v60 = vcombine.high %v431_v22, %v435_v29  ;;  %v184_v34 = vld [vmem:[#allocation7 + $0x18] sm:$0xff]  ;;  %v10778_v39 = vcombine.low %v431_v22, %v435_v29 }
 0x2db   :  { %7112 = vmatprep.subr.bf16.mxu1 %v11505_v61  ;;  %v439_v61 = vld [vmem:[#allocation7 + $0x810] sm:$0xff]  ;;  %v224_v29 = vld [vmem:[#allocation7 + $0x158] sm:$0xff] }
 0x2dc   :  { %7197 = vmatpush1.bf16.msra.mxu0 %v10730_v35  ;;  %v188_v35 = vld [vmem:[#allocation7 + $0x38] sm:$0xff] }
 0x2dd   :  { %7198 = vmatprep.subr.bf16.mxu0 %v10739_v0  ;;  %v443_v0 = vld [vmem:[#allocation7 + $0x830] sm:$0xff]  ;;  %v10533_v41 = vcombine.high %v184_v34, %v188_v35  ;;  %v10532_v47 = vcombine.low %v184_v34, %v188_v35 }
 0x2de   :  { %7113 = vmatpush1.bf16.msra.mxu1 %v11504_v43  ;;  %v10787_v42 = vcombine.high %v439_v61, %v443_v0  ;;  %v192_v43 = vld [vmem:[#allocation7 + $0x58] sm:$0xff]  ;;  %v10786_v23 = vcombine.low %v439_v61, %v443_v0 }
 0x2df   :  { %7114 = vmatprep.subr.bf16.mxu1 %v11513_v45  ;;  %v447_v45 = vld [vmem:[#allocation7 + $0x850] sm:$0xff]  ;;  %v232_v0 = vld [vmem:[#allocation7 + $0x198] sm:$0xff] }
 0x2e0   :  { %7199 = vmatpush1.bf16.msra.mxu0 %v10738_v44  ;;  %v196_v44 = vld [vmem:[#allocation7 + $0x78] sm:$0xff] }
 0x2e1   :  { %7200 = vmatprep.subr.bf16.mxu0 %v10747_v46  ;;  %v451_v46 = vld [vmem:[#allocation7 + $0x870] sm:$0xff]  ;;  %v10541_v24 = vcombine.high %v192_v43, %v196_v44  ;;  %v10540_v1 = vcombine.low %v192_v43, %v196_v44 }
 0x2e2   :  { %7115 = vmatpush1.bf16.msra.mxu1 %v11512_v50  ;;  %v10795_v49 = vcombine.high %v447_v45, %v451_v46  ;;  %v200_v50 = vld [vmem:[#allocation7 + $0x98] sm:$0xff]  ;;  %v10794_v4 = vcombine.low %v447_v45, %v451_v46 }
 0x2e3   :  { %7116 = vmatprep.subr.bf16.mxu1 %v11521_v52  ;;  %v455_v52 = vld [vmem:[#allocation7 + $0x890] sm:$0xff]  ;;  %v240_v46 = vld [vmem:[#allocation7 + $0x1d8] sm:$0xff] }
 0x2e4   :  { %7201 = vmatpush1.bf16.msra.mxu0 %v10746_v51  ;;  %v204_v51 = vld [vmem:[#allocation7 + $0xb8] sm:$0xff] }
 0x2e5   :  { %7202 = vmatprep.subr.bf16.mxu0 %v10755_v53  ;;  %v459_v53 = vld [vmem:[#allocation7 + $0x8b0] sm:$0xff]  ;;  %v10549_v5 = vcombine.high %v200_v50, %v204_v51  ;;  %v10548_v7 = vcombine.low %v200_v50, %v204_v51 }
 0x2e6   :  { %7117 = vmatpush1.bf16.msra.mxu1 %v11520_v9  ;;  %v10803_v6 = vcombine.high %v455_v52, %v459_v53  ;;  %v208_v9 = vld [vmem:[#allocation7 + $0xd8] sm:$0xff]  ;;  %v10802_v57 = vcombine.low %v455_v52, %v459_v53 }
 0x2e7   :  { %7118 = vmatprep.subr.bf16.mxu1 %v11529_v12  ;;  %v463_v12 = vld [vmem:[#allocation7 + $0x8d0] sm:$0xff]  ;;  %v248_v53 = vld [vmem:[#allocation7 + $0x218] sm:$0xff] }
 0x2e8   :  { %7203 = vmatpush1.bf16.msra.mxu0 %v10754_v38  ;;  %v212_v38 = vld [vmem:[#allocation7 + $0xf8] sm:$0xff] }
 0x2e9   :  { %7204 = vmatprep.subr.bf16.mxu0 %v10763_v13  ;;  %v467_v13 = vld [vmem:[#allocation7 + $0x8f0] sm:$0xff]  ;;  %v10557_v62 = vcombine.high %v208_v9, %v212_v38  ;;  %v10556_v28 = vcombine.low %v208_v9, %v212_v38 }
 0x2ea   :  { %7119 = vmatpush1.bf16.msra.mxu1 %v11528_v14  ;;  %v10811_v8 = vcombine.high %v463_v12, %v467_v13  ;;  %v216_v14 = vld [vmem:[#allocation7 + $0x118] sm:$0xff]  ;;  %v10810_v20 = vcombine.low %v463_v12, %v467_v13 }
 0x2eb   :  { %7120 = vmatprep.subr.bf16.mxu1 %v11537_v18  ;;  %v471_v18 = vld [vmem:[#allocation7 + $0x910] sm:$0xff]  ;;  %v256_v13 = vld [vmem:[#allocation7 + $0x258] sm:$0xff] }
 0x2ec   :  { %7205 = vmatpush1.bf16.msra.mxu0 %v10762_v17  ;;  %v220_v17 = vld [vmem:[#allocation7 + $0x138] sm:$0xff] }
 0x2ed   :  { %7206 = vmatprep.subr.bf16.mxu0 %v10771_v27  ;;  %v475_v27 = vld [vmem:[#allocation7 + $0x930] sm:$0xff]  ;;  %v10565_v22 = vcombine.high %v216_v14, %v220_v17 }
 0x2ee   :  { %7121 = vmatpush1.bf16.msra.mxu1 %v11536_v31  ;;  %v228_v31 = vld [vmem:[#allocation7 + $0x178] sm:$0xff]  ;;  %v10818_v34 = vcombine.low %v471_v18, %v475_v27 }
 0x2ef   :  { %7122 = vmatprep.subr.bf16.mxu1 %v11545_v59  ;;  %v483_v59 = vld [vmem:[#allocation7 + $0x970] sm:$0xff]  ;;  %v10573_v35 = vcombine.high %v224_v29, %v228_v31 }
 0x2f0   :  { %7207 = vmatpush1.bf16.msra.mxu0 %v10770_v32  ;;  %v479_v32 = vld [vmem:[#allocation7 + $0x950] sm:$0xff] }
 0x2f1   :  { %7208 = vmatprep.subr.bf16.mxu0 %v10779_v60  ;;  %v10564_v60 = vcombine.low %v216_v14, %v220_v17  ;;  %v10827_v61 = vcombine.high %v479_v32, %v483_v59  ;;  %v10826_v43 = vcombine.low %v479_v32, %v483_v59  ;;  %v272_v59 = vld [vmem:[#allocation7 + $0x2d8] sm:$0xff] }
 0x2f2   :  { %7123 = vmatpush1.bf16.msra.mxu1 %v11544_v37  ;;  %v236_v37 = vld [vmem:[#allocation7 + $0x1b8] sm:$0xff] }
 0x2f3   :  { %7479 = vmatprep.subr.bf16.mxu1 %v10533_v41  ;;  %v491_v41 = vld [vmem:[#allocation7 + $0x9b0] sm:$0xff]  ;;  %v10581_v44 = vcombine.high %v232_v0, %v236_v37 }
 0x2f4   :  { %7209 = vmatpush1.bf16.msra.mxu0 %v10778_v39  ;;  %v487_v39 = vld [vmem:[#allocation7 + $0x990] sm:$0xff] }
 0x2f5   :  { %7221 = vmatprep.subr.bf16.mxu0 %v10787_v42  ;;  %7125 = vmatmul.mubr.bf16.vlgmr.msra.gmra.mrb[4].mxu1 %v13167_v56  ;;  %v10572_v42 = vcombine.low %v224_v29, %v228_v31  ;;  %v10835_v45 = vcombine.high %v487_v39, %v491_v41  ;;  %v10834_v50 = vcombine.low %v487_v39, %v491_v41  ;;  %v280_v41 = vld [vmem:[#allocation7 + $0x318] sm:$0xff] }
 0x2f6   :  { %7480 = vmatpush1.bf16.msra.mxu1 %v10532_v47  ;;  %7511 = vmatprep.mubr.bf16.mxu1 %v13045_v58  ;;  %v10819_v58 = vcombine.high %v471_v18, %v475_v27  ;;  %v244_v47 = vld [vmem:[#allocation7 + $0x1f8] sm:$0xff] }
 0x2f7   :  { %7211 = vmatmul.mubr.bf16.vlgmr.msra.gmra.mrb[4].mxu0 %v13067_v26  ;;  %7481 = vmatprep.subr.bf16.mxu1 %v10541_v24  ;;  %v499_v24 = vld [vmem:[#allocation7 + $0x9f0] sm:$0xff]  ;;  %v10589_v51 = vcombine.high %v240_v46, %v244_v47  ;;  %v264_v27 = vld [vmem:[#allocation7 + $0x298] sm:$0xff] }
 0x2f8   :  { %7222 = vmatpush1.bf16.msra.mxu0 %v10786_v23  ;;  %7253 = vmatprep.mubr.bf16.mxu0 %v13071_v55  ;;  %v495_v23 = vld [vmem:[#allocation7 + $0x9d0] sm:$0xff] }
 0x2f9   :  { %7223 = vmatprep.subr.bf16.mxu0 %v10795_v49  ;;  %v10580_v49 = vcombine.low %v232_v0, %v236_v37  ;;  %v10843_v52 = vcombine.high %v495_v23, %v499_v24  ;;  %v10842_v9 = vcombine.low %v495_v23, %v499_v24  ;;  %v288_v24 = vld [vmem:[#allocation7 + $0x358] sm:$0xff] }
 0x2fa   :  { %7482 = vmatpush1.bf16.msra.mxu1 %v10540_v1  ;;  %v252_v1 = vld [vmem:[#allocation7 + $0x238] sm:$0xff] }
 0x2fb   :  { %7483 = vmatprep.subr.bf16.mxu1 %v10549_v5  ;;  %v507_v5 = vld [vmem:[#allocation7 + $0xa30] sm:$0xff]  ;;  %v10597_v38 = vcombine.high %v248_v53, %v252_v1 }
 0x2fc   :  { %7224 = vmatpush1.bf16.msra.mxu0 %v10794_v4  ;;  %v503_v4 = vld [vmem:[#allocation7 + $0xa10] sm:$0xff] }
 0x2fd   :  { %7225 = vmatprep.subr.bf16.mxu0 %v10803_v6  ;;  %v10588_v6 = vcombine.low %v240_v46, %v244_v47  ;;  %v10851_v12 = vcombine.high %v503_v4, %v507_v5  ;;  %v10850_v14 = vcombine.low %v503_v4, %v507_v5  ;;  %v296_v5 = vld [vmem:[#allocation7 + $0x398] sm:$0xff] }
 0x2fe   :  { %7484 = vmatpush1.bf16.msra.mxu1 %v10548_v7  ;;  %v260_v7 = vld [vmem:[#allocation7 + $0x278] sm:$0xff] }
 0x2ff   :  { %7485 = vmatprep.subr.bf16.mxu1 %v10557_v62  ;;  %v515_v62 = vld [vmem:[#allocation7 + $0xa70] sm:$0xff]  ;;  %v10605_v17 = vcombine.high %v256_v13, %v260_v7 }
 0x300   :  { %7226 = vmatpush1.bf16.msra.mxu0 %v10802_v57  ;;  %v511_v57 = vld [vmem:[#allocation7 + $0xa50] sm:$0xff] }
 0x301   :  { %7227 = vmatprep.subr.bf16.mxu0 %v10811_v8  ;;  %v10596_v8 = vcombine.low %v248_v53, %v252_v1  ;;  %v10859_v18 = vcombine.high %v511_v57, %v515_v62  ;;  %v10858_v29 = vcombine.low %v511_v57, %v515_v62  ;;  %v304_v62 = vld [vmem:[#allocation7 + $0x3d8] sm:$0xff] }
 0x302   :  { %7486 = vmatpush1.bf16.msra.mxu1 %v10556_v28  ;;  %v268_v28 = vld [vmem:[#allocation7 + $0x2b8] sm:$0xff] }
 0x303   :  { %7487 = vmatprep.subr.bf16.mxu1 %v10565_v22  ;;  %v523_v22 = vld [vmem:[#allocation7 + $0xab0] sm:$0xff]  ;;  %v10613_v31 = vcombine.high %v264_v27, %v268_v28 }
 0x304   :  { %7228 = vmatpush1.bf16.msra.mxu0 %v10810_v20  ;;  %v519_v20 = vld [vmem:[#allocation7 + $0xa90] sm:$0xff] }
 0x305   :  { %7229 = vmatprep.subr.bf16.mxu0 %v10819_v58  ;;  %v10604_v58 = vcombine.low %v256_v13, %v260_v7  ;;  %v10867_v32 = vcombine.high %v519_v20, %v523_v22  ;;  %v10866_v0 = vcombine.low %v519_v20, %v523_v22  ;;  %v312_v22 = vld [vmem:[#allocation7 + $0x418] sm:$0xff] }
 0x306   :  { %7488 = vmatpush1.bf16.msra.mxu1 %v10564_v60  ;;  %v276_v60 = vld [vmem:[#allocation7 + $0x2f8] sm:$0xff] }
 0x307   :  { %7489 = vmatprep.subr.bf16.mxu1 %v10573_v35  ;;  %v531_v35 = vld [vmem:[#allocation7 + $0xaf0] sm:$0xff]  ;;  %v10621_v37 = vcombine.high %v272_v59, %v276_v60 }
 0x308   :  { %7230 = vmatpush1.bf16.msra.mxu0 %v10818_v34  ;;  %v527_v34 = vld [vmem:[#allocation7 + $0xad0] sm:$0xff] }
 0x309   :  { %7231 = vmatprep.subr.bf16.mxu0 %v10827_v61  ;;  %v10612_v61 = vcombine.low %v264_v27, %v268_v28  ;;  %v10875_v39 = vcombine.high %v527_v34, %v531_v35  ;;  %v10874_v46 = vcombine.low %v527_v34, %v531_v35  ;;  %v320_v35 = vld [vmem:[#allocation7 + $0x458] sm:$0xff] }
 0x30a   :  { %7490 = vmatpush1.bf16.msra.mxu1 %v10572_v42  ;;  %v284_v42 = vld [vmem:[#allocation7 + $0x338] sm:$0xff] }
 0x30b   :  { %7491 = vmatprep.subr.bf16.mxu1 %v10581_v44  ;;  %v539_v44 = vld [vmem:[#allocation7 + $0xb30] sm:$0xff]  ;;  %v10629_v47 = vcombine.high %v280_v41, %v284_v42 }
 0x30c   :  { %7232 = vmatpush1.bf16.msra.mxu0 %v10826_v43  ;;  %v535_v43 = vld [vmem:[#allocation7 + $0xb10] sm:$0xff] }
 0x30d   :  { %7233 = vmatprep.subr.bf16.mxu0 %v10835_v45  ;;  %v10620_v45 = vcombine.low %v272_v59, %v276_v60  ;;  %v10883_v23 = vcombine.high %v535_v43, %v539_v44  ;;  %v10882_v53 = vcombine.low %v535_v43, %v539_v44  ;;  %v328_v44 = vld [vmem:[#allocation7 + $0x498] sm:$0xff] }
 0x30e   :  { %7492 = vmatpush1.bf16.msra.mxu1 %v10580_v49  ;;  %v292_v49 = vld [vmem:[#allocation7 + $0x378] sm:$0xff] }
 0x30f   :  { %7493 = vmatprep.subr.bf16.mxu1 %v10589_v51  ;;  %v547_v51 = vld [vmem:[#allocation7 + $0xb70] sm:$0xff]  ;;  %v10637_v1 = vcombine.high %v288_v24, %v292_v49 }
 0x310   :  { %7234 = vmatpush1.bf16.msra.mxu0 %v10834_v50  ;;  %v543_v50 = vld [vmem:[#allocation7 + $0xb50] sm:$0xff] }
 0x311   :  { %7235 = vmatprep.subr.bf16.mxu0 %v10843_v52  ;;  %v10628_v52 = vcombine.low %v280_v41, %v284_v42  ;;  %v10891_v4 = vcombine.high %v543_v50, %v547_v51  ;;  %v10890_v13 = vcombine.low %v543_v50, %v547_v51  ;;  %v1207_v50 = vlaneseq }
 0x312   :  { %7494 = vmatpush1.bf16.msra.mxu1 %v10588_v6  ;;  %v300_v6 = vld [vmem:[#allocation7 + $0x3b8] sm:$0xff] }
 0x313   :  { %7495 = vmatprep.subr.bf16.mxu1 %v10597_v38  ;;  %v555_v38 = vld [vmem:[#allocation7 + $0xbb0] sm:$0xff]  ;;  %v10645_v7 = vcombine.high %v296_v5, %v300_v6 }
 0x314   :  { %7236 = vmatpush1.bf16.msra.mxu0 %v10842_v9  ;;  %v551_v9 = vld [vmem:[#allocation7 + $0xb90] sm:$0xff] }
 0x315   :  { %7237 = vmatprep.subr.bf16.mxu0 %v10851_v12  ;;  %v10636_v12 = vcombine.low %v288_v24, %v292_v49  ;;  %v10899_v57 = vcombine.high %v551_v9, %v555_v38  ;;  %v10898_v27 = vcombine.low %v551_v9, %v555_v38  ;;  %v13185_v9 = vshrl.u32 %v1207_v50, 7  ;;  %v627_v50 = vld [vmem:[#allocation7 + $0xdf0] sm:$0xff] }
 0x316   :  { %7496 = vmatpush1.bf16.msra.mxu1 %v10596_v8  ;;  %v308_v8 = vld [vmem:[#allocation7 + $0x3f8] sm:$0xff] }
 0x317   :  { %7497 = vmatprep.subr.bf16.mxu1 %v10605_v17  ;;  %v563_v17 = vld [vmem:[#allocation7 + $0xbf0] sm:$0xff]  ;;  %v10653_v28 = vcombine.high %v304_v62, %v308_v8 }
 0x318   :  { %7238 = vmatpush1.bf16.msra.mxu0 %v10850_v14  ;;  %v559_v14 = vld [vmem:[#allocation7 + $0xbd0] sm:$0xff] }
 0x319   :  { %7239 = vmatprep.subr.bf16.mxu0 %v10859_v18  ;;  %v10644_v18 = vcombine.low %v296_v5, %v300_v6  ;;  %v10907_v20 = vcombine.high %v559_v14, %v563_v17  ;;  %v10906_v59 = vcombine.low %v559_v14, %v563_v17  ;;  %v13188_v14 = vsub.s32 0, %v13185_v9 }
 0x31a   :  { %7498 = vmatpush1.bf16.msra.mxu1 %v10604_v58  ;;  %v316_v58 = vld [vmem:[#allocation7 + $0x438] sm:$0xff] }
 0x31b   :  { %7499 = vmatprep.subr.bf16.mxu1 %v10613_v31  ;;  %v571_v31 = vld [vmem:[#allocation7 + $0xc30] sm:$0xff]  ;;  %v10661_v60 = vcombine.high %v312_v22, %v316_v58 }
 0x31c   :  { %7240 = vmatpush1.bf16.msra.mxu0 %v10858_v29  ;;  %v567_v29 = vld [vmem:[#allocation7 + $0xc10] sm:$0xff] }
 0x31d   :  { %7241 = vmatprep.subr.bf16.mxu0 %v10867_v32  ;;  %v10652_v32 = vcombine.low %v304_v62, %v308_v8  ;;  %v10915_v34 = vcombine.high %v567_v29, %v571_v31  ;;  %v10914_v41 = vcombine.low %v567_v29, %v571_v31 }
 0x31e   :  { %7500 = vmatpush1.bf16.msra.mxu1 %v10612_v61  ;;  %v324_v61 = vld [vmem:[#allocation7 + $0x478] sm:$0xff] }
 0x31f   :  { %7501 = vmatprep.subr.bf16.mxu1 %v10621_v37  ;;  %v579_v37 = vld [vmem:[#allocation7 + $0xc70] sm:$0xff]  ;;  %v10669_v42 = vcombine.high %v320_v35, %v324_v61 }
 0x320   :  { %7242 = vmatpush1.bf16.msra.mxu0 %v10866_v0  ;;  %v575_v0 = vld [vmem:[#allocation7 + $0xc50] sm:$0xff] }
 0x321   :  { %7243 = vmatprep.subr.bf16.mxu0 %v10875_v39  ;;  %v10660_v39 = vcombine.low %v312_v22, %v316_v58  ;;  %v10923_v43 = vcombine.high %v575_v0, %v579_v37  ;;  %v10922_v24 = vcombine.low %v575_v0, %v579_v37  ;;  %v607_v22 = vld [vmem:[#allocation7 + $0xd50] sm:$0xff] }
 0x322   :  { %7502 = vmatpush1.bf16.msra.mxu1 %v10620_v45  ;;  %v332_v45 = vld [vmem:[#allocation7 + $0x4b8] sm:$0xff]  ;;  %v611_v58 = vld [vmem:[#allocation7 + $0xd70] sm:$0xff] }
 0x323   :  { %7503 = vmatprep.subr.bf16.mxu1 %v10629_v47  ;;  %v587_v47 = vld [vmem:[#allocation7 + $0xcb0] sm:$0xff]  ;;  %v10677_v49 = vcombine.high %v328_v44, %v332_v45 }
 0x324   :  { %7244 = vmatpush1.bf16.msra.mxu0 %v10874_v46  ;;  %v583_v46 = vld [vmem:[#allocation7 + $0xc90] sm:$0xff] }
 0x325   :  { %7245 = vmatprep.subr.bf16.mxu0 %v10883_v23  ;;  %v10668_v23 = vcombine.low %v320_v35, %v324_v61  ;;  %v10931_v51 = vcombine.high %v583_v46, %v587_v47  ;;  %v10930_v5 = vcombine.low %v583_v46, %v587_v47  ;;  %v364_v35 = vld [vmem:[#allocation7 + $0x5b8] sm:$0xff]  ;;  %v615_v0 = vld [vmem:[#allocation7 + $0xd90] sm:$0xff] }
 0x326   :  { %7504 = vmatpush1.bf16.msra.mxu1 %v10628_v52  ;;  %v336_v52 = vld [vmem:[#allocation7 + $0x4d8] sm:$0xff]  ;;  %v619_v37 = vld [vmem:[#allocation7 + $0xdb0] sm:$0xff] }
 0x327   :  { %7505 = vmatprep.subr.bf16.mxu1 %v10637_v1  ;;  %v591_v1 = vld [vmem:[#allocation7 + $0xcd0] sm:$0xff]  ;;  %v372_v46 = vld [vmem:[#allocation7 + $0x5f8] sm:$0xff] }
 0x328   :  { %7246 = vmatpush1.bf16.msra.mxu0 %v10882_v53  ;;  %v340_v53 = vld [vmem:[#allocation7 + $0x4f8] sm:$0xff] }
 0x329   :  { %7247 = vmatprep.subr.bf16.mxu0 %v10891_v4  ;;  %v595_v4 = vld [vmem:[#allocation7 + $0xcf0] sm:$0xff]  ;;  %v10685_v6 = vcombine.high %v336_v52, %v340_v53  ;;  %v10684_v62 = vcombine.low %v336_v52, %v340_v53 }
 0x32a   :  { %7506 = vmatpush1.bf16.msra.mxu1 %v10636_v12  ;;  %v10939_v38 = vcombine.high %v591_v1, %v595_v4  ;;  %v344_v12 = vld [vmem:[#allocation7 + $0x518] sm:$0xff]  ;;  %v10938_v8 = vcombine.low %v591_v1, %v595_v4 }
 0x32b   :  { %7507 = vmatprep.subr.bf16.mxu1 %v10645_v7  ;;  %v599_v7 = vld [vmem:[#allocation7 + $0xd10] sm:$0xff] }
 0x32c   :  { %7248 = vmatpush1.bf16.msra.mxu0 %v10890_v13  ;;  %v348_v13 = vld [vmem:[#allocation7 + $0x538] sm:$0xff] }
 0x32d   :  { %7249 = vmatprep.subr.bf16.mxu0 %v10899_v57  ;;  %v603_v57 = vld [vmem:[#allocation7 + $0xd30] sm:$0xff]  ;;  %v10692_v29 = vcombine.low %v344_v12, %v348_v13 }
 0x32e   :  { %7508 = vmatpush1.bf16.msra.mxu1 %v10644_v18  ;;  %v10947_v17 = vcombine.high %v599_v7, %v603_v57  ;;  %v352_v18 = vld [vmem:[#allocation7 + $0x558] sm:$0xff]  ;;  %v10946_v31 = vcombine.low %v599_v7, %v603_v57 }
 0x32f   :  { %7509 = vmatprep.subr.bf16.mxu1 %v10653_v28  ;;  %v13190_v28 = vld [vmem:[#allocation9] sm:$0xff]  ;;  %v376_v7 = vld [vmem:[#allocation7 + $0x618] sm:$0xff] }
 0x330   :  { %7250 = vmatpush1.bf16.msra.mxu0 %v10898_v27  ;;  %v356_v27 = vld [vmem:[#allocation7 + $0x578] sm:$0xff] }
 0x331   :  { %7251 = vmatprep.subr.bf16.mxu0 %v10907_v20  ;;  %v13193_v20 = vsub.s32 1, %v13185_v9 }
 0x332   :  { %7510 = vmatpush1.bf16.msra.mxu1 %v10652_v32  ;;  %v10701_v32 = vcombine.high %v352_v18, %v356_v27 }
 0x333   :  { %7522 = vmatprep.subr.bf16.mxu1 %v10661_v60  ;;  %v10955_v60 = vcombine.high %v607_v22, %v611_v58  ;;  %v1214_v61 = vrot.slane %v13190_v28, %v13193_v20 }
 0x334   :  { %7252 = vmatpush1.bf16.msra.mxu0 %v10906_v59  ;;  %v1210_v59 = vrot.slane %v13190_v28, %v13188_v14 }
 0x335   :  { %7264 = vmatprep.subr.bf16.mxu0 %v10915_v34  ;;  %7512 = vmatmul.mubr.bf16.vlgmr.msra.gmra.mrb[8].mxu1 %v13059_v21  ;;  %v10676_v21 = vcombine.low %v328_v44, %v332_v45  ;;  %v360_v34 = vld [vmem:[#allocation7 + $0x598] sm:$0xff]  ;;  %v10963_v44 = vcombine.high %v615_v0, %v619_v37  ;;  %v6484_v47 = vadd.f32 %v13127_v19, %v1214_v61 }
 0x336   :  { %7523 = vmatpush1.bf16.msra.mxu1 %v10660_v39  ;;  %7554 = vmatprep.mubr.bf16.mxu1 %v13053_v63  ;;  %v10693_v63 = vcombine.high %v344_v12, %v348_v13  ;;  %v10700_v39 = vcombine.low %v352_v18, %v356_v27  ;;  %v368_v45 = vld [vmem:[#allocation7 + $0x5d8] sm:$0xff]  ;;  %v6488_v52 = vadd.f32 %v13131_v54, %v1214_v61 }
 0x337   :  { %7254 = vmatmul.mubr.bf16.vlgmr.msra.gmra.mrb[4].mxu0 %v13083_v40  ;;  %7524 = vmatprep.subr.bf16.mxu1 %v10669_v42  ;;  %v10709_v42 = vcombine.high %v360_v34, %v364_v35  ;;  %v10708_v4 = vcombine.low %v360_v34, %v364_v35  ;;  %v639_v34 = vld [vmem:[#allocation7 + $0xe50] sm:$0xff] }
 0x338   :  { %7265 = vmatpush1.bf16.msra.mxu0 %v10914_v41  ;;  %7296 = vmatprep.mubr.bf16.mxu0 %v13087_v48  ;;  %v10954_v41 = vcombine.low %v607_v22, %v611_v58  ;;  %v643_v35 = vld [vmem:[#allocation7 + $0xe70] sm:$0xff] }
 0x339   :  { %7266 = vmatprep.subr.bf16.mxu0 %v10923_v43  ;;  %v6482_v43 = vadd.f32 %v13125_v15, %v1210_v59 }
 0x33a   :  { %7525 = vmatpush1.bf16.msra.mxu1 %v10668_v23 }
 0x33b   :  { %7526 = vmatprep.subr.bf16.mxu1 %v10677_v49  ;;  %v623_v49 = vld [vmem:[#allocation7 + $0xdd0] sm:$0xff] }
 0x33c   :  { %7267 = vmatpush1.bf16.msra.mxu0 %v10922_v24  ;;  %v13201_v24 = vstv %s162_s9  ;;  %v10971_v13 = vcombine.high %v623_v49, %v627_v50  ;;  %v10970_v27 = vcombine.low %v623_v49, %v627_v50  ;;  %v10986_v49 = vcombine.low %v639_v34, %v643_v35 }
 0x33d   :  { %7268 = vmatprep.subr.bf16.mxu0 %v10931_v51  ;;  %v6486_v51 = vadd.f32 %v13129_v25, %v1210_v59  ;;  %v380_v25 = vld [vmem:[#allocation7 + $0x638] sm:$0xff] }
 0x33e   :  { %7527 = vmatpush1.bf16.msra.mxu1 %v10676_v21  ;;  %v10725_v22 = vcombine.high %v376_v7, %v380_v25  ;;  %v388_v59 = vld [vmem:[#allocation7 + $0x678] sm:$0xff] }
 0x33f   :  { %7528 = vmatprep.subr.bf16.mxu1 %v10685_v6  ;;  %v10717_v6 = vcombine.high %v368_v45, %v372_v46 }
 0x340   :  { %7269 = vmatpush1.bf16.msra.mxu0 %v10930_v5  ;;  %v10962_v5 = vcombine.low %v615_v0, %v619_v37  ;;  %v10724_v37 = vcombine.low %v376_v7, %v380_v25 }
 0x341   :  { %7270 = vmatprep.subr.bf16.mxu0 %v10939_v38 }
 0x342   :  { %7529 = vmatpush1.bf16.msra.mxu1 %v10684_v62  ;;  %v631_v62 = vld [vmem:[#allocation7 + $0xe10] sm:$0xff] }
 0x343   :  { %7530 = vmatprep.subr.bf16.mxu1 %v10693_v63 }
 0x344   :  { %7271 = vmatpush1.bf16.msra.mxu0 %v10938_v8  ;;  %v635_v8 = vld [vmem:[#allocation7 + $0xe30] sm:$0xff] }
 0x345   :  { %7272 = vmatprep.subr.bf16.mxu0 %v10947_v17  ;;  %v10716_v17 = vcombine.low %v368_v45, %v372_v46  ;;  %v396_v45 = vld [vmem:[#allocation7 + $0x6b8] sm:$0xff]  ;;  %v647_v46 = vld [vmem:[#allocation7 + $0xe90] sm:$0xff] }
 0x346   :  { %7531 = vmatpush1.bf16.msra.mxu1 %v10692_v29 }
 0x347   :  { %7532 = vmatprep.subr.bf16.mxu1 %v10701_v32  ;;  %v384_v32 = vld [vmem:[#allocation7 + $0x658] sm:$0xff] }
 0x348   :  { %7273 = vmatpush1.bf16.msra.mxu0 %v10946_v31  ;;  %v10979_v31 = vcombine.high %v631_v62, %v635_v8 }
 0x349   :  { %7274 = vmatprep.subr.bf16.mxu0 %v10955_v60 }
 0x34a   :  { %v6782_v23 = vpop.f32.mrb[0].mxu0  ;;  %7533 = vmatpush1.bf16.msra.mxu1 %v10700_v39 }
 0x34b   :  { %v11910_v53 = vadd.f32 %v6782_v23, %v6482_v43  ;;  %v6784_v1 = vpop.f32.mrb[1].mxu0  ;;  %7534 = vmatprep.subr.bf16.mxu1 %v10709_v42  ;;  %v10733_v42 = vcombine.high %v384_v32, %v388_v59  ;;  %v10987_v43 = vcombine.high %v639_v34, %v643_v35  ;;  %v10732_v23 = vcombine.low %v384_v32, %v388_v59  ;;  %v679_v32 = vld [vmem:[#allocation7 + $0xf90] sm:$0xff] }
 0x34c   :  { %v11912_v15 = vadd.f32 %v6784_v1, %v6484_v47  ;;  %v6786_v21 = vpop.f32.mrb[2].mxu0  ;;  %7275 = vmatpush1.bf16.msra.mxu0 %v10954_v41  ;;  %v10978_v41 = vcombine.low %v631_v62, %v635_v8  ;;  %v651_v47 = vld [vmem:[#allocation7 + $0xeb0] sm:$0xff]  ;;  %v416_v62 = vld [vmem:[#allocation7 + $0x758] sm:$0xff] }
 0x34d   :  { %v7840_v19 = vmul.f32 %v11910_v53, %v13201_v24  ;;  %v11914_v38 = vadd.f32 %v6786_v21, %v6486_v51  ;;  %v6788_v12 = vpop.f32.mrb[3].mxu0  ;;  %7276 = vmatprep.subr.bf16.mxu0 %v10963_v44  ;;  %vm7823_vm0 = vcmp.gt.f32.partialorder %v11910_v53, 0.0  ;;  %v392_v44 = vld [vmem:[#allocation7 + $0x698] sm:$0xff]  ;;  %v10995_v51 = vcombine.high %v647_v46, %v651_v47  ;;  %v655_v1 = vld [vmem:[#allocation7 + $0xed0] sm:$0xff] }
 0x34e   :  { %v7841_v54 = vmul.f32 %v11912_v15, %v13201_v24  ;;  %v11916_v57 = vadd.f32 %v6788_v12, %v6488_v52  ;;  %vm7824_vm1 = vcmp.gt.f32.partialorder %v11912_v15, 0.0  ;;  %7535 = vmatpush1.bf16.msra.mxu1 %v10708_v4  ;;  %v10741_v50 = vcombine.high %v392_v44, %v396_v45  ;;  %v400_v52 = vld [vmem:[#allocation7 + $0x6d8] sm:$0xff]  ;;  %v659_v4 = vld [vmem:[#allocation7 + $0xef0] sm:$0xff] }
 0x34f   :  { %vm7831_vm2 = vcmp.gt.f32.partialorder %v11914_v38, 0.0  ;;  %v7848_v63 = vmul.f32 %v11914_v38, %v13201_v24  ;;  %7536 = vmatprep.subr.bf16.mxu1 %v10717_v6  ;;  %v7856_v58 = vsel %vm7823_vm0, %v11910_v53, %v7840_v19  ;;  %v404_v53 = vld [vmem:[#allocation7 + $0x6f8] sm:$0xff]  ;;  %v10994_v21 = vcombine.low %v647_v46, %v651_v47  ;;  %v663_v12 = vld [vmem:[#allocation7 + $0xf10] sm:$0xff] }
 0x350   :  { %vm7832_vm3 = vcmp.gt.f32.partialorder %v11916_v57, 0.0  ;;  %v7849_v18 = vmul.f32 %v11916_v57, %v13201_v24  ;;  %7277 = vmatpush1.bf16.msra.mxu0 %v10962_v5  ;;  %v7857_v61 = vsel %vm7824_vm1, %v11912_v15, %v7841_v54  ;;  %v10740_v15 = vcombine.low %v392_v44, %v396_v45  ;;  %v408_v19 = vld [vmem:[#allocation7 + $0x718] sm:$0xff]  ;;  %v683_v59 = vld [vmem:[#allocation7 + $0xfb0] sm:$0xff] }
 0x351   :  { %v7864_v29 = vsel %vm7831_vm2, %v11914_v38, %v7848_v63  ;;  %7278 = vmatprep.subr.bf16.mxu0 %v10971_v13  ;;  %v10749_v5 = vcombine.high %v400_v52, %v404_v53  ;;  %v11003_v6 = vcombine.high %v655_v1, %v659_v4  ;;  %v412_v38 = vld [vmem:[#allocation7 + $0x738] sm:$0xff]  ;;  %v667_v13 = vld [vmem:[#allocation7 + $0xf30] sm:$0xff]  ;;  %v10748_v7 = vcombine.low %v400_v52, %v404_v53 }
 0x352   :  { %v13210_v60 = vpack.c.bf16 %v7864_v29, %v7856_v58  ;;  %v7865_v0 = vsel %vm7832_vm3, %v11916_v57, %v7849_v18  ;;  %7537 = vmatpush1.bf16.msra.mxu1 %v10716_v17  ;;  %v11002_v25 = vcombine.low %v655_v1, %v659_v4  ;;  %v10757_v54 = vcombine.high %v408_v19, %v412_v38  ;;  %v420_v8 = vld [vmem:[#allocation7 + $0x778] sm:$0xff]  ;;  %v671_v63 = vld [vmem:[#allocation7 + $0xf50] sm:$0xff] }
 0x353   :  { %v13214_v39 = vpack.c.bf16 %v7865_v0, %v7857_v61  ;;  %7538 = vmatprep.subr.bf16.mxu1 %v10725_v22  ;;  %v11011_v57 = vcombine.high %v663_v12, %v667_v13  ;;  %v675_v17 = vld [vmem:[#allocation7 + $0xf70] sm:$0xff]  ;;  %v10756_v18 = vcombine.low %v408_v19, %v412_v38  ;;  %v10765_v22 = vcombine.high %v416_v62, %v420_v8  ;;  %v424_v29 = vld [vmem:[#allocation7 + $0x798] sm:$0xff] }
 0x354   :  { %7279 = vmatpush1.bf16.msra.mxu0 %v10970_v27  ;;  %v11010_v27 = vcombine.low %v663_v12, %v667_v13  ;;  %v11019_v58 = vcombine.high %v671_v63, %v675_v17  ;;  %v10764_v34 = vcombine.low %v416_v62, %v420_v8  ;;  %v11018_v35 = vcombine.low %v671_v63, %v675_v17 }
 0x355   :  { %7280 = vmatprep.subr.bf16.mxu0 %v10979_v31  ;;  %v428_v31 = vld [vmem:[#allocation7 + $0x7b8] sm:$0xff]  ;;  %v11027_v0 = vcombine.high %v679_v32, %v683_v59  ;;  %v11026_v45 = vcombine.low %v679_v32, %v683_v59 }
 0x356   :  { %7539 = vmatpush1.bf16.msra.mxu1 %v10724_v37  ;;  %v10773_v61 = vcombine.high %v424_v29, %v428_v31  ;;  %v432_v37 = vld [vmem:[#allocation7 + $0x7d8] sm:$0xff]  ;;  %v10772_v44 = vcombine.low %v424_v29, %v428_v31 }
 0x357   :  { %7540 = vmatprep.subr.bf16.mxu1 %v10733_v42  ;;  %v687_v42 = vld [vmem:[#allocation7 + $0xfd0] sm:$0xff]  ;;  %v472_v59 = vld [vmem:[#allocation7 + $0x918] sm:$0xff] }
 0x358   :  { %7281 = vmatpush1.bf16.msra.mxu0 %v10978_v41  ;;  %v436_v41 = vld [vmem:[#allocation7 + $0x7f8] sm:$0xff] }
 0x359   :  { %7282 = vmatprep.subr.bf16.mxu0 %v10987_v43  ;;  %v691_v43 = vld [vmem:[#allocation7 + $0xff0] sm:$0xff]  ;;  %v10781_v46 = vcombine.high %v432_v37, %v436_v41  ;;  %v10780_v52 = vcombine.low %v432_v37, %v436_v41 }
 0x35a   :  { %7541 = vmatpush1.bf16.msra.mxu1 %v10732_v23  ;;  %v11035_v47 = vcombine.high %v687_v42, %v691_v43  ;;  %v440_v23 = vld [vmem:[#allocation7 + $0x818] sm:$0xff]  ;;  %v11034_v53 = vcombine.low %v687_v42, %v691_v43 }
 0x35b   :  { %7542 = vmatprep.subr.bf16.mxu1 %v10741_v50  ;;  %v695_v50 = vld [vmem:[#allocation7 + $0x1010] sm:$0xff]  ;;  %v480_v42 = vld [vmem:[#allocation7 + $0x958] sm:$0xff] }
 0x35c   :  { %7283 = vmatpush1.bf16.msra.mxu0 %v10986_v49  ;;  %v444_v49 = vld [vmem:[#allocation7 + $0x838] sm:$0xff] }
 0x35d   :  { %7284 = vmatprep.subr.bf16.mxu0 %v10995_v51  ;;  %v699_v51 = vld [vmem:[#allocation7 + $0x1030] sm:$0xff]  ;;  %v10789_v1 = vcombine.high %v440_v23, %v444_v49  ;;  %v10788_v19 = vcombine.low %v440_v23, %v444_v49  ;;  %v484_v43 = vld [vmem:[#allocation7 + $0x978] sm:$0xff] }
 0x35e   :  { %7543 = vmatpush1.bf16.msra.mxu1 %v10740_v15  ;;  %v11043_v4 = vcombine.high %v695_v50, %v699_v51  ;;  %v448_v15 = vld [vmem:[#allocation7 + $0x858] sm:$0xff]  ;;  %v11042_v38 = vcombine.low %v695_v50, %v699_v51  ;;  %v10829_v23 = vcombine.high %v480_v42, %v484_v43 }
 0x35f   :  { %7544 = vmatprep.subr.bf16.mxu1 %v10749_v5  ;;  %v703_v5 = vld [vmem:[#allocation7 + $0x1050] sm:$0xff]  ;;  %v488_v50 = vld [vmem:[#allocation7 + $0x998] sm:$0xff] }
 0x360   :  { %7285 = vmatpush1.bf16.msra.mxu0 %v10994_v21  ;;  %v452_v21 = vld [vmem:[#allocation7 + $0x878] sm:$0xff] }
 0x361   :  { %7286 = vmatprep.subr.bf16.mxu0 %v11003_v6  ;;  %v707_v6 = vld [vmem:[#allocation7 + $0x1070] sm:$0xff]  ;;  %v10797_v12 = vcombine.high %v448_v15, %v452_v21  ;;  %v10796_v62 = vcombine.low %v448_v15, %v452_v21  ;;  %v492_v51 = vld [vmem:[#allocation7 + $0x9b8] sm:$0xff] }
 0x362   :  { %7545 = vmatpush1.bf16.msra.mxu1 %v10748_v7  ;;  %v11051_v13 = vcombine.high %v703_v5, %v707_v6  ;;  %v456_v7 = vld [vmem:[#allocation7 + $0x898] sm:$0xff]  ;;  %v11050_v8 = vcombine.low %v703_v5, %v707_v6  ;;  %v10837_v15 = vcombine.high %v488_v50, %v492_v51 }
 0x363   :  { %7546 = vmatprep.subr.bf16.mxu1 %v10757_v54  ;;  %v711_v54 = vld [vmem:[#allocation7 + $0x1090] sm:$0xff]  ;;  %v496_v5 = vld [vmem:[#allocation7 + $0x9d8] sm:$0xff] }
 0x364   :  { %7287 = vmatpush1.bf16.msra.mxu0 %v11002_v25  ;;  %v460_v25 = vld [vmem:[#allocation7 + $0x8b8] sm:$0xff] }
 0x365   :  { %7288 = vmatprep.subr.bf16.mxu0 %v11011_v57  ;;  %v715_v57 = vld [vmem:[#allocation7 + $0x10b0] sm:$0xff]  ;;  %v10805_v63 = vcombine.high %v456_v7, %v460_v25  ;;  %v500_v6 = vld [vmem:[#allocation7 + $0x9f8] sm:$0xff] }
 0x366   :  { %7547 = vmatpush1.bf16.msra.mxu1 %v10756_v18  ;;  %v11059_v17 = vcombine.high %v711_v54, %v715_v57  ;;  %v464_v18 = vld [vmem:[#allocation7 + $0x8d8] sm:$0xff]  ;;  %v11058_v29 = vcombine.low %v711_v54, %v715_v57 }
 0x367   :  { %7548 = vmatprep.subr.bf16.mxu1 %v10765_v22  ;;  %v719_v22 = vld [vmem:[#allocation7 + $0x10d0] sm:$0xff]  ;;  %v504_v54 = vld [vmem:[#allocation7 + $0xa18] sm:$0xff] }
 0x368   :  { %7289 = vmatpush1.bf16.msra.mxu0 %v11010_v27  ;;  %v468_v27 = vld [vmem:[#allocation7 + $0x8f8] sm:$0xff] }
 0x369   :  { %7290 = vmatprep.subr.bf16.mxu0 %v11019_v58  ;;  %v723_v58 = vld [vmem:[#allocation7 + $0x10f0] sm:$0xff]  ;;  %v10813_v31 = vcombine.high %v464_v18, %v468_v27  ;;  %v508_v57 = vld [vmem:[#allocation7 + $0xa38] sm:$0xff] }
 0x36a   :  { %7549 = vmatpush1.bf16.msra.mxu1 %v10764_v34  ;;  %v11067_v32 = vcombine.high %v719_v22, %v723_v58  ;;  %v476_v34 = vld [vmem:[#allocation7 + $0x938] sm:$0xff]  ;;  %v11066_v37 = vcombine.low %v719_v22, %v723_v58 }
 0x36b   :  { %7550 = vmatprep.subr.bf16.mxu1 %v10773_v61  ;;  %v731_v61 = vld [vmem:[#allocation7 + $0x1130] sm:$0xff]  ;;  %v10821_v41 = vcombine.high %v472_v59, %v476_v34  ;;  %v512_v22 = vld [vmem:[#allocation7 + $0xa58] sm:$0xff] }
 0x36c   :  { %7291 = vmatpush1.bf16.msra.mxu0 %v11018_v35  ;;  %v727_v35 = vld [vmem:[#allocation7 + $0x1110] sm:$0xff]  ;;  %v516_v58 = vld [vmem:[#allocation7 + $0xa78] sm:$0xff] }
 0x36d   :  { %7292 = vmatprep.subr.bf16.mxu0 %v11027_v0  ;;  %v10812_v0 = vcombine.low %v464_v18, %v468_v27  ;;  %v10853_v18 = vcombine.high %v504_v54, %v508_v57 }
 0x36e   :  { %7551 = vmatpush1.bf16.msra.mxu1 %v10772_v44  ;;  %v735_v44 = vld [vmem:[#allocation7 + $0x1150] sm:$0xff] }
 0x36f   :  { %7552 = vmatprep.subr.bf16.mxu1 %v10781_v46  ;;  %v10820_v46 = vcombine.low %v472_v59, %v476_v34  ;;  %v10861_v59 = vcombine.high %v512_v22, %v516_v58 }
 0x370   :  { %7293 = vmatpush1.bf16.msra.mxu0 %v11026_v45  ;;  %v739_v45 = vld [vmem:[#allocation7 + $0x1170] sm:$0xff] }
 0x371   :  { %7294 = vmatprep.subr.bf16.mxu0 %v11035_v47  ;;  %v11074_v47 = vcombine.low %v727_v35, %v731_v61  ;;  %v11083_v49 = vcombine.high %v735_v44, %v739_v45 }
 0x372   :  { %7553 = vmatpush1.bf16.msra.mxu1 %v10780_v52  ;;  %v743_v52 = vld [vmem:[#allocation7 + $0x1190] sm:$0xff] }
 0x373   :  { %7565 = vmatprep.subr.bf16.mxu1 %v10789_v1  ;;  %v10828_v1 = vcombine.low %v480_v42, %v484_v43 }
 0x374   :  { %7295 = vmatpush1.bf16.msra.mxu0 %v11034_v53  ;;  %v747_v53 = vld [vmem:[#allocation7 + $0x11b0] sm:$0xff] }
 0x375   :  { %7307 = vmatprep.subr.bf16.mxu0 %v11043_v4  ;;  %7555 = vmatmul.mubr.bf16.vlgmr.msra.gmra.mrb[8].mxu1 %v13067_v26  ;;  %v10804_v26 = vcombine.low %v456_v7, %v460_v25  ;;  %v11082_v4 = vcombine.low %v735_v44, %v739_v45  ;;  %v11091_v21 = vcombine.high %v743_v52, %v747_v53  ;;  %v528_v44 = vld [vmem:[#allocation7 + $0xad8] sm:$0xff] }
 0x376   :  { %7566 = vmatpush1.bf16.msra.mxu1 %v10788_v19  ;;  %7597 = vmatprep.mubr.bf16.mxu1 %v13071_v55  ;;  %v11075_v55 = vcombine.high %v727_v35, %v731_v61  ;;  %v751_v19 = vld [vmem:[#allocation7 + $0x11d0] sm:$0xff]  ;;  %v10845_v7 = vcombine.high %v496_v5, %v500_v6  ;;  %v520_v35 = vld [vmem:[#allocation7 + $0xa98] sm:$0xff] }
 0x377   :  { %7297 = vmatmul.mubr.bf16.vlgmr.msra.gmra.mrb[4].mxu0 %v13099_v2  ;;  %7567 = vmatprep.subr.bf16.mxu1 %v10797_v12  ;;  %v10836_v12 = vcombine.low %v488_v50, %v492_v51  ;;  %v524_v61 = vld [vmem:[#allocation7 + $0xab8] sm:$0xff] }
 0x378   :  { %7308 = vmatpush1.bf16.msra.mxu0 %v11042_v38  ;;  %7339 = vmatprep.mubr.bf16.mxu0 %v13103_v10  ;;  %v755_v38 = vld [vmem:[#allocation7 + $0x11f0] sm:$0xff]  ;;  %v10869_v42 = vcombine.high %v520_v35, %v524_v61  ;;  %v532_v45 = vld [vmem:[#allocation7 + $0xaf8] sm:$0xff] }
 0x379   :  { %7309 = vmatprep.subr.bf16.mxu0 %v11051_v13  ;;  %v11090_v13 = vcombine.low %v743_v52, %v747_v53  ;;  %v11099_v25 = vcombine.high %v751_v19, %v755_v38  ;;  %v10877_v50 = vcombine.high %v528_v44, %v532_v45  ;;  %v536_v52 = vld [vmem:[#allocation7 + $0xb18] sm:$0xff] }
 0x37a   :  { %7568 = vmatpush1.bf16.msra.mxu1 %v10796_v62  ;;  %v759_v62 = vld [vmem:[#allocation7 + $0x1210] sm:$0xff]  ;;  %v540_v53 = vld [vmem:[#allocation7 + $0xb38] sm:$0xff] }
 0x37b   :  { %7569 = vmatprep.subr.bf16.mxu1 %v10805_v63  ;;  %v10844_v63 = vcombine.low %v496_v5, %v500_v6  ;;  %v10885_v5 = vcombine.high %v536_v52, %v540_v53 }
 0x37c   :  { %7310 = vmatpush1.bf16.msra.mxu0 %v11050_v8  ;;  %v763_v8 = vld [vmem:[#allocation7 + $0x1230] sm:$0xff] }
 0x37d   :  { %7311 = vmatprep.subr.bf16.mxu0 %v11059_v17  ;;  %v11098_v17 = vcombine.low %v751_v19, %v755_v38  ;;  %v11107_v27 = vcombine.high %v759_v62, %v763_v8  ;;  %v544_v19 = vld [vmem:[#allocation7 + $0xb58] sm:$0xff] }
 0x37e   :  { %7570 = vmatpush1.bf16.msra.mxu1 %v10804_v26  ;;  %v767_v26 = vld [vmem:[#allocation7 + $0x1250] sm:$0xff]  ;;  %v548_v38 = vld [vmem:[#allocation7 + $0xb78] sm:$0xff] }
 0x37f   :  { %7571 = vmatprep.subr.bf16.mxu1 %v10813_v31  ;;  %v10852_v31 = vcombine.low %v504_v54, %v508_v57  ;;  %v10893_v54 = vcombine.high %v544_v19, %v548_v38 }
 0x380   :  { %7312 = vmatpush1.bf16.msra.mxu0 %v11058_v29  ;;  %v771_v29 = vld [vmem:[#allocation7 + $0x1270] sm:$0xff] }
 0x381   :  { %7313 = vmatprep.subr.bf16.mxu0 %v11067_v32  ;;  %v11106_v32 = vcombine.low %v759_v62, %v763_v8  ;;  %v11115_v34 = vcombine.high %v767_v26, %v771_v29  ;;  %v552_v62 = vld [vmem:[#allocation7 + $0xb98] sm:$0xff] }
 0x382   :  { %7572 = vmatpush1.bf16.msra.mxu1 %v10812_v0  ;;  %v775_v0 = vld [vmem:[#allocation7 + $0x1290] sm:$0xff]  ;;  %v556_v8 = vld [vmem:[#allocation7 + $0xbb8] sm:$0xff] }
 0x383   :  { %7573 = vmatprep.subr.bf16.mxu1 %v10821_v41  ;;  %v10860_v41 = vcombine.low %v512_v22, %v516_v58  ;;  %v10901_v22 = vcombine.high %v552_v62, %v556_v8 }
 0x384   :  { %7314 = vmatpush1.bf16.msra.mxu0 %v11066_v37  ;;  %v779_v37 = vld [vmem:[#allocation7 + $0x12b0] sm:$0xff] }
 0x385   :  { %7315 = vmatprep.subr.bf16.mxu0 %v11075_v55  ;;  %v11114_v55 = vcombine.low %v767_v26, %v771_v29  ;;  %v11123_v43 = vcombine.high %v775_v0, %v779_v37  ;;  %v560_v26 = vld [vmem:[#allocation7 + $0xbd8] sm:$0xff] }
 0x386   :  { %7574 = vmatpush1.bf16.msra.mxu1 %v10820_v46  ;;  %v783_v46 = vld [vmem:[#allocation7 + $0x12d0] sm:$0xff]  ;;  %v564_v29 = vld [vmem:[#allocation7 + $0xbf8] sm:$0xff] }
 0x387   :  { %7575 = vmatprep.subr.bf16.mxu1 %v10829_v23  ;;  %v10868_v23 = vcombine.low %v520_v35, %v524_v61  ;;  %v10909_v35 = vcombine.high %v560_v26, %v564_v29 }
 0x388   :  { %7316 = vmatpush1.bf16.msra.mxu0 %v11074_v47  ;;  %v787_v47 = vld [vmem:[#allocation7 + $0x12f0] sm:$0xff] }
 0x389   :  { %7317 = vmatprep.subr.bf16.mxu0 %v11083_v49  ;;  %v11122_v49 = vcombine.low %v775_v0, %v779_v37  ;;  %v11131_v51 = vcombine.high %v783_v46, %v787_v47  ;;  %v568_v0 = vld [vmem:[#allocation7 + $0xc18] sm:$0xff] }
 0x38a   :  { %7576 = vmatpush1.bf16.msra.mxu1 %v10828_v1  ;;  %v791_v1 = vld [vmem:[#allocation7 + $0x1310] sm:$0xff]  ;;  %v572_v37 = vld [vmem:[#allocation7 + $0xc38] sm:$0xff] }
 0x38b   :  { %7577 = vmatprep.subr.bf16.mxu1 %v10837_v15  ;;  %v10876_v15 = vcombine.low %v528_v44, %v532_v45  ;;  %v10917_v44 = vcombine.high %v568_v0, %v572_v37 }
 0x38c   :  { %7318 = vmatpush1.bf16.msra.mxu0 %v11082_v4  ;;  %v795_v4 = vld [vmem:[#allocation7 + $0x1330] sm:$0xff] }
 0x38d   :  { %7319 = vmatprep.subr.bf16.mxu0 %v11091_v21  ;;  %v11130_v21 = vcombine.low %v783_v46, %v787_v47  ;;  %v11139_v6 = vcombine.high %v791_v1, %v795_v4  ;;  %v576_v46 = vld [vmem:[#allocation7 + $0xc58] sm:$0xff] }
 0x38e   :  { %7578 = vmatpush1.bf16.msra.mxu1 %v10836_v12  ;;  %v799_v12 = vld [vmem:[#allocation7 + $0x1350] sm:$0xff]  ;;  %v580_v47 = vld [vmem:[#allocation7 + $0xc78] sm:$0xff] }
 0x38f   :  { %7579 = vmatprep.subr.bf16.mxu1 %v10845_v7  ;;  %v10884_v7 = vcombine.low %v536_v52, %v540_v53  ;;  %v10925_v52 = vcombine.high %v576_v46, %v580_v47 }
 0x390   :  { %7320 = vmatpush1.bf16.msra.mxu0 %v11090_v13  ;;  %v803_v13 = vld [vmem:[#allocation7 + $0x1370] sm:$0xff] }
 0x391   :  { %7321 = vmatprep.subr.bf16.mxu0 %v11099_v25  ;;  %v11138_v25 = vcombine.low %v791_v1, %v795_v4  ;;  %v11147_v57 = vcombine.high %v799_v12, %v803_v13  ;;  %v584_v1 = vld [vmem:[#allocation7 + $0xc98] sm:$0xff] }
 0x392   :  { %7580 = vmatpush1.bf16.msra.mxu1 %v10844_v63  ;;  %v807_v63 = vld [vmem:[#allocation7 + $0x1390] sm:$0xff]  ;;  %v588_v4 = vld [vmem:[#allocation7 + $0xcb8] sm:$0xff] }
 0x393   :  { %7581 = vmatprep.subr.bf16.mxu1 %v10853_v18  ;;  %v10892_v18 = vcombine.low %v544_v19, %v548_v38  ;;  %v10933_v19 = vcombine.high %v584_v1, %v588_v4 }
 0x394   :  { %7322 = vmatpush1.bf16.msra.mxu0 %v11098_v17  ;;  %v811_v17 = vld [vmem:[#allocation7 + $0x13b0] sm:$0xff] }
 0x395   :  { %7323 = vmatprep.subr.bf16.mxu0 %v11107_v27  ;;  %v11146_v27 = vcombine.low %v799_v12, %v803_v13  ;;  %v11155_v58 = vcombine.high %v807_v63, %v811_v17  ;;  %v592_v12 = vld [vmem:[#allocation7 + $0xcd8] sm:$0xff] }
 0x396   :  { %7582 = vmatpush1.bf16.msra.mxu1 %v10852_v31  ;;  %v815_v31 = vld [vmem:[#allocation7 + $0x13d0] sm:$0xff]  ;;  %v596_v13 = vld [vmem:[#allocation7 + $0xcf8] sm:$0xff] }
 0x397   :  { %7583 = vmatprep.subr.bf16.mxu1 %v10861_v59  ;;  %v10900_v59 = vcombine.low %v552_v62, %v556_v8  ;;  %v600_v8 = vld [vmem:[#allocation7 + $0xd18] sm:$0xff] }
 0x398   :  { %7324 = vmatpush1.bf16.msra.mxu0 %v11106_v32  ;;  %v819_v32 = vld [vmem:[#allocation7 + $0x13f0] sm:$0xff] }
 0x399   :  { %7325 = vmatprep.subr.bf16.mxu0 %v11115_v34  ;;  %v11154_v34 = vcombine.low %v807_v63, %v811_v17  ;;  %v11163_v61 = vcombine.high %v815_v31, %v819_v32  ;;  %v604_v63 = vld [vmem:[#allocation7 + $0xd38] sm:$0xff]  ;;  %v855_v17 = vld [vmem:[#allocation7 + $0x1510] sm:$0xff] }
 0x39a   :  { %7584 = vmatpush1.bf16.msra.mxu1 %v10860_v41  ;;  %v823_v41 = vld [vmem:[#allocation7 + $0x1410] sm:$0xff] }
 0x39b   :  { %7585 = vmatprep.subr.bf16.mxu1 %v10869_v42  ;;  %v10908_v42 = vcombine.low %v560_v26, %v564_v29  ;;  %v608_v26 = vld [vmem:[#allocation7 + $0xd58] sm:$0xff] }
 0x39c   :  { %7326 = vmatpush1.bf16.msra.mxu0 %v11114_v55  ;;  %v827_v55 = vld [vmem:[#allocation7 + $0x1430] sm:$0xff]  ;;  %v612_v29 = vld [vmem:[#allocation7 + $0xd78] sm:$0xff] }
 0x39d   :  { %7327 = vmatprep.subr.bf16.mxu0 %v11123_v43  ;;  %v11162_v43 = vcombine.low %v815_v31, %v819_v32  ;;  %v11171_v45 = vcombine.high %v823_v41, %v827_v55  ;;  %v1217_v31 = vsub.s32 2, %v13185_v9  ;;  %v863_v32 = vld [vmem:[#allocation7 + $0x1550] sm:$0xff] }
 0x39e   :  { %7586 = vmatpush1.bf16.msra.mxu1 %v10868_v23  ;;  %v831_v23 = vld [vmem:[#allocation7 + $0x1450] sm:$0xff] }
 0x39f   :  { %7587 = vmatprep.subr.bf16.mxu1 %v10877_v50  ;;  %v10916_v50 = vcombine.low %v568_v0, %v572_v37  ;;  %v10957_v0 = vcombine.high %v608_v26, %v612_v29 }
 0x3a0   :  { %7328 = vmatpush1.bf16.msra.mxu0 %v11122_v49  ;;  %v835_v49 = vld [vmem:[#allocation7 + $0x1470] sm:$0xff] }
 0x3a1   :  { %7329 = vmatprep.subr.bf16.mxu0 %v11131_v51  ;;  %v11170_v51 = vcombine.low %v823_v41, %v827_v55  ;;  %v11179_v53 = vcombine.high %v831_v23, %v835_v49  ;;  %v616_v41 = vld [vmem:[#allocation7 + $0xd98] sm:$0xff] }
 0x3a2   :  { %7588 = vmatpush1.bf16.msra.mxu1 %v10876_v15  ;;  %v839_v15 = vld [vmem:[#allocation7 + $0x1490] sm:$0xff]  ;;  %v620_v55 = vld [vmem:[#allocation7 + $0xdb8] sm:$0xff] }
 0x3a3   :  { %7589 = vmatprep.subr.bf16.mxu1 %v10885_v5  ;;  %v10924_v5 = vcombine.low %v576_v46, %v580_v47  ;;  %v10956_v46 = vcombine.low %v608_v26, %v612_v29 }
 0x3a4   :  { %7330 = vmatpush1.bf16.msra.mxu0 %v11130_v21  ;;  %v843_v21 = vld [vmem:[#allocation7 + $0x14b0] sm:$0xff] }
 0x3a5   :  { %7331 = vmatprep.subr.bf16.mxu0 %v11139_v6  ;;  %v11178_v6 = vcombine.low %v831_v23, %v835_v49  ;;  %v11187_v38 = vcombine.high %v839_v15, %v843_v21  ;;  %v10965_v23 = vcombine.high %v616_v41, %v620_v55 }
 0x3a6   :  { %7590 = vmatpush1.bf16.msra.mxu1 %v10884_v7  ;;  %v847_v7 = vld [vmem:[#allocation7 + $0x14d0] sm:$0xff] }
 0x3a7   :  { %7591 = vmatprep.subr.bf16.mxu1 %v10893_v54  ;;  %v11186_v54 = vcombine.low %v839_v15, %v843_v21  ;;  %v883_v15 = vld [vmem:[#allocation7 + $0x15f0] sm:$0xff] }
 0x3a8   :  { %7332 = vmatpush1.bf16.msra.mxu0 %v11138_v25  ;;  %v851_v25 = vld [vmem:[#allocation7 + $0x14f0] sm:$0xff] }
 0x3a9   :  { %7333 = vmatprep.subr.bf16.mxu0 %v11147_v57  ;;  %v10941_v57 = vcombine.high %v592_v12, %v596_v13  ;;  %v11195_v62 = vcombine.high %v847_v7, %v851_v25 }
 0x3aa   :  { %7592 = vmatpush1.bf16.msra.mxu1 %v10892_v18  ;;  %v859_v18 = vld [vmem:[#allocation7 + $0x1530] sm:$0xff] }
 0x3ab   :  { %7593 = vmatprep.subr.bf16.mxu1 %v10901_v22  ;;  %v11194_v22 = vcombine.low %v847_v7, %v851_v25 }
 0x3ac   :  { %7334 = vmatpush1.bf16.msra.mxu0 %v11146_v27  ;;  %v10940_v27 = vcombine.low %v592_v12, %v596_v13 }
 0x3ad   :  { %7335 = vmatprep.subr.bf16.mxu0 %v11155_v58  ;;  %v10949_v58 = vcombine.high %v600_v8, %v604_v63 }
 0x3ae   :  { %7594 = vmatpush1.bf16.msra.mxu1 %v10900_v59  ;;  %v867_v59 = vld [vmem:[#allocation7 + $0x1570] sm:$0xff] }
 0x3af   :  { %7595 = vmatprep.subr.bf16.mxu1 %v10909_v35  ;;  %v1221_v35 = vsub.s32 3, %v13185_v9  ;;  %v11211_v37 = vcombine.high %v863_v32, %v867_v59  ;;  %v11210_v47 = vcombine.low %v863_v32, %v867_v59  ;;  %v640_v32 = vld [vmem:[#allocation7 + $0xe58] sm:$0xff] }
 0x3b0   :  { %7336 = vmatpush1.bf16.msra.mxu0 %v11154_v34  ;;  %v10948_v34 = vcombine.low %v600_v8, %v604_v63  ;;  %v887_v8 = vld [vmem:[#allocation7 + $0x1610] sm:$0xff]  ;;  %v644_v59 = vld [vmem:[#allocation7 + $0xe78] sm:$0xff] }
 0x3b1   :  { %7337 = vmatprep.subr.bf16.mxu0 %v11163_v61  ;;  %v11202_v61 = vcombine.low %v855_v17, %v859_v18  ;;  %v891_v63 = vld [vmem:[#allocation7 + $0x1630] sm:$0xff] }
 0x3b2   :  { %7596 = vmatpush1.bf16.msra.mxu1 %v10908_v42  ;;  %v1218_v42 = vrot.slane %v13190_v28, %v1217_v31  ;;  %v11235_v29 = vcombine.high %v887_v8, %v891_v63 }
 0x3b3   :  { %7608 = vmatprep.subr.bf16.mxu1 %v10917_v44  ;;  %v875_v44 = vld [vmem:[#allocation7 + $0x15b0] sm:$0xff] }
 0x3b4   :  { %7338 = vmatpush1.bf16.msra.mxu0 %v11162_v43  ;;  %v871_v43 = vld [vmem:[#allocation7 + $0x1590] sm:$0xff] }
 0x3b5   :  { %7350 = vmatprep.subr.bf16.mxu0 %v11171_v45  ;;  %7598 = vmatmul.mubr.bf16.vlgmr.msra.gmra.mrb[8].mxu1 %v13083_v40  ;;  %v10932_v40 = vcombine.low %v584_v1, %v588_v4  ;;  %v1222_v45 = vrot.slane %v13190_v28, %v1221_v35  ;;  %v879_v4 = vld [vmem:[#allocation7 + $0x15d0] sm:$0xff] }
 0x3b6   :  { %7609 = vmatpush1.bf16.msra.mxu1 %v10916_v50  ;;  %7640 = vmatprep.mubr.bf16.mxu1 %v13087_v48  ;;  %v11203_v48 = vcombine.high %v855_v17, %v859_v18  ;;  %v11219_v50 = vcombine.high %v871_v43, %v875_v44  ;;  %v11226_v18 = vcombine.low %v879_v4, %v883_v15 }
 0x3b7   :  { %7340 = vmatmul.mubr.bf16.vlgmr.msra.gmra.mrb[4].mxu0 %v13115_v30  ;;  %7610 = vmatprep.subr.bf16.mxu1 %v10925_v52  ;;  %v628_v52 = vld [vmem:[#allocation7 + $0xdf8] sm:$0xff] }
 0x3b8   :  { %7351 = vmatpush1.bf16.msra.mxu0 %v11170_v51  ;;  %7382 = vmatprep.mubr.bf16.mxu0 %v13119_v33  ;;  %v624_v51 = vld [vmem:[#allocation7 + $0xdd8] sm:$0xff] }
 0x3b9   :  { %7352 = vmatprep.subr.bf16.mxu0 %v11179_v53  ;;  %v10973_v13 = vcombine.high %v624_v51, %v628_v52 }
 0x3ba   :  { %7611 = vmatpush1.bf16.msra.mxu1 %v10924_v5 }
 0x3bb   :  { %7612 = vmatprep.subr.bf16.mxu1 %v10933_v19  ;;  %v10964_v19 = vcombine.low %v616_v41, %v620_v55 }
 0x3bc   :  { %7353 = vmatpush1.bf16.msra.mxu0 %v11178_v6  ;;  %v11218_v6 = vcombine.low %v871_v43, %v875_v44  ;;  %v10989_v43 = vcombine.high %v640_v32, %v644_v59 }
 0x3bd   :  { %7354 = vmatprep.subr.bf16.mxu0 %v11187_v38 }
 0x3be   :  { %7613 = vmatpush1.bf16.msra.mxu1 %v10932_v40  ;;  %v11227_v40 = vcombine.high %v879_v4, %v883_v15  ;;  %v911_v4 = vld [vmem:[#allocation7 + $0x16d0] sm:$0xff] }
 0x3bf   :  { %7614 = vmatprep.subr.bf16.mxu1 %v10941_v57  ;;  %v636_v57 = vld [vmem:[#allocation7 + $0xe38] sm:$0xff]  ;;  %v915_v15 = vld [vmem:[#allocation7 + $0x16f0] sm:$0xff] }
 0x3c0   :  { %7355 = vmatpush1.bf16.msra.mxu0 %v11186_v54  ;;  %v632_v54 = vld [vmem:[#allocation7 + $0xe18] sm:$0xff] }
 0x3c1   :  { %7356 = vmatprep.subr.bf16.mxu0 %v11195_v62  ;;  %v10980_v55 = vcombine.low %v632_v54, %v636_v57 }
 0x3c2   :  { %7615 = vmatpush1.bf16.msra.mxu1 %v10940_v27  ;;  %v10972_v27 = vcombine.low %v624_v51, %v628_v52 }
 0x3c3   :  { %7616 = vmatprep.subr.bf16.mxu1 %v10949_v58 }
 0x3c4   :  { %7357 = vmatpush1.bf16.msra.mxu0 %v11194_v22 }
 0x3c5   :  { %7358 = vmatprep.subr.bf16.mxu0 %v11203_v48  ;;  %v10981_v48 = vcombine.high %v632_v54, %v636_v57  ;;  %v672_v57 = vld [vmem:[#allocation7 + $0xf58] sm:$0xff] }
 0x3c6   :  { %7617 = vmatpush1.bf16.msra.mxu1 %v10948_v34 }
 0x3c7   :  { %7618 = vmatprep.subr.bf16.mxu1 %v10957_v0  ;;  %v895_v0 = vld [vmem:[#allocation7 + $0x1650] sm:$0xff] }
 0x3c8   :  { %7359 = vmatpush1.bf16.msra.mxu0 %v11202_v61  ;;  %v7126_v49 = vpop.f32.mrb[4].mxu1 }
 0x3c9   :  { %7360 = vmatprep.subr.bf16.mxu0 %v11211_v37  ;;  %v11917_v53 = vadd.f32 %v7126_v49, %v1218_v42  ;;  %v7128_v1 = vpop.f32.mrb[5].mxu1  ;;  %v899_v37 = vld [vmem:[#allocation7 + $0x1670] sm:$0xff]  ;;  %v10988_v49 = vcombine.low %v640_v32, %v644_v59 }
 0x3ca   :  { %v11918_v21 = vadd.f32 %v7128_v1, %v1222_v45  ;;  %v7130_v5 = vpop.f32.mrb[6].mxu1  ;;  %7619 = vmatpush1.bf16.msra.mxu1 %v10956_v46  ;;  %v11243_v44 = vcombine.high %v895_v0, %v899_v37  ;;  %v652_v46 = vld [vmem:[#allocation7 + $0xeb8] sm:$0xff]  ;;  %v939_v32 = vld [vmem:[#allocation7 + $0x17b0] sm:$0xff] }
 0x3cb   :  { %v7842_v28 = vmul.f32 %v11917_v53, %v13201_v24  ;;  %v11919_v38 = vadd.f32 %v7130_v5, %v1218_v42  ;;  %v7132_v12 = vpop.f32.mrb[7].mxu1  ;;  %7620 = vmatprep.subr.bf16.mxu1 %v10965_v23  ;;  %vm7825_vm4 = vcmp.gt.f32.partialorder %v11917_v53, 0.0  ;;  %v11234_v42 = vcombine.low %v887_v8, %v891_v63  ;;  %v907_v23 = vld [vmem:[#allocation7 + $0x16b0] sm:$0xff]  ;;  %v660_v1 = vld [vmem:[#allocation7 + $0xef8] sm:$0xff] }
 0x3cc   :  { %7361 = vmatpush1.bf16.msra.mxu0 %v11210_v47  ;;  %v7843_v7 = vmul.f32 %v11918_v21, %v13201_v24  ;;  %v11920_v25 = vadd.f32 %v7132_v12, %v1222_v45  ;;  %vm7826_vm5 = vcmp.gt.f32.partialorder %v11918_v21, 0.0  ;;  %v648_v45 = vld [vmem:[#allocation7 + $0xe98] sm:$0xff]  ;;  %v903_v47 = vld [vmem:[#allocation7 + $0x1690] sm:$0xff] }
 0x3cd   :  { %7362 = vmatprep.subr.bf16.mxu0 %v11219_v50  ;;  %vm7833_vm6 = vcmp.gt.f32.partialorder %v11919_v38, 0.0  ;;  %v7850_v62 = vmul.f32 %v11919_v38, %v13201_v24  ;;  %v7858_v22 = vsel %vm7825_vm4, %v11917_v53, %v7842_v28  ;;  %v11242_v50 = vcombine.low %v895_v0, %v899_v37  ;;  %v656_v53 = vld [vmem:[#allocation7 + $0xed8] sm:$0xff]  ;;  %v919_v12 = vld [vmem:[#allocation7 + $0x1710] sm:$0xff] }
 0x3ce   :  { %vm7834_vm7 = vcmp.gt.f32.partialorder %v11920_v25, 0.0  ;;  %v7851_v17 = vmul.f32 %v11920_v25, %v13201_v24  ;;  %7621 = vmatpush1.bf16.msra.mxu1 %v10964_v19  ;;  %v7859_v34 = vsel %vm7826_vm5, %v11918_v21, %v7843_v7  ;;  %v10997_v51 = vcombine.high %v648_v45, %v652_v46  ;;  %v664_v28 = vld [vmem:[#allocation7 + $0xf18] sm:$0xff]  ;;  %v927_v8 = vld [vmem:[#allocation7 + $0x1750] sm:$0xff] }
 0x3cf   :  { %v7866_v58 = vsel %vm7833_vm6, %v11919_v38, %v7850_v62  ;;  %7622 = vmatprep.subr.bf16.mxu1 %v10973_v13  ;;  %v11251_v52 = vcombine.high %v903_v47, %v907_v23  ;;  %v10996_v21 = vcombine.low %v648_v45, %v652_v46  ;;  %v11250_v5 = vcombine.low %v903_v47, %v907_v23  ;;  %v668_v38 = vld [vmem:[#allocation7 + $0xf38] sm:$0xff]  ;;  %v923_v13 = vld [vmem:[#allocation7 + $0x1730] sm:$0xff] }
 0x3d0   :  { %7363 = vmatpush1.bf16.msra.mxu0 %v11218_v6  ;;  %v13237_v26 = vpack.c.bf16 %v7866_v58, %v7858_v22  ;;  %v7867_v61 = vsel %vm7834_vm7, %v11920_v25, %v7851_v17  ;;  %v11005_v6 = vcombine.high %v656_v53, %v660_v1  ;;  %v11259_v19 = vcombine.high %v911_v4, %v915_v15  ;;  %v676_v62 = vld [vmem:[#allocation7 + $0xf78] sm:$0xff]  ;;  %v931_v63 = vld [vmem:[#allocation7 + $0x1770] sm:$0xff] }
 0x3d1   :  { %7364 = vmatprep.subr.bf16.mxu0 %v11227_v40  ;;  %v13241_v41 = vpack.c.bf16 %v7867_v61, %v7859_v34  ;;  %v11004_v7 = vcombine.low %v656_v53, %v660_v1  ;;  %v11258_v25 = vcombine.low %v911_v4, %v915_v15  ;;  %v11013_v40 = vcombine.high %v664_v28, %v668_v38  ;;  %v680_v58 = vld [vmem:[#allocation7 + $0xf98] sm:$0xff] }
 0x3d2   :  { %7623 = vmatpush1.bf16.msra.mxu1 %v10972_v27  ;;  %v11267_v54 = vcombine.high %v919_v12, %v923_v13  ;;  %v11012_v17 = vcombine.low %v664_v28, %v668_v38  ;;  %v11021_v27 = vcombine.high %v672_v57, %v676_v62  ;;  %v11275_v22 = vcombine.high %v927_v8, %v931_v63  ;;  %v688_v37 = vld [vmem:[#allocation7 + $0xfd8] sm:$0xff] }
 0x3d3   :  { %7624 = vmatprep.subr.bf16.mxu1 %v10981_v48  ;;  %v684_v48 = vld [vmem:[#allocation7 + $0xfb8] sm:$0xff]  ;;  %v11020_v59 = vcombine.low %v672_v57, %v676_v62  ;;  %v11274_v34 = vcombine.low %v927_v8, %v931_v63 }
 0x3d4   :  { %7365 = vmatpush1.bf16.msra.mxu0 %v11226_v18  ;;  %v11266_v18 = vcombine.low %v919_v12, %v923_v13  ;;  %v11029_v61 = vcombine.high %v680_v58, %v684_v48  ;;  %v696_v23 = vld [vmem:[#allocation7 + $0x1018] sm:$0xff] }
 0x3d5   :  { %7366 = vmatprep.subr.bf16.mxu0 %v11235_v29  ;;  %v935_v29 = vld [vmem:[#allocation7 + $0x1790] sm:$0xff]  ;;  %v704_v15 = vld [vmem:[#allocation7 + $0x1058] sm:$0xff] }
 0x3d6   :  { %7625 = vmatpush1.bf16.msra.mxu1 %v10980_v55  ;;  %v11283_v0 = vcombine.high %v935_v29, %v939_v32  ;;  %v692_v55 = vld [vmem:[#allocation7 + $0xff8] sm:$0xff]  ;;  %v11282_v45 = vcombine.low %v935_v29, %v939_v32 }
 0x3d7   :  { %7626 = vmatprep.subr.bf16.mxu1 %v10989_v43  ;;  %v947_v43 = vld [vmem:[#allocation7 + $0x17f0] sm:$0xff]  ;;  %v11037_v46 = vcombine.high %v688_v37, %v692_v55  ;;  %v712_v13 = vld [vmem:[#allocation7 + $0x1098] sm:$0xff] }
 0x3d8   :  { %7367 = vmatpush1.bf16.msra.mxu0 %v11234_v42  ;;  %v943_v42 = vld [vmem:[#allocation7 + $0x17d0] sm:$0xff]  ;;  %v720_v63 = vld [vmem:[#allocation7 + $0x10d8] sm:$0xff] }
 0x3d9   :  { %7368 = vmatprep.subr.bf16.mxu0 %v11243_v44  ;;  %v11028_v44 = vcombine.low %v680_v58, %v684_v48  ;;  %v11291_v47 = vcombine.high %v943_v42, %v947_v43  ;;  %v11290_v53 = vcombine.low %v943_v42, %v947_v43  ;;  %v728_v29 = vld [vmem:[#allocation7 + $0x1118] sm:$0xff]  ;;  %v991_v43 = vld [vmem:[#allocation7 + $0x1950] sm:$0xff] }
 0x3da   :  { %7627 = vmatpush1.bf16.msra.mxu1 %v10988_v49  ;;  %v700_v49 = vld [vmem:[#allocation7 + $0x1038] sm:$0xff] }
 0x3db   :  { %7628 = vmatprep.subr.bf16.mxu1 %v10997_v51  ;;  %v955_v51 = vld [vmem:[#allocation7 + $0x1830] sm:$0xff]  ;;  %v11045_v1 = vcombine.high %v696_v23, %v700_v49  ;;  %v732_v32 = vld [vmem:[#allocation7 + $0x1138] sm:$0xff] }
 0x3dc   :  { %7369 = vmatpush1.bf16.msra.mxu0 %v11242_v50  ;;  %v951_v50 = vld [vmem:[#allocation7 + $0x1810] sm:$0xff]  ;;  %v740_v42 = vld [vmem:[#allocation7 + $0x1178] sm:$0xff] }
 0x3dd   :  { %7370 = vmatprep.subr.bf16.mxu0 %v11251_v52  ;;  %v11036_v52 = vcombine.low %v688_v37, %v692_v55  ;;  %v11299_v4 = vcombine.high %v951_v50, %v955_v51  ;;  %v11298_v28 = vcombine.low %v951_v50, %v955_v51  ;;  %v11077_v37 = vcombine.high %v728_v29, %v732_v32  ;;  %v736_v55 = vld [vmem:[#allocation7 + $0x1158] sm:$0xff]  ;;  %v999_v51 = vld [vmem:[#allocation7 + $0x1990] sm:$0xff] }
 0x3de   :  { %7629 = vmatpush1.bf16.msra.mxu1 %v10996_v21  ;;  %v708_v21 = vld [vmem:[#allocation7 + $0x1078] sm:$0xff] }
 0x3df   :  { %7630 = vmatprep.subr.bf16.mxu1 %v11005_v6  ;;  %v963_v6 = vld [vmem:[#allocation7 + $0x1870] sm:$0xff]  ;;  %v11053_v38 = vcombine.high %v704_v15, %v708_v21  ;;  %v748_v50 = vld [vmem:[#allocation7 + $0x11b8] sm:$0xff] }
 0x3e0   :  { %7371 = vmatpush1.bf16.msra.mxu0 %v11250_v5  ;;  %v959_v5 = vld [vmem:[#allocation7 + $0x1850] sm:$0xff] }
 0x3e1   :  { %7372 = vmatprep.subr.bf16.mxu0 %v11259_v19  ;;  %v11044_v19 = vcombine.low %v696_v23, %v700_v49  ;;  %v11307_v12 = vcombine.high %v959_v5, %v963_v6  ;;  %v11306_v57 = vcombine.low %v959_v5, %v963_v6  ;;  %v744_v49 = vld [vmem:[#allocation7 + $0x1198] sm:$0xff]  ;;  %v1007_v6 = vld [vmem:[#allocation7 + $0x19d0] sm:$0xff] }
 0x3e2   :  { %7631 = vmatpush1.bf16.msra.mxu1 %v11004_v7  ;;  %v716_v7 = vld [vmem:[#allocation7 + $0x10b8] sm:$0xff] }
 0x3e3   :  { %7632 = vmatprep.subr.bf16.mxu1 %v11013_v40  ;;  %v971_v40 = vld [vmem:[#allocation7 + $0x18b0] sm:$0xff]  ;;  %v11061_v62 = vcombine.high %v712_v13, %v716_v7  ;;  %v756_v5 = vld [vmem:[#allocation7 + $0x11f8] sm:$0xff] }
 0x3e4   :  { %7373 = vmatpush1.bf16.msra.mxu0 %v11258_v25  ;;  %v967_v25 = vld [vmem:[#allocation7 + $0x1890] sm:$0xff] }
 0x3e5   :  { %7374 = vmatprep.subr.bf16.mxu0 %v11267_v54  ;;  %v11052_v54 = vcombine.low %v704_v15, %v708_v21  ;;  %v11315_v8 = vcombine.high %v967_v25, %v971_v40  ;;  %v752_v21 = vld [vmem:[#allocation7 + $0x11d8] sm:$0xff] }
 0x3e6   :  { %7633 = vmatpush1.bf16.msra.mxu1 %v11012_v17  ;;  %v724_v17 = vld [vmem:[#allocation7 + $0x10f8] sm:$0xff] }
 0x3e7   :  { %7634 = vmatprep.subr.bf16.mxu1 %v11021_v27  ;;  %v979_v27 = vld [vmem:[#allocation7 + $0x18f0] sm:$0xff]  ;;  %v11069_v58 = vcombine.high %v720_v63, %v724_v17 }
 0x3e8   :  { %7375 = vmatpush1.bf16.msra.mxu0 %v11266_v18  ;;  %v975_v18 = vld [vmem:[#allocation7 + $0x18d0] sm:$0xff] }
 0x3e9   :  { %7376 = vmatprep.subr.bf16.mxu0 %v11275_v22  ;;  %v11314_v22 = vcombine.low %v967_v25, %v971_v40  ;;  %v11323_v48 = vcombine.high %v975_v18, %v979_v27  ;;  %v764_v25 = vld [vmem:[#allocation7 + $0x1238] sm:$0xff]  ;;  %v1015_v40 = vld [vmem:[#allocation7 + $0x1a10] sm:$0xff] }
 0x3ea   :  { %7635 = vmatpush1.bf16.msra.mxu1 %v11020_v59  ;;  %v983_v59 = vld [vmem:[#allocation7 + $0x1910] sm:$0xff] }
 0x3eb   :  { %7636 = vmatprep.subr.bf16.mxu1 %v11029_v61  ;;  %v11068_v61 = vcombine.low %v720_v63, %v724_v17  ;;  %v768_v17 = vld [vmem:[#allocation7 + $0x1258] sm:$0xff] }
 0x3ec   :  { %7377 = vmatpush1.bf16.msra.mxu0 %v11274_v34  ;;  %v987_v34 = vld [vmem:[#allocation7 + $0x1930] sm:$0xff] }
 0x3ed   :  { %7378 = vmatprep.subr.bf16.mxu0 %v11283_v0  ;;  %v11322_v0 = vcombine.low %v975_v18, %v979_v27  ;;  %v772_v18 = vld [vmem:[#allocation7 + $0x1278] sm:$0xff]  ;;  %v1023_v27 = vld [vmem:[#allocation7 + $0x1a50] sm:$0xff] }
 0x3ee   :  { %7637 = vmatpush1.bf16.msra.mxu1 %v11028_v44  ;;  %v995_v44 = vld [vmem:[#allocation7 + $0x1970] sm:$0xff] }
 0x3ef   :  { %7638 = vmatprep.subr.bf16.mxu1 %v11037_v46  ;;  %v11330_v46 = vcombine.low %v983_v59, %v987_v34  ;;  %v11339_v23 = vcombine.high %v991_v43, %v995_v44 }
 0x3f0   :  { %7379 = vmatpush1.bf16.msra.mxu0 %v11282_v45  ;;  %v11076_v45 = vcombine.low %v728_v29, %v732_v32  ;;  %v776_v32 = vld [vmem:[#allocation7 + $0x1298] sm:$0xff] }
 0x3f1   :  { %7380 = vmatprep.subr.bf16.mxu0 %v11291_v47  ;;  %v11085_v47 = vcombine.high %v736_v55, %v740_v42 }
 0x3f2   :  { %7639 = vmatpush1.bf16.msra.mxu1 %v11036_v52  ;;  %v1003_v52 = vld [vmem:[#allocation7 + $0x19b0] sm:$0xff] }
 0x3f3   :  { %7651 = vmatprep.subr.bf16.mxu1 %v11045_v1  ;;  %v11338_v1 = vcombine.low %v991_v43, %v995_v44  ;;  %v11347_v15 = vcombine.high %v999_v51, %v1003_v52  ;;  %v788_v43 = vld [vmem:[#allocation7 + $0x12f8] sm:$0xff]  ;;  %v1039_v44 = vld [vmem:[#allocation7 + $0x1ad0] sm:$0xff] }
 0x3f4   :  { %7381 = vmatpush1.bf16.msra.mxu0 %v11290_v53  ;;  %v11084_v53 = vcombine.low %v736_v55, %v740_v42  ;;  %v784_v42 = vld [vmem:[#allocation7 + $0x12d8] sm:$0xff] }
 0x3f5   :  { %7393 = vmatprep.subr.bf16.mxu0 %v11299_v4  ;;  %7641 = vmatmul.mubr.bf16.vlgmr.msra.gmra.mrb[8].mxu1 %v13099_v2  ;;  %v11060_v2 = vcombine.low %v712_v13, %v716_v7  ;;  %v11093_v4 = vcombine.high %v744_v49, %v748_v50  ;;  %v760_v7 = vld [vmem:[#allocation7 + $0x1218] sm:$0xff] }
 0x3f6   :  { %7652 = vmatpush1.bf16.msra.mxu1 %v11044_v19  ;;  %7683 = vmatprep.mubr.bf16.mxu1 %v13103_v10  ;;  %v11331_v10 = vcombine.high %v983_v59, %v987_v34  ;;  %v1011_v19 = vld [vmem:[#allocation7 + $0x19f0] sm:$0xff]  ;;  %v780_v59 = vld [vmem:[#allocation7 + $0x12b8] sm:$0xff] }
 0x3f7   :  { %7383 = vmatmul.mubr.bf16.vlgmr.msra.gmra.mrb[4].mxu0 %v13139_v36  ;;  %7653 = vmatprep.subr.bf16.mxu1 %v11053_v38  ;;  %v11346_v38 = vcombine.low %v999_v51, %v1003_v52  ;;  %v11355_v13 = vcombine.high %v1007_v6, %v1011_v19  ;;  %v1031_v34 = vld [vmem:[#allocation7 + $0x1a90] sm:$0xff]  ;;  %v796_v51 = vld [vmem:[#allocation7 + $0x1338] sm:$0xff] }
 0x3f8   :  { %7394 = vmatpush1.bf16.msra.mxu0 %v11298_v28  ;;  %7425 = vmatprep.mubr.bf16.mxu0 %v13143_v16  ;;  %v11092_v28 = vcombine.low %v744_v49, %v748_v50  ;;  %v792_v50 = vld [vmem:[#allocation7 + $0x1318] sm:$0xff]  ;;  %v1047_v52 = vld [vmem:[#allocation7 + $0x1b10] sm:$0xff] }
 0x3f9   :  { %7395 = vmatprep.subr.bf16.mxu0 %v11307_v12  ;;  %v11101_v12 = vcombine.high %v752_v21, %v756_v5 }
 0x3fa   :  { %7654 = vmatpush1.bf16.msra.mxu1 %v11052_v54  ;;  %v1019_v54 = vld [vmem:[#allocation7 + $0x1a30] sm:$0xff] }
 0x3fb   :  { %7655 = vmatprep.subr.bf16.mxu1 %v11061_v62  ;;  %v11354_v62 = vcombine.low %v1007_v6, %v1011_v19  ;;  %v11363_v63 = vcombine.high %v1015_v40, %v1019_v54  ;;  %v804_v6 = vld [vmem:[#allocation7 + $0x1378] sm:$0xff]  ;;  %v1055_v19 = vld [vmem:[#allocation7 + $0x1b50] sm:$0xff] }
 0x3fc   :  { %7396 = vmatpush1.bf16.msra.mxu0 %v11306_v57  ;;  %v11100_v57 = vcombine.low %v752_v21, %v756_v5  ;;  %v800_v5 = vld [vmem:[#allocation7 + $0x1358] sm:$0xff] }
 0x3fd   :  { %7397 = vmatprep.subr.bf16.mxu0 %v11315_v8  ;;  %v11109_v8 = vcombine.high %v760_v7, %v764_v25 }
 0x3fe   :  { %7656 = vmatpush1.bf16.msra.mxu1 %v11060_v2  ;;  %v1027_v2 = vld [vmem:[#allocation7 + $0x1a70] sm:$0xff] }
 0x3ff   :  { %7657 = vmatprep.subr.bf16.mxu1 %v11069_v58  ;;  %v11362_v58 = vcombine.low %v1015_v40, %v1019_v54  ;;  %v11371_v29 = vcombine.high %v1023_v27, %v1027_v2  ;;  %v812_v40 = vld [vmem:[#allocation7 + $0x13b8] sm:$0xff]  ;;  %v1063_v54 = vld [vmem:[#allocation7 + $0x1b90] sm:$0xff] }
 0x400   :  { %7398 = vmatpush1.bf16.msra.mxu0 %v11314_v22  ;;  %v11108_v22 = vcombine.low %v760_v7, %v764_v25  ;;  %v808_v25 = vld [vmem:[#allocation7 + $0x1398] sm:$0xff] }
 0x401   :  { %7399 = vmatprep.subr.bf16.mxu0 %v11323_v48  ;;  %v11117_v48 = vcombine.high %v768_v17, %v772_v18 }
 0x402   :  { %7658 = vmatpush1.bf16.msra.mxu1 %v11068_v61  ;;  %v1035_v61 = vld [vmem:[#allocation7 + $0x1ab0] sm:$0xff] }
 0x403   :  { %7659 = vmatprep.subr.bf16.mxu1 %v11077_v37  ;;  %v11370_v37 = vcombine.low %v1023_v27, %v1027_v2  ;;  %v11379_v55 = vcombine.high %v1031_v34, %v1035_v61  ;;  %v820_v27 = vld [vmem:[#allocation7 + $0x13f8] sm:$0xff]  ;;  %v1071_v2 = vld [vmem:[#allocation7 + $0x1bd0] sm:$0xff] }
 0x404   :  { %7400 = vmatpush1.bf16.msra.mxu0 %v11322_v0  ;;  %v11116_v0 = vcombine.low %v768_v17, %v772_v18  ;;  %v816_v18 = vld [vmem:[#allocation7 + $0x13d8] sm:$0xff] }
 0x405   :  { %7401 = vmatprep.subr.bf16.mxu0 %v11331_v10  ;;  %v11125_v10 = vcombine.high %v776_v32, %v780_v59 }
 0x406   :  { %7660 = vmatpush1.bf16.msra.mxu1 %v11076_v45  ;;  %v1043_v45 = vld [vmem:[#allocation7 + $0x1af0] sm:$0xff] }
 0x407   :  { %7661 = vmatprep.subr.bf16.mxu1 %v11085_v47  ;;  %v11378_v47 = vcombine.low %v1031_v34, %v1035_v61  ;;  %v11387_v49 = vcombine.high %v1039_v44, %v1043_v45  ;;  %v828_v34 = vld [vmem:[#allocation7 + $0x1438] sm:$0xff]  ;;  %v1079_v61 = vld [vmem:[#allocation7 + $0x1c10] sm:$0xff] }
 0x408   :  { %7402 = vmatpush1.bf16.msra.mxu0 %v11330_v46  ;;  %v11124_v46 = vcombine.low %v776_v32, %v780_v59  ;;  %v824_v59 = vld [vmem:[#allocation7 + $0x1418] sm:$0xff] }
 0x409   :  { %7403 = vmatprep.subr.bf16.mxu0 %v11339_v23  ;;  %v11133_v23 = vcombine.high %v784_v42, %v788_v43 }
 0x40a   :  { %7662 = vmatpush1.bf16.msra.mxu1 %v11084_v53  ;;  %v1051_v53 = vld [vmem:[#allocation7 + $0x1b30] sm:$0xff] }
 0x40b   :  { %7663 = vmatprep.subr.bf16.mxu1 %v11093_v4  ;;  %v11386_v4 = vcombine.low %v1039_v44, %v1043_v45  ;;  %v11395_v21 = vcombine.high %v1047_v52, %v1051_v53  ;;  %v836_v44 = vld [vmem:[#allocation7 + $0x1478] sm:$0xff]  ;;  %v1087_v45 = vld [vmem:[#allocation7 + $0x1c50] sm:$0xff] }
 0x40c   :  { %7404 = vmatpush1.bf16.msra.mxu0 %v11338_v1  ;;  %v11132_v1 = vcombine.low %v784_v42, %v788_v43  ;;  %v832_v43 = vld [vmem:[#allocation7 + $0x1458] sm:$0xff] }
 0x40d   :  { %7405 = vmatprep.subr.bf16.mxu0 %v11347_v15  ;;  %v11141_v15 = vcombine.high %v792_v50, %v796_v51 }
 0x40e   :  { %7664 = vmatpush1.bf16.msra.mxu1 %v11092_v28  ;;  %v1059_v28 = vld [vmem:[#allocation7 + $0x1b70] sm:$0xff] }
 0x40f   :  { %7665 = vmatprep.subr.bf16.mxu1 %v11101_v12  ;;  %v11394_v12 = vcombine.low %v1047_v52, %v1051_v53  ;;  %v11403_v7 = vcombine.high %v1055_v19, %v1059_v28  ;;  %v844_v52 = vld [vmem:[#allocation7 + $0x14b8] sm:$0xff]  ;;  %v1095_v53 = vld [vmem:[#allocation7 + $0x1c90] sm:$0xff] }
 0x410   :  { %7406 = vmatpush1.bf16.msra.mxu0 %v11346_v38  ;;  %v11140_v38 = vcombine.low %v792_v50, %v796_v51  ;;  %v840_v51 = vld [vmem:[#allocation7 + $0x1498] sm:$0xff] }
 0x411   :  { %7407 = vmatprep.subr.bf16.mxu0 %v11355_v13  ;;  %v11149_v13 = vcombine.high %v800_v5, %v804_v6 }
 0x412   :  { %7666 = vmatpush1.bf16.msra.mxu1 %v11100_v57  ;;  %v1067_v57 = vld [vmem:[#allocation7 + $0x1bb0] sm:$0xff] }
 0x413   :  { %7667 = vmatprep.subr.bf16.mxu1 %v11109_v8  ;;  %v11402_v8 = vcombine.low %v1055_v19, %v1059_v28  ;;  %v11411_v17 = vcombine.high %v1063_v54, %v1067_v57  ;;  %v852_v19 = vld [vmem:[#allocation7 + $0x14f8] sm:$0xff]  ;;  %v1103_v28 = vld [vmem:[#allocation7 + $0x1cd0] sm:$0xff] }
 0x414   :  { %7408 = vmatpush1.bf16.msra.mxu0 %v11354_v62  ;;  %v11148_v62 = vcombine.low %v800_v5, %v804_v6  ;;  %v848_v6 = vld [vmem:[#allocation7 + $0x14d8] sm:$0xff] }
 0x415   :  { %7409 = vmatprep.subr.bf16.mxu0 %v11363_v63  ;;  %v11157_v63 = vcombine.high %v808_v25, %v812_v40 }
 0x416   :  { %7668 = vmatpush1.bf16.msra.mxu1 %v11108_v22  ;;  %v1075_v22 = vld [vmem:[#allocation7 + $0x1bf0] sm:$0xff] }
 0x417   :  { %7669 = vmatprep.subr.bf16.mxu1 %v11117_v48  ;;  %v11410_v48 = vcombine.low %v1063_v54, %v1067_v57  ;;  %v11419_v32 = vcombine.high %v1071_v2, %v1075_v22  ;;  %v1111_v54 = vld [vmem:[#allocation7 + $0x1d10] sm:$0xff] }
 0x418   :  { %7410 = vmatpush1.bf16.msra.mxu0 %v11362_v58  ;;  %v11156_v58 = vcombine.low %v808_v25, %v812_v40  ;;  %v856_v25 = vld [vmem:[#allocation7 + $0x1518] sm:$0xff]  ;;  %v1115_v57 = vld [vmem:[#allocation7 + $0x1d30] sm:$0xff] }
 0x419   :  { %7411 = vmatprep.subr.bf16.mxu0 %v11371_v29  ;;  %v11165_v29 = vcombine.high %v816_v18, %v820_v27  ;;  %v860_v40 = vld [vmem:[#allocation7 + $0x1538] sm:$0xff] }
 0x41a   :  { %7670 = vmatpush1.bf16.msra.mxu1 %v11116_v0  ;;  %v1083_v0 = vld [vmem:[#allocation7 + $0x1c30] sm:$0xff] }
 0x41b   :  { %7671 = vmatprep.subr.bf16.mxu1 %v11125_v10  ;;  %v11418_v10 = vcombine.low %v1071_v2, %v1075_v22  ;;  %v11427_v42 = vcombine.high %v1079_v61, %v1083_v0  ;;  %v1123_v2 = vld [vmem:[#allocation7 + $0x1d70] sm:$0xff]  ;;  %v11204_v22 = vcombine.low %v856_v25, %v860_v40 }
 0x41c   :  { %7412 = vmatpush1.bf16.msra.mxu0 %v11370_v37  ;;  %v11164_v37 = vcombine.low %v816_v18, %v820_v27  ;;  %v868_v18 = vld [vmem:[#allocation7 + $0x1578] sm:$0xff]  ;;  %v1119_v27 = vld [vmem:[#allocation7 + $0x1d50] sm:$0xff] }
 0x41d   :  { %7413 = vmatprep.subr.bf16.mxu0 %v11379_v55  ;;  %v11173_v55 = vcombine.high %v824_v59, %v828_v34 }
 0x41e   :  { %7672 = vmatpush1.bf16.msra.mxu1 %v11124_v46  ;;  %v1091_v46 = vld [vmem:[#allocation7 + $0x1c70] sm:$0xff] }
 0x41f   :  { %7673 = vmatprep.subr.bf16.mxu1 %v11133_v23  ;;  %v11426_v23 = vcombine.low %v1079_v61, %v1083_v0  ;;  %v11435_v50 = vcombine.high %v1087_v45, %v1091_v46  ;;  %v1131_v61 = vld [vmem:[#allocation7 + $0x1db0] sm:$0xff] }
 0x420   :  { %7414 = vmatpush1.bf16.msra.mxu0 %v11378_v47  ;;  %v11172_v47 = vcombine.low %v824_v59, %v828_v34  ;;  %v876_v59 = vld [vmem:[#allocation7 + $0x15b8] sm:$0xff]  ;;  %v1127_v34 = vld [vmem:[#allocation7 + $0x1d90] sm:$0xff] }
 0x421   :  { %7415 = vmatprep.subr.bf16.mxu0 %v11387_v49  ;;  %v11181_v49 = vcombine.high %v832_v43, %v836_v44 }
 0x422   :  { %7674 = vmatpush1.bf16.msra.mxu1 %v11132_v1  ;;  %v1099_v1 = vld [vmem:[#allocation7 + $0x1cb0] sm:$0xff] }
 0x423   :  { %7675 = vmatprep.subr.bf16.mxu1 %v11141_v15  ;;  %v11434_v15 = vcombine.low %v1087_v45, %v1091_v46  ;;  %v11443_v5 = vcombine.high %v1095_v53, %v1099_v1  ;;  %v1139_v45 = vld [vmem:[#allocation7 + $0x1df0] sm:$0xff] }
 0x424   :  { %7416 = vmatpush1.bf16.msra.mxu0 %v11386_v4  ;;  %v11180_v4 = vcombine.low %v832_v43, %v836_v44  ;;  %v884_v43 = vld [vmem:[#allocation7 + $0x15f8] sm:$0xff]  ;;  %v1135_v44 = vld [vmem:[#allocation7 + $0x1dd0] sm:$0xff] }
 0x425   :  { %7417 = vmatprep.subr.bf16.mxu0 %v11395_v21  ;;  %v11189_v21 = vcombine.high %v840_v51, %v844_v52 }
 0x426   :  { %7676 = vmatpush1.bf16.msra.mxu1 %v11140_v38  ;;  %v1107_v38 = vld [vmem:[#allocation7 + $0x1cf0] sm:$0xff] }
 0x427   :  { %7677 = vmatprep.subr.bf16.mxu1 %v11149_v13  ;;  %v11197_v13 = vcombine.high %v848_v6, %v852_v19 }
 0x428   :  { %7418 = vmatpush1.bf16.msra.mxu0 %v11394_v12  ;;  %v11442_v12 = vcombine.low %v1095_v53, %v1099_v1  ;;  %v1147_v53 = vld [vmem:[#allocation7 + $0x1e30] sm:$0xff] }
 0x429   :  { %7419 = vmatprep.subr.bf16.mxu0 %v11403_v7  ;;  %v11451_v7 = vcombine.high %v1103_v28, %v1107_v38 }
 0x42a   :  { %7678 = vmatpush1.bf16.msra.mxu1 %v11148_v62  ;;  %v11196_v62 = vcombine.low %v848_v6, %v852_v19  ;;  %v900_v6 = vld [vmem:[#allocation7 + $0x1678] sm:$0xff]  ;;  %v1151_v19 = vld [vmem:[#allocation7 + $0x1e50] sm:$0xff] }
 0x42b   :  { %7679 = vmatprep.subr.bf16.mxu1 %v11157_v63  ;;  %v11205_v63 = vcombine.high %v856_v25, %v860_v40  ;;  %v908_v25 = vld [vmem:[#allocation7 + $0x16b8] sm:$0xff]  ;;  %v1159_v40 = vld [vmem:[#allocation7 + $0x1e90] sm:$0xff] }
 0x42c   :  { %7420 = vmatpush1.bf16.msra.mxu0 %v11402_v8  ;;  %v11450_v8 = vcombine.low %v1103_v28, %v1107_v38  ;;  %v1155_v28 = vld [vmem:[#allocation7 + $0x1e70] sm:$0xff] }
 0x42d   :  { %7421 = vmatprep.subr.bf16.mxu0 %v11411_v17  ;;  %v864_v17 = vld [vmem:[#allocation7 + $0x1558] sm:$0xff] }
 0x42e   :  { %7680 = vmatpush1.bf16.msra.mxu1 %v11156_v58  ;;  %v11458_v58 = vcombine.low %v1111_v54, %v1115_v57  ;;  %v11212_v0 = vcombine.low %v864_v17, %v868_v18 }
 0x42f   :  { %7681 = vmatprep.subr.bf16.mxu1 %v11165_v29  ;;  %v11467_v29 = vcombine.high %v1119_v27, %v1123_v2 }
 0x430   :  { %7422 = vmatpush1.bf16.msra.mxu0 %v11410_v48  ;;  %v11213_v48 = vcombine.high %v864_v17, %v868_v18  ;;  %v916_v17 = vld [vmem:[#allocation7 + $0x16f8] sm:$0xff]  ;;  %v1167_v18 = vld [vmem:[#allocation7 + $0x1ed0] sm:$0xff] }
 0x431   :  { %7423 = vmatprep.subr.bf16.mxu0 %v11419_v32  ;;  %v872_v32 = vld [vmem:[#allocation7 + $0x1598] sm:$0xff] }
 0x432   :  { %7682 = vmatpush1.bf16.msra.mxu1 %v11164_v37  ;;  %v11466_v37 = vcombine.low %v1119_v27, %v1123_v2  ;;  %v11220_v46 = vcombine.low %v872_v32, %v876_v59  ;;  %v1171_v27 = vld [vmem:[#allocation7 + $0x1ef0] sm:$0xff] }
 0x433   :  { %7694 = vmatprep.subr.bf16.mxu1 %v11173_v55  ;;  %v11475_v55 = vcombine.high %v1127_v34, %v1131_v61 }
 0x434   :  { %7424 = vmatpush1.bf16.msra.mxu0 %v11418_v10  ;;  %v11221_v10 = vcombine.high %v872_v32, %v876_v59  ;;  %v924_v32 = vld [vmem:[#allocation7 + $0x1738] sm:$0xff]  ;;  %v1175_v59 = vld [vmem:[#allocation7 + $0x1f10] sm:$0xff] }
 0x435   :  { %7436 = vmatprep.subr.bf16.mxu0 %v11427_v42  ;;  %7684 = vmatmul.mubr.bf16.vlgmr.msra.gmra.mrb[8].mxu1 %v13115_v30  ;;  %v11188_v30 = vcombine.low %v840_v51, %v844_v52  ;;  %v880_v42 = vld [vmem:[#allocation7 + $0x15d8] sm:$0xff]  ;;  %v1143_v52 = vld [vmem:[#allocation7 + $0x1e10] sm:$0xff] }
 0x436   :  { %7695 = vmatpush1.bf16.msra.mxu1 %v11172_v47  ;;  %7726 = vmatprep.mubr.bf16.mxu1 %v13119_v33  ;;  %v11459_v33 = vcombine.high %v1111_v54, %v1115_v57  ;;  %v11474_v47 = vcombine.low %v1127_v34, %v1131_v61  ;;  %v892_v51 = vld [vmem:[#allocation7 + $0x1638] sm:$0xff]  ;;  %v11228_v1 = vcombine.low %v880_v42, %v884_v43  ;;  %v1163_v54 = vld [vmem:[#allocation7 + $0x1eb0] sm:$0xff] }
 0x437   :  { %7426 = vmatmul.mubr.bf16.vlgmr.msra.gmra.mrb[4].mxu0 %v13155_v3  ;;  %7696 = vmatprep.subr.bf16.mxu1 %v11181_v49  ;;  %v11483_v49 = vcombine.high %v1135_v44, %v1139_v45  ;;  %v1179_v34 = vld [vmem:[#allocation7 + $0x1f30] sm:$0xff] }
 0x438   :  { %7437 = vmatpush1.bf16.msra.mxu0 %v11426_v23  ;;  %7468 = vmatprep.mubr.bf16.mxu0 %v13159_v11  ;;  %v11229_v23 = vcombine.high %v880_v42, %v884_v43  ;;  %v932_v42 = vld [vmem:[#allocation7 + $0x1778] sm:$0xff]  ;;  %v1183_v43 = vld [vmem:[#allocation7 + $0x1f50] sm:$0xff] }
 0x439   :  { %7438 = vmatprep.subr.bf16.mxu0 %v11435_v50  ;;  %v888_v50 = vld [vmem:[#allocation7 + $0x1618] sm:$0xff] }
 0x43a   :  { %7697 = vmatpush1.bf16.msra.mxu1 %v11180_v4  ;;  %v11482_v4 = vcombine.low %v1135_v44, %v1139_v45  ;;  %v11236_v38 = vcombine.low %v888_v50, %v892_v51  ;;  %v1187_v44 = vld [vmem:[#allocation7 + $0x1f70] sm:$0xff] }
 0x43b   :  { %7698 = vmatprep.subr.bf16.mxu1 %v11189_v21  ;;  %v11491_v21 = vcombine.high %v1143_v52, %v1147_v53 }
 0x43c   :  { %7439 = vmatpush1.bf16.msra.mxu0 %v11434_v15  ;;  %v11237_v15 = vcombine.high %v888_v50, %v892_v51  ;;  %v940_v50 = vld [vmem:[#allocation7 + $0x17b8] sm:$0xff]  ;;  %v1191_v51 = vld [vmem:[#allocation7 + $0x1f90] sm:$0xff] }
 0x43d   :  { %7440 = vmatprep.subr.bf16.mxu0 %v11443_v5  ;;  %v896_v5 = vld [vmem:[#allocation7 + $0x1658] sm:$0xff] }
 0x43e   :  { %7699 = vmatpush1.bf16.msra.mxu1 %v11188_v30  ;;  %v11490_v30 = vcombine.low %v1143_v52, %v1147_v53  ;;  %v11244_v57 = vcombine.low %v896_v5, %v900_v6  ;;  %v1195_v52 = vld [vmem:[#allocation7 + $0x1fb0] sm:$0xff] }
 0x43f   :  { %7700 = vmatprep.subr.bf16.mxu1 %v11197_v13  ;;  %v11499_v13 = vcombine.high %v1151_v19, %v1155_v28 }
 0x440   :  { %7441 = vmatpush1.bf16.msra.mxu0 %v11442_v12  ;;  %v11245_v12 = vcombine.high %v896_v5, %v900_v6  ;;  %v948_v5 = vld [vmem:[#allocation7 + $0x17f8] sm:$0xff]  ;;  %v1199_v6 = vld [vmem:[#allocation7 + $0x1fd0] sm:$0xff] }
 0x441   :  { %7442 = vmatprep.subr.bf16.mxu0 %v11451_v7  ;;  %v904_v7 = vld [vmem:[#allocation7 + $0x1698] sm:$0xff] }
 0x442   :  { %7701 = vmatpush1.bf16.msra.mxu1 %v11196_v62  ;;  %v11498_v62 = vcombine.low %v1151_v19, %v1155_v28  ;;  %v11252_v2 = vcombine.low %v904_v7, %v908_v25  ;;  %v1203_v19 = vld [vmem:[#allocation7 + $0x1ff0] sm:$0xff] }
 0x443   :  { %7702 = vmatprep.subr.bf16.mxu1 %v11205_v63  ;;  %v11507_v63 = vcombine.high %v1159_v40, %v1163_v54 }
 0x444   :  { %7443 = vmatpush1.bf16.msra.mxu0 %v11450_v8  ;;  %v11253_v8 = vcombine.high %v904_v7, %v908_v25  ;;  %v956_v7 = vld [vmem:[#allocation7 + $0x1838] sm:$0xff] }
 0x445   :  { %7444 = vmatprep.subr.bf16.mxu0 %v11459_v33  ;;  %v912_v33 = vld [vmem:[#allocation7 + $0x16d8] sm:$0xff] }
 0x446   :  { %7703 = vmatpush1.bf16.msra.mxu1 %v11204_v22  ;;  %v11506_v22 = vcombine.low %v1159_v40, %v1163_v54  ;;  %v11260_v61 = vcombine.low %v912_v33, %v916_v17  ;;  %v11546_v40 = vcombine.low %v1199_v6, %v1203_v19 }
 0x447   :  { %7704 = vmatprep.subr.bf16.mxu1 %v11213_v48  ;;  %v11515_v48 = vcombine.high %v1167_v18, %v1171_v27 }
 0x448   :  { %7445 = vmatpush1.bf16.msra.mxu0 %v11458_v58  ;;  %v11261_v58 = vcombine.high %v912_v33, %v916_v17  ;;  %v12097_v33 = vld [vmem:[#allocation10] ss:$16 sps:$4 sm:$0xff]  }
 0x449   :  { %7446 = vmatprep.subr.bf16.mxu0 %v11467_v29  ;;  %v920_v29 = vld [vmem:[#allocation7 + $0x1718] sm:$0xff] }
 0x44a   :  { %7705 = vmatpush1.bf16.msra.mxu1 %v11212_v0  ;;  %v11514_v0 = vcombine.low %v1167_v18, %v1171_v27  ;;  %v11268_v45 = vcombine.low %v920_v29, %v924_v32  ;;  %v12102_v18 = vld [vmem:[#allocation10 + $0x24] ss:$16 sps:$4 sm:$0xff]  }
 0x44b   :  { %7706 = vmatprep.subr.bf16.mxu1 %v11221_v10  ;;  %v11523_v10 = vcombine.high %v1175_v59, %v1179_v34  ;;  %v968_v27 = vld [vmem:[#allocation7 + $0x1898] sm:$0xff] }
 0x44c   :  { %7447 = vmatpush1.bf16.msra.mxu0 %v11466_v37  ;;  %v11269_v37 = vcombine.high %v920_v29, %v924_v32  ;;  %v12105_v29 = vld [vmem:[#allocation10 + $0x44] ss:$16 sps:$4 sm:$0xff]  }
 0x44d   :  { %7448 = vmatprep.subr.bf16.mxu0 %v11475_v55  ;;  %v928_v55 = vld [vmem:[#allocation7 + $0x1758] sm:$0xff] }
 0x44e   :  { %7707 = vmatpush1.bf16.msra.mxu1 %v11220_v46  ;;  %v11522_v46 = vcombine.low %v1175_v59, %v1179_v34  ;;  %v11276_v53 = vcombine.low %v928_v55, %v932_v42  ;;  %v976_v32 = vld [vmem:[#allocation7 + $0x18d8] sm:$0xff] }
 0x44f   :  { %7708 = vmatprep.subr.bf16.mxu1 %v11229_v23  ;;  %v11531_v23 = vcombine.high %v1183_v43, %v1187_v44  ;;  %v980_v59 = vld [vmem:[#allocation7 + $0x18f8] sm:$0xff] }
 0x450   :  { %7449 = vmatpush1.bf16.msra.mxu0 %v11474_v47  ;;  %v11277_v47 = vcombine.high %v928_v55, %v932_v42  ;;  %v11324_v55 = vcombine.low %v976_v32, %v980_v59  ;;  %v12106_v42 = vld [vmem:[#allocation10 + $0x60] ss:$16 sps:$4 sm:$0xff]  }
 0x451   :  { %7450 = vmatprep.subr.bf16.mxu0 %v11483_v49  ;;  %v936_v49 = vld [vmem:[#allocation7 + $0x1798] sm:$0xff] }
 0x452   :  { %7709 = vmatpush1.bf16.msra.mxu1 %v11228_v1  ;;  %v11530_v1 = vcombine.low %v1183_v43, %v1187_v44  ;;  %v11284_v28 = vcombine.low %v936_v49, %v940_v50  ;;  %v12111_v44 = vld [vmem:[#allocation10 + $0x84] ss:$16 sps:$4 sm:$0xff]  }
 0x453   :  { %7710 = vmatprep.subr.bf16.mxu1 %v11237_v15  ;;  %v11539_v15 = vcombine.high %v1191_v51, %v1195_v52 }
 0x454   :  { %7451 = vmatpush1.bf16.msra.mxu0 %v11482_v4  ;;  %v11285_v4 = vcombine.high %v936_v49, %v940_v50  ;;  %v12114_v49 = vld [vmem:[#allocation10 + $0xa4] ss:$16 sps:$4 sm:$0xff]  }
 0x455   :  { %7452 = vmatprep.subr.bf16.mxu0 %v11491_v21  ;;  %v944_v21 = vld [vmem:[#allocation7 + $0x17d8] sm:$0xff] }
 0x456   :  { %7711 = vmatpush1.bf16.msra.mxu1 %v11236_v38  ;;  %v11538_v38 = vcombine.low %v1191_v51, %v1195_v52  ;;  %v11292_v25 = vcombine.low %v944_v21, %v948_v5  ;;  %v1000_v50 = vld [vmem:[#allocation7 + $0x1998] sm:$0xff] }
 0x457   :  { %7712 = vmatprep.subr.bf16.mxu1 %v11245_v12  ;;  %v11547_v12 = vcombine.high %v1199_v6, %v1203_v19  ;;  %v1004_v51 = vld [vmem:[#allocation7 + $0x19b8] sm:$0xff] }
 0x458   :  { %7453 = vmatpush1.bf16.msra.mxu0 %v11490_v30  ;;  %v11293_v30 = vcombine.high %v944_v21, %v948_v5  ;;  %v1012_v21 = vld [vmem:[#allocation7 + $0x19f8] sm:$0xff]  ;;  %v11348_v5 = vcombine.low %v1000_v50, %v1004_v51 }
 0x459   :  { %7454 = vmatprep.subr.bf16.mxu0 %v11499_v13  ;;  %v952_v13 = vld [vmem:[#allocation7 + $0x1818] sm:$0xff] }
 0x45a   :  { %7713 = vmatpush1.bf16.msra.mxu1 %v11244_v57  ;;  %v11301_v54 = vcombine.high %v952_v13, %v956_v7  ;;  %v12099_v57 = vld [vmem:[#allocation10 + $0x4] ss:$16 sps:$4 sm:$0xff]   ;;  %v12115_v6 = vld [vmem:[#allocation10 + $0xc0] ss:$16 sps:$4 sm:$0xff]  }
 0x45b   :  { %7714 = vmatprep.subr.bf16.mxu1 %v11253_v8  ;;  %v964_v8 = vld [vmem:[#allocation7 + $0x1878] sm:$0xff] }
 0x45c   :  { %7455 = vmatpush1.bf16.msra.mxu0 %v11498_v62  ;;  %v960_v62 = vld [vmem:[#allocation7 + $0x1858] sm:$0xff] }
 0x45d   :  { %7456 = vmatprep.subr.bf16.mxu0 %v11507_v63  ;;  %v11300_v63 = vcombine.low %v952_v13, %v956_v7  ;;  %v11309_v17 = vcombine.high %v960_v62, %v964_v8  ;;  %v12118_v13 = vld [vmem:[#allocation10 + $0xe0] ss:$16 sps:$4 sm:$0xff]  }
 0x45e   :  { %7715 = vmatpush1.bf16.msra.mxu1 %v11252_v2  ;;  %v972_v2 = vld [vmem:[#allocation7 + $0x18b8] sm:$0xff] }
 0x45f   :  { %7716 = vmatprep.subr.bf16.mxu1 %v11261_v58  ;;  %v12100_v58 = vld [vmem:[#allocation10 + $0x20] ss:$16 sps:$4 sm:$0xff]   ;;  %v11316_v34 = vcombine.low %v968_v27, %v972_v2 }
 0x460   :  { %7457 = vmatpush1.bf16.msra.mxu0 %v11506_v22  ;;  %v11308_v22 = vcombine.low %v960_v62, %v964_v8  ;;  %v12121_v62 = vld [vmem:[#allocation10 + $0x100] ss:$16 sps:$4 sm:$0xff]  }
 0x461   :  { %7458 = vmatprep.subr.bf16.mxu0 %v11515_v48  ;;  %v11317_v48 = vcombine.high %v968_v27, %v972_v2  ;;  %v12124_v27 = vld [vmem:[#allocation10 + $0x120] ss:$16 sps:$4 sm:$0xff]  }
 0x462   :  { %7717 = vmatpush1.bf16.msra.mxu1 %v11260_v61  ;;  %v11325_v61 = vcombine.high %v976_v32, %v980_v59  ;;  %v12127_v32 = vld [vmem:[#allocation10 + $0x140] ss:$16 sps:$4 sm:$0xff]  }
 0x463   :  { %7718 = vmatprep.subr.bf16.mxu1 %v11269_v37  ;;  %v984_v37 = vld [vmem:[#allocation7 + $0x1918] sm:$0xff] }
 0x464   :  { %7459 = vmatpush1.bf16.msra.mxu0 %v11514_v0  ;;  %v12108_v0 = vld [vmem:[#allocation10 + $0x64] ss:$16 sps:$4 sm:$0xff]  }
 0x465   :  { %7460 = vmatprep.subr.bf16.mxu0 %v11523_v10  ;;  %v988_v10 = vld [vmem:[#allocation7 + $0x1938] sm:$0xff] }
 0x466   :  { %7719 = vmatpush1.bf16.msra.mxu1 %v11268_v45  ;;  %v11333_v43 = vcombine.high %v984_v37, %v988_v10  ;;  %v992_v45 = vld [vmem:[#allocation7 + $0x1958] sm:$0xff] }
 0x467   :  { %7720 = vmatprep.subr.bf16.mxu1 %v11277_v47  ;;  %v12109_v47 = vld [vmem:[#allocation10 + $0x80] ss:$16 sps:$4 sm:$0xff]  }
 0x468   :  { %7461 = vmatpush1.bf16.msra.mxu0 %v11522_v46  ;;  %v11332_v46 = vcombine.low %v984_v37, %v988_v10  ;;  %v12130_v37 = vld [vmem:[#allocation10 + $0x160] ss:$16 sps:$4 sm:$0xff]  }
 0x469   :  { %7462 = vmatprep.subr.bf16.mxu0 %v11531_v23 }
 0x46a   :  { %7721 = vmatpush1.bf16.msra.mxu1 %v11276_v53  ;;  %v12112_v53 = vld [vmem:[#allocation10 + $0xa0] ss:$16 sps:$4 sm:$0xff]  }
 0x46b   :  { %7722 = vmatprep.subr.bf16.mxu1 %v11285_v4  ;;  %v12117_v4 = vld [vmem:[#allocation10 + $0xc4] ss:$16 sps:$4 sm:$0xff]  }
 0x46c   :  { %7463 = vmatpush1.bf16.msra.mxu0 %v11530_v1  ;;  %v11349_v1 = vcombine.high %v1000_v50, %v1004_v51  ;;  %v12136_v50 = vld [vmem:[#allocation10 + $0x1a0] ss:$16 sps:$4 sm:$0xff]  }
 0x46d   :  { %7464 = vmatprep.subr.bf16.mxu0 %v11539_v15  ;;  %v1008_v15 = vld [vmem:[#allocation7 + $0x19d8] sm:$0xff] }
 0x46e   :  { %7723 = vmatpush1.bf16.msra.mxu1 %v11284_v28  ;;  %v11357_v19 = vcombine.high %v1008_v15, %v1012_v21  ;;  %v12120_v28 = vld [vmem:[#allocation10 + $0xe4] ss:$16 sps:$4 sm:$0xff]  }
 0x46f   :  { %7724 = vmatprep.subr.bf16.mxu1 %v11293_v30  ;;  %v1020_v30 = vld [vmem:[#allocation7 + $0x1a38] sm:$0xff] }
 0x470   :  { %7465 = vmatpush1.bf16.msra.mxu0 %v11538_v38  ;;  %v1016_v38 = vld [vmem:[#allocation7 + $0x1a18] sm:$0xff] }
 0x471   :  { %7466 = vmatprep.subr.bf16.mxu0 %v11547_v12  ;;  %v11356_v12 = vcombine.low %v1008_v15, %v1012_v21  ;;  %v11365_v7 = vcombine.high %v1016_v38, %v1020_v30  ;;  %v12139_v15 = vld [vmem:[#allocation10 + $0x1c0] ss:$16 sps:$4 sm:$0xff]  }
 0x472   :  { %7725 = vmatpush1.bf16.msra.mxu1 %v11292_v25  ;;  %v12123_v25 = vld [vmem:[#allocation10 + $0x104] ss:$16 sps:$4 sm:$0xff]  }
 0x473   :  { %7737 = vmatprep.subr.bf16.mxu1 %v11301_v54  ;;  %v1028_v54 = vld [vmem:[#allocation7 + $0x1a78] sm:$0xff] }
 0x474   :  { %7467 = vmatpush1.bf16.msra.mxu0 %v11546_v40  ;;  %v1024_v40 = vld [vmem:[#allocation7 + $0x1a58] sm:$0xff] }
 0x475   :  { %9438 = vmatprep.subr.bf16.mxu0 %v12099_v57  ;;  %7727 = vmatmul.mubr.bf16.vlgmr.msra.gmra.mrb[8].mxu1 %v13139_v36  ;;  %v12103_v36 = vld [vmem:[#allocation10 + $0x40] ss:$16 sps:$4 sm:$0xff]   ;;  %v11364_v57 = vcombine.low %v1016_v38, %v1020_v30  ;;  %v11373_v8 = vcombine.high %v1024_v40, %v1028_v54 }
 0x476   :  { %7738 = vmatpush1.bf16.msra.mxu1 %v11300_v63  ;;  %7769 = vmatprep.mubr.bf16.mxu1 %v13143_v16  ;;  %v996_v16 = vld [vmem:[#allocation7 + $0x1978] sm:$0xff] }
 0x477   :  { %7469 = vmatmul.mubr.bf16.vlgmr.msra.gmra.mrb[4].mxu0 %v13167_v56  ;;  %7739 = vmatprep.subr.bf16.mxu1 %v11309_v17  ;;  %v11341_v23 = vcombine.high %v992_v45, %v996_v16  ;;  %v11340_v52 = vcombine.low %v992_v45, %v996_v16  ;;  %v12126_v63 = vld [vmem:[#allocation10 + $0x124] ss:$16 sps:$4 sm:$0xff]   ;;  %v12133_v45 = vld [vmem:[#allocation10 + $0x180] ss:$16 sps:$4 sm:$0xff]  }
 0x478   :  { %9439 = vmatpush1.bf16.msra.mxu0 %v12097_v33  ;;  %9470 = vmatprep.mubr.bf16.mxu0 %v13214_v39  ;;  %v1032_v33 = vld [vmem:[#allocation7 + $0x1a98] sm:$0xff] }
 0x479   :  { %9440 = vmatprep.subr.bf16.mxu0 %v12102_v18  ;;  %v1036_v17 = vld [vmem:[#allocation7 + $0x1ab8] sm:$0xff]  ;;  %v11372_v18 = vcombine.low %v1024_v40, %v1028_v54 }
 0x47a   :  { %7740 = vmatpush1.bf16.msra.mxu1 %v11308_v22  ;;  %v11381_v2 = vcombine.high %v1032_v33, %v1036_v17  ;;  %v12129_v22 = vld [vmem:[#allocation10 + $0x144] ss:$16 sps:$4 sm:$0xff]   ;;  %v12142_v38 = vld [vmem:[#allocation10 + $0x1e0] ss:$16 sps:$4 sm:$0xff]  }
 0x47b   :  { %7741 = vmatprep.subr.bf16.mxu1 %v11317_v48  ;;  %v1044_v48 = vld [vmem:[#allocation7 + $0x1af8] sm:$0xff] }
 0x47c   :  { %9441 = vmatpush1.bf16.msra.mxu0 %v12100_v58  ;;  %v1040_v58 = vld [vmem:[#allocation7 + $0x1ad8] sm:$0xff] }
 0x47d   :  { %9442 = vmatprep.subr.bf16.mxu0 %v12105_v29  ;;  %v11380_v29 = vcombine.low %v1032_v33, %v1036_v17  ;;  %v11389_v59 = vcombine.high %v1040_v58, %v1044_v48  ;;  %v12145_v40 = vld [vmem:[#allocation10 + $0x200] ss:$16 sps:$4 sm:$0xff]  }
 0x47e   :  { %7742 = vmatpush1.bf16.msra.mxu1 %v11316_v34  ;;  %v12132_v34 = vld [vmem:[#allocation10 + $0x164] ss:$16 sps:$4 sm:$0xff]   ;;  %v12148_v33 = vld [vmem:[#allocation10 + $0x220] ss:$16 sps:$4 sm:$0xff]  }
 0x47f   :  { %7743 = vmatprep.subr.bf16.mxu1 %v11325_v61  ;;  %v1052_v61 = vld [vmem:[#allocation7 + $0x1b38] sm:$0xff] }
 0x480   :  { %9443 = vmatpush1.bf16.msra.mxu0 %v12103_v36  ;;  %v1048_v36 = vld [vmem:[#allocation7 + $0x1b18] sm:$0xff] }
 0x481   :  { %9444 = vmatprep.subr.bf16.mxu0 %v12108_v0  ;;  %v11388_v0 = vcombine.low %v1040_v58, %v1044_v48  ;;  %v11397_v10 = vcombine.high %v1048_v36, %v1052_v61  ;;  %v12156_v48 = vld [vmem:[#allocation10 + $0x264] ss:$16 sps:$4 sm:$0xff]  }
 0x482   :  { %7744 = vmatpush1.bf16.msra.mxu1 %v11324_v55  ;;  %v12135_v55 = vld [vmem:[#allocation10 + $0x184] ss:$16 sps:$4 sm:$0xff]  }
 0x483   :  { %7745 = vmatprep.subr.bf16.mxu1 %v11333_v43  ;;  %v1060_v43 = vld [vmem:[#allocation7 + $0x1b78] sm:$0xff] }
 0x484   :  { %9445 = vmatpush1.bf16.msra.mxu0 %v12106_v42  ;;  %v1056_v42 = vld [vmem:[#allocation7 + $0x1b58] sm:$0xff] }
 0x485   :  { %9446 = vmatprep.subr.bf16.mxu0 %v12111_v44  ;;  %v11396_v44 = vcombine.low %v1048_v36, %v1052_v61  ;;  %v11405_v16 = vcombine.high %v1056_v42, %v1060_v43  ;;  %v12159_v61 = vld [vmem:[#allocation10 + $0x284] ss:$16 sps:$4 sm:$0xff]  }
 0x486   :  { %7746 = vmatpush1.bf16.msra.mxu1 %v11332_v46  ;;  %v12138_v46 = vld [vmem:[#allocation10 + $0x1a4] ss:$16 sps:$4 sm:$0xff]  }
 0x487   :  { %7747 = vmatprep.subr.bf16.mxu1 %v11341_v23  ;;  %v1068_v23 = vld [vmem:[#allocation7 + $0x1bb8] sm:$0xff] }
 0x488   :  { %9447 = vmatpush1.bf16.msra.mxu0 %v12109_v47  ;;  %v1064_v47 = vld [vmem:[#allocation7 + $0x1b98] sm:$0xff] }
 0x489   :  { %9448 = vmatprep.subr.bf16.mxu0 %v12114_v49  ;;  %v11404_v49 = vcombine.low %v1056_v42, %v1060_v43  ;;  %v11413_v51 = vcombine.high %v1064_v47, %v1068_v23  ;;  %v12162_v42 = vld [vmem:[#allocation10 + $0x2a4] ss:$16 sps:$4 sm:$0xff]  }
 0x48a   :  { %7748 = vmatpush1.bf16.msra.mxu1 %v11340_v52  ;;  %v12141_v52 = vld [vmem:[#allocation10 + $0x1c4] ss:$16 sps:$4 sm:$0xff]  }
 0x48b   :  { %7749 = vmatprep.subr.bf16.mxu1 %v11349_v1  ;;  %v1076_v1 = vld [vmem:[#allocation7 + $0x1bf8] sm:$0xff] }
 0x48c   :  { %9449 = vmatpush1.bf16.msra.mxu0 %v12112_v53  ;;  %v1072_v53 = vld [vmem:[#allocation7 + $0x1bd8] sm:$0xff] }
 0x48d   :  { %9450 = vmatprep.subr.bf16.mxu0 %v12117_v4  ;;  %v11412_v4 = vcombine.low %v1064_v47, %v1068_v23  ;;  %v11421_v21 = vcombine.high %v1072_v53, %v1076_v1  ;;  %v1128_v43 = vld [vmem:[#allocation7 + $0x1d98] sm:$0xff] }
 0x48e   :  { %7750 = vmatpush1.bf16.msra.mxu1 %v11348_v5  ;;  %v12144_v5 = vld [vmem:[#allocation10 + $0x1e4] ss:$16 sps:$4 sm:$0xff]  }
 0x48f   :  { %7751 = vmatprep.subr.bf16.mxu1 %v11357_v19  ;;  %v1084_v19 = vld [vmem:[#allocation7 + $0x1c38] sm:$0xff] }
 0x490   :  { %9451 = vmatpush1.bf16.msra.mxu0 %v12115_v6  ;;  %v1080_v6 = vld [vmem:[#allocation7 + $0x1c18] sm:$0xff] }
 0x491   :  { %9452 = vmatprep.subr.bf16.mxu0 %v12120_v28  ;;  %v11420_v28 = vcombine.low %v1072_v53, %v1076_v1  ;;  %v11429_v30 = vcombine.high %v1080_v6, %v1084_v19  ;;  %v12165_v47 = vld [vmem:[#allocation10 + $0x2c4] ss:$16 sps:$4 sm:$0xff]  }
 0x492   :  { %7752 = vmatpush1.bf16.msra.mxu1 %v11356_v12  ;;  %v12147_v12 = vld [vmem:[#allocation10 + $0x204] ss:$16 sps:$4 sm:$0xff]  }
 0x493   :  { %7753 = vmatprep.subr.bf16.mxu1 %v11365_v7  ;;  %v1092_v7 = vld [vmem:[#allocation7 + $0x1c78] sm:$0xff] }
 0x494   :  { %9453 = vmatpush1.bf16.msra.mxu0 %v12118_v13  ;;  %v1088_v13 = vld [vmem:[#allocation7 + $0x1c58] sm:$0xff] }
 0x495   :  { %9454 = vmatprep.subr.bf16.mxu0 %v12123_v25  ;;  %v11428_v25 = vcombine.low %v1080_v6, %v1084_v19  ;;  %v11437_v54 = vcombine.high %v1088_v13, %v1092_v7  ;;  %v1136_v23 = vld [vmem:[#allocation7 + $0x1dd8] sm:$0xff] }
 0x496   :  { %7754 = vmatpush1.bf16.msra.mxu1 %v11364_v57  ;;  %v12150_v57 = vld [vmem:[#allocation10 + $0x224] ss:$16 sps:$4 sm:$0xff]  }
 0x497   :  { %7755 = vmatprep.subr.bf16.mxu1 %v11373_v8  ;;  %v1100_v8 = vld [vmem:[#allocation7 + $0x1cb8] sm:$0xff] }
 0x498   :  { %9455 = vmatpush1.bf16.msra.mxu0 %v12121_v62  ;;  %v1096_v62 = vld [vmem:[#allocation7 + $0x1c98] sm:$0xff] }
 0x499   :  { %9456 = vmatprep.subr.bf16.mxu0 %v12126_v63  ;;  %v11436_v63 = vcombine.low %v1088_v13, %v1092_v7  ;;  %v11445_v17 = vcombine.high %v1096_v62, %v1100_v8  ;;  %v12168_v53 = vld [vmem:[#allocation10 + $0x2e4] ss:$16 sps:$4 sm:$0xff]  }
 0x49a   :  { %7756 = vmatpush1.bf16.msra.mxu1 %v11372_v18  ;;  %v12153_v18 = vld [vmem:[#allocation10 + $0x244] ss:$16 sps:$4 sm:$0xff]  }
 0x49b   :  { %7757 = vmatprep.subr.bf16.mxu1 %v11381_v2  ;;  %v1108_v2 = vld [vmem:[#allocation7 + $0x1cf8] sm:$0xff] }
 0x49c   :  { %9457 = vmatpush1.bf16.msra.mxu0 %v12124_v27  ;;  %v1104_v27 = vld [vmem:[#allocation7 + $0x1cd8] sm:$0xff] }
 0x49d   :  { %9458 = vmatprep.subr.bf16.mxu0 %v12129_v22  ;;  %v11444_v22 = vcombine.low %v1096_v62, %v1100_v8  ;;  %v11453_v58 = vcombine.high %v1104_v27, %v1108_v2  ;;  %v1144_v1 = vld [vmem:[#allocation7 + $0x1e18] sm:$0xff] }
 0x49e   :  { %7758 = vmatpush1.bf16.msra.mxu1 %v11380_v29  ;;  %v1112_v29 = vld [vmem:[#allocation7 + $0x1d18] sm:$0xff] }
 0x49f   :  { %7759 = vmatprep.subr.bf16.mxu1 %v11389_v59  ;;  %v11452_v59 = vcombine.low %v1104_v27, %v1108_v2  ;;  %v12171_v6 = vld [vmem:[#allocation10 + $0x304] ss:$16 sps:$4 sm:$0xff]  }
 0x4a0   :  { %9459 = vmatpush1.bf16.msra.mxu0 %v12127_v32  ;;  %v1116_v32 = vld [vmem:[#allocation7 + $0x1d38] sm:$0xff] }
 0x4a1   :  { %9460 = vmatprep.subr.bf16.mxu0 %v12132_v34  ;;  %v12154_v34 = vld [vmem:[#allocation10 + $0x260] ss:$16 sps:$4 sm:$0xff]   ;;  %v11461_v36 = vcombine.high %v1112_v29, %v1116_v32  ;;  %v12174_v13 = vld [vmem:[#allocation10 + $0x324] ss:$16 sps:$4 sm:$0xff]  }
 0x4a2   :  { %7760 = vmatpush1.bf16.msra.mxu1 %v11388_v0  ;;  %v1120_v0 = vld [vmem:[#allocation7 + $0x1d58] sm:$0xff] }
 0x4a3   :  { %7761 = vmatprep.subr.bf16.mxu1 %v11397_v10  ;;  %v12157_v10 = vld [vmem:[#allocation10 + $0x280] ss:$16 sps:$4 sm:$0xff]   ;;  %v12177_v62 = vld [vmem:[#allocation10 + $0x344] ss:$16 sps:$4 sm:$0xff]  }
 0x4a4   :  { %9461 = vmatpush1.bf16.msra.mxu0 %v12130_v37  ;;  %v11460_v37 = vcombine.low %v1112_v29, %v1116_v32  ;;  %v1152_v19 = vld [vmem:[#allocation7 + $0x1e58] sm:$0xff] }
 0x4a5   :  { %9462 = vmatprep.subr.bf16.mxu0 %v12135_v55  ;;  %v1160_v7 = vld [vmem:[#allocation7 + $0x1e98] sm:$0xff] }
 0x4a6   :  { %7762 = vmatpush1.bf16.msra.mxu1 %v11396_v44  ;;  %v1132_v44 = vld [vmem:[#allocation7 + $0x1db8] sm:$0xff] }
 0x4a7   :  { %7763 = vmatprep.subr.bf16.mxu1 %v11405_v16  ;;  %v12160_v16 = vld [vmem:[#allocation10 + $0x2a0] ss:$16 sps:$4 sm:$0xff]   ;;  %v12180_v27 = vld [vmem:[#allocation10 + $0x364] ss:$16 sps:$4 sm:$0xff]  }
 0x4a8   :  { %9463 = vmatpush1.bf16.msra.mxu0 %v12133_v45  ;;  %v1168_v8 = vld [vmem:[#allocation7 + $0x1ed8] sm:$0xff] }
 0x4a9   :  { %9464 = vmatprep.subr.bf16.mxu0 %v12138_v46  ;;  %v11477_v46 = vcombine.high %v1128_v43, %v1132_v44  ;;  %v1176_v2 = vld [vmem:[#allocation7 + $0x1f18] sm:$0xff] }
 0x4aa   :  { %7764 = vmatpush1.bf16.msra.mxu1 %v11404_v49  ;;  %v1140_v49 = vld [vmem:[#allocation7 + $0x1df8] sm:$0xff] }
 0x4ab   :  { %7765 = vmatprep.subr.bf16.mxu1 %v11413_v51  ;;  %v12163_v51 = vld [vmem:[#allocation10 + $0x2c0] ss:$16 sps:$4 sm:$0xff]   ;;  %v12183_v29 = vld [vmem:[#allocation10 + $0x384] ss:$16 sps:$4 sm:$0xff]  }
 0x4ac   :  { %9465 = vmatpush1.bf16.msra.mxu0 %v12136_v50  ;;  %v11476_v50 = vcombine.low %v1128_v43, %v1132_v44  ;;  %v1184_v32 = vld [vmem:[#allocation7 + $0x1f58] sm:$0xff] }
 0x4ad   :  { %9466 = vmatprep.subr.bf16.mxu0 %v12141_v52  ;;  %v11485_v52 = vcombine.high %v1136_v23, %v1140_v49  ;;  %v12189_v43 = vld [vmem:[#allocation10 + $0x3c4] ss:$16 sps:$4 sm:$0xff]  }
 0x4ae   :  { %7766 = vmatpush1.bf16.msra.mxu1 %v11412_v4  ;;  %v1148_v4 = vld [vmem:[#allocation7 + $0x1e38] sm:$0xff] }
 0x4af   :  { %7767 = vmatprep.subr.bf16.mxu1 %v11421_v21  ;;  %v12166_v21 = vld [vmem:[#allocation10 + $0x2e0] ss:$16 sps:$4 sm:$0xff]  }
 0x4b0   :  { %9467 = vmatpush1.bf16.msra.mxu0 %v12139_v15  ;;  %v11484_v15 = vcombine.low %v1136_v23, %v1140_v49  ;;  %v1200_v44 = vld [vmem:[#allocation7 + $0x1fd8] sm:$0xff] }
 0x4b1   :  { %9468 = vmatprep.subr.bf16.mxu0 %v12144_v5  ;;  %v11493_v5 = vcombine.high %v1144_v1, %v1148_v4  ;;  %v12192_v23 = vld [vmem:[#allocation10 + $0x3e4] ss:$16 sps:$4 sm:$0xff]  }
 0x4b2   :  { %7768 = vmatpush1.bf16.msra.mxu1 %v11420_v28  ;;  %v1156_v28 = vld [vmem:[#allocation7 + $0x1e78] sm:$0xff] }
 0x4b3   :  { %7780 = vmatprep.subr.bf16.mxu1 %v11429_v30  ;;  %v12169_v30 = vld [vmem:[#allocation10 + $0x300] ss:$16 sps:$4 sm:$0xff]  }
 0x4b4   :  { %9469 = vmatpush1.bf16.msra.mxu0 %v12142_v38  ;;  %v11492_v38 = vcombine.low %v1144_v1, %v1148_v4  ;;  %v12198_v1 = vld [vmem:[#allocation10 + $0x2c] ss:$16 sps:$4 sm:$0xff]   ;;  %v12217_v4 = vld [vmem:[#allocation10 + $0x400] ss:$16 sps:$4 sm:$0xff]  }
 0x4b5   :  { %9481 = vmatprep.subr.bf16.mxu0 %v12147_v12  ;;  %7770 = vmatmul.mubr.bf16.vlgmr.msra.gmra.mrb[8].mxu1 %v13155_v3  ;;  %v12151_v3 = vld [vmem:[#allocation10 + $0x240] ss:$16 sps:$4 sm:$0xff]   ;;  %v11501_v12 = vcombine.high %v1152_v19, %v1156_v28 }
 0x4b6   :  { %7781 = vmatpush1.bf16.msra.mxu1 %v11428_v25  ;;  %7812 = vmatprep.mubr.bf16.mxu1 %v13159_v11  ;;  %v1124_v11 = vld [vmem:[#allocation7 + $0x1d78] sm:$0xff] }
 0x4b7   :  { %9471 = vmatmul.mubr.bf16.vlgmr.msra.gmra.mrb[8].mxu0 %v13210_v60  ;;  %7782 = vmatprep.subr.bf16.mxu1 %v11437_v54  ;;  %v11469_v55 = vcombine.high %v1120_v0, %v1124_v11  ;;  %v11468_v45 = vcombine.low %v1120_v0, %v1124_v11  ;;  %v1164_v25 = vld [vmem:[#allocation7 + $0x1eb8] sm:$0xff] }
 0x4b8   :  { %9482 = vmatpush1.bf16.msra.mxu0 %v12145_v40  ;;  %9513 = vmatprep.mubr.bf16.mxu0 %v13241_v41  ;;  %v11500_v40 = vcombine.low %v1152_v19, %v1156_v28  ;;  %v12172_v54 = vld [vmem:[#allocation10 + $0x320] ss:$16 sps:$4 sm:$0xff]   ;;  %v12186_v0 = vld [vmem:[#allocation10 + $0x3a4] ss:$16 sps:$4 sm:$0xff]   ;;  %v12199_v28 = vld [vmem:[#allocation10 + $0x48] ss:$16 sps:$4 sm:$0xff]  }
 0x4b9   :  { %9483 = vmatprep.subr.bf16.mxu0 %v12150_v57  ;;  %v11509_v57 = vcombine.high %v1160_v7, %v1164_v25  ;;  %v1192_v11 = vld [vmem:[#allocation7 + $0x1f98] sm:$0xff] }
 0x4ba   :  { %7783 = vmatpush1.bf16.msra.mxu1 %v11436_v63  ;;  %v1172_v63 = vld [vmem:[#allocation7 + $0x1ef8] sm:$0xff] }
 0x4bb   :  { %7784 = vmatprep.subr.bf16.mxu1 %v11445_v17  ;;  %v12175_v17 = vld [vmem:[#allocation10 + $0x340] ss:$16 sps:$4 sm:$0xff]   ;;  %v12231_v19 = vld [vmem:[#allocation10 + $0x444] ss:$16 sps:$4 sm:$0xff]  }
 0x4bc   :  { %9484 = vmatpush1.bf16.msra.mxu0 %v12148_v33  ;;  %v11508_v33 = vcombine.low %v1160_v7, %v1164_v25  ;;  %v12243_v7 = vld [vmem:[#allocation10 + $0x484] ss:$16 sps:$4 sm:$0xff]   ;;  %v12205_v25 = vld [vmem:[#allocation10 + $0x88] ss:$16 sps:$4 sm:$0xff]  }
 0x4bd   :  { %9485 = vmatprep.subr.bf16.mxu0 %v12153_v18  ;;  %v11517_v18 = vcombine.high %v1168_v8, %v1172_v63 }
 0x4be   :  { %7785 = vmatpush1.bf16.msra.mxu1 %v11444_v22  ;;  %v1180_v22 = vld [vmem:[#allocation7 + $0x1f38] sm:$0xff] }
 0x4bf   :  { %7786 = vmatprep.subr.bf16.mxu1 %v11453_v58  ;;  %v12178_v58 = vld [vmem:[#allocation10 + $0x360] ss:$16 sps:$4 sm:$0xff]  }
 0x4c0   :  { %9486 = vmatpush1.bf16.msra.mxu0 %v12151_v3  ;;  %v11516_v3 = vcombine.low %v1168_v8, %v1172_v63  ;;  %v12213_v8 = vld [vmem:[#allocation10 + $0xcc] ss:$16 sps:$4 sm:$0xff]   ;;  %v12247_v63 = vld [vmem:[#allocation10 + $0x4a0] ss:$16 sps:$4 sm:$0xff]  }
 0x4c1   :  { %9487 = vmatprep.subr.bf16.mxu0 %v12156_v48  ;;  %v11525_v48 = vcombine.high %v1176_v2, %v1180_v22 }
 0x4c2   :  { %7787 = vmatpush1.bf16.msra.mxu1 %v11452_v59  ;;  %v1188_v59 = vld [vmem:[#allocation7 + $0x1f78] sm:$0xff] }
 0x4c3   :  { %7788 = vmatprep.subr.bf16.mxu1 %v11461_v36  ;;  %v12181_v36 = vld [vmem:[#allocation10 + $0x380] ss:$16 sps:$4 sm:$0xff]  }
 0x4c4   :  { %9488 = vmatpush1.bf16.msra.mxu0 %v12154_v34  ;;  %v11524_v34 = vcombine.low %v1176_v2, %v1180_v22  ;;  %v12261_v2 = vld [vmem:[#allocation10 + $0x4e4] ss:$16 sps:$4 sm:$0xff]   ;;  %v12214_v22 = vld [vmem:[#allocation10 + $0xe8] ss:$16 sps:$4 sm:$0xff]  }
 0x4c5   :  { %9489 = vmatprep.subr.bf16.mxu0 %v12159_v61  ;;  %v11533_v61 = vcombine.high %v1184_v32, %v1188_v59 }
 0x4c6   :  { %7789 = vmatpush1.bf16.msra.mxu1 %v11460_v37  ;;  %v1196_v37 = vld [vmem:[#allocation7 + $0x1fb8] sm:$0xff] }
 0x4c7   :  { %7790 = vmatprep.subr.bf16.mxu1 %v11469_v55  ;;  %v12184_v55 = vld [vmem:[#allocation10 + $0x3a0] ss:$16 sps:$4 sm:$0xff]  }
 0x4c8   :  { %9490 = vmatpush1.bf16.msra.mxu0 %v12157_v10  ;;  %v11532_v10 = vcombine.low %v1184_v32, %v1188_v59  ;;  %v12228_v32 = vld [vmem:[#allocation10 + $0x12c] ss:$16 sps:$4 sm:$0xff]   ;;  %v12265_v59 = vld [vmem:[#allocation10 + $0x500] ss:$16 sps:$4 sm:$0xff]  }
 0x4c9   :  { %9491 = vmatprep.subr.bf16.mxu0 %v12162_v42  ;;  %v11541_v42 = vcombine.high %v1192_v11, %v1196_v37 }
 0x4ca   :  { %7791 = vmatpush1.bf16.msra.mxu1 %v11468_v45  ;;  %v1204_v45 = vld [vmem:[#allocation7 + $0x1ff8] sm:$0xff] }
 0x4cb   :  { %7792 = vmatprep.subr.bf16.mxu1 %v11477_v46  ;;  %v12187_v46 = vld [vmem:[#allocation10 + $0x3c0] ss:$16 sps:$4 sm:$0xff]   ;;  %v11548_v49 = vcombine.low %v1200_v44, %v1204_v45 }
 0x4cc   :  { %9492 = vmatpush1.bf16.msra.mxu0 %v12160_v16  ;;  %v11540_v16 = vcombine.low %v1192_v11, %v1196_v37  ;;  %v12279_v11 = vld [vmem:[#allocation10 + $0x544] ss:$16 sps:$4 sm:$0xff]   ;;  %v12232_v37 = vld [vmem:[#allocation10 + $0x148] ss:$16 sps:$4 sm:$0xff]  }
 0x4cd   :  { %9493 = vmatprep.subr.bf16.mxu0 %v12165_v47  ;;  %v11549_v47 = vcombine.high %v1200_v44, %v1204_v45  ;;  %v12246_v44 = vld [vmem:[#allocation10 + $0x18c] ss:$16 sps:$4 sm:$0xff]   ;;  %v12283_v45 = vld [vmem:[#allocation10 + $0x560] ss:$16 sps:$4 sm:$0xff]  }
 0x4ce   :  { %7793 = vmatpush1.bf16.msra.mxu1 %v11476_v50  ;;  %v12190_v50 = vld [vmem:[#allocation10 + $0x3e0] ss:$16 sps:$4 sm:$0xff]  }
 0x4cf   :  { %7794 = vmatprep.subr.bf16.mxu1 %v11485_v52  ;;  %v12219_v52 = vld [vmem:[#allocation10 + $0x404] ss:$16 sps:$4 sm:$0xff]  }
 0x4d0   :  { %9494 = vmatpush1.bf16.msra.mxu0 %v12163_v51  ;;  %v12195_v51 = vld [vmem:[#allocation10 + $0xc] ss:$16 sps:$4 sm:$0xff]  }
 0x4d1   :  { %9495 = vmatprep.subr.bf16.mxu0 %v12168_v53  ;;  %v12193_v53 = vld [vmem:[#allocation10 + $0x8] ss:$16 sps:$4 sm:$0xff]  }
 0x4d2   :  { %7795 = vmatpush1.bf16.msra.mxu1 %v11484_v15  ;;  %v12225_v15 = vld [vmem:[#allocation10 + $0x424] ss:$16 sps:$4 sm:$0xff]  }
 0x4d3   :  { %7796 = vmatprep.subr.bf16.mxu1 %v11493_v5  ;;  %v12201_v5 = vld [vmem:[#allocation10 + $0x4c] ss:$16 sps:$4 sm:$0xff]  }
 0x4d4   :  { %9496 = vmatpush1.bf16.msra.mxu0 %v12166_v21  ;;  %v12196_v21 = vld [vmem:[#allocation10 + $0x28] ss:$16 sps:$4 sm:$0xff]  }
 0x4d5   :  { %9497 = vmatprep.subr.bf16.mxu0 %v12171_v6  ;;  %v12223_v6 = vld [vmem:[#allocation10 + $0x420] ss:$16 sps:$4 sm:$0xff]  }
 0x4d6   :  { %7797 = vmatpush1.bf16.msra.mxu1 %v11492_v38  ;;  %v12204_v38 = vld [vmem:[#allocation10 + $0x6c] ss:$16 sps:$4 sm:$0xff]  }
 0x4d7   :  { %7798 = vmatprep.subr.bf16.mxu1 %v11501_v12  ;;  %v12202_v12 = vld [vmem:[#allocation10 + $0x68] ss:$16 sps:$4 sm:$0xff]  }
 0x4d8   :  { %9498 = vmatpush1.bf16.msra.mxu0 %v12169_v30  ;;  %v12229_v30 = vld [vmem:[#allocation10 + $0x440] ss:$16 sps:$4 sm:$0xff]  }
 0x4d9   :  { %9499 = vmatprep.subr.bf16.mxu0 %v12174_v13  ;;  %v12207_v13 = vld [vmem:[#allocation10 + $0x8c] ss:$16 sps:$4 sm:$0xff]  }
 0x4da   :  { %7799 = vmatpush1.bf16.msra.mxu1 %v11500_v40  ;;  %v12210_v40 = vld [vmem:[#allocation10 + $0xac] ss:$16 sps:$4 sm:$0xff]  }
 0x4db   :  { %7800 = vmatprep.subr.bf16.mxu1 %v11509_v57  ;;  %v12249_v57 = vld [vmem:[#allocation10 + $0x4a4] ss:$16 sps:$4 sm:$0xff]  }
 0x4dc   :  { %9500 = vmatpush1.bf16.msra.mxu0 %v12172_v54  ;;  %v12241_v54 = vld [vmem:[#allocation10 + $0x480] ss:$16 sps:$4 sm:$0xff]  }
 0x4dd   :  { %9501 = vmatprep.subr.bf16.mxu0 %v12177_v62  ;;  %v12208_v62 = vld [vmem:[#allocation10 + $0xa8] ss:$16 sps:$4 sm:$0xff]  }
 0x4de   :  { %7801 = vmatpush1.bf16.msra.mxu1 %v11508_v33  ;;  %v12255_v33 = vld [vmem:[#allocation10 + $0x4c4] ss:$16 sps:$4 sm:$0xff]  }
 0x4df   :  { %7802 = vmatprep.subr.bf16.mxu1 %v11517_v18  ;;  %v12216_v18 = vld [vmem:[#allocation10 + $0xec] ss:$16 sps:$4 sm:$0xff]  }
 0x4e0   :  { %9502 = vmatpush1.bf16.msra.mxu0 %v12175_v17  ;;  %v12211_v17 = vld [vmem:[#allocation10 + $0xc8] ss:$16 sps:$4 sm:$0xff]  }
 0x4e1   :  { %9503 = vmatprep.subr.bf16.mxu0 %v12180_v27  ;;  %v12253_v27 = vld [vmem:[#allocation10 + $0x4c0] ss:$16 sps:$4 sm:$0xff]  }
 0x4e2   :  { %7803 = vmatpush1.bf16.msra.mxu1 %v11516_v3  ;;  %v12222_v3 = vld [vmem:[#allocation10 + $0x10c] ss:$16 sps:$4 sm:$0xff]  }
 0x4e3   :  { %7804 = vmatprep.subr.bf16.mxu1 %v11525_v48  ;;  %v12267_v48 = vld [vmem:[#allocation10 + $0x504] ss:$16 sps:$4 sm:$0xff]  }
 0x4e4   :  { %9504 = vmatpush1.bf16.msra.mxu0 %v12178_v58  ;;  %v12259_v58 = vld [vmem:[#allocation10 + $0x4e0] ss:$16 sps:$4 sm:$0xff]  }
 0x4e5   :  { %9505 = vmatprep.subr.bf16.mxu0 %v12183_v29  ;;  %v12220_v29 = vld [vmem:[#allocation10 + $0x108] ss:$16 sps:$4 sm:$0xff]  }
 0x4e6   :  { %7805 = vmatpush1.bf16.msra.mxu1 %v11524_v34  ;;  %v12273_v34 = vld [vmem:[#allocation10 + $0x524] ss:$16 sps:$4 sm:$0xff]  }
 0x4e7   :  { %7806 = vmatprep.subr.bf16.mxu1 %v11533_v61  ;;  %v12234_v61 = vld [vmem:[#allocation10 + $0x14c] ss:$16 sps:$4 sm:$0xff]  }
 0x4e8   :  { %9506 = vmatpush1.bf16.msra.mxu0 %v12181_v36  ;;  %v12226_v36 = vld [vmem:[#allocation10 + $0x128] ss:$16 sps:$4 sm:$0xff]  }
 0x4e9   :  { %9507 = vmatprep.subr.bf16.mxu0 %v12186_v0  ;;  %v12271_v0 = vld [vmem:[#allocation10 + $0x520] ss:$16 sps:$4 sm:$0xff]  }
 0x4ea   :  { %7807 = vmatpush1.bf16.msra.mxu1 %v11532_v10  ;;  %v12240_v10 = vld [vmem:[#allocation10 + $0x16c] ss:$16 sps:$4 sm:$0xff]  }
 0x4eb   :  { %7808 = vmatprep.subr.bf16.mxu1 %v11541_v42  ;;  %v12285_v42 = vld [vmem:[#allocation10 + $0x564] ss:$16 sps:$4 sm:$0xff]  }
 0x4ec   :  { %9508 = vmatpush1.bf16.msra.mxu0 %v12184_v55  ;;  %v12277_v55 = vld [vmem:[#allocation10 + $0x540] ss:$16 sps:$4 sm:$0xff]  }
 0x4ed   :  { %9509 = vmatprep.subr.bf16.mxu0 %v12189_v43  ;;  %v12238_v43 = vld [vmem:[#allocation10 + $0x168] ss:$16 sps:$4 sm:$0xff]  }
 0x4ee   :  { %7809 = vmatpush1.bf16.msra.mxu1 %v11540_v16  ;;  %v12291_v16 = vld [vmem:[#allocation10 + $0x584] ss:$16 sps:$4 sm:$0xff]  }
 0x4ef   :  { %7810 = vmatprep.subr.bf16.mxu1 %v11549_v47  ;;  %v12252_v47 = vld [vmem:[#allocation10 + $0x1ac] ss:$16 sps:$4 sm:$0xff]  }
 0x4f0   :  { %9510 = vmatpush1.bf16.msra.mxu0 %v12187_v46  ;;  %v12244_v46 = vld [vmem:[#allocation10 + $0x188] ss:$16 sps:$4 sm:$0xff]  }
 0x4f1   :  { %9511 = vmatprep.subr.bf16.mxu0 %v12192_v23  ;;  %v12289_v23 = vld [vmem:[#allocation10 + $0x580] ss:$16 sps:$4 sm:$0xff]  }
 0x4f2   :  { %7811 = vmatpush1.bf16.msra.mxu1 %v11548_v49  ;;  %v12297_v49 = vld [vmem:[#allocation10 + $0x5a4] ss:$16 sps:$4 sm:$0xff]  }
 0x4f3   :  { %9610 = vmatprep.subr.bf16.mxu1 %v12195_v51  ;;  %v12258_v51 = vld [vmem:[#allocation10 + $0x1cc] ss:$16 sps:$4 sm:$0xff]  }
 0x4f4   :  { %9512 = vmatpush1.bf16.msra.mxu0 %v12190_v50  ;;  %v12250_v50 = vld [vmem:[#allocation10 + $0x1a8] ss:$16 sps:$4 sm:$0xff]  }
 0x4f5   :  { %9524 = vmatprep.subr.bf16.mxu0 %v12219_v52  ;;  %7813 = vmatmul.mubr.bf16.vlgmr.msra.gmra.mrb[8].mxu1 %v13167_v56  ;;  %v12237_v56 = vld [vmem:[#allocation10 + $0x464] ss:$16 sps:$4 sm:$0xff]   ;;  %v12295_v52 = vld [vmem:[#allocation10 + $0x5a0] ss:$16 sps:$4 sm:$0xff]  }
 0x4f6   :  { %9611 = vmatpush1.bf16.msra.mxu1 %v12193_v53  ;;  %9642 = vmatprep.mubr.bf16.mxu1 %v13214_v39  ;;  %v12235_v39 = vld [vmem:[#allocation10 + $0x460] ss:$16 sps:$4 sm:$0xff]   ;;  %v12303_v53 = vld [vmem:[#allocation10 + $0x5c4] ss:$16 sps:$4 sm:$0xff]  }
 0x4f7   :  { %9514 = vmatmul.mubr.bf16.vlgmr.msra.gmra.mrb[8].mxu0 %v13237_v26  ;;  %9612 = vmatprep.subr.bf16.mxu1 %v12198_v1  ;;  %v12256_v1 = vld [vmem:[#allocation10 + $0x1c8] ss:$16 sps:$4 sm:$0xff]  }
 0x4f8   :  { %9525 = vmatpush1.bf16.msra.mxu0 %v12217_v4  ;;  %v12264_v4 = vld [vmem:[#allocation10 + $0x1ec] ss:$16 sps:$4 sm:$0xff]  }
 0x4f9   :  { %9526 = vmatprep.subr.bf16.mxu0 %v12225_v15  ;;  %v12301_v15 = vld [vmem:[#allocation10 + $0x5c0] ss:$16 sps:$4 sm:$0xff]  }
 0x4fa   :  { %9613 = vmatpush1.bf16.msra.mxu1 %v12196_v21  ;;  %v12309_v21 = vld [vmem:[#allocation10 + $0x5e4] ss:$16 sps:$4 sm:$0xff]  }
 0x4fb   :  { %9614 = vmatprep.subr.bf16.mxu1 %v12201_v5  ;;  %v12262_v5 = vld [vmem:[#allocation10 + $0x1e8] ss:$16 sps:$4 sm:$0xff]  }
 0x4fc   :  { %9527 = vmatpush1.bf16.msra.mxu0 %v12223_v6  ;;  %v12270_v6 = vld [vmem:[#allocation10 + $0x20c] ss:$16 sps:$4 sm:$0xff]  }
 0x4fd   :  { %9528 = vmatprep.subr.bf16.mxu0 %v12231_v19  ;;  %v12307_v19 = vld [vmem:[#allocation10 + $0x5e0] ss:$16 sps:$4 sm:$0xff]  }
 0x4fe   :  { %9615 = vmatpush1.bf16.msra.mxu1 %v12199_v28  ;;  %v12363_v28 = vld [vmem:[#allocation10 + $0x604] ss:$16 sps:$4 sm:$0xff]  }
 0x4ff   :  { %9616 = vmatprep.subr.bf16.mxu1 %v12204_v38  ;;  %v12268_v38 = vld [vmem:[#allocation10 + $0x208] ss:$16 sps:$4 sm:$0xff]  }
 0x500   :  { %9529 = vmatpush1.bf16.msra.mxu0 %v12229_v30  ;;  %v12276_v30 = vld [vmem:[#allocation10 + $0x22c] ss:$16 sps:$4 sm:$0xff]  }
 0x501   :  { %9530 = vmatprep.subr.bf16.mxu0 %v12237_v56  ;;  %v12274_v56 = vld [vmem:[#allocation10 + $0x228] ss:$16 sps:$4 sm:$0xff]  }
 0x502   :  { %9617 = vmatpush1.bf16.msra.mxu1 %v12202_v12  ;;  %v12282_v12 = vld [vmem:[#allocation10 + $0x24c] ss:$16 sps:$4 sm:$0xff]  }
 0x503   :  { %9618 = vmatprep.subr.bf16.mxu1 %v12207_v13  ;;  %v12280_v13 = vld [vmem:[#allocation10 + $0x248] ss:$16 sps:$4 sm:$0xff]  }
 0x504   :  { %9531 = vmatpush1.bf16.msra.mxu0 %v12235_v39  ;;  %v12288_v39 = vld [vmem:[#allocation10 + $0x26c] ss:$16 sps:$4 sm:$0xff]  }
 0x505   :  { %9532 = vmatprep.subr.bf16.mxu0 %v12243_v7  ;;  %v12286_v7 = vld [vmem:[#allocation10 + $0x268] ss:$16 sps:$4 sm:$0xff]  }
 0x506   :  { %9619 = vmatpush1.bf16.msra.mxu1 %v12205_v25  ;;  %v12294_v25 = vld [vmem:[#allocation10 + $0x28c] ss:$16 sps:$4 sm:$0xff]  }
 0x507   :  { %9620 = vmatprep.subr.bf16.mxu1 %v12210_v40  ;;  %v12292_v40 = vld [vmem:[#allocation10 + $0x288] ss:$16 sps:$4 sm:$0xff]  }
 0x508   :  { %9533 = vmatpush1.bf16.msra.mxu0 %v12241_v54  ;;  %v1225_v54 = vsub.s32 4, %v13185_v9 }
 0x509   :  { %9534 = vmatprep.subr.bf16.mxu0 %v12249_v57  ;;  %v12300_v57 = vld [vmem:[#allocation10 + $0x2ac] ss:$16 sps:$4 sm:$0xff]  }
 0x50a   :  { %9621 = vmatpush1.bf16.msra.mxu1 %v12208_v62 }
 0x50b   :  { %9622 = vmatprep.subr.bf16.mxu1 %v12213_v8  ;;  %v12298_v8 = vld [vmem:[#allocation10 + $0x2a8] ss:$16 sps:$4 sm:$0xff]  }
 0x50c   :  { %9535 = vmatpush1.bf16.msra.mxu0 %v12247_v63 }
 0x50d   :  { %9536 = vmatprep.subr.bf16.mxu0 %v12255_v33  ;;  %v12306_v33 = vld [vmem:[#allocation10 + $0x2cc] ss:$16 sps:$4 sm:$0xff]  }
 0x50e   :  { %9623 = vmatpush1.bf16.msra.mxu1 %v12211_v17 }
 0x50f   :  { %9624 = vmatprep.subr.bf16.mxu1 %v12216_v18 }
 0x510   :  { %9537 = vmatpush1.bf16.msra.mxu0 %v12253_v27 }
 0x511   :  { %9538 = vmatprep.subr.bf16.mxu0 %v12261_v2  ;;  %v12304_v2 = vld [vmem:[#allocation10 + $0x2c8] ss:$16 sps:$4 sm:$0xff]  }
 0x512   :  { %9625 = vmatpush1.bf16.msra.mxu1 %v12214_v22 }
 0x513   :  { %9626 = vmatprep.subr.bf16.mxu1 %v12222_v3 }
 0x514   :  { %9539 = vmatpush1.bf16.msra.mxu0 %v12259_v58  ;;  %v12312_v58 = vld [vmem:[#allocation10 + $0x2ec] ss:$16 sps:$4 sm:$0xff]  }
 0x515   :  { %9540 = vmatprep.subr.bf16.mxu0 %v12267_v48 }
 0x516   :  { %9627 = vmatpush1.bf16.msra.mxu1 %v12220_v29 }
 0x517   :  { %9628 = vmatprep.subr.bf16.mxu1 %v12228_v32 }
 0x518   :  { %9541 = vmatpush1.bf16.msra.mxu0 %v12265_v59 }
 0x519   :  { %9542 = vmatprep.subr.bf16.mxu0 %v12273_v34 }
 0x51a   :  { %9629 = vmatpush1.bf16.msra.mxu1 %v12226_v36 }
 0x51b   :  { %9630 = vmatprep.subr.bf16.mxu1 %v12234_v61  ;;  %v12310_v61 = vld [vmem:[#allocation10 + $0x2e8] ss:$16 sps:$4 sm:$0xff]  }
 0x51c   :  { %9543 = vmatpush1.bf16.msra.mxu0 %v12271_v0 }
 0x51d   :  { %9544 = vmatprep.subr.bf16.mxu0 %v12279_v11  ;;  %v12315_v11 = vld [vmem:[#allocation10 + $0x30c] ss:$16 sps:$4 sm:$0xff]  }
 0x51e   :  { %9631 = vmatpush1.bf16.msra.mxu1 %v12232_v37 }
 0x51f   :  { %9632 = vmatprep.subr.bf16.mxu1 %v12240_v10 }
 0x520   :  { %9545 = vmatpush1.bf16.msra.mxu0 %v12277_v55 }
 0x521   :  { %9546 = vmatprep.subr.bf16.mxu0 %v12285_v42 }
 0x522   :  { %9633 = vmatpush1.bf16.msra.mxu1 %v12238_v43 }
 0x523   :  { %9634 = vmatprep.subr.bf16.mxu1 %v12246_v44 }
 0x524   :  { %9547 = vmatpush1.bf16.msra.mxu0 %v12283_v45  ;;  %v12313_v45 = vld [vmem:[#allocation10 + $0x308] ss:$16 sps:$4 sm:$0xff]  }
 0x525   :  { %9548 = vmatprep.subr.bf16.mxu0 %v12291_v16  ;;  %v12361_v16 = vld [vmem:[#allocation10 + $0x600] ss:$16 sps:$4 sm:$0xff]  }
 0x526   :  { %9635 = vmatpush1.bf16.msra.mxu1 %v12244_v46  ;;  %v12318_v46 = vld [vmem:[#allocation10 + $0x32c] ss:$16 sps:$4 sm:$0xff]  }
 0x527   :  { %9636 = vmatprep.subr.bf16.mxu1 %v12252_v47  ;;  %v12369_v47 = vld [vmem:[#allocation10 + $0x624] ss:$16 sps:$4 sm:$0xff]  }
 0x528   :  { %9549 = vmatpush1.bf16.msra.mxu0 %v12289_v23  ;;  %v12316_v23 = vld [vmem:[#allocation10 + $0x328] ss:$16 sps:$4 sm:$0xff]  }
 0x529   :  { %9550 = vmatprep.subr.bf16.mxu0 %v12297_v49  ;;  %v12367_v49 = vld [vmem:[#allocation10 + $0x620] ss:$16 sps:$4 sm:$0xff]  }
 0x52a   :  { %9637 = vmatpush1.bf16.msra.mxu1 %v12250_v50  ;;  %v12321_v50 = vld [vmem:[#allocation10 + $0x34c] ss:$16 sps:$4 sm:$0xff]  }
 0x52b   :  { %9638 = vmatprep.subr.bf16.mxu1 %v12258_v51  ;;  %v12375_v51 = vld [vmem:[#allocation10 + $0x644] ss:$16 sps:$4 sm:$0xff]  }
 0x52c   :  { %9551 = vmatpush1.bf16.msra.mxu0 %v12295_v52  ;;  %v12319_v52 = vld [vmem:[#allocation10 + $0x348] ss:$16 sps:$4 sm:$0xff]  }
 0x52d   :  { %9552 = vmatprep.subr.bf16.mxu0 %v12303_v53  ;;  %v12373_v53 = vld [vmem:[#allocation10 + $0x640] ss:$16 sps:$4 sm:$0xff]  }
 0x52e   :  { %9639 = vmatpush1.bf16.msra.mxu1 %v12256_v1  ;;  %v12324_v1 = vld [vmem:[#allocation10 + $0x36c] ss:$16 sps:$4 sm:$0xff]  }
 0x52f   :  { %9640 = vmatprep.subr.bf16.mxu1 %v12264_v4  ;;  %v12381_v4 = vld [vmem:[#allocation10 + $0x664] ss:$16 sps:$4 sm:$0xff]  }
 0x530   :  { %9553 = vmatpush1.bf16.msra.mxu0 %v12301_v15  ;;  %v12322_v15 = vld [vmem:[#allocation10 + $0x368] ss:$16 sps:$4 sm:$0xff]  }
 0x531   :  { %9554 = vmatprep.subr.bf16.mxu0 %v12309_v21  ;;  %v12379_v21 = vld [vmem:[#allocation10 + $0x660] ss:$16 sps:$4 sm:$0xff]  }
 0x532   :  { %9641 = vmatpush1.bf16.msra.mxu1 %v12262_v5  ;;  %v12327_v5 = vld [vmem:[#allocation10 + $0x38c] ss:$16 sps:$4 sm:$0xff]  }
 0x533   :  { %9653 = vmatprep.subr.bf16.mxu1 %v12270_v6  ;;  %v12387_v6 = vld [vmem:[#allocation10 + $0x684] ss:$16 sps:$4 sm:$0xff]  }
 0x534   :  { %9555 = vmatpush1.bf16.msra.mxu0 %v12307_v19  ;;  %v12325_v19 = vld [vmem:[#allocation10 + $0x388] ss:$16 sps:$4 sm:$0xff]  }
 0x535   :  { %9643 = vmatmul.mubr.bf16.vlgmr.msra.gmra.mrb[12].mxu1 %v13210_v60  ;;  %9567 = vmatprep.subr.bf16.mxu0 %v12363_v28  ;;  %v1229_v60 = vsub.s32 5, %v13185_v9  ;;  %v12385_v28 = vld [vmem:[#allocation10 + $0x680] ss:$16 sps:$4 sm:$0xff]  }
 0x536   :  { %9654 = vmatpush1.bf16.msra.mxu1 %v12268_v38  ;;  %9685 = vmatprep.mubr.bf16.mxu1 %v13241_v41  ;;  %v13266_v41 = vld [vmem:[#allocation9] sm:$0xff] }
 0x537   :  { %9655 = vmatprep.subr.bf16.mxu1 %v12276_v30  ;;  %v1226_v62 = vrot.slane %v13266_v41, %v1225_v54  ;;  %v1230_v63 = vrot.slane %v13266_v41, %v1229_v60  ;;  %v12330_v38 = vld [vmem:[#allocation10 + $0x3ac] ss:$16 sps:$4 sm:$0xff]   ;;  %v12393_v30 = vld [vmem:[#allocation10 + $0x6a4] ss:$16 sps:$4 sm:$0xff]   ;;  %v12334_v60 = vld [vmem:[#allocation10 + $0x3e8] ss:$16 sps:$4 sm:$0xff]  }
 0x538   :  { %v12405_v54 = vld [vmem:[#allocation10 + $0x6e4] ss:$16 sps:$4 sm:$0xff]  }
 0x53a   :  { %9656 = vmatpush1.bf16.msra.mxu1 %v12274_v56  ;;  %v12328_v56 = vld [vmem:[#allocation10 + $0x3a8] ss:$16 sps:$4 sm:$0xff]  }
 0x53b   :  { %9657 = vmatprep.subr.bf16.mxu1 %v12282_v12  ;;  %v12391_v12 = vld [vmem:[#allocation10 + $0x6a0] ss:$16 sps:$4 sm:$0xff]  }
 0x53e   :  { %9658 = vmatpush1.bf16.msra.mxu1 %v12280_v13  ;;  %v12333_v13 = vld [vmem:[#allocation10 + $0x3cc] ss:$16 sps:$4 sm:$0xff]  }
 0x53f   :  { %9659 = vmatprep.subr.bf16.mxu1 %v12288_v39  ;;  %v12399_v39 = vld [vmem:[#allocation10 + $0x6c4] ss:$16 sps:$4 sm:$0xff]  }
 0x542   :  { %9660 = vmatpush1.bf16.msra.mxu1 %v12286_v7  ;;  %v12331_v7 = vld [vmem:[#allocation10 + $0x3c8] ss:$16 sps:$4 sm:$0xff]  }
 0x543   :  { %9661 = vmatprep.subr.bf16.mxu1 %v12294_v25  ;;  %v12397_v25 = vld [vmem:[#allocation10 + $0x6c0] ss:$16 sps:$4 sm:$0xff]  }
 0x546   :  { %9662 = vmatpush1.bf16.msra.mxu1 %v12292_v40  ;;  %v12336_v40 = vld [vmem:[#allocation10 + $0x3ec] ss:$16 sps:$4 sm:$0xff]  }
 0x547   :  { %9663 = vmatprep.subr.bf16.mxu1 %v12300_v57  ;;  %v12403_v57 = vld [vmem:[#allocation10 + $0x6e0] ss:$16 sps:$4 sm:$0xff]  }
 0x54a   :  { %v7470_v17 = vpop.f32.mrb[4].mxu0  ;;  %9664 = vmatpush1.bf16.msra.mxu1 %v12298_v8  ;;  %v12411_v8 = vld [vmem:[#allocation10 + $0x704] ss:$16 sps:$4 sm:$0xff]  }
 0x54b   :  { %v11921_v18 = vadd.f32 %v7470_v17, %v1226_v62  ;;  %v7472_v27 = vpop.f32.mrb[5].mxu0  ;;  %9665 = vmatprep.subr.bf16.mxu1 %v12306_v33  ;;  %v12342_v33 = vld [vmem:[#allocation10 + $0x42c] ss:$16 sps:$4 sm:$0xff]   ;;  %v12409_v17 = vld [vmem:[#allocation10 + $0x700] ss:$16 sps:$4 sm:$0xff]  }
 0x54c   :  { %v11922_v22 = vadd.f32 %v7472_v27, %v1230_v63  ;;  %v7474_v3 = vpop.f32.mrb[6].mxu0  ;;  %v12340_v27 = vld [vmem:[#allocation10 + $0x428] ss:$16 sps:$4 sm:$0xff]  }
 0x54d   :  { %v7844_v48 = vmul.f32 %v11921_v18, %v13201_v24  ;;  %v11923_v29 = vadd.f32 %v7474_v3, %v1226_v62  ;;  %v7476_v32 = vpop.f32.mrb[7].mxu0  ;;  %vm7827_vm8 = vcmp.gt.f32.partialorder %v11921_v18, 0.0  ;;  %v12339_v62 = vld [vmem:[#allocation10 + $0x40c] ss:$16 sps:$4 sm:$0xff]   ;;  %v12423_v3 = vld [vmem:[#allocation10 + $0x744] ss:$16 sps:$4 sm:$0xff]  }
 0x54e   :  { %v7845_v59 = vmul.f32 %v11922_v22, %v13201_v24  ;;  %v11924_v34 = vadd.f32 %v7476_v32, %v1230_v63  ;;  %vm7828_vm9 = vcmp.gt.f32.partialorder %v11922_v22, 0.0  ;;  %9666 = vmatpush1.bf16.msra.mxu1 %v12304_v2  ;;  %v12337_v63 = vld [vmem:[#allocation10 + $0x408] ss:$16 sps:$4 sm:$0xff]   ;;  %v12345_v2 = vld [vmem:[#allocation10 + $0x44c] ss:$16 sps:$4 sm:$0xff]  }
 0x54f   :  { %vm7835_vm10 = vcmp.gt.f32.partialorder %v11923_v29, 0.0  ;;  %v7852_v36 = vmul.f32 %v11923_v29, %v13201_v24  ;;  %9667 = vmatprep.subr.bf16.mxu1 %v12312_v58  ;;  %v7860_v37 = vsel %vm7827_vm8, %v11921_v18, %v7844_v48  ;;  %v12417_v18 = vld [vmem:[#allocation10 + $0x724] ss:$16 sps:$4 sm:$0xff]   ;;  %v12343_v58 = vld [vmem:[#allocation10 + $0x448] ss:$16 sps:$4 sm:$0xff]  }
 0x550   :  { %vm7836_vm11 = vcmp.gt.f32.partialorder %v11924_v34, 0.0  ;;  %v7853_v0 = vmul.f32 %v11924_v34, %v13201_v24  ;;  %v7861_v42 = vsel %vm7828_vm9, %v11922_v22, %v7845_v59  ;;  %v12415_v22 = vld [vmem:[#allocation10 + $0x720] ss:$16 sps:$4 sm:$0xff]   ;;  %v12348_v48 = vld [vmem:[#allocation10 + $0x46c] ss:$16 sps:$4 sm:$0xff]  }
 0x551   :  { %v7868_v10 = vsel %vm7835_vm10, %v11923_v29, %v7852_v36  ;;  %v12421_v29 = vld [vmem:[#allocation10 + $0x740] ss:$16 sps:$4 sm:$0xff]   ;;  %v12429_v32 = vld [vmem:[#allocation10 + $0x764] ss:$16 sps:$4 sm:$0xff]   ;;  %v12351_v59 = vld [vmem:[#allocation10 + $0x48c] ss:$16 sps:$4 sm:$0xff]  }
 0x552   :  { %v13274_v55 = vpack.c.bf16 %v7868_v10, %v7860_v37  ;;  %v7869_v43 = vsel %vm7836_vm11, %v11924_v34, %v7853_v0  ;;  %9668 = vmatpush1.bf16.msra.mxu1 %v12310_v61  ;;  %v12427_v34 = vld [vmem:[#allocation10 + $0x760] ss:$16 sps:$4 sm:$0xff]   ;;  %v12435_v36 = vld [vmem:[#allocation10 + $0x784] ss:$16 sps:$4 sm:$0xff]   ;;  %v12349_v61 = vld [vmem:[#allocation10 + $0x488] ss:$16 sps:$4 sm:$0xff]  }
 0x553   :  { %v13276_v44 = vpack.c.bf16 %v7869_v43, %v7861_v42  ;;  %9669 = vmatprep.subr.bf16.mxu1 %v12315_v11  ;;  %v12354_v0 = vld [vmem:[#allocation10 + $0x4ac] ss:$16 sps:$4 sm:$0xff]   ;;  %v12433_v11 = vld [vmem:[#allocation10 + $0x780] ss:$16 sps:$4 sm:$0xff]   ;;  %v12441_v37 = vld [vmem:[#allocation10 + $0x7a4] ss:$16 sps:$4 sm:$0xff]  }
 0x554   :  { %v12352_v10 = vld [vmem:[#allocation10 + $0x4a8] ss:$16 sps:$4 sm:$0xff]   ;;  %v12357_v42 = vld [vmem:[#allocation10 + $0x4cc] ss:$16 sps:$4 sm:$0xff]   ;;  %v12439_v43 = vld [vmem:[#allocation10 + $0x7a0] ss:$16 sps:$4 sm:$0xff]  }
 0x555   :  { %9556 = vmatprep.mubr.bf16.mxu0 %v13276_v44 }
 0x556   :  { %9557 = vmatmul.mubr.bf16.vlgmr.msra.gmra.mrb[8].mxu0 %v13274_v55  ;;  %9670 = vmatpush1.bf16.msra.mxu1 %v12313_v45  ;;  %v12355_v45 = vld [vmem:[#allocation10 + $0x4c8] ss:$16 sps:$4 sm:$0xff]  }
 0x557   :  { %9568 = vmatpush1.bf16.msra.mxu0 %v12361_v16  ;;  %9671 = vmatprep.subr.bf16.mxu1 %v12318_v46  ;;  %v12360_v16 = vld [vmem:[#allocation10 + $0x4ec] ss:$16 sps:$4 sm:$0xff]   ;;  %v12445_v46 = vld [vmem:[#allocation10 + $0x7c0] ss:$16 sps:$4 sm:$0xff]  }
 0x558   :  { %9569 = vmatprep.subr.bf16.mxu0 %v12369_v47  ;;  %v12453_v47 = vld [vmem:[#allocation10 + $0x7e4] ss:$16 sps:$4 sm:$0xff]  }
 0x55a   :  { %9672 = vmatpush1.bf16.msra.mxu1 %v12316_v23  ;;  %v12358_v23 = vld [vmem:[#allocation10 + $0x4e8] ss:$16 sps:$4 sm:$0xff]  }
 0x55b   :  { %9570 = vmatpush1.bf16.msra.mxu0 %v12367_v49  ;;  %9673 = vmatprep.subr.bf16.mxu1 %v12321_v50  ;;  %v12366_v49 = vld [vmem:[#allocation10 + $0x50c] ss:$16 sps:$4 sm:$0xff]   ;;  %v12451_v50 = vld [vmem:[#allocation10 + $0x7e0] ss:$16 sps:$4 sm:$0xff]  }
 0x55c   :  { %9571 = vmatprep.subr.bf16.mxu0 %v12375_v51  ;;  %v12483_v51 = vld [vmem:[#allocation13 + $0x4] ss:$8 sps:$4 sm:$0xff]  }
 0x55e   :  { %9674 = vmatpush1.bf16.msra.mxu1 %v12319_v52  ;;  %v12364_v52 = vld [vmem:[#allocation10 + $0x508] ss:$16 sps:$4 sm:$0xff]  }
 0x55f   :  { %9572 = vmatpush1.bf16.msra.mxu0 %v12373_v53  ;;  %9675 = vmatprep.subr.bf16.mxu1 %v12324_v1  ;;  %v12372_v53 = vld [vmem:[#allocation10 + $0x52c] ss:$16 sps:$4 sm:$0xff]   ;;  %v12370_v1 = vld [vmem:[#allocation10 + $0x528] ss:$16 sps:$4 sm:$0xff]  }
 0x560   :  { %9573 = vmatprep.subr.bf16.mxu0 %v12381_v4  ;;  %v12378_v4 = vld [vmem:[#allocation10 + $0x54c] ss:$16 sps:$4 sm:$0xff]  }
 0x562   :  { %9676 = vmatpush1.bf16.msra.mxu1 %v12322_v15  ;;  %v12376_v15 = vld [vmem:[#allocation10 + $0x548] ss:$16 sps:$4 sm:$0xff]  }
 0x563   :  { %9574 = vmatpush1.bf16.msra.mxu0 %v12379_v21  ;;  %9677 = vmatprep.subr.bf16.mxu1 %v12327_v5  ;;  %v12384_v21 = vld [vmem:[#allocation10 + $0x56c] ss:$16 sps:$4 sm:$0xff]   ;;  %v12382_v5 = vld [vmem:[#allocation10 + $0x568] ss:$16 sps:$4 sm:$0xff]  }
 0x564   :  { %9575 = vmatprep.subr.bf16.mxu0 %v12387_v6  ;;  %v12390_v6 = vld [vmem:[#allocation10 + $0x58c] ss:$16 sps:$4 sm:$0xff]  }
 0x566   :  { %9678 = vmatpush1.bf16.msra.mxu1 %v12325_v19  ;;  %v12388_v19 = vld [vmem:[#allocation10 + $0x588] ss:$16 sps:$4 sm:$0xff]  }
 0x567   :  { %9576 = vmatpush1.bf16.msra.mxu0 %v12385_v28  ;;  %9679 = vmatprep.subr.bf16.mxu1 %v12330_v38  ;;  %v12396_v28 = vld [vmem:[#allocation10 + $0x5ac] ss:$16 sps:$4 sm:$0xff]   ;;  %v12394_v38 = vld [vmem:[#allocation10 + $0x5a8] ss:$16 sps:$4 sm:$0xff]  }
 0x568   :  { %9577 = vmatprep.subr.bf16.mxu0 %v12393_v30  ;;  %v12402_v30 = vld [vmem:[#allocation10 + $0x5cc] ss:$16 sps:$4 sm:$0xff]  }
 0x56a   :  { %9680 = vmatpush1.bf16.msra.mxu1 %v12328_v56  ;;  %v12400_v56 = vld [vmem:[#allocation10 + $0x5c8] ss:$16 sps:$4 sm:$0xff]  }
 0x56b   :  { %9578 = vmatpush1.bf16.msra.mxu0 %v12391_v12  ;;  %9681 = vmatprep.subr.bf16.mxu1 %v12333_v13  ;;  %v12408_v12 = vld [vmem:[#allocation10 + $0x5ec] ss:$16 sps:$4 sm:$0xff]   ;;  %v12406_v13 = vld [vmem:[#allocation10 + $0x5e8] ss:$16 sps:$4 sm:$0xff]  }
 0x56c   :  { %9579 = vmatprep.subr.bf16.mxu0 %v12399_v39  ;;  %v12414_v39 = vld [vmem:[#allocation10 + $0x60c] ss:$16 sps:$4 sm:$0xff]  }
 0x56e   :  { %9682 = vmatpush1.bf16.msra.mxu1 %v12331_v7  ;;  %v12412_v7 = vld [vmem:[#allocation10 + $0x608] ss:$16 sps:$4 sm:$0xff]  }
 0x56f   :  { %9580 = vmatpush1.bf16.msra.mxu0 %v12397_v25  ;;  %9683 = vmatprep.subr.bf16.mxu1 %v12336_v40  ;;  %v12420_v25 = vld [vmem:[#allocation10 + $0x62c] ss:$16 sps:$4 sm:$0xff]   ;;  %v12418_v40 = vld [vmem:[#allocation10 + $0x628] ss:$16 sps:$4 sm:$0xff]  }
 0x570   :  { %9581 = vmatprep.subr.bf16.mxu0 %v12405_v54  ;;  %v12426_v54 = vld [vmem:[#allocation10 + $0x64c] ss:$16 sps:$4 sm:$0xff]  }
 0x572   :  { %9684 = vmatpush1.bf16.msra.mxu1 %v12334_v60  ;;  %v12424_v60 = vld [vmem:[#allocation10 + $0x648] ss:$16 sps:$4 sm:$0xff]  }
 0x573   :  { %9582 = vmatpush1.bf16.msra.mxu0 %v12403_v57  ;;  %9696 = vmatprep.subr.bf16.mxu1 %v12339_v62  ;;  %v12432_v57 = vld [vmem:[#allocation10 + $0x66c] ss:$16 sps:$4 sm:$0xff]   ;;  %v12430_v62 = vld [vmem:[#allocation10 + $0x668] ss:$16 sps:$4 sm:$0xff]  }
 0x574   :  { %9583 = vmatprep.subr.bf16.mxu0 %v12411_v8  ;;  %v12438_v8 = vld [vmem:[#allocation10 + $0x68c] ss:$16 sps:$4 sm:$0xff]  }
 0x575   :  { %9686 = vmatmul.mubr.bf16.vlgmr.msra.gmra.mrb[12].mxu1 %v13237_v26  ;;  %v12346_v26 = vld [vmem:[#allocation10 + $0x468] ss:$16 sps:$4 sm:$0xff]  }
 0x576   :  { %9697 = vmatpush1.bf16.msra.mxu1 %v12337_v63  ;;  %9728 = vmatprep.mubr.bf16.mxu1 %v13276_v44  ;;  %v12447_v44 = vld [vmem:[#allocation10 + $0x7c4] ss:$16 sps:$4 sm:$0xff]   ;;  %v1233_v63 = vsub.s32 6, %v13185_v9 }
 0x577   :  { %9698 = vmatprep.subr.bf16.mxu1 %v12342_v33  ;;  %9584 = vmatpush1.bf16.msra.mxu0 %v12409_v17  ;;  %v12436_v33 = vld [vmem:[#allocation10 + $0x688] ss:$16 sps:$4 sm:$0xff]   ;;  %v1237_v17 = vsub.s32 7, %v13185_v9  ;;  %v12550_v9 = vld [vmem:[#allocation13 + $0x170] ss:$8 sps:$4 sm:$0xff]  }
 0x578   :  { %9585 = vmatprep.subr.bf16.mxu0 %v12417_v18  ;;  %v1234_v18 = vrot.slane %v13266_v41, %v1233_v63  ;;  %v12478_v63 = vld [vmem:[#allocation10 + $0x7e8] ss:$16 sps:$4 sm:$0xff]  }
 0x57a   :  { %9699 = vmatpush1.bf16.msra.mxu1 %v12340_v27  ;;  %v1238_v27 = vrot.slane %v13266_v41, %v1237_v17  ;;  %v12505_v17 = vld [vmem:[#allocation13 + $0x80] ss:$8 sps:$4 sm:$0xff]  }
 0x57b   :  { %9700 = vmatprep.subr.bf16.mxu1 %v12345_v2  ;;  %9586 = vmatpush1.bf16.msra.mxu0 %v12415_v22  ;;  %v12442_v2 = vld [vmem:[#allocation10 + $0x6a8] ss:$16 sps:$4 sm:$0xff]   ;;  %v12450_v22 = vld [vmem:[#allocation10 + $0x6cc] ss:$16 sps:$4 sm:$0xff]  }
 0x57c   :  { %9587 = vmatprep.subr.bf16.mxu0 %v12423_v3 }
 0x57e   :  { %9701 = vmatpush1.bf16.msra.mxu1 %v12343_v58 }
 0x57f   :  { %9702 = vmatprep.subr.bf16.mxu1 %v12348_v48  ;;  %9588 = vmatpush1.bf16.msra.mxu0 %v12421_v29 }
 0x580   :  { %9589 = vmatprep.subr.bf16.mxu0 %v12429_v32 }
 0x582   :  { %9703 = vmatpush1.bf16.msra.mxu1 %v12346_v26  ;;  %v12448_v26 = vld [vmem:[#allocation10 + $0x6c8] ss:$16 sps:$4 sm:$0xff]  }
 0x583   :  { %9704 = vmatprep.subr.bf16.mxu1 %v12351_v59  ;;  %9590 = vmatpush1.bf16.msra.mxu0 %v12427_v34 }
 0x584   :  { %9591 = vmatprep.subr.bf16.mxu0 %v12435_v36 }
 0x586   :  { %9705 = vmatpush1.bf16.msra.mxu1 %v12349_v61  ;;  %v12456_v61 = vld [vmem:[#allocation10 + $0x6ec] ss:$16 sps:$4 sm:$0xff]  }
 0x587   :  { %9706 = vmatprep.subr.bf16.mxu1 %v12354_v0  ;;  %9592 = vmatpush1.bf16.msra.mxu0 %v12433_v11 }
 0x588   :  { %9593 = vmatprep.subr.bf16.mxu0 %v12441_v37 }
 0x58a   :  { %9707 = vmatpush1.bf16.msra.mxu1 %v12352_v10  ;;  %v12454_v10 = vld [vmem:[#allocation10 + $0x6e8] ss:$16 sps:$4 sm:$0xff]  }
 0x58b   :  { %9708 = vmatprep.subr.bf16.mxu1 %v12357_v42  ;;  %9594 = vmatpush1.bf16.msra.mxu0 %v12439_v43 }
 0x58c   :  { %9595 = vmatprep.subr.bf16.mxu0 %v12447_v44 }
 0x58e   :  { %9709 = vmatpush1.bf16.msra.mxu1 %v12355_v45 }
 0x58f   :  { %9710 = vmatprep.subr.bf16.mxu1 %v12360_v16  ;;  %9596 = vmatpush1.bf16.msra.mxu0 %v12445_v46  ;;  %v12459_v46 = vld [vmem:[#allocation10 + $0x70c] ss:$16 sps:$4 sm:$0xff]  }
 0x590   :  { %9597 = vmatprep.subr.bf16.mxu0 %v12453_v47 }
 0x592   :  { %9711 = vmatpush1.bf16.msra.mxu1 %v12358_v23  ;;  %v12481_v23 = vld [vmem:[#allocation13] ss:$8 sps:$4 sm:$0xff]  }
 0x593   :  { %9712 = vmatprep.subr.bf16.mxu1 %v12366_v49  ;;  %9598 = vmatpush1.bf16.msra.mxu0 %v12451_v50  ;;  %v12457_v49 = vld [vmem:[#allocation10 + $0x708] ss:$16 sps:$4 sm:$0xff]  }
 0x594   :  { %10207 = vmatprep.subr.bf16.mxu0 %v12483_v51  ;;  %v12486_v50 = vld [vmem:[#allocation13 + $0x14] ss:$8 sps:$4 sm:$0xff]   ;;  %v12462_v51 = vld [vmem:[#allocation10 + $0x72c] ss:$16 sps:$4 sm:$0xff]  }
 0x596   :  { %9713 = vmatpush1.bf16.msra.mxu1 %v12364_v52  ;;  %v12460_v52 = vld [vmem:[#allocation10 + $0x728] ss:$16 sps:$4 sm:$0xff]  }
 0x597   :  { %9714 = vmatprep.subr.bf16.mxu1 %v12372_v53  ;;  %v12489_v53 = vld [vmem:[#allocation13 + $0x24] ss:$8 sps:$4 sm:$0xff]  }
 0x59a   :  { %9715 = vmatpush1.bf16.msra.mxu1 %v12370_v1  ;;  %v12465_v1 = vld [vmem:[#allocation10 + $0x74c] ss:$16 sps:$4 sm:$0xff]  }
 0x59b   :  { %9716 = vmatprep.subr.bf16.mxu1 %v12378_v4  ;;  %v12487_v4 = vld [vmem:[#allocation13 + $0x20] ss:$8 sps:$4 sm:$0xff]  }
 0x59e   :  { %9717 = vmatpush1.bf16.msra.mxu1 %v12376_v15  ;;  %v12463_v15 = vld [vmem:[#allocation10 + $0x748] ss:$16 sps:$4 sm:$0xff]  }
 0x59f   :  { %9718 = vmatprep.subr.bf16.mxu1 %v12384_v21  ;;  %v12492_v21 = vld [vmem:[#allocation13 + $0x34] ss:$8 sps:$4 sm:$0xff]  }
 0x5a2   :  { %9719 = vmatpush1.bf16.msra.mxu1 %v12382_v5  ;;  %v12468_v5 = vld [vmem:[#allocation10 + $0x76c] ss:$16 sps:$4 sm:$0xff]  }
 0x5a3   :  { %9720 = vmatprep.subr.bf16.mxu1 %v12390_v6  ;;  %v12490_v6 = vld [vmem:[#allocation13 + $0x30] ss:$8 sps:$4 sm:$0xff]  }
 0x5a6   :  { %9721 = vmatpush1.bf16.msra.mxu1 %v12388_v19  ;;  %v12466_v19 = vld [vmem:[#allocation10 + $0x768] ss:$16 sps:$4 sm:$0xff]  }
 0x5a7   :  { %9722 = vmatprep.subr.bf16.mxu1 %v12396_v28  ;;  %v12495_v28 = vld [vmem:[#allocation13 + $0x44] ss:$8 sps:$4 sm:$0xff]  }
 0x5aa   :  { %9723 = vmatpush1.bf16.msra.mxu1 %v12394_v38  ;;  %v12471_v38 = vld [vmem:[#allocation10 + $0x78c] ss:$16 sps:$4 sm:$0xff]  }
 0x5ab   :  { %9724 = vmatprep.subr.bf16.mxu1 %v12402_v30  ;;  %v12493_v30 = vld [vmem:[#allocation13 + $0x40] ss:$8 sps:$4 sm:$0xff]  }
 0x5ae   :  { %9725 = vmatpush1.bf16.msra.mxu1 %v12400_v56  ;;  %v12469_v56 = vld [vmem:[#allocation10 + $0x788] ss:$16 sps:$4 sm:$0xff]  }
 0x5af   :  { %9726 = vmatprep.subr.bf16.mxu1 %v12408_v12  ;;  %v12498_v12 = vld [vmem:[#allocation13 + $0x54] ss:$8 sps:$4 sm:$0xff]  }
 0x5b2   :  { %9727 = vmatpush1.bf16.msra.mxu1 %v12406_v13  ;;  %v12474_v13 = vld [vmem:[#allocation10 + $0x7ac] ss:$16 sps:$4 sm:$0xff]  }
 0x5b3   :  { %9739 = vmatprep.subr.bf16.mxu1 %v12414_v39  ;;  %v12496_v39 = vld [vmem:[#allocation13 + $0x50] ss:$8 sps:$4 sm:$0xff]  }
 0x5b5   :  { %9729 = vmatmul.mubr.bf16.vlgmr.msra.gmra.mrb[12].mxu1 %v13274_v55  ;;  %v12444_v55 = vld [vmem:[#allocation10 + $0x6ac] ss:$16 sps:$4 sm:$0xff]  }
 0x5b6   :  { %9740 = vmatpush1.bf16.msra.mxu1 %v12412_v7  ;;  %v12472_v7 = vld [vmem:[#allocation10 + $0x7a8] ss:$16 sps:$4 sm:$0xff]  }
 0x5b7   :  { %9741 = vmatprep.subr.bf16.mxu1 %v12420_v25  ;;  %v12501_v25 = vld [vmem:[#allocation13 + $0x64] ss:$8 sps:$4 sm:$0xff]  }
 0x5ba   :  { %9742 = vmatpush1.bf16.msra.mxu1 %v12418_v40  ;;  %v12477_v40 = vld [vmem:[#allocation10 + $0x7cc] ss:$16 sps:$4 sm:$0xff]  }
 0x5bb   :  { %9743 = vmatprep.subr.bf16.mxu1 %v12426_v54  ;;  %v12499_v54 = vld [vmem:[#allocation13 + $0x60] ss:$8 sps:$4 sm:$0xff]  }
 0x5be   :  { %9744 = vmatpush1.bf16.msra.mxu1 %v12424_v60  ;;  %v12475_v60 = vld [vmem:[#allocation10 + $0x7c8] ss:$16 sps:$4 sm:$0xff]  }
 0x5bf   :  { %9745 = vmatprep.subr.bf16.mxu1 %v12432_v57  ;;  %v12504_v57 = vld [vmem:[#allocation13 + $0x74] ss:$8 sps:$4 sm:$0xff]  }
 0x5c2   :  { %9746 = vmatpush1.bf16.msra.mxu1 %v12430_v62  ;;  %v12480_v62 = vld [vmem:[#allocation10 + $0x7ec] ss:$16 sps:$4 sm:$0xff]  }
 0x5c3   :  { %9747 = vmatprep.subr.bf16.mxu1 %v12438_v8  ;;  %v12502_v8 = vld [vmem:[#allocation13 + $0x70] ss:$8 sps:$4 sm:$0xff]  }
 0x5c6   :  { %9748 = vmatpush1.bf16.msra.mxu1 %v12436_v33  ;;  %v12507_v33 = vld [vmem:[#allocation13 + $0x84] ss:$8 sps:$4 sm:$0xff]  }
 0x5c7   :  { %9749 = vmatprep.subr.bf16.mxu1 %v12444_v55  ;;  %v12510_v55 = vld [vmem:[#allocation13 + $0x94] ss:$8 sps:$4 sm:$0xff]  }
 0x5c8   :  { %v7814_v3 = vpop.f32.mrb[8].mxu1 }
 0x5c9   :  { %v11925_v58 = vadd.f32 %v7814_v3, %v1234_v18  ;;  %v7816_v48 = vpop.f32.mrb[9].mxu1  ;;  %v12514_v3 = vld [vmem:[#allocation13 + $0xb0] ss:$8 sps:$4 sm:$0xff]  }
 0x5ca   :  { %v11926_v29 = vadd.f32 %v7816_v48, %v1238_v27  ;;  %v7818_v32 = vpop.f32.mrb[10].mxu1  ;;  %9750 = vmatpush1.bf16.msra.mxu1 %v12442_v2  ;;  %v12511_v2 = vld [vmem:[#allocation13 + $0xa0] ss:$8 sps:$4 sm:$0xff]  }
 0x5cb   :  { %v7846_v59 = vmul.f32 %v11925_v58, %v13201_v24  ;;  %v11927_v34 = vadd.f32 %v7818_v32, %v1234_v18  ;;  %v7820_v36 = vpop.f32.mrb[11].mxu1  ;;  %9751 = vmatprep.subr.bf16.mxu1 %v12450_v22  ;;  %vm7829_vm12 = vcmp.gt.f32.partialorder %v11925_v58, 0.0  ;;  %v12508_v18 = vld [vmem:[#allocation13 + $0x90] ss:$8 sps:$4 sm:$0xff]   ;;  %v12516_v22 = vld [vmem:[#allocation13 + $0xb4] ss:$8 sps:$4 sm:$0xff]  }
 0x5cc   :  { %v7847_v0 = vmul.f32 %v11926_v29, %v13201_v24  ;;  %v11928_v41 = vadd.f32 %v7820_v36, %v1238_v27  ;;  %vm7830_vm13 = vcmp.gt.f32.partialorder %v11926_v29, 0.0  ;;  %v12513_v27 = vld [vmem:[#allocation13 + $0xa4] ss:$8 sps:$4 sm:$0xff]   ;;  %v12517_v48 = vld [vmem:[#allocation13 + $0xc0] ss:$8 sps:$4 sm:$0xff]  }
 0x5cd   :  { %vm7837_vm14 = vcmp.gt.f32.partialorder %v11927_v34, 0.0  ;;  %v7854_v11 = vmul.f32 %v11927_v34, %v13201_v24  ;;  %v7862_v42 = vsel %vm7829_vm12, %v11925_v58, %v7846_v59  ;;  %v12519_v58 = vld [vmem:[#allocation13 + $0xc4] ss:$8 sps:$4 sm:$0xff]   ;;  %v12520_v32 = vld [vmem:[#allocation13 + $0xd0] ss:$8 sps:$4 sm:$0xff]  }
 0x5ce   :  { %vm7838_vm15 = vcmp.gt.f32.partialorder %v11928_v41, 0.0  ;;  %v7855_v37 = vmul.f32 %v11928_v41, %v13201_v24  ;;  %9752 = vmatpush1.bf16.msra.mxu1 %v12448_v26  ;;  %v7863_v45 = vsel %vm7830_vm13, %v11926_v29, %v7847_v0  ;;  %v12484_v24 = vld [vmem:[#allocation13 + $0x10] ss:$8 sps:$4 sm:$0xff]   ;;  %v12522_v29 = vld [vmem:[#allocation13 + $0xd4] ss:$8 sps:$4 sm:$0xff]   ;;  %v12577_v0 = vld [vmem:[#allocation16 + $0x40] sm:$0xff]  }
 0x5cf   :  { %v7870_v43 = vsel %vm7837_vm14, %v11927_v34, %v7854_v11  ;;  %9753 = vmatprep.subr.bf16.mxu1 %v12456_v61  ;;  %v12525_v26 = vld [vmem:[#allocation13 + $0xe4] ss:$8 sps:$4 sm:$0xff]   ;;  %v12523_v59 = vld [vmem:[#allocation13 + $0xe0] ss:$8 sps:$4 sm:$0xff]   ;;  %v12528_v34 = vld [vmem:[#allocation13 + $0xf4] ss:$8 sps:$4 sm:$0xff]  }
 0x5d0   :  { %v13291_v44 = vpack.c.bf16 %v7870_v43, %v7862_v42  ;;  %v7871_v16 = vsel %vm7838_vm15, %v11928_v41, %v7855_v37  ;;  %v12526_v36 = vld [vmem:[#allocation13 + $0xf0] ss:$8 sps:$4 sm:$0xff]   ;;  %v12531_v61 = vld [vmem:[#allocation13 + $0x104] ss:$8 sps:$4 sm:$0xff]  }
 0x5d1   :  { %v7879_v47 = vpack.c.bf16 %v7871_v16, %v7863_v45  ;;  %v12578_v41 = vld [vmem:[#allocation16] sm:$0xff]   ;;  %v12579_v11 = vld [vmem:[#allocation16 + $0x48] sm:$0xff]   ;;  %v12582_v42 = vld [vmem:[#allocation16 + $0x10] sm:$0xff]  }
 0x5d2   :  { %9754 = vmatpush1.bf16.msra.mxu1 %v12454_v10  ;;  %v12580_v37 = vld [vmem:[#allocation16 + $0x8] sm:$0xff]   ;;  %v12581_v10 = vld [vmem:[#allocation16 + $0x50] sm:$0xff]   ;;  %v12583_v43 = vld [vmem:[#allocation16 + $0x58] sm:$0xff]  }
 0x5d3   :  { %9599 = vmatprep.mubr.bf16.mxu0 %v7879_v47  ;;  %9771 = vmatprep.mubr.bf16.mxu1 %v7879_v47  ;;  %v12585_v45 = vld [vmem:[#allocation16 + $0x60] sm:$0xff]  }
 0x5d4   :  { %9600 = vmatmul.mubr.bf16.vlgmr.msra.gmra.mrb[8].mxu0 %v13291_v44  ;;  %9755 = vmatprep.subr.bf16.mxu1 %v12459_v46  ;;  %v12586_v16 = vld [vmem:[#allocation16 + $0x20] sm:$0xff]   ;;  %v8136_v46 = vld [vmem:[#allocation12] sm:$0xf] }
 0x5d5   :  { %10208 = vmatpush1.bf16.msra.mxu0 %v12481_v23  ;;  %v8141_v47 = vrot.slane %v8136_v46, %v13188_v14  ;;  %v8145_v23 = vrot.slane %v8136_v46, %v13193_v20 }
 0x5d6   :  { %9756 = vmatpush1.bf16.msra.mxu1 %v12457_v49  ;;  %10209 = vmatprep.subr.bf16.mxu0 %v12486_v50  ;;  %v13297_v50 = vstv %s10508_s3 }
 0x5d7   :  { %9757 = vmatprep.subr.bf16.mxu1 %v12462_v51 }
 0x5d9   :  { %10210 = vmatpush1.bf16.msra.mxu0 %v12484_v24 }
 0x5da   :  { %9758 = vmatpush1.bf16.msra.mxu1 %v12460_v52  ;;  %10211 = vmatprep.subr.bf16.mxu0 %v12489_v53 }
 0x5db   :  { %9759 = vmatprep.subr.bf16.mxu1 %v12465_v1 }
 0x5dd   :  { %10212 = vmatpush1.bf16.msra.mxu0 %v12487_v4 }
 0x5de   :  { %9760 = vmatpush1.bf16.msra.mxu1 %v12463_v15  ;;  %10213 = vmatprep.subr.bf16.mxu0 %v12492_v21 }
 0x5df   :  { %9761 = vmatprep.subr.bf16.mxu1 %v12468_v5 }
 0x5e1   :  { %10214 = vmatpush1.bf16.msra.mxu0 %v12490_v6 }
 0x5e2   :  { %9762 = vmatpush1.bf16.msra.mxu1 %v12466_v19  ;;  %10215 = vmatprep.subr.bf16.mxu0 %v12495_v28 }
 0x5e3   :  { %9763 = vmatprep.subr.bf16.mxu1 %v12471_v38 }
 0x5e5   :  { %10216 = vmatpush1.bf16.msra.mxu0 %v12493_v30 }
 0x5e6   :  { %9764 = vmatpush1.bf16.msra.mxu1 %v12469_v56  ;;  %10217 = vmatprep.subr.bf16.mxu0 %v12498_v12 }
 0x5e7   :  { %9765 = vmatprep.subr.bf16.mxu1 %v12474_v13 }
 0x5e9   :  { %10218 = vmatpush1.bf16.msra.mxu0 %v12496_v39  ;;  %v12529_v39 = vld [vmem:[#allocation13 + $0x100] ss:$8 sps:$4 sm:$0xff]  }
 0x5ea   :  { %9766 = vmatpush1.bf16.msra.mxu1 %v12472_v7  ;;  %10219 = vmatprep.subr.bf16.mxu0 %v12501_v25  ;;  %v12534_v7 = vld [vmem:[#allocation13 + $0x114] ss:$8 sps:$4 sm:$0xff]   ;;  %v12532_v25 = vld [vmem:[#allocation13 + $0x110] ss:$8 sps:$4 sm:$0xff]  }
 0x5eb   :  { %9767 = vmatprep.subr.bf16.mxu1 %v12477_v40  ;;  %v12537_v40 = vld [vmem:[#allocation13 + $0x124] ss:$8 sps:$4 sm:$0xff]  }
 0x5ed   :  { %10220 = vmatpush1.bf16.msra.mxu0 %v12499_v54  ;;  %v12535_v54 = vld [vmem:[#allocation13 + $0x120] ss:$8 sps:$4 sm:$0xff]  }
 0x5ee   :  { %9768 = vmatpush1.bf16.msra.mxu1 %v12475_v60  ;;  %10221 = vmatprep.subr.bf16.mxu0 %v12504_v57  ;;  %v12540_v60 = vld [vmem:[#allocation13 + $0x134] ss:$8 sps:$4 sm:$0xff]   ;;  %v12538_v57 = vld [vmem:[#allocation13 + $0x130] ss:$8 sps:$4 sm:$0xff]  }
 0x5ef   :  { %9769 = vmatprep.subr.bf16.mxu1 %v12480_v62  ;;  %v12543_v62 = vld [vmem:[#allocation13 + $0x144] ss:$8 sps:$4 sm:$0xff]  }
 0x5f1   :  { %10222 = vmatpush1.bf16.msra.mxu0 %v12502_v8  ;;  %v12541_v8 = vld [vmem:[#allocation13 + $0x140] ss:$8 sps:$4 sm:$0xff]  }
 0x5f2   :  { %9770 = vmatpush1.bf16.msra.mxu1 %v12478_v63  ;;  %10223 = vmatprep.subr.bf16.mxu0 %v12507_v33  ;;  %v12546_v63 = vld [vmem:[#allocation13 + $0x154] ss:$8 sps:$4 sm:$0xff]   ;;  %v12544_v33 = vld [vmem:[#allocation13 + $0x150] ss:$8 sps:$4 sm:$0xff]  }
 0x5f3   :  { %11887 = vmatprep.subr.bf16.mxu1 %v12577_v0 }
 0x5f5   :  { %9772 = vmatmul.mubr.bf16.vlgmr.msra.gmra.mrb[12].mxu1 %v13291_v44  ;;  %10224 = vmatpush1.bf16.msra.mxu0 %v12505_v17  ;;  %v12584_v44 = vld [vmem:[#allocation16 + $0x18] sm:$0xff]   ;;  %v8149_v17 = vrot.slane %v8136_v46, %v1217_v31 }
 0x5f6   :  { %10225 = vmatprep.subr.bf16.mxu0 %v12510_v55  ;;  %11888 = vmatpush3.bf16.msra.mxu1 %v12578_v41  ;;  %v12549_v55 = vld [vmem:[#allocation13 + $0x164] ss:$8 sps:$4 sm:$0xff]  }
 0x5f7   :  { %11889 = vmatprep.subr.bf16.mxu1 %v12579_v11 }
 0x5f9   :  { %10226 = vmatpush1.bf16.msra.mxu0 %v12508_v18  ;;  %v8153_v18 = vrot.slane %v8136_v46, %v1221_v35  ;;  %v12559_v46 = vld [vmem:[#allocation13 + $0x1a0] ss:$8 sps:$4 sm:$0xff]  }
 0x5fa   :  { %10227 = vmatprep.subr.bf16.mxu0 %v12513_v27  ;;  %11890 = vmatpush3.bf16.msra.mxu1 %v12580_v37  ;;  %v12553_v37 = vld [vmem:[#allocation13 + $0x180] ss:$8 sps:$4 sm:$0xff]  }
 0x5fb   :  { %11891 = vmatprep.subr.bf16.mxu1 %v12581_v10 }
 0x5fd   :  { %10228 = vmatpush1.bf16.msra.mxu0 %v12511_v2  ;;  %v12547_v2 = vld [vmem:[#allocation13 + $0x160] ss:$8 sps:$4 sm:$0xff]  }
 0x5fe   :  { %10229 = vmatprep.subr.bf16.mxu0 %v12516_v22  ;;  %11892 = vmatpush3.bf16.msra.mxu1 %v12582_v42 }
 0x5ff   :  { %11893 = vmatprep.subr.bf16.mxu1 %v12583_v43 }
 0x601   :  { %10230 = vmatpush1.bf16.msra.mxu0 %v12514_v3 }
 0x602   :  { %10231 = vmatprep.subr.bf16.mxu0 %v12519_v58  ;;  %11894 = vmatpush3.bf16.msra.mxu1 %v12584_v44  ;;  %v12552_v58 = vld [vmem:[#allocation13 + $0x174] ss:$8 sps:$4 sm:$0xff]  }
 0x603   :  { %11895 = vmatprep.subr.bf16.mxu1 %v12585_v45  ;;  %v12558_v44 = vld [vmem:[#allocation13 + $0x194] ss:$8 sps:$4 sm:$0xff]   ;;  %v12556_v45 = vld [vmem:[#allocation13 + $0x190] ss:$8 sps:$4 sm:$0xff]  }
 0x605   :  { %10232 = vmatpush1.bf16.msra.mxu0 %v12517_v48 }
 0x606   :  { %10233 = vmatprep.subr.bf16.mxu0 %v12522_v29  ;;  %11896 = vmatpush3.bf16.msra.mxu1 %v12586_v16  ;;  %v12561_v16 = vld [vmem:[#allocation13 + $0x1a4] ss:$8 sps:$4 sm:$0xff]  }
 0x609   :  { %10234 = vmatpush1.bf16.msra.mxu0 %v12520_v32 }
 0x60a   :  { %10235 = vmatprep.subr.bf16.mxu0 %v12525_v26 }
 0x60d   :  { %10236 = vmatpush1.bf16.msra.mxu0 %v12523_v59 }
 0x60e   :  { %10237 = vmatprep.subr.bf16.mxu0 %v12528_v34 }
 0x611   :  { %10238 = vmatpush1.bf16.msra.mxu0 %v12526_v36 }
 0x612   :  { %10250 = vmatprep.subr.bf16.mxu0 %v12531_v61  ;;  %v12555_v61 = vld [vmem:[#allocation13 + $0x184] ss:$8 sps:$4 sm:$0xff]  }
 0x6a7   :  { %v9601_v49 = vpop.f32.mrb[8].mxu0 }
 0x6a8   :  { %v11929_v51 = vadd.f32 %v9601_v49, %v8141_v47  ;;  %v9603_v24 = vpop.f32.mrb[9].mxu0  ;;  %v12567_v49 = vld [vmem:[#allocation13 + $0x1c4] ss:$8 sps:$4 sm:$0xff]  }
 0x6a9   :  { %v11930_v52 = vadd.f32 %v9603_v24, %v8145_v23  ;;  %v9605_v53 = vpop.f32.mrb[10].mxu0  ;;  %v12568_v24 = vld [vmem:[#allocation13 + $0x1d0] ss:$8 sps:$4 sm:$0xff]  }
 0x6aa   :  { %v9791_v1 = vmul.f32 %v11929_v51, %v13297_v50  ;;  %v11931_v4 = vadd.f32 %v9605_v53, %v8141_v47  ;;  %v9607_v15 = vpop.f32.mrb[11].mxu0  ;;  %vm9782_vm0 = vcmp.gt.f32.partialorder %v11929_v51, 0.0  ;;  %v12564_v47 = vld [vmem:[#allocation13 + $0x1b4] ss:$8 sps:$4 sm:$0xff]   ;;  %v12571_v53 = vld [vmem:[#allocation13 + $0x1e0] ss:$8 sps:$4 sm:$0xff]  }
 0x6ab   :  { %v9792_v21 = vmul.f32 %v11930_v52, %v13297_v50  ;;  %v11932_v5 = vadd.f32 %v9607_v15, %v8145_v23  ;;  %vm9783_vm1 = vcmp.gt.f32.partialorder %v11930_v52, 0.0  ;;  %v12562_v23 = vld [vmem:[#allocation13 + $0x1b0] ss:$8 sps:$4 sm:$0xff]  }
 0x6ac   :  { %vm9786_vm2 = vcmp.gt.f32.partialorder %v11931_v4, 0.0  ;;  %v9795_v6 = vmul.f32 %v11931_v4, %v13297_v50  ;;  %v9799_v28 = vsel %vm9782_vm0, %v11929_v51, %v9791_v1  ;;  %v12570_v51 = vld [vmem:[#allocation13 + $0x1d4] ss:$8 sps:$4 sm:$0xff]   ;;  %v12587_v15 = vld [vmem:[#allocation16 + $0x68] sm:$0xff]  }
 0x6ad   :  { %vm9787_vm3 = vcmp.gt.f32.partialorder %v11932_v5, 0.0  ;;  %v9796_v19 = vmul.f32 %v11932_v5, %v13297_v50  ;;  %v9800_v56 = vsel %vm9783_vm1, %v11930_v52, %v9792_v21  ;;  %v12573_v52 = vld [vmem:[#allocation13 + $0x1e4] ss:$8 sps:$4 sm:$0xff]   ;;  %v12576_v1 = vld [vmem:[#allocation13 + $0x1f4] ss:$8 sps:$4 sm:$0xff]   ;;  %11897 = vmatprep.subr.bf16.mxu1 %v12587_v15 }
 0x6ae   :  { %v9803_v38 = vsel %vm9786_vm2, %v11931_v4, %v9795_v6  ;;  %v12574_v4 = vld [vmem:[#allocation13 + $0x1f0] ss:$8 sps:$4 sm:$0xff]  }
 0x6af   :  { %v9807_v30 = vpack.c.bf16 %v9803_v38, %v9799_v28  ;;  %v9804_v12 = vsel %vm9787_vm3, %v11932_v5, %v9796_v19  ;;  %v12588_v21 = vld [vmem:[#allocation16 + $0x28] sm:$0xff]   ;;  %v12589_v5 = vld [vmem:[#allocation16 + $0x70] sm:$0xff]   ;;  %v12591_v19 = vld [vmem:[#allocation16 + $0x78] sm:$0xff]  }
 0x6b0   :  { %v9808_v13 = vpack.c.bf16 %v9804_v12, %v9800_v56  ;;  %11898 = vmatpush3.bf16.msra.mxu1 %v12588_v21  ;;  %v12590_v6 = vld [vmem:[#allocation16 + $0x30] sm:$0xff]   ;;  %v12592_v28 = vld [vmem:[#allocation16 + $0x38] sm:$0xff]  }
 0x6b1   :  { %11899 = vmatprep.subr.bf16.mxu1 %v12589_v5  ;;  %v9875_v38 = vld [vmem:[#allocation15] sm:$0x3] }
 0x6b2   :  { %10239 = vmatprep.mubr.bf16.mxu0 %v9808_v13  ;;  %v9884_v56 = vrot.slane %v9875_v38, %v13193_v20  ;;  %v10297_v13 = vstv %s10509_s24 }
 0x6b3   :  { %10240 = vmatmul.mubr.bf16.vlgmr.msra.gmra.mrb[12].mxu0 %v9807_v30  ;;  %v9880_v30 = vrot.slane %v9875_v38, %v13188_v14 }
 0x6b4   :  { %10251 = vmatpush1.bf16.msra.mxu0 %v12529_v39  ;;  %11900 = vmatpush3.bf16.msra.mxu1 %v12590_v6 }
 0x6b5   :  { %10252 = vmatprep.subr.bf16.mxu0 %v12534_v7  ;;  %11901 = vmatprep.subr.bf16.mxu1 %v12591_v19 }
 0x6b8   :  { %10253 = vmatpush1.bf16.msra.mxu0 %v12532_v25  ;;  %11902 = vmatpush3.bf16.msra.mxu1 %v12592_v28 }
 0x6b9   :  { %10254 = vmatprep.subr.bf16.mxu0 %v12537_v40 }
 0x6bc   :  { %10255 = vmatpush1.bf16.msra.mxu0 %v12535_v54 }
 0x6bd   :  { %10256 = vmatprep.subr.bf16.mxu0 %v12540_v60 }
 0x6c0   :  { %10257 = vmatpush1.bf16.msra.mxu0 %v12538_v57 }
 0x6c1   :  { %10258 = vmatprep.subr.bf16.mxu0 %v12543_v62 }
 0x6c4   :  { %10259 = vmatpush1.bf16.msra.mxu0 %v12541_v8 }
 0x6c5   :  { %10260 = vmatprep.subr.bf16.mxu0 %v12546_v63 }
 0x6c8   :  { %10261 = vmatpush1.bf16.msra.mxu0 %v12544_v33  ;;  %v9773_v27 = vpop.f32.mrb[12].mxu1 }
 0x6c9   :  { %v11933_v22 = vadd.f32 %v9773_v27, %v8149_v17  ;;  %v9775_v3 = vpop.f32.mrb[13].mxu1  ;;  %10262 = vmatprep.subr.bf16.mxu0 %v12549_v55 }
 0x6ca   :  { %v11934_v48 = vadd.f32 %v9775_v3, %v8153_v18  ;;  %v9777_v29 = vpop.f32.mrb[14].mxu1  ;;  %v11870_v3 = vld [vmem:[#allocation18] ss:$0 sm:$0xff] }
 0x6cb   :  { %vm9784_vm4 = vcmp.gt.f32.partialorder %v11933_v22, 0.0  ;;  %v9793_v32 = vmul.f32 %v11933_v22, %v13297_v50  ;;  %v11935_v26 = vadd.f32 %v9777_v29, %v8149_v17  ;;  %v9779_v59 = vpop.f32.mrb[15].mxu1 }
 0x6cc   :  { %v9794_v31 = vmul.f32 %v11934_v48, %v13297_v50  ;;  %v11936_v34 = vadd.f32 %v9779_v59, %v8153_v18  ;;  %10263 = vmatpush1.bf16.msra.mxu0 %v12547_v2  ;;  %vm9785_vm5 = vcmp.gt.f32.partialorder %v11934_v48, 0.0 }
 0x6cd   :  { %v9801_v35 = vsel %vm9784_vm4, %v11933_v22, %v9793_v32  ;;  %vm9788_vm6 = vcmp.gt.f32.partialorder %v11935_v26, 0.0  ;;  %v9797_v36 = vmul.f32 %v11935_v26, %v13297_v50  ;;  %10264 = vmatprep.subr.bf16.mxu0 %v12552_v58 }
 0x6ce   :  { %vm9789_vm7 = vcmp.gt.f32.partialorder %v11936_v34, 0.0  ;;  %v9798_v0 = vmul.f32 %v11936_v34, %v13297_v50  ;;  %v9802_v10 = vsel %vm9785_vm5, %v11934_v48, %v9794_v31  ;;  %v12565_v50 = vld [vmem:[#allocation13 + $0x1c0] ss:$8 sps:$4 sm:$0xff]  }
 0x6cf   :  { %v9805_v41 = vsel %vm9788_vm6, %v11935_v26, %v9797_v36 }
 0x6d0   :  { %v9809_v11 = vpack.c.bf16 %v9805_v41, %v9801_v35  ;;  %10265 = vmatpush1.bf16.msra.mxu0 %v12550_v9  ;;  %v9806_v42 = vsel %vm9789_vm7, %v11936_v34, %v9798_v0 }
 0x6d1   :  { %10266 = vmatprep.subr.bf16.mxu0 %v12555_v61  ;;  %v9810_v43 = vpack.c.bf16 %v9806_v42, %v9802_v10 }
 0x6d3   :  { %10282 = vmatprep.mubr.bf16.mxu0 %v9810_v43 }
 0x6d4   :  { %10267 = vmatpush1.bf16.msra.mxu0 %v12553_v37 }
 0x6d5   :  { %10268 = vmatprep.subr.bf16.mxu0 %v12558_v44 }
 0x6d8   :  { %10269 = vmatpush1.bf16.msra.mxu0 %v12556_v45 }
 0x6d9   :  { %10270 = vmatprep.subr.bf16.mxu0 %v12561_v16 }
 0x6dc   :  { %10271 = vmatpush1.bf16.msra.mxu0 %v12559_v46 }
 0x6dd   :  { %10272 = vmatprep.subr.bf16.mxu0 %v12564_v47 }
 0x6e0   :  { %10273 = vmatpush1.bf16.msra.mxu0 %v12562_v23 }
 0x6e1   :  { %10274 = vmatprep.subr.bf16.mxu0 %v12567_v49 }
 0x6e4   :  { %10275 = vmatpush1.bf16.msra.mxu0 %v12565_v50 }
 0x6e5   :  { %10276 = vmatprep.subr.bf16.mxu0 %v12570_v51 }
 0x6e8   :  { %10277 = vmatpush1.bf16.msra.mxu0 %v12568_v24 }
 0x6e9   :  { %10278 = vmatprep.subr.bf16.mxu0 %v12573_v52 }
 0x6ec   :  { %10279 = vmatpush1.bf16.msra.mxu0 %v12571_v53 }
 0x6ed   :  { %10280 = vmatprep.subr.bf16.mxu0 %v12576_v1 }
 0x6f0   :  { %10281 = vmatpush1.bf16.msra.mxu0 %v12574_v4 }
 0x6f3   :  { %10283 = vmatmul.mubr.bf16.vlgmr.msra.gmra.mrb[12].mxu0 %v9809_v11 }
 0x7c6   :  { %v10284_v12 = vpop.f32.mrb[12].mxu0 }
 0x7c7   :  { %v11937_v39 = vadd.f32 %v10284_v12, %v9880_v30  ;;  %v10286_v7 = vpop.f32.mrb[13].mxu0 }
 0x7c8   :  { %v11938_v25 = vadd.f32 %v10286_v7, %v9884_v56  ;;  %v10288_v40 = vpop.f32.mrb[14].mxu0 }
 0x7c9   :  { %v10298_v54 = vmul.f32 %v11937_v39, %v10297_v13  ;;  %v11939_v60 = vadd.f32 %v10288_v40, %v9880_v30  ;;  %v10290_v57 = vpop.f32.mrb[15].mxu0  ;;  %vm10293_vm8 = vcmp.gt.f32.partialorder %v11937_v39, 0.0 }
 0x7ca   :  { %v10299_v62 = vmul.f32 %v11938_v25, %v10297_v13  ;;  %v11940_v8 = vadd.f32 %v10290_v57, %v9884_v56  ;;  %vm10294_vm9 = vcmp.gt.f32.partialorder %v11938_v25, 0.0 }
 0x7cb   :  { %vm10295_vm10 = vcmp.gt.f32.partialorder %v11939_v60, 0.0  ;;  %v10300_v63 = vmul.f32 %v11939_v60, %v10297_v13  ;;  %v10302_v14 = vsel %vm10293_vm8, %v11937_v39, %v10298_v54 }
 0x7cc   :  { %vm10296_vm11 = vcmp.gt.f32.partialorder %v11940_v8, 0.0  ;;  %v10301_v33 = vmul.f32 %v11940_v8, %v10297_v13  ;;  %v10303_v55 = vsel %vm10294_vm9, %v11938_v25, %v10299_v62 }
 0x7cd   :  { %v10304_v17 = vsel %vm10295_vm10, %v11939_v60, %v10300_v63 }
 0x7ce   :  { %v10306_v20 = vpack.c.bf16 %v10304_v17, %v10302_v14  ;;  %v10305_v18 = vsel %vm10296_vm11, %v11940_v8, %v10301_v33 }
 0x7cf   :  { %v10307_v27 = vpack.c.bf16 %v10305_v18, %v10303_v55 }
 0x7d1   :  { %10475 = vmatprep.mubr.bf16.mxu1 %v10307_v27 }
 0x7d2   :  { %10476 = vmatmul.mubr.bf16.vlgmr.msra.gmra.mrb[16].mxu1 %v10306_v20 }
 0x8a5   :  { %v11903_v2 = vpop.f32.mrb[16].mxu1 }
 0x8a6   :  { %v11904_v22 = vpop.f32.mrb[17].mxu1 }
 0x8a7   :  { %v11905_v58 = vadd.f32 %v11904_v22, %v11903_v2  ;;  %v11906_v48 = vpop.f32.mrb[18].mxu1 }
 0x8a8   :  { %v11907_v29 = vpop.f32.mrb[19].mxu1 }
 0x8a9   :  { %v11908_v32 = vadd.f32 %v11907_v29, %v11906_v48  ;;  %v10478_v26 = vadd.f32 %v11905_v58, %v11870_v3 }
 0x8ab   :  { %v10481_v59 = vadd.f32 %v11908_v32, %v11870_v3  ;;  %10484 = vst [vmem:[#allocation19] sm:$0xff] %v10478_v26 }
 0x8ad   :  { %10485 = vst [vmem:[#allocation19 + $0x8] sm:$0xff] %v10481_v59 }
 0x8ae   :  { %12813 = shalt.err (!%p12810_p9)
}
 0x8af   :  { %s12814_s12 = scalar_lea.hbm %s13338_s10, 256 }
 0x8b0   :  { %p12815_p10 = scmp.ne.s32.totalorder %s13338_s10, %s12814_s12  ;;  %p12818_p11 = scmp.lt.u32.totalorder %s12814_s12, %s13338_s10 }
 0x8b2   :  { %p12820_p12 = pnand %p12818_p11, %p12815_p10 }
 0x8b4   :  { %12823 = shalt.err (!%p12820_p12)
}
 0x8b5   :  { %10497 = dma.vmem_to_hbm [thread:$0]  %s10492_s26, 256, %s13338_s10, [#allocation4], %s12845_s4, %s12845_s4, %s12846_s28  }
 0x8b6   :  { %12836 = dma.done.wait [#allocation4], 256  }
 0x8b7   :  { %12837 = vsyncadd [#allocation4], 4294967040 }
 0x8b8   :  { %10501 = vsyncpa [#allocation3], 1 }
 0x8b9   :  { %10502 = vsyncpa [#allocation8], 1 }
 0x8ba   :  { %10503 = vsyncpa [#allocation11], 1 }
 0x8bb   :  { %10504 = vsyncpa [#allocation14], 1 }
 0x8bc   :  { %10505 = vsyncpa [#allocation17], 1 }
 0x8bd   :  { %10506 = vsyncpa [#allocation4], 1 }
 0x8be   :  { %10507 = vsyncpa [#allocation5], 1 }

</bundles_post_ra>
